<compile_context>
chip_gen: v7x
topology: tpu7x:2x2x1
jax: 0.10.0
libtpu: 0.0.40
codegen_flags: <defaults>
</compile_context>

<pallas_src>
import functools
import math

import jax
import jax.numpy as jnp
from jax import lax
from jax.experimental import pallas as pl
from jax.experimental.pallas import tpu as pltpu

HIDDEN = 32            # hidden_dim (== per-head out_channels in the PyG conv)
HEADS = 4
N_NODES = 8            # nodes per graph
C_DIM = HEADS * HIDDEN  # 128 (concat-heads feature width == one lane group)
OUT_PAD = 128          # lane-dense padded output width (true width = HIDDEN//2)
LN_EPS = 1e-5          # torch.nn.LayerNorm default
NEG_BIAS = -1e30


def _layernorm(x, gamma, beta):
    mean = jnp.mean(x, axis=-1, keepdims=True)
    var = jnp.mean((x - mean) ** 2, axis=-1, keepdims=True)
    return (x - mean) * lax.rsqrt(var + LN_EPS) * gamma + beta


def _gelu_exact(x):
    # torch.nn.GELU default (approximate='none'): 0.5*x*(1+erf(x/sqrt(2)))
    return 0.5 * x * (1.0 + lax.erf(x * (1.0 / math.sqrt(2.0))))


def graph_encoder_kernel(
    x_ref,        # [GB*N, H]        bf16  node features (graphs flattened)
    ea_ref,       # [N, GB*N, H]     bf16  edge features, source-node major
    bias_ref,     # [GB*N, N*heads]  f32   additive mask bias (0 / -1e30)
    w_xproj_ref,  # [H, 5*C]         bf16  wq | wk | wv | wskip | gate_col | 0
    b_xproj_ref,  # [1, 5*C]         f32
    w_edge_ref,   # [H, C]           bf16  lin_edge (no bias)
    sel_ref,      # [C, heads]       f32   head selector, pre-scaled 1/sqrt(H)
    expand_ref,   # [heads, C]       f32   head -> feature-lane expander
    w_gate_ref,   # [C, 1]           f32   wA = w0 + w2 of decomposed lin_beta
    w_lin_ref,    # [C, H]           f32
    w_fin_ref,    # [H, H]           f32
    w_mlp1_ref,   # [H, 2H]          f32
    w_mlp2_ref,   # [2H, OUT_PAD]    f32   zero-padded past H//2
    vecs_ref,     # [8, OUT_PAD]     f32   packed biases / LayerNorm params
    out_ref,      # [GB*N, OUT_PAD]  f32   lane-dense output block
):
    GBN, H = x_ref.shape
    N = ea_ref.shape[0]
    C = w_edge_ref.shape[1]
    heads = sel_ref.shape[1]
    GB = GBN // N

    # ---------------- TransformerConv(heads=4, edge_dim=H, beta=True) -------
    # fused q|k|v|skip|gate projection: one MXU pass (bf16 in, f32 accumulate)
    qkvs = (jnp.dot(x_ref[...], w_xproj_ref[...],
                    preferred_element_type=jnp.float32) + b_xproj_ref[...])
    q3 = qkvs[:, 0 * C:1 * C].reshape(GB, N, C)
    k3 = qkvs[:, 1 * C:2 * C].reshape(GB, N, C)
    v3 = qkvs[:, 2 * C:3 * C].reshape(GB, N, C)
    skip = qkvs[:, 3 * C:4 * C]
    gate_skip = qkvs[:, 4 * C:4 * C + 1]     # skip @ wB, folded into the proj

    w_edge = w_edge_ref[...]
    sel = sel_ref[...]
    expand = expand_ref[...]
    bias = bias_ref[...]

    # flash-style online softmax over source nodes j; heads live in 4 lanes,
    # the attention output stays packed in the C=heads*H lane axis.
    m = jnp.full((GBN, heads), NEG_BIAS, jnp.float32)
    l = jnp.zeros((GBN, heads), jnp.float32)
    acc = jnp.zeros((GBN, C), jnp.float32)

    for j in range(N):                       # N=8, static unroll
        ea_j = ea_ref[j]                     # [GBN, H] bf16, clean row block
        e_j = jnp.dot(ea_j, w_edge,
                      preferred_element_type=jnp.float32).reshape(GB, N, C)
        # s[b,i,h] = q_i . (k_j + e_ij) / sqrt(H) within head h (MXU reduce)
        t_j = (q3 * (k3[:, j:j + 1, :] + e_j)).reshape(GBN, C)
        s_j = (jnp.dot(t_j, sel, preferred_element_type=jnp.float32)
               + bias[:, j * heads:(j + 1) * heads])     # additive mask
        m_new = jnp.maximum(m, s_j)
        a = jnp.exp(m - m_new)               # correction for running sums
        p = jnp.exp(s_j - m_new)
        l = a * l + p
        ve_j = (v3[:, j:j + 1, :] + e_j).reshape(GBN, C)
        a_c = jnp.dot(a, expand, preferred_element_type=jnp.float32)
        p_c = jnp.dot(p, expand, preferred_element_type=jnp.float32)
        acc = a_c * acc + p_c * ve_j
        m = m_new

    # exact normalization (no approx reciprocal); rows with no in-edges fall
    # back to a uniform average -- safe because self-loops are enforced.
    inv_l = 1.0 / l
    out_att = acc * jnp.dot(inv_l, expand, preferred_element_type=jnp.float32)

    # beta-gated root/skip connection (decomposed lin_beta; skip half folded
    # into the fused projection above)
    logit = (jnp.dot(out_att, w_gate_ref[...],
                     preferred_element_type=jnp.float32) + gate_skip)
    bg = jax.nn.sigmoid(logit)
    h = bg * skip + (1.0 - bg) * out_att     # [GBN, C]

    # ---------- Linear(4H -> H) -> LayerNorm -> GELU -> Dropout(identity) ---
    vecs = vecs_ref[...]
    h = (jnp.dot(h, w_lin_ref[...], preferred_element_type=jnp.float32)
         + vecs[0:1, 0:H])
    h = _layernorm(h, vecs[1:2, 0:H], vecs[2:3, 0:H])
    h = _gelu_exact(h)

    # ---------- final LayerNorm -> Linear(H->H) -> MLP([H, 2H, H//2]) -------
    h = _layernorm(h, vecs[3:4, 0:H], vecs[4:5, 0:H])
    h = (jnp.dot(h, w_fin_ref[...], preferred_element_type=jnp.float32)
         + vecs[5:6, 0:H])
    # PyG MLP(norm=None): Linear -> ReLU -> Linear (plain last layer)
    h = jnp.maximum(
        jnp.dot(h, w_mlp1_ref[...], preferred_element_type=jnp.float32)
        + vecs[6:7, 0:2 * H], 0.0)
    h = (jnp.dot(h, w_mlp2_ref[...], preferred_element_type=jnp.float32)
         + vecs[7:8, :])
    out_ref[...] = h                          # [GBN, OUT_PAD] unmasked store


def make_params(key, hidden=HIDDEN, heads=HEADS):
    H = hidden
    C = heads * H
    ks = jax.random.split(key, 10)

    def rnd(k, shape, fan_in):
        return jax.random.normal(k, shape, jnp.float32) * (1.0 / math.sqrt(fan_in))

    wq = rnd(ks[0], (H, C), H)
    wk = rnd(ks[1], (H, C), H)
    wv = rnd(ks[2], (H, C), H)
    wskip = rnd(ks[3], (H, C), H)
    we = rnd(ks[4], (H, C), H)                 # lin_edge, no bias
    wbeta = rnd(ks[5], (3 * C,), 3 * C)        # lin_beta, no bias
    wlin = rnd(ks[6], (C, H), C)
    wfin = rnd(ks[7], (H, H), H)
    w1 = rnd(ks[8], (H, 2 * H), H)
    w2 = rnd(ks[9], (2 * H, H // 2), 2 * H)

    # decomposed beta gate: sigmoid(out.wA + skip.wB) with wA=w0+w2, wB=w1-w2
    wA = wbeta[0:C] + wbeta[2 * C:3 * C]
    wB = wbeta[C:2 * C] - wbeta[2 * C:3 * C]
    gate_col = (wskip @ wB)[:, None]           # fold skip.wB into the x-proj

    p = {}
    # fused x-projection (q | k | v | skip | gate_col | zero padding)
    p["w_xproj"] = jnp.concatenate(
        [wq, wk, wv, wskip, gate_col, jnp.zeros((H, C - 1), jnp.float32)],
        axis=1).astype(jnp.bfloat16)                       # [H, 5C]
    p["b_xproj"] = jnp.zeros((1, 5 * C), jnp.float32)      # biases zero-init
    p["w_edge"] = we.astype(jnp.bfloat16)

    # head selector (pre-scaled by 1/sqrt(H)) and head -> feature-lane expander
    head_of_lane = jnp.arange(C) // H
    sel = (head_of_lane[:, None] == jnp.arange(heads)[None, :]).astype(jnp.float32)
    p["sel"] = sel * (1.0 / math.sqrt(H))      # [C, heads]
    p["expand"] = sel.T                        # [heads, C]

    p["w_gate"] = wA[:, None]                  # [C, 1]
    p["w_lin"] = wlin
    p["w_fin"] = wfin
    p["w_mlp1"] = w1
    p["w_mlp2"] = jnp.zeros((2 * H, OUT_PAD), jnp.float32).at[:, :H // 2].set(w2)

    # packed per-feature rows: [b_lin, ln1_g, ln1_b, norm_g, norm_b, b_fin,
    #                           b_mlp1, b_mlp2]   (biases zero-initialized)
    vecs = jnp.zeros((8, OUT_PAD), jnp.float32)
    vecs = vecs.at[1, :H].set(1.0)   # per-layer LayerNorm gamma
    vecs = vecs.at[3, :H].set(1.0)   # final LayerNorm gamma
    p["vecs"] = vecs
    return p


WEIGHT_ORDER = ("w_xproj", "b_xproj", "w_edge", "sel", "expand", "w_gate",
                "w_lin", "w_fin", "w_mlp1", "w_mlp2", "vecs")


@functools.partial(jax.jit, static_argnames=("graphs_per_block",))
def graph_encoder_forward(x, adj, edge_attr, params, graphs_per_block=16):
    """x: [B, N, H] f32, adj: [B, N, N] binary (adj[b,i,j]=1 <=> edge j->i),
    edge_attr: [B, N, N, H] f32 (edge_attr[b,i,j] = feature of edge j->i)."""
    B, N, H = x.shape
    GB = graphs_per_block
    heads = HEADS
    assert B % GB == 0, "batch must be divisible by graphs_per_block"

    # TODO(synk): producers could hand us bf16 x/edge_attr directly to avoid
    # the wrapper-side cast pass (fused here with the source-major transpose).
    x_flat = x.reshape(B * N, H).astype(jnp.bfloat16)
    ea_src = jnp.transpose(edge_attr, (2, 0, 1, 3)).reshape(
        N, B * N, H).astype(jnp.bfloat16)                   # [N_src, B*N_dst, H]

    # lane-dense additive mask bias, pre-broadcast over heads: [B*N, N*heads]
    bias = (adj.astype(jnp.float32) - 1.0) * 1e30           # 0 or -1e30
    bias = jnp.broadcast_to(bias.reshape(B * N, N, 1),
                            (B * N, N, heads)).reshape(B * N, N * heads)

    weights = [params[name] for name in WEIGHT_ORDER]

    in_specs = (
        [pl.BlockSpec((GB * N, H), lambda g: (g, 0)),
         pl.BlockSpec((N, GB * N, H), lambda g: (0, g, 0)),
         pl.BlockSpec((GB * N, N * heads), lambda g: (g, 0))]
        + [pl.BlockSpec(w.shape, lambda g: (0, 0)) for w in weights]
    )
    out_specs = pl.BlockSpec((GB * N, OUT_PAD), lambda g: (g, 0))

    grid_spec = pltpu.PrefetchScalarGridSpec(
        num_scalar_prefetch=0,
        grid=(B // GB,),
        in_specs=in_specs,
        out_specs=out_specs,
    )
    out = pl.pallas_call(
        graph_encoder_kernel,
        out_shape=jax.ShapeDtypeStruct((B * N, OUT_PAD), jnp.float32),
        grid_spec=grid_spec,
        compiler_params=pltpu.CompilerParams(
            dimension_semantics=("parallel",)),
    )(x_flat, ea_src, bias, *weights)
    return out[:, :H // 2].reshape(B, N, H // 2)


if __name__ == "__main__":
    key = jax.random.PRNGKey(0)
    k_x, k_adj, k_ea, k_w = jax.random.split(key, 4)

    B, N, H = 64, N_NODES, HIDDEN
    x = jax.random.normal(k_x, (B, N, H), jnp.float32)

    # random directed graphs with self-loops (every softmax row is non-empty)
    adj = (jax.random.uniform(k_adj, (B, N, N)) > 0.5).astype(jnp.float32)
    adj = jnp.maximum(adj, jnp.eye(N, dtype=jnp.float32)[None, :, :])

    edge_attr = (jax.random.normal(k_ea, (B, N, N, H), jnp.float32)
                 * adj[:, :, :, None])

    params = make_params(k_w)

    out = graph_encoder_forward(x, adj, edge_attr, params, graphs_per_block=16)
    out = jax.block_until_ready(out)

    assert out.shape == (B, N, H // 2), out.shape
    assert bool(jnp.all(jnp.isfinite(out)))
    print("KERNEL_OK")
</pallas_src>

<mosaic_0001>
module attributes {stable_mosaic.version = 11 : i64} {
  func.func @graph_encoder_kernel(%arg0: i32, %arg1: memref<128x32xbf16, #tpu.memory_space<vmem>>, %arg2: memref<8x128x32xbf16, #tpu.memory_space<vmem>>, %arg3: memref<128x32xf32, #tpu.memory_space<vmem>>, %arg4: memref<32x640xbf16, #tpu.memory_space<vmem>>, %arg5: memref<1x640xf32, #tpu.memory_space<vmem>>, %arg6: memref<32x128xbf16, #tpu.memory_space<vmem>>, %arg7: memref<128x4xf32, #tpu.memory_space<vmem>>, %arg8: memref<4x128xf32, #tpu.memory_space<vmem>>, %arg9: memref<128x1xf32, #tpu.memory_space<vmem>>, %arg10: memref<128x32xf32, #tpu.memory_space<vmem>>, %arg11: memref<32x32xf32, #tpu.memory_space<vmem>>, %arg12: memref<32x64xf32, #tpu.memory_space<vmem>>, %arg13: memref<64x128xf32, #tpu.memory_space<vmem>>, %arg14: memref<8x128xf32, #tpu.memory_space<vmem>>, %arg15: memref<128x128xf32, #tpu.memory_space<vmem>>) attributes {dimension_semantics = [#tpu.dimension_semantics<parallel>], iteration_bounds = array<i64: 4>, scalar_prefetch = 0 : i64, scratch_operands = 0 : i64, tpu.core_type = #tpu.core_type<tc>, window_params = [{transform_indices = @transform_0, window_bounds = array<i64: 128, 32>}, {transform_indices = @transform_1, window_bounds = array<i64: 8, 128, 32>}, {transform_indices = @transform_2, window_bounds = array<i64: 128, 32>}, {pipeline_mode = #tpu.pipeline_mode<synchronous>, transform_indices = @transform_3, window_bounds = array<i64: 32, 640>}, {pipeline_mode = #tpu.pipeline_mode<synchronous>, transform_indices = @transform_4, window_bounds = array<i64: 1, 640>}, {pipeline_mode = #tpu.pipeline_mode<synchronous>, transform_indices = @transform_5, window_bounds = array<i64: 32, 128>}, {pipeline_mode = #tpu.pipeline_mode<synchronous>, transform_indices = @transform_6, window_bounds = array<i64: 128, 4>}, {pipeline_mode = #tpu.pipeline_mode<synchronous>, transform_indices = @transform_7, window_bounds = array<i64: 4, 128>}, {pipeline_mode = #tpu.pipeline_mode<synchronous>, transform_indices = @transform_8, window_bounds = array<i64: 128, 1>}, {pipeline_mode = #tpu.pipeline_mode<synchronous>, transform_indices = @transform_9, window_bounds = array<i64: 128, 32>}, {pipeline_mode = #tpu.pipeline_mode<synchronous>, transform_indices = @transform_10, window_bounds = array<i64: 32, 32>}, {pipeline_mode = #tpu.pipeline_mode<synchronous>, transform_indices = @transform_11, window_bounds = array<i64: 32, 64>}, {pipeline_mode = #tpu.pipeline_mode<synchronous>, transform_indices = @transform_12, window_bounds = array<i64: 64, 128>}, {pipeline_mode = #tpu.pipeline_mode<synchronous>, transform_indices = @transform_13, window_bounds = array<i64: 8, 128>}, {transform_indices = @transform_14, window_bounds = array<i64: 128, 128>}]} {
    %c0 = arith.constant 0 : index
    %c0_0 = arith.constant 0 : index
    %0 = vector.load %arg1[%c0, %c0_0] : memref<128x32xbf16, #tpu.memory_space<vmem>>, vector<128x32xbf16>
    %c0_1 = arith.constant 0 : index
    %c0_2 = arith.constant 0 : index
    %1 = vector.load %arg4[%c0_1, %c0_2] : memref<32x640xbf16, #tpu.memory_space<vmem>>, vector<32x640xbf16>
    %cst = arith.constant dense<0.000000e+00> : vector<128x640xf32>
    %2 = tpu.matmul %0, %1, %cst {dimension_numbers = #tpu.dot_dimension_numbers<[1], [0], [0], [1], [0, 0, 1, 1], [], []>} : vector<128x32xbf16>, vector<32x640xbf16>, vector<128x640xf32> -> vector<128x640xf32>
    %c0_3 = arith.constant 0 : index
    %c0_4 = arith.constant 0 : index
    %3 = vector.load %arg5[%c0_3, %c0_4] : memref<1x640xf32, #tpu.memory_space<vmem>>, vector<1x640xf32>
    %4 = vector.broadcast %3 : vector<1x640xf32> to vector<128x640xf32>
    %5 = arith.addf %2, %4 : vector<128x640xf32>
    %6 = vector.extract_strided_slice %5 {offsets = [0, 0], sizes = [128, 128], strides = [1, 1]} : vector<128x640xf32> to vector<128x128xf32>
    %7 = vector.shape_cast %6 : vector<128x128xf32> to vector<16x8x128xf32>
    %8 = vector.extract_strided_slice %5 {offsets = [0, 128], sizes = [128, 128], strides = [1, 1]} : vector<128x640xf32> to vector<128x128xf32>
    %9 = vector.shape_cast %8 : vector<128x128xf32> to vector<16x8x128xf32>
    %10 = vector.extract_strided_slice %5 {offsets = [0, 256], sizes = [128, 128], strides = [1, 1]} : vector<128x640xf32> to vector<128x128xf32>
    %11 = vector.shape_cast %10 : vector<128x128xf32> to vector<16x8x128xf32>
    %12 = vector.extract_strided_slice %5 {offsets = [0, 384], sizes = [128, 128], strides = [1, 1]} : vector<128x640xf32> to vector<128x128xf32>
    %13 = vector.extract_strided_slice %5 {offsets = [0, 512], sizes = [128, 1], strides = [1, 1]} : vector<128x640xf32> to vector<128x1xf32>
    %c0_5 = arith.constant 0 : index
    %c0_6 = arith.constant 0 : index
    %14 = vector.load %arg6[%c0_5, %c0_6] : memref<32x128xbf16, #tpu.memory_space<vmem>>, vector<32x128xbf16>
    %c0_7 = arith.constant 0 : index
    %c0_8 = arith.constant 0 : index
    %15 = vector.load %arg7[%c0_7, %c0_8] : memref<128x4xf32, #tpu.memory_space<vmem>>, vector<128x4xf32>
    %c0_9 = arith.constant 0 : index
    %c0_10 = arith.constant 0 : index
    %16 = vector.load %arg8[%c0_9, %c0_10] : memref<4x128xf32, #tpu.memory_space<vmem>>, vector<4x128xf32>
    %c0_11 = arith.constant 0 : index
    %c0_12 = arith.constant 0 : index
    %17 = vector.load %arg3[%c0_11, %c0_12] : memref<128x32xf32, #tpu.memory_space<vmem>>, vector<128x32xf32>
    %cst_13 = arith.constant -1.000000e+30 : f32
    %18 = vector.broadcast %cst_13 : f32 to vector<128x4xf32>
    %cst_14 = arith.constant 0.000000e+00 : f32
    %19 = vector.broadcast %cst_14 : f32 to vector<128x4xf32>
    %cst_15 = arith.constant 0.000000e+00 : f32
    %20 = vector.broadcast %cst_15 : f32 to vector<128x128xf32>
    %c0_16 = arith.constant 0 : index
    %c0_17 = arith.constant 0 : index
    %c0_18 = arith.constant 0 : index
    %21 = vector.load %arg2[%c0_16, %c0_17, %c0_18] : memref<8x128x32xbf16, #tpu.memory_space<vmem>>, vector<1x128x32xbf16>
    %22 = vector.shape_cast %21 : vector<1x128x32xbf16> to vector<128x32xbf16>
    %cst_19 = arith.constant dense<0.000000e+00> : vector<128x128xf32>
    %23 = tpu.matmul %22, %14, %cst_19 {dimension_numbers = #tpu.dot_dimension_numbers<[1], [0], [0], [1], [0, 0, 1, 1], [], []>} : vector<128x32xbf16>, vector<32x128xbf16>, vector<128x128xf32> -> vector<128x128xf32>
    %24 = vector.shape_cast %23 : vector<128x128xf32> to vector<16x8x128xf32>
    %25 = vector.extract_strided_slice %9 {offsets = [0, 0, 0], sizes = [16, 1, 128], strides = [1, 1, 1]} : vector<16x8x128xf32> to vector<16x1x128xf32>
    %26 = vector.broadcast %25 : vector<16x1x128xf32> to vector<16x8x128xf32>
    %27 = arith.addf %26, %24 : vector<16x8x128xf32>
    %28 = arith.mulf %7, %27 : vector<16x8x128xf32>
    %29 = vector.shape_cast %28 : vector<16x8x128xf32> to vector<128x128xf32>
    %cst_20 = arith.constant dense<0.000000e+00> : vector<128x4xf32>
    %30 = tpu.matmul %29, %15, %cst_20 {dimension_numbers = #tpu.dot_dimension_numbers<[1], [0], [0], [1], [0, 0, 1, 1], [], []>} : vector<128x128xf32>, vector<128x4xf32>, vector<128x4xf32> -> vector<128x4xf32>
    %31 = vector.extract_strided_slice %17 {offsets = [0, 0], sizes = [128, 4], strides = [1, 1]} : vector<128x32xf32> to vector<128x4xf32>
    %32 = arith.addf %30, %31 : vector<128x4xf32>
    %33 = arith.maximumf %18, %32 : vector<128x4xf32>
    %34 = arith.subf %18, %33 : vector<128x4xf32>
    %35 = math.exp %34 : vector<128x4xf32>
    %36 = arith.subf %32, %33 : vector<128x4xf32>
    %37 = math.exp %36 : vector<128x4xf32>
    %38 = arith.mulf %35, %19 : vector<128x4xf32>
    %39 = arith.addf %38, %37 : vector<128x4xf32>
    %40 = vector.extract_strided_slice %11 {offsets = [0, 0, 0], sizes = [16, 1, 128], strides = [1, 1, 1]} : vector<16x8x128xf32> to vector<16x1x128xf32>
    %41 = vector.broadcast %40 : vector<16x1x128xf32> to vector<16x8x128xf32>
    %42 = arith.addf %41, %24 : vector<16x8x128xf32>
    %43 = vector.shape_cast %42 : vector<16x8x128xf32> to vector<128x128xf32>
    %cst_21 = arith.constant dense<0.000000e+00> : vector<128x128xf32>
    %44 = tpu.matmul %35, %16, %cst_21 {dimension_numbers = #tpu.dot_dimension_numbers<[1], [0], [0], [1], [0, 0, 1, 1], [], []>} : vector<128x4xf32>, vector<4x128xf32>, vector<128x128xf32> -> vector<128x128xf32>
    %cst_22 = arith.constant dense<0.000000e+00> : vector<128x128xf32>
    %45 = tpu.matmul %37, %16, %cst_22 {dimension_numbers = #tpu.dot_dimension_numbers<[1], [0], [0], [1], [0, 0, 1, 1], [], []>} : vector<128x4xf32>, vector<4x128xf32>, vector<128x128xf32> -> vector<128x128xf32>
    %46 = arith.mulf %44, %20 : vector<128x128xf32>
    %47 = arith.mulf %45, %43 : vector<128x128xf32>
    %48 = arith.addf %46, %47 : vector<128x128xf32>
    %c1 = arith.constant 1 : index
    %c0_23 = arith.constant 0 : index
    %c0_24 = arith.constant 0 : index
    %49 = vector.load %arg2[%c1, %c0_23, %c0_24] : memref<8x128x32xbf16, #tpu.memory_space<vmem>>, vector<1x128x32xbf16>
    %50 = vector.shape_cast %49 : vector<1x128x32xbf16> to vector<128x32xbf16>
    %cst_25 = arith.constant dense<0.000000e+00> : vector<128x128xf32>
    %51 = tpu.matmul %50, %14, %cst_25 {dimension_numbers = #tpu.dot_dimension_numbers<[1], [0], [0], [1], [0, 0, 1, 1], [], []>} : vector<128x32xbf16>, vector<32x128xbf16>, vector<128x128xf32> -> vector<128x128xf32>
    %52 = vector.shape_cast %51 : vector<128x128xf32> to vector<16x8x128xf32>
    %53 = vector.extract_strided_slice %9 {offsets = [0, 1, 0], sizes = [16, 1, 128], strides = [1, 1, 1]} : vector<16x8x128xf32> to vector<16x1x128xf32>
    %54 = vector.broadcast %53 : vector<16x1x128xf32> to vector<16x8x128xf32>
    %55 = arith.addf %54, %52 : vector<16x8x128xf32>
    %56 = arith.mulf %7, %55 : vector<16x8x128xf32>
    %57 = vector.shape_cast %56 : vector<16x8x128xf32> to vector<128x128xf32>
    %cst_26 = arith.constant dense<0.000000e+00> : vector<128x4xf32>
    %58 = tpu.matmul %57, %15, %cst_26 {dimension_numbers = #tpu.dot_dimension_numbers<[1], [0], [0], [1], [0, 0, 1, 1], [], []>} : vector<128x128xf32>, vector<128x4xf32>, vector<128x4xf32> -> vector<128x4xf32>
    %59 = vector.extract_strided_slice %17 {offsets = [0, 4], sizes = [128, 4], strides = [1, 1]} : vector<128x32xf32> to vector<128x4xf32>
    %60 = arith.addf %58, %59 : vector<128x4xf32>
    %61 = arith.maximumf %33, %60 : vector<128x4xf32>
    %62 = arith.subf %33, %61 : vector<128x4xf32>
    %63 = math.exp %62 : vector<128x4xf32>
    %64 = arith.subf %60, %61 : vector<128x4xf32>
    %65 = math.exp %64 : vector<128x4xf32>
    %66 = arith.mulf %63, %39 : vector<128x4xf32>
    %67 = arith.addf %66, %65 : vector<128x4xf32>
    %68 = vector.extract_strided_slice %11 {offsets = [0, 1, 0], sizes = [16, 1, 128], strides = [1, 1, 1]} : vector<16x8x128xf32> to vector<16x1x128xf32>
    %69 = vector.broadcast %68 : vector<16x1x128xf32> to vector<16x8x128xf32>
    %70 = arith.addf %69, %52 : vector<16x8x128xf32>
    %71 = vector.shape_cast %70 : vector<16x8x128xf32> to vector<128x128xf32>
    %cst_27 = arith.constant dense<0.000000e+00> : vector<128x128xf32>
    %72 = tpu.matmul %63, %16, %cst_27 {dimension_numbers = #tpu.dot_dimension_numbers<[1], [0], [0], [1], [0, 0, 1, 1], [], []>} : vector<128x4xf32>, vector<4x128xf32>, vector<128x128xf32> -> vector<128x128xf32>
    %cst_28 = arith.constant dense<0.000000e+00> : vector<128x128xf32>
    %73 = tpu.matmul %65, %16, %cst_28 {dimension_numbers = #tpu.dot_dimension_numbers<[1], [0], [0], [1], [0, 0, 1, 1], [], []>} : vector<128x4xf32>, vector<4x128xf32>, vector<128x128xf32> -> vector<128x128xf32>
    %74 = arith.mulf %72, %48 : vector<128x128xf32>
    %75 = arith.mulf %73, %71 : vector<128x128xf32>
    %76 = arith.addf %74, %75 : vector<128x128xf32>
    %c2 = arith.constant 2 : index
    %c0_29 = arith.constant 0 : index
    %c0_30 = arith.constant 0 : index
    %77 = vector.load %arg2[%c2, %c0_29, %c0_30] : memref<8x128x32xbf16, #tpu.memory_space<vmem>>, vector<1x128x32xbf16>
    %78 = vector.shape_cast %77 : vector<1x128x32xbf16> to vector<128x32xbf16>
    %cst_31 = arith.constant dense<0.000000e+00> : vector<128x128xf32>
    %79 = tpu.matmul %78, %14, %cst_31 {dimension_numbers = #tpu.dot_dimension_numbers<[1], [0], [0], [1], [0, 0, 1, 1], [], []>} : vector<128x32xbf16>, vector<32x128xbf16>, vector<128x128xf32> -> vector<128x128xf32>
    %80 = vector.shape_cast %79 : vector<128x128xf32> to vector<16x8x128xf32>
    %81 = vector.extract_strided_slice %9 {offsets = [0, 2, 0], sizes = [16, 1, 128], strides = [1, 1, 1]} : vector<16x8x128xf32> to vector<16x1x128xf32>
    %82 = vector.broadcast %81 : vector<16x1x128xf32> to vector<16x8x128xf32>
    %83 = arith.addf %82, %80 : vector<16x8x128xf32>
    %84 = arith.mulf %7, %83 : vector<16x8x128xf32>
    %85 = vector.shape_cast %84 : vector<16x8x128xf32> to vector<128x128xf32>
    %cst_32 = arith.constant dense<0.000000e+00> : vector<128x4xf32>
    %86 = tpu.matmul %85, %15, %cst_32 {dimension_numbers = #tpu.dot_dimension_numbers<[1], [0], [0], [1], [0, 0, 1, 1], [], []>} : vector<128x128xf32>, vector<128x4xf32>, vector<128x4xf32> -> vector<128x4xf32>
    %87 = vector.extract_strided_slice %17 {offsets = [0, 8], sizes = [128, 4], strides = [1, 1]} : vector<128x32xf32> to vector<128x4xf32>
    %88 = arith.addf %86, %87 : vector<128x4xf32>
    %89 = arith.maximumf %61, %88 : vector<128x4xf32>
    %90 = arith.subf %61, %89 : vector<128x4xf32>
    %91 = math.exp %90 : vector<128x4xf32>
    %92 = arith.subf %88, %89 : vector<128x4xf32>
    %93 = math.exp %92 : vector<128x4xf32>
    %94 = arith.mulf %91, %67 : vector<128x4xf32>
    %95 = arith.addf %94, %93 : vector<128x4xf32>
    %96 = vector.extract_strided_slice %11 {offsets = [0, 2, 0], sizes = [16, 1, 128], strides = [1, 1, 1]} : vector<16x8x128xf32> to vector<16x1x128xf32>
    %97 = vector.broadcast %96 : vector<16x1x128xf32> to vector<16x8x128xf32>
    %98 = arith.addf %97, %80 : vector<16x8x128xf32>
    %99 = vector.shape_cast %98 : vector<16x8x128xf32> to vector<128x128xf32>
    %cst_33 = arith.constant dense<0.000000e+00> : vector<128x128xf32>
    %100 = tpu.matmul %91, %16, %cst_33 {dimension_numbers = #tpu.dot_dimension_numbers<[1], [0], [0], [1], [0, 0, 1, 1], [], []>} : vector<128x4xf32>, vector<4x128xf32>, vector<128x128xf32> -> vector<128x128xf32>
    %cst_34 = arith.constant dense<0.000000e+00> : vector<128x128xf32>
    %101 = tpu.matmul %93, %16, %cst_34 {dimension_numbers = #tpu.dot_dimension_numbers<[1], [0], [0], [1], [0, 0, 1, 1], [], []>} : vector<128x4xf32>, vector<4x128xf32>, vector<128x128xf32> -> vector<128x128xf32>
    %102 = arith.mulf %100, %76 : vector<128x128xf32>
    %103 = arith.mulf %101, %99 : vector<128x128xf32>
    %104 = arith.addf %102, %103 : vector<128x128xf32>
    %c3 = arith.constant 3 : index
    %c0_35 = arith.constant 0 : index
    %c0_36 = arith.constant 0 : index
    %105 = vector.load %arg2[%c3, %c0_35, %c0_36] : memref<8x128x32xbf16, #tpu.memory_space<vmem>>, vector<1x128x32xbf16>
    %106 = vector.shape_cast %105 : vector<1x128x32xbf16> to vector<128x32xbf16>
    %cst_37 = arith.constant dense<0.000000e+00> : vector<128x128xf32>
    %107 = tpu.matmul %106, %14, %cst_37 {dimension_numbers = #tpu.dot_dimension_numbers<[1], [0], [0], [1], [0, 0, 1, 1], [], []>} : vector<128x32xbf16>, vector<32x128xbf16>, vector<128x128xf32> -> vector<128x128xf32>
    %108 = vector.shape_cast %107 : vector<128x128xf32> to vector<16x8x128xf32>
    %109 = vector.extract_strided_slice %9 {offsets = [0, 3, 0], sizes = [16, 1, 128], strides = [1, 1, 1]} : vector<16x8x128xf32> to vector<16x1x128xf32>
    %110 = vector.broadcast %109 : vector<16x1x128xf32> to vector<16x8x128xf32>
    %111 = arith.addf %110, %108 : vector<16x8x128xf32>
    %112 = arith.mulf %7, %111 : vector<16x8x128xf32>
    %113 = vector.shape_cast %112 : vector<16x8x128xf32> to vector<128x128xf32>
    %cst_38 = arith.constant dense<0.000000e+00> : vector<128x4xf32>
    %114 = tpu.matmul %113, %15, %cst_38 {dimension_numbers = #tpu.dot_dimension_numbers<[1], [0], [0], [1], [0, 0, 1, 1], [], []>} : vector<128x128xf32>, vector<128x4xf32>, vector<128x4xf32> -> vector<128x4xf32>
    %115 = vector.extract_strided_slice %17 {offsets = [0, 12], sizes = [128, 4], strides = [1, 1]} : vector<128x32xf32> to vector<128x4xf32>
    %116 = arith.addf %114, %115 : vector<128x4xf32>
    %117 = arith.maximumf %89, %116 : vector<128x4xf32>
    %118 = arith.subf %89, %117 : vector<128x4xf32>
    %119 = math.exp %118 : vector<128x4xf32>
    %120 = arith.subf %116, %117 : vector<128x4xf32>
    %121 = math.exp %120 : vector<128x4xf32>
    %122 = arith.mulf %119, %95 : vector<128x4xf32>
    %123 = arith.addf %122, %121 : vector<128x4xf32>
    %124 = vector.extract_strided_slice %11 {offsets = [0, 3, 0], sizes = [16, 1, 128], strides = [1, 1, 1]} : vector<16x8x128xf32> to vector<16x1x128xf32>
    %125 = vector.broadcast %124 : vector<16x1x128xf32> to vector<16x8x128xf32>
    %126 = arith.addf %125, %108 : vector<16x8x128xf32>
    %127 = vector.shape_cast %126 : vector<16x8x128xf32> to vector<128x128xf32>
    %cst_39 = arith.constant dense<0.000000e+00> : vector<128x128xf32>
    %128 = tpu.matmul %119, %16, %cst_39 {dimension_numbers = #tpu.dot_dimension_numbers<[1], [0], [0], [1], [0, 0, 1, 1], [], []>} : vector<128x4xf32>, vector<4x128xf32>, vector<128x128xf32> -> vector<128x128xf32>
    %cst_40 = arith.constant dense<0.000000e+00> : vector<128x128xf32>
    %129 = tpu.matmul %121, %16, %cst_40 {dimension_numbers = #tpu.dot_dimension_numbers<[1], [0], [0], [1], [0, 0, 1, 1], [], []>} : vector<128x4xf32>, vector<4x128xf32>, vector<128x128xf32> -> vector<128x128xf32>
    %130 = arith.mulf %128, %104 : vector<128x128xf32>
    %131 = arith.mulf %129, %127 : vector<128x128xf32>
    %132 = arith.addf %130, %131 : vector<128x128xf32>
    %c4 = arith.constant 4 : index
    %c0_41 = arith.constant 0 : index
    %c0_42 = arith.constant 0 : index
    %133 = vector.load %arg2[%c4, %c0_41, %c0_42] : memref<8x128x32xbf16, #tpu.memory_space<vmem>>, vector<1x128x32xbf16>
    %134 = vector.shape_cast %133 : vector<1x128x32xbf16> to vector<128x32xbf16>
    %cst_43 = arith.constant dense<0.000000e+00> : vector<128x128xf32>
    %135 = tpu.matmul %134, %14, %cst_43 {dimension_numbers = #tpu.dot_dimension_numbers<[1], [0], [0], [1], [0, 0, 1, 1], [], []>} : vector<128x32xbf16>, vector<32x128xbf16>, vector<128x128xf32> -> vector<128x128xf32>
    %136 = vector.shape_cast %135 : vector<128x128xf32> to vector<16x8x128xf32>
    %137 = vector.extract_strided_slice %9 {offsets = [0, 4, 0], sizes = [16, 1, 128], strides = [1, 1, 1]} : vector<16x8x128xf32> to vector<16x1x128xf32>
    %138 = vector.broadcast %137 : vector<16x1x128xf32> to vector<16x8x128xf32>
    %139 = arith.addf %138, %136 : vector<16x8x128xf32>
    %140 = arith.mulf %7, %139 : vector<16x8x128xf32>
    %141 = vector.shape_cast %140 : vector<16x8x128xf32> to vector<128x128xf32>
    %cst_44 = arith.constant dense<0.000000e+00> : vector<128x4xf32>
    %142 = tpu.matmul %141, %15, %cst_44 {dimension_numbers = #tpu.dot_dimension_numbers<[1], [0], [0], [1], [0, 0, 1, 1], [], []>} : vector<128x128xf32>, vector<128x4xf32>, vector<128x4xf32> -> vector<128x4xf32>
    %143 = vector.extract_strided_slice %17 {offsets = [0, 16], sizes = [128, 4], strides = [1, 1]} : vector<128x32xf32> to vector<128x4xf32>
    %144 = arith.addf %142, %143 : vector<128x4xf32>
    %145 = arith.maximumf %117, %144 : vector<128x4xf32>
    %146 = arith.subf %117, %145 : vector<128x4xf32>
    %147 = math.exp %146 : vector<128x4xf32>
    %148 = arith.subf %144, %145 : vector<128x4xf32>
    %149 = math.exp %148 : vector<128x4xf32>
    %150 = arith.mulf %147, %123 : vector<128x4xf32>
    %151 = arith.addf %150, %149 : vector<128x4xf32>
    %152 = vector.extract_strided_slice %11 {offsets = [0, 4, 0], sizes = [16, 1, 128], strides = [1, 1, 1]} : vector<16x8x128xf32> to vector<16x1x128xf32>
    %153 = vector.broadcast %152 : vector<16x1x128xf32> to vector<16x8x128xf32>
    %154 = arith.addf %153, %136 : vector<16x8x128xf32>
    %155 = vector.shape_cast %154 : vector<16x8x128xf32> to vector<128x128xf32>
    %cst_45 = arith.constant dense<0.000000e+00> : vector<128x128xf32>
    %156 = tpu.matmul %147, %16, %cst_45 {dimension_numbers = #tpu.dot_dimension_numbers<[1], [0], [0], [1], [0, 0, 1, 1], [], []>} : vector<128x4xf32>, vector<4x128xf32>, vector<128x128xf32> -> vector<128x128xf32>
    %cst_46 = arith.constant dense<0.000000e+00> : vector<128x128xf32>
    %157 = tpu.matmul %149, %16, %cst_46 {dimension_numbers = #tpu.dot_dimension_numbers<[1], [0], [0], [1], [0, 0, 1, 1], [], []>} : vector<128x4xf32>, vector<4x128xf32>, vector<128x128xf32> -> vector<128x128xf32>
    %158 = arith.mulf %156, %132 : vector<128x128xf32>
    %159 = arith.mulf %157, %155 : vector<128x128xf32>
    %160 = arith.addf %158, %159 : vector<128x128xf32>
    %c5 = arith.constant 5 : index
    %c0_47 = arith.constant 0 : index
    %c0_48 = arith.constant 0 : index
    %161 = vector.load %arg2[%c5, %c0_47, %c0_48] : memref<8x128x32xbf16, #tpu.memory_space<vmem>>, vector<1x128x32xbf16>
    %162 = vector.shape_cast %161 : vector<1x128x32xbf16> to vector<128x32xbf16>
    %cst_49 = arith.constant dense<0.000000e+00> : vector<128x128xf32>
    %163 = tpu.matmul %162, %14, %cst_49 {dimension_numbers = #tpu.dot_dimension_numbers<[1], [0], [0], [1], [0, 0, 1, 1], [], []>} : vector<128x32xbf16>, vector<32x128xbf16>, vector<128x128xf32> -> vector<128x128xf32>
    %164 = vector.shape_cast %163 : vector<128x128xf32> to vector<16x8x128xf32>
    %165 = vector.extract_strided_slice %9 {offsets = [0, 5, 0], sizes = [16, 1, 128], strides = [1, 1, 1]} : vector<16x8x128xf32> to vector<16x1x128xf32>
    %166 = vector.broadcast %165 : vector<16x1x128xf32> to vector<16x8x128xf32>
    %167 = arith.addf %166, %164 : vector<16x8x128xf32>
    %168 = arith.mulf %7, %167 : vector<16x8x128xf32>
    %169 = vector.shape_cast %168 : vector<16x8x128xf32> to vector<128x128xf32>
    %cst_50 = arith.constant dense<0.000000e+00> : vector<128x4xf32>
    %170 = tpu.matmul %169, %15, %cst_50 {dimension_numbers = #tpu.dot_dimension_numbers<[1], [0], [0], [1], [0, 0, 1, 1], [], []>} : vector<128x128xf32>, vector<128x4xf32>, vector<128x4xf32> -> vector<128x4xf32>
    %171 = vector.extract_strided_slice %17 {offsets = [0, 20], sizes = [128, 4], strides = [1, 1]} : vector<128x32xf32> to vector<128x4xf32>
    %172 = arith.addf %170, %171 : vector<128x4xf32>
    %173 = arith.maximumf %145, %172 : vector<128x4xf32>
    %174 = arith.subf %145, %173 : vector<128x4xf32>
    %175 = math.exp %174 : vector<128x4xf32>
    %176 = arith.subf %172, %173 : vector<128x4xf32>
    %177 = math.exp %176 : vector<128x4xf32>
    %178 = arith.mulf %175, %151 : vector<128x4xf32>
    %179 = arith.addf %178, %177 : vector<128x4xf32>
    %180 = vector.extract_strided_slice %11 {offsets = [0, 5, 0], sizes = [16, 1, 128], strides = [1, 1, 1]} : vector<16x8x128xf32> to vector<16x1x128xf32>
    %181 = vector.broadcast %180 : vector<16x1x128xf32> to vector<16x8x128xf32>
    %182 = arith.addf %181, %164 : vector<16x8x128xf32>
    %183 = vector.shape_cast %182 : vector<16x8x128xf32> to vector<128x128xf32>
    %cst_51 = arith.constant dense<0.000000e+00> : vector<128x128xf32>
    %184 = tpu.matmul %175, %16, %cst_51 {dimension_numbers = #tpu.dot_dimension_numbers<[1], [0], [0], [1], [0, 0, 1, 1], [], []>} : vector<128x4xf32>, vector<4x128xf32>, vector<128x128xf32> -> vector<128x128xf32>
    %cst_52 = arith.constant dense<0.000000e+00> : vector<128x128xf32>
    %185 = tpu.matmul %177, %16, %cst_52 {dimension_numbers = #tpu.dot_dimension_numbers<[1], [0], [0], [1], [0, 0, 1, 1], [], []>} : vector<128x4xf32>, vector<4x128xf32>, vector<128x128xf32> -> vector<128x128xf32>
    %186 = arith.mulf %184, %160 : vector<128x128xf32>
    %187 = arith.mulf %185, %183 : vector<128x128xf32>
    %188 = arith.addf %186, %187 : vector<128x128xf32>
    %c6 = arith.constant 6 : index
    %c0_53 = arith.constant 0 : index
    %c0_54 = arith.constant 0 : index
    %189 = vector.load %arg2[%c6, %c0_53, %c0_54] : memref<8x128x32xbf16, #tpu.memory_space<vmem>>, vector<1x128x32xbf16>
    %190 = vector.shape_cast %189 : vector<1x128x32xbf16> to vector<128x32xbf16>
    %cst_55 = arith.constant dense<0.000000e+00> : vector<128x128xf32>
    %191 = tpu.matmul %190, %14, %cst_55 {dimension_numbers = #tpu.dot_dimension_numbers<[1], [0], [0], [1], [0, 0, 1, 1], [], []>} : vector<128x32xbf16>, vector<32x128xbf16>, vector<128x128xf32> -> vector<128x128xf32>
    %192 = vector.shape_cast %191 : vector<128x128xf32> to vector<16x8x128xf32>
    %193 = vector.extract_strided_slice %9 {offsets = [0, 6, 0], sizes = [16, 1, 128], strides = [1, 1, 1]} : vector<16x8x128xf32> to vector<16x1x128xf32>
    %194 = vector.broadcast %193 : vector<16x1x128xf32> to vector<16x8x128xf32>
    %195 = arith.addf %194, %192 : vector<16x8x128xf32>
    %196 = arith.mulf %7, %195 : vector<16x8x128xf32>
    %197 = vector.shape_cast %196 : vector<16x8x128xf32> to vector<128x128xf32>
    %cst_56 = arith.constant dense<0.000000e+00> : vector<128x4xf32>
    %198 = tpu.matmul %197, %15, %cst_56 {dimension_numbers = #tpu.dot_dimension_numbers<[1], [0], [0], [1], [0, 0, 1, 1], [], []>} : vector<128x128xf32>, vector<128x4xf32>, vector<128x4xf32> -> vector<128x4xf32>
    %199 = vector.extract_strided_slice %17 {offsets = [0, 24], sizes = [128, 4], strides = [1, 1]} : vector<128x32xf32> to vector<128x4xf32>
    %200 = arith.addf %198, %199 : vector<128x4xf32>
    %201 = arith.maximumf %173, %200 : vector<128x4xf32>
    %202 = arith.subf %173, %201 : vector<128x4xf32>
    %203 = math.exp %202 : vector<128x4xf32>
    %204 = arith.subf %200, %201 : vector<128x4xf32>
    %205 = math.exp %204 : vector<128x4xf32>
    %206 = arith.mulf %203, %179 : vector<128x4xf32>
    %207 = arith.addf %206, %205 : vector<128x4xf32>
    %208 = vector.extract_strided_slice %11 {offsets = [0, 6, 0], sizes = [16, 1, 128], strides = [1, 1, 1]} : vector<16x8x128xf32> to vector<16x1x128xf32>
    %209 = vector.broadcast %208 : vector<16x1x128xf32> to vector<16x8x128xf32>
    %210 = arith.addf %209, %192 : vector<16x8x128xf32>
    %211 = vector.shape_cast %210 : vector<16x8x128xf32> to vector<128x128xf32>
    %cst_57 = arith.constant dense<0.000000e+00> : vector<128x128xf32>
    %212 = tpu.matmul %203, %16, %cst_57 {dimension_numbers = #tpu.dot_dimension_numbers<[1], [0], [0], [1], [0, 0, 1, 1], [], []>} : vector<128x4xf32>, vector<4x128xf32>, vector<128x128xf32> -> vector<128x128xf32>
    %cst_58 = arith.constant dense<0.000000e+00> : vector<128x128xf32>
    %213 = tpu.matmul %205, %16, %cst_58 {dimension_numbers = #tpu.dot_dimension_numbers<[1], [0], [0], [1], [0, 0, 1, 1], [], []>} : vector<128x4xf32>, vector<4x128xf32>, vector<128x128xf32> -> vector<128x128xf32>
    %214 = arith.mulf %212, %188 : vector<128x128xf32>
    %215 = arith.mulf %213, %211 : vector<128x128xf32>
    %216 = arith.addf %214, %215 : vector<128x128xf32>
    %c7 = arith.constant 7 : index
    %c0_59 = arith.constant 0 : index
    %c0_60 = arith.constant 0 : index
    %217 = vector.load %arg2[%c7, %c0_59, %c0_60] : memref<8x128x32xbf16, #tpu.memory_space<vmem>>, vector<1x128x32xbf16>
    %218 = vector.shape_cast %217 : vector<1x128x32xbf16> to vector<128x32xbf16>
    %cst_61 = arith.constant dense<0.000000e+00> : vector<128x128xf32>
    %219 = tpu.matmul %218, %14, %cst_61 {dimension_numbers = #tpu.dot_dimension_numbers<[1], [0], [0], [1], [0, 0, 1, 1], [], []>} : vector<128x32xbf16>, vector<32x128xbf16>, vector<128x128xf32> -> vector<128x128xf32>
    %220 = vector.shape_cast %219 : vector<128x128xf32> to vector<16x8x128xf32>
    %221 = vector.extract_strided_slice %9 {offsets = [0, 7, 0], sizes = [16, 1, 128], strides = [1, 1, 1]} : vector<16x8x128xf32> to vector<16x1x128xf32>
    %222 = vector.broadcast %221 : vector<16x1x128xf32> to vector<16x8x128xf32>
    %223 = arith.addf %222, %220 : vector<16x8x128xf32>
    %224 = arith.mulf %7, %223 : vector<16x8x128xf32>
    %225 = vector.shape_cast %224 : vector<16x8x128xf32> to vector<128x128xf32>
    %cst_62 = arith.constant dense<0.000000e+00> : vector<128x4xf32>
    %226 = tpu.matmul %225, %15, %cst_62 {dimension_numbers = #tpu.dot_dimension_numbers<[1], [0], [0], [1], [0, 0, 1, 1], [], []>} : vector<128x128xf32>, vector<128x4xf32>, vector<128x4xf32> -> vector<128x4xf32>
    %227 = vector.extract_strided_slice %17 {offsets = [0, 28], sizes = [128, 4], strides = [1, 1]} : vector<128x32xf32> to vector<128x4xf32>
    %228 = arith.addf %226, %227 : vector<128x4xf32>
    %229 = arith.maximumf %201, %228 : vector<128x4xf32>
    %230 = arith.subf %201, %229 : vector<128x4xf32>
    %231 = math.exp %230 : vector<128x4xf32>
    %232 = arith.subf %228, %229 : vector<128x4xf32>
    %233 = math.exp %232 : vector<128x4xf32>
    %234 = arith.mulf %231, %207 : vector<128x4xf32>
    %235 = arith.addf %234, %233 : vector<128x4xf32>
    %236 = vector.extract_strided_slice %11 {offsets = [0, 7, 0], sizes = [16, 1, 128], strides = [1, 1, 1]} : vector<16x8x128xf32> to vector<16x1x128xf32>
    %237 = vector.broadcast %236 : vector<16x1x128xf32> to vector<16x8x128xf32>
    %238 = arith.addf %237, %220 : vector<16x8x128xf32>
    %239 = vector.shape_cast %238 : vector<16x8x128xf32> to vector<128x128xf32>
    %cst_63 = arith.constant dense<0.000000e+00> : vector<128x128xf32>
    %240 = tpu.matmul %231, %16, %cst_63 {dimension_numbers = #tpu.dot_dimension_numbers<[1], [0], [0], [1], [0, 0, 1, 1], [], []>} : vector<128x4xf32>, vector<4x128xf32>, vector<128x128xf32> -> vector<128x128xf32>
    %cst_64 = arith.constant dense<0.000000e+00> : vector<128x128xf32>
    %241 = tpu.matmul %233, %16, %cst_64 {dimension_numbers = #tpu.dot_dimension_numbers<[1], [0], [0], [1], [0, 0, 1, 1], [], []>} : vector<128x4xf32>, vector<4x128xf32>, vector<128x128xf32> -> vector<128x128xf32>
    %242 = arith.mulf %240, %216 : vector<128x128xf32>
    %243 = arith.mulf %241, %239 : vector<128x128xf32>
    %244 = arith.addf %242, %243 : vector<128x128xf32>
    %cst_65 = arith.constant 1.000000e+00 : f32
    %245 = vector.broadcast %cst_65 : f32 to vector<128x4xf32>
    %246 = arith.divf %245, %235 : vector<128x4xf32>
    %cst_66 = arith.constant dense<0.000000e+00> : vector<128x128xf32>
    %247 = tpu.matmul %246, %16, %cst_66 {dimension_numbers = #tpu.dot_dimension_numbers<[1], [0], [0], [1], [0, 0, 1, 1], [], []>} : vector<128x4xf32>, vector<4x128xf32>, vector<128x128xf32> -> vector<128x128xf32>
    %248 = arith.mulf %244, %247 : vector<128x128xf32>
    %c0_67 = arith.constant 0 : index
    %c0_68 = arith.constant 0 : index
    %249 = vector.load %arg9[%c0_67, %c0_68] : memref<128x1xf32, #tpu.memory_space<vmem>>, vector<128x1xf32>
    %cst_69 = arith.constant dense<0.000000e+00> : vector<128x1xf32>
    %250 = tpu.matmul %248, %249, %cst_69 {dimension_numbers = #tpu.dot_dimension_numbers<[1], [0], [0], [1], [0, 0, 1, 1], [], []>} : vector<128x128xf32>, vector<128x1xf32>, vector<128x1xf32> -> vector<128x1xf32>
    %251 = arith.addf %250, %13 : vector<128x1xf32>
    %252 = arith.negf %251 : vector<128x1xf32>
    %253 = math.exp %252 : vector<128x1xf32>
    %cst_70 = arith.constant 1.000000e+00 : f32
    %254 = vector.broadcast %cst_70 : f32 to vector<128x1xf32>
    %255 = arith.addf %254, %253 : vector<128x1xf32>
    %256 = arith.divf %254, %255 : vector<128x1xf32>
    %257 = vector.broadcast %256 : vector<128x1xf32> to vector<128x128xf32>
    %258 = arith.mulf %257, %12 : vector<128x128xf32>
    %cst_71 = arith.constant 1.000000e+00 : f32
    %259 = vector.broadcast %cst_71 : f32 to vector<128x1xf32>
    %260 = arith.subf %259, %256 : vector<128x1xf32>
    %261 = vector.broadcast %260 : vector<128x1xf32> to vector<128x128xf32>
    %262 = arith.mulf %261, %248 : vector<128x128xf32>
    %263 = arith.addf %258, %262 : vector<128x128xf32>
    %c0_72 = arith.constant 0 : index
    %c0_73 = arith.constant 0 : index
    %264 = vector.load %arg14[%c0_72, %c0_73] : memref<8x128xf32, #tpu.memory_space<vmem>>, vector<8x128xf32>
    %c0_74 = arith.constant 0 : index
    %c0_75 = arith.constant 0 : index
    %265 = vector.load %arg10[%c0_74, %c0_75] : memref<128x32xf32, #tpu.memory_space<vmem>>, vector<128x32xf32>
    %cst_76 = arith.constant dense<0.000000e+00> : vector<128x32xf32>
    %266 = tpu.matmul %263, %265, %cst_76 {dimension_numbers = #tpu.dot_dimension_numbers<[1], [0], [0], [1], [0, 0, 1, 1], [], []>} : vector<128x128xf32>, vector<128x32xf32>, vector<128x32xf32> -> vector<128x32xf32>
    %267 = vector.extract_strided_slice %264 {offsets = [0, 0], sizes = [1, 32], strides = [1, 1]} : vector<8x128xf32> to vector<1x32xf32>
    %268 = vector.broadcast %267 : vector<1x32xf32> to vector<128x32xf32>
    %269 = arith.addf %266, %268 : vector<128x32xf32>
    %270 = vector.extract_strided_slice %264 {offsets = [1, 0], sizes = [1, 32], strides = [1, 1]} : vector<8x128xf32> to vector<1x32xf32>
    %271 = vector.extract_strided_slice %264 {offsets = [2, 0], sizes = [1, 32], strides = [1, 1]} : vector<8x128xf32> to vector<1x32xf32>
    %cst_77 = arith.constant dense<0.000000e+00> : vector<128xf32>
    %272 = vector.multi_reduction <add>, %269, %cst_77 [1] : vector<128x32xf32> to vector<128xf32>
    %273 = vector.shape_cast %272 : vector<128xf32> to vector<128x1xf32>
    %cst_78 = arith.constant 3.200000e+01 : f32
    %274 = vector.broadcast %cst_78 : f32 to vector<128x1xf32>
    %275 = arith.divf %273, %274 : vector<128x1xf32>
    %276 = vector.broadcast %275 : vector<128x1xf32> to vector<128x32xf32>
    %277 = arith.subf %269, %276 : vector<128x32xf32>
    %278 = arith.mulf %277, %277 : vector<128x32xf32>
    %cst_79 = arith.constant dense<0.000000e+00> : vector<128xf32>
    %279 = vector.multi_reduction <add>, %278, %cst_79 [1] : vector<128x32xf32> to vector<128xf32>
    %280 = vector.shape_cast %279 : vector<128xf32> to vector<128x1xf32>
    %cst_80 = arith.constant 3.200000e+01 : f32
    %281 = vector.broadcast %cst_80 : f32 to vector<128x1xf32>
    %282 = arith.divf %280, %281 : vector<128x1xf32>
    %283 = vector.broadcast %275 : vector<128x1xf32> to vector<128x32xf32>
    %284 = arith.subf %269, %283 : vector<128x32xf32>
    %cst_81 = arith.constant 9.99999974E-6 : f32
    %285 = vector.broadcast %cst_81 : f32 to vector<128x1xf32>
    %286 = arith.addf %282, %285 : vector<128x1xf32>
    %287 = math.rsqrt %286 : vector<128x1xf32>
    %288 = vector.broadcast %287 : vector<128x1xf32> to vector<128x32xf32>
    %289 = arith.mulf %284, %288 : vector<128x32xf32>
    %290 = vector.broadcast %270 : vector<1x32xf32> to vector<128x32xf32>
    %291 = arith.mulf %289, %290 : vector<128x32xf32>
    %292 = vector.broadcast %271 : vector<1x32xf32> to vector<128x32xf32>
    %293 = arith.addf %291, %292 : vector<128x32xf32>
    %cst_82 = arith.constant 5.000000e-01 : f32
    %294 = vector.broadcast %cst_82 : f32 to vector<128x32xf32>
    %295 = arith.mulf %294, %293 : vector<128x32xf32>
    %cst_83 = arith.constant 0.707106769 : f32
    %296 = vector.broadcast %cst_83 : f32 to vector<128x32xf32>
    %297 = arith.mulf %293, %296 : vector<128x32xf32>
    %298 = math.erf %297 : vector<128x32xf32>
    %cst_84 = arith.constant 1.000000e+00 : f32
    %299 = vector.broadcast %cst_84 : f32 to vector<128x32xf32>
    %300 = arith.addf %299, %298 : vector<128x32xf32>
    %301 = arith.mulf %295, %300 : vector<128x32xf32>
    %302 = vector.extract_strided_slice %264 {offsets = [3, 0], sizes = [1, 32], strides = [1, 1]} : vector<8x128xf32> to vector<1x32xf32>
    %303 = vector.extract_strided_slice %264 {offsets = [4, 0], sizes = [1, 32], strides = [1, 1]} : vector<8x128xf32> to vector<1x32xf32>
    %cst_85 = arith.constant dense<0.000000e+00> : vector<128xf32>
    %304 = vector.multi_reduction <add>, %301, %cst_85 [1] : vector<128x32xf32> to vector<128xf32>
    %305 = vector.shape_cast %304 : vector<128xf32> to vector<128x1xf32>
    %cst_86 = arith.constant 3.200000e+01 : f32
    %306 = vector.broadcast %cst_86 : f32 to vector<128x1xf32>
    %307 = arith.divf %305, %306 : vector<128x1xf32>
    %308 = vector.broadcast %307 : vector<128x1xf32> to vector<128x32xf32>
    %309 = arith.subf %301, %308 : vector<128x32xf32>
    %310 = arith.mulf %309, %309 : vector<128x32xf32>
    %cst_87 = arith.constant dense<0.000000e+00> : vector<128xf32>
    %311 = vector.multi_reduction <add>, %310, %cst_87 [1] : vector<128x32xf32> to vector<128xf32>
    %312 = vector.shape_cast %311 : vector<128xf32> to vector<128x1xf32>
    %cst_88 = arith.constant 3.200000e+01 : f32
    %313 = vector.broadcast %cst_88 : f32 to vector<128x1xf32>
    %314 = arith.divf %312, %313 : vector<128x1xf32>
    %315 = vector.broadcast %307 : vector<128x1xf32> to vector<128x32xf32>
    %316 = arith.subf %301, %315 : vector<128x32xf32>
    %cst_89 = arith.constant 9.99999974E-6 : f32
    %317 = vector.broadcast %cst_89 : f32 to vector<128x1xf32>
    %318 = arith.addf %314, %317 : vector<128x1xf32>
    %319 = math.rsqrt %318 : vector<128x1xf32>
    %320 = vector.broadcast %319 : vector<128x1xf32> to vector<128x32xf32>
    %321 = arith.mulf %316, %320 : vector<128x32xf32>
    %322 = vector.broadcast %302 : vector<1x32xf32> to vector<128x32xf32>
    %323 = arith.mulf %321, %322 : vector<128x32xf32>
    %324 = vector.broadcast %303 : vector<1x32xf32> to vector<128x32xf32>
    %325 = arith.addf %323, %324 : vector<128x32xf32>
    %c0_90 = arith.constant 0 : index
    %c0_91 = arith.constant 0 : index
    %326 = vector.load %arg11[%c0_90, %c0_91] : memref<32x32xf32, #tpu.memory_space<vmem>>, vector<32x32xf32>
    %cst_92 = arith.constant dense<0.000000e+00> : vector<128x32xf32>
    %327 = tpu.matmul %325, %326, %cst_92 {dimension_numbers = #tpu.dot_dimension_numbers<[1], [0], [0], [1], [0, 0, 1, 1], [], []>} : vector<128x32xf32>, vector<32x32xf32>, vector<128x32xf32> -> vector<128x32xf32>
    %328 = vector.extract_strided_slice %264 {offsets = [5, 0], sizes = [1, 32], strides = [1, 1]} : vector<8x128xf32> to vector<1x32xf32>
    %329 = vector.broadcast %328 : vector<1x32xf32> to vector<128x32xf32>
    %330 = arith.addf %327, %329 : vector<128x32xf32>
    %c0_93 = arith.constant 0 : index
    %c0_94 = arith.constant 0 : index
    %331 = vector.load %arg12[%c0_93, %c0_94] : memref<32x64xf32, #tpu.memory_space<vmem>>, vector<32x64xf32>
    %cst_95 = arith.constant dense<0.000000e+00> : vector<128x64xf32>
    %332 = tpu.matmul %330, %331, %cst_95 {dimension_numbers = #tpu.dot_dimension_numbers<[1], [0], [0], [1], [0, 0, 1, 1], [], []>} : vector<128x32xf32>, vector<32x64xf32>, vector<128x64xf32> -> vector<128x64xf32>
    %333 = vector.extract_strided_slice %264 {offsets = [6, 0], sizes = [1, 64], strides = [1, 1]} : vector<8x128xf32> to vector<1x64xf32>
    %334 = vector.broadcast %333 : vector<1x64xf32> to vector<128x64xf32>
    %335 = arith.addf %332, %334 : vector<128x64xf32>
    %cst_96 = arith.constant 0.000000e+00 : f32
    %336 = vector.broadcast %cst_96 : f32 to vector<128x64xf32>
    %337 = arith.maximumf %335, %336 : vector<128x64xf32>
    %c0_97 = arith.constant 0 : index
    %c0_98 = arith.constant 0 : index
    %338 = vector.load %arg13[%c0_97, %c0_98] : memref<64x128xf32, #tpu.memory_space<vmem>>, vector<64x128xf32>
    %cst_99 = arith.constant dense<0.000000e+00> : vector<128x128xf32>
    %339 = tpu.matmul %337, %338, %cst_99 {dimension_numbers = #tpu.dot_dimension_numbers<[1], [0], [0], [1], [0, 0, 1, 1], [], []>} : vector<128x64xf32>, vector<64x128xf32>, vector<128x128xf32> -> vector<128x128xf32>
    %340 = vector.extract_strided_slice %264 {offsets = [7, 0], sizes = [1, 128], strides = [1, 1]} : vector<8x128xf32> to vector<1x128xf32>
    %341 = vector.broadcast %340 : vector<1x128xf32> to vector<128x128xf32>
    %342 = arith.addf %339, %341 : vector<128x128xf32>
    %c0_100 = arith.constant 0 : index
    %c0_101 = arith.constant 0 : index
    %343 = vector.load %arg15[%c0_100, %c0_101] : memref<128x128xf32, #tpu.memory_space<vmem>>, vector<128x128xf32>
    tpu.vector_store %arg15[%c0_100, %c0_101], %342 {strides = array<i32>} : memref<128x128xf32, #tpu.memory_space<vmem>>, vector<128x128xf32>,
    return
  }
  func.func @transform_0(%arg0: i32) -> (i32, i32) {
    %c0_i32 = arith.constant 0 : i32
    %c0_i32_0 = arith.constant 0 : i32
    return %arg0, %c0_i32 : i32, i32
  }
  func.func @transform_1(%arg0: i32) -> (i32, i32, i32) {
    %c0_i32 = arith.constant 0 : i32
    %c0_i32_0 = arith.constant 0 : i32
    %c0_i32_1 = arith.constant 0 : i32
    return %c0_i32, %arg0, %c0_i32_0 : i32, i32, i32
  }
  func.func @transform_2(%arg0: i32) -> (i32, i32) {
    %c0_i32 = arith.constant 0 : i32
    %c0_i32_0 = arith.constant 0 : i32
    return %arg0, %c0_i32 : i32, i32
  }
  func.func @transform_3(%arg0: i32) -> (i32, i32) {
    %c0_i32 = arith.constant 0 : i32
    %c0_i32_0 = arith.constant 0 : i32
    %c0_i32_1 = arith.constant 0 : i32
    return %c0_i32, %c0_i32_0 : i32, i32
  }
  func.func @transform_4(%arg0: i32) -> (i32, i32) {
    %c0_i32 = arith.constant 0 : i32
    %c0_i32_0 = arith.constant 0 : i32
    %c0_i32_1 = arith.constant 0 : i32
    return %c0_i32, %c0_i32_0 : i32, i32
  }
  func.func @transform_5(%arg0: i32) -> (i32, i32) {
    %c0_i32 = arith.constant 0 : i32
    %c0_i32_0 = arith.constant 0 : i32
    %c0_i32_1 = arith.constant 0 : i32
    return %c0_i32, %c0_i32_0 : i32, i32
  }
  func.func @transform_6(%arg0: i32) -> (i32, i32) {
    %c0_i32 = arith.constant 0 : i32
    %c0_i32_0 = arith.constant 0 : i32
    %c0_i32_1 = arith.constant 0 : i32
    return %c0_i32, %c0_i32_0 : i32, i32
  }
  func.func @transform_7(%arg0: i32) -> (i32, i32) {
    %c0_i32 = arith.constant 0 : i32
    %c0_i32_0 = arith.constant 0 : i32
    %c0_i32_1 = arith.constant 0 : i32
    return %c0_i32, %c0_i32_0 : i32, i32
  }
  func.func @transform_8(%arg0: i32) -> (i32, i32) {
    %c0_i32 = arith.constant 0 : i32
    %c0_i32_0 = arith.constant 0 : i32
    %c0_i32_1 = arith.constant 0 : i32
    return %c0_i32, %c0_i32_0 : i32, i32
  }
  func.func @transform_9(%arg0: i32) -> (i32, i32) {
    %c0_i32 = arith.constant 0 : i32
    %c0_i32_0 = arith.constant 0 : i32
    %c0_i32_1 = arith.constant 0 : i32
    return %c0_i32, %c0_i32_0 : i32, i32
  }
  func.func @transform_10(%arg0: i32) -> (i32, i32) {
    %c0_i32 = arith.constant 0 : i32
    %c0_i32_0 = arith.constant 0 : i32
    %c0_i32_1 = arith.constant 0 : i32
    return %c0_i32, %c0_i32_0 : i32, i32
  }
  func.func @transform_11(%arg0: i32) -> (i32, i32) {
    %c0_i32 = arith.constant 0 : i32
    %c0_i32_0 = arith.constant 0 : i32
    %c0_i32_1 = arith.constant 0 : i32
    return %c0_i32, %c0_i32_0 : i32, i32
  }
  func.func @transform_12(%arg0: i32) -> (i32, i32) {
    %c0_i32 = arith.constant 0 : i32
    %c0_i32_0 = arith.constant 0 : i32
    %c0_i32_1 = arith.constant 0 : i32
    return %c0_i32, %c0_i32_0 : i32, i32
  }
  func.func @transform_13(%arg0: i32) -> (i32, i32) {
    %c0_i32 = arith.constant 0 : i32
    %c0_i32_0 = arith.constant 0 : i32
    %c0_i32_1 = arith.constant 0 : i32
    return %c0_i32, %c0_i32_0 : i32, i32
  }
  func.func @transform_14(%arg0: i32) -> (i32, i32) {
    %c0_i32 = arith.constant 0 : i32
    %c0_i32_0 = arith.constant 0 : i32
    return %arg0, %c0_i32 : i32, i32
  }
}

</mosaic_0001>

<bundles_post_ra>
// kernel: graph_encoder_forward.1
= control target key start
LH: loop header
LB: loop body
LE: loop exit
PB: predicated region body
PF: predicated region fallthrough
CT: control target
= control target key end

     0   :  { %s16831_s29 = smov 0   ;;  %s16833_s30 = smov 0   ;;  %s21872_s0 = inlined_call_operand.vmem [shape: bf16[512,32], index: 0, kind: input, shape index: {}]   ;;  %s21873_s1 = inlined_call_operand.vmem [shape: bf16[8,512,32], index: 1, kind: input, shape index: {}]   ;;  %s21874_s2 = inlined_call_operand.vmem [shape: f32[512,32], index: 2, kind: input, shape index: {}]   ;;  %s21875_s3 = inlined_call_operand.vmem [shape: bf16[32,640], index: 3, kind: input, shape index: {}]   ;;  %s21876_s4 = inlined_call_operand.vmem [shape: f32[1,640], index: 4, kind: input, shape index: {}]   ;;  %s21877_s5 = inlined_call_operand.vmem [shape: bf16[32,128], index: 5, kind: input, shape index: {}]   ;;  %s21878_s6 = inlined_call_operand.vmem [shape: f32[128,4], index: 6, kind: input, shape index: {}]   ;;  %s21879_s7 = inlined_call_operand.vmem [shape: f32[4,128], index: 7, kind: input, shape index: {}]   ;;  %s21880_s8 = inlined_call_operand.vmem [shape: f32[128,1], index: 8, kind: input, shape index: {}]   ;;  %s21881_s9 = inlined_call_operand.vmem [shape: f32[128,32], index: 9, kind: input, shape index: {}]   ;;  %s21882_s10 = inlined_call_operand.vmem [shape: f32[32,32], index: 10, kind: input, shape index: {}]   ;;  %s21883_s11 = inlined_call_operand.vmem [shape: f32[32,64], index: 11, kind: input, shape index: {}]   ;;  %s21884_s12 = inlined_call_operand.vmem [shape: f32[64,128], index: 12, kind: input, shape index: {}]   ;;  %s21885_s13 = inlined_call_operand.vmem [shape: f32[8,128], index: 13, kind: input, shape index: {}]   ;;  %s21886_s14 = inlined_call_operand.vmem [shape: f32[512,128], index: 14, kind: output, shape index: {}]  }
   0x1   :  { %s16835_s15 = smov 0  }
   0x2 LB: > { %s12772_s16 = sadd.s32 4294967295, %s16746_s15   ;;  %s16848_s17 = sadd.s32 1, %s16746_s15   ;;  %s16746_s15 = sphi %s16835_s15, %s23219_s15   ;;  %s16742_s30 = sphi %s16833_s30, %s23218_s30   ;;  %s16738_s29 = sphi %s16831_s29, %s23217_s29  }
   0x3   : > { %s54_s18 = ssub.s32 %s16746_s15, %s16848_s17  ;;  %s57_s19 = sadd.s32 1, %s16742_s30 }
   0x4   : > { %p55_p0 = scmp.eq.s32.totalorder %s54_s18, 0  ;;  %p64_p1 = scmp.ne.s32.totalorder %s16742_s30, %s16738_s29 }
   0x5   : > { %p65_p2 = scmp.eq.s32.totalorder %s16746_s15, 0  ;;  %p12775_p4 = scmp.ge.s32.totalorder %s16746_s15, 4 }
   0x6   : > { %s16857_s20 = scalar_select %p55_p0, %s16742_s30, %s57_s19  }
   0x7   : > { %p66_p3 = por %p65_p2, %p64_p1  ;;  %406 = sbr.rel (%p12775_p4) target bundleno = 50 (0x32), region = 60 }
   0xe   : > { %418 = sbr.rel (!%p66_p3) target bundleno = 50 (0x32), region = 68  ;;  %s420_s21 = sand.u32 (%p66_p3), 1, %s16742_s30  }
   0xf   : > { %s13426_s22 = sshll.u32 (%p66_p3), %s16746_s15, 6  ;;  %s12776_s23 = sshll.u32 (%p66_p3), %s420_s21, 9 }
  0x10   : > { %s16865_s26 = scalar_lea.vmem (%p66_p3), %s21873_s1, %s13426_s22  ;;  %s16870_s27 = scalar_lea.vmem (%p66_p3), [#allocation2], %s12776_s23 }
  0x11   : > { %v441_v0 = vld [vmem:[%s16865_s26] sm:$0xff] (%p66_p3)   ;;  %v445_v1 = vld [vmem:[%s16865_s26 + $0x8] sm:$0xff] (%p66_p3)   ;;  %v449_v2 = vld [vmem:[%s16865_s26 + $0x10] sm:$0xff] (%p66_p3)  }
  0x12   : > { %442 = vst [vmem:[%s16870_s27] sm:$0xff] (%p66_p3), %v441_v0   ;;  %446 = vst [vmem:[%s16870_s27 + $0x8] sm:$0xff] (%p66_p3), %v445_v1   ;;  %v453_v3 = vld [vmem:[%s16865_s26 + $0x18] sm:$0xff] (%p66_p3)   ;;  %v457_v4 = vld [vmem:[%s16865_s26 + $0x20] sm:$0xff] (%p66_p3)  }
  0x13   : > { %450 = vst [vmem:[%s16870_s27 + $0x10] sm:$0xff] (%p66_p3), %v449_v2   ;;  %v461_v5 = vld [vmem:[%s16865_s26 + $0x28] sm:$0xff] (%p66_p3)   ;;  %454 = vst [vmem:[%s16870_s27 + $0x18] sm:$0xff] (%p66_p3), %v453_v3   ;;  %v465_v6 = vld [vmem:[%s16865_s26 + $0x30] sm:$0xff] (%p66_p3)  }
  0x14   : > { %458 = vst [vmem:[%s16870_s27 + $0x20] sm:$0xff] (%p66_p3), %v457_v4   ;;  %462 = vst [vmem:[%s16870_s27 + $0x28] sm:$0xff] (%p66_p3), %v461_v5   ;;  %v469_v7 = vld [vmem:[%s16865_s26 + $0x38] sm:$0xff] (%p66_p3)   ;;  %v473_v8 = vld [vmem:[%s16865_s26 + $0x100] sm:$0xff] (%p66_p3)  }
  0x15   : > { %466 = vst [vmem:[%s16870_s27 + $0x30] sm:$0xff] %v465_v6   ;;  %470 = vst [vmem:[%s16870_s27 + $0x38] sm:$0xff] %v469_v7   ;;  %v477_v9 = vld [vmem:[%s16865_s26 + $0x108] sm:$0xff]   ;;  %v481_v10 = vld [vmem:[%s16865_s26 + $0x110] sm:$0xff]  }
  0x16   : > { %474 = vst [vmem:[%s16870_s27 + $0x40] sm:$0xff] %v473_v8   ;;  %v485_v11 = vld [vmem:[%s16865_s26 + $0x118] sm:$0xff]   ;;  %478 = vst [vmem:[%s16870_s27 + $0x48] sm:$0xff] %v477_v9   ;;  %v489_v12 = vld [vmem:[%s16865_s26 + $0x120] sm:$0xff]  }
  0x17   : > { %482 = vst [vmem:[%s16870_s27 + $0x50] sm:$0xff] %v481_v10   ;;  %486 = vst [vmem:[%s16870_s27 + $0x58] sm:$0xff] %v485_v11   ;;  %v493_v13 = vld [vmem:[%s16865_s26 + $0x128] sm:$0xff]   ;;  %v497_v14 = vld [vmem:[%s16865_s26 + $0x130] sm:$0xff]  }
  0x18   : > { %490 = vst [vmem:[%s16870_s27 + $0x60] sm:$0xff] %v489_v12   ;;  %494 = vst [vmem:[%s16870_s27 + $0x68] sm:$0xff] %v493_v13   ;;  %v501_v15 = vld [vmem:[%s16865_s26 + $0x138] sm:$0xff]   ;;  %v505_v16 = vld [vmem:[%s16865_s26 + $0x200] sm:$0xff]  }
  0x19   : > { %498 = vst [vmem:[%s16870_s27 + $0x70] sm:$0xff] %v497_v14   ;;  %v509_v17 = vld [vmem:[%s16865_s26 + $0x208] sm:$0xff]   ;;  %502 = vst [vmem:[%s16870_s27 + $0x78] sm:$0xff] %v501_v15   ;;  %v513_v18 = vld [vmem:[%s16865_s26 + $0x210] sm:$0xff]  }
  0x1a   : > { %506 = vst [vmem:[%s16870_s27 + $0x80] sm:$0xff] %v505_v16   ;;  %510 = vst [vmem:[%s16870_s27 + $0x88] sm:$0xff] %v509_v17   ;;  %v517_v19 = vld [vmem:[%s16865_s26 + $0x218] sm:$0xff]   ;;  %v521_v20 = vld [vmem:[%s16865_s26 + $0x220] sm:$0xff]  }
  0x1b   : > { %514 = vst [vmem:[%s16870_s27 + $0x90] sm:$0xff] %v513_v18   ;;  %518 = vst [vmem:[%s16870_s27 + $0x98] sm:$0xff] %v517_v19   ;;  %v525_v21 = vld [vmem:[%s16865_s26 + $0x228] sm:$0xff]   ;;  %v529_v22 = vld [vmem:[%s16865_s26 + $0x230] sm:$0xff]  }
  0x1c   : > { %522 = vst [vmem:[%s16870_s27 + $0xa0] sm:$0xff] %v521_v20   ;;  %v533_v23 = vld [vmem:[%s16865_s26 + $0x238] sm:$0xff]   ;;  %526 = vst [vmem:[%s16870_s27 + $0xa8] sm:$0xff] %v525_v21   ;;  %v537_v24 = vld [vmem:[%s16865_s26 + $0x300] sm:$0xff]  }
  0x1d   : > { %530 = vst [vmem:[%s16870_s27 + $0xb0] sm:$0xff] %v529_v22   ;;  %534 = vst [vmem:[%s16870_s27 + $0xb8] sm:$0xff] %v533_v23   ;;  %v541_v25 = vld [vmem:[%s16865_s26 + $0x308] sm:$0xff]   ;;  %v545_v26 = vld [vmem:[%s16865_s26 + $0x310] sm:$0xff]  }
  0x1e   : > { %538 = vst [vmem:[%s16870_s27 + $0xc0] sm:$0xff] %v537_v24   ;;  %542 = vst [vmem:[%s16870_s27 + $0xc8] sm:$0xff] %v541_v25   ;;  %v549_v27 = vld [vmem:[%s16865_s26 + $0x318] sm:$0xff]   ;;  %v553_v28 = vld [vmem:[%s16865_s26 + $0x320] sm:$0xff]  }
  0x1f   : > { %546 = vst [vmem:[%s16870_s27 + $0xd0] sm:$0xff] %v545_v26   ;;  %v557_v29 = vld [vmem:[%s16865_s26 + $0x328] sm:$0xff]   ;;  %550 = vst [vmem:[%s16870_s27 + $0xd8] sm:$0xff] %v549_v27   ;;  %v561_v30 = vld [vmem:[%s16865_s26 + $0x330] sm:$0xff]  }
  0x20   : > { %554 = vst [vmem:[%s16870_s27 + $0xe0] sm:$0xff] %v553_v28   ;;  %558 = vst [vmem:[%s16870_s27 + $0xe8] sm:$0xff] %v557_v29   ;;  %v565_v31 = vld [vmem:[%s16865_s26 + $0x338] sm:$0xff]   ;;  %v569_v32 = vld [vmem:[%s16865_s26 + $0x400] sm:$0xff]  }
  0x21   : > { %562 = vst [vmem:[%s16870_s27 + $0xf0] sm:$0xff] %v561_v30   ;;  %566 = vst [vmem:[%s16870_s27 + $0xf8] sm:$0xff] %v565_v31   ;;  %v573_v33 = vld [vmem:[%s16865_s26 + $0x408] sm:$0xff]   ;;  %v577_v34 = vld [vmem:[%s16865_s26 + $0x410] sm:$0xff]  }
  0x22   : > { %570 = vst [vmem:[%s16870_s27 + $0x100] sm:$0xff] %v569_v32   ;;  %v581_v35 = vld [vmem:[%s16865_s26 + $0x418] sm:$0xff]   ;;  %574 = vst [vmem:[%s16870_s27 + $0x108] sm:$0xff] %v573_v33   ;;  %v585_v36 = vld [vmem:[%s16865_s26 + $0x420] sm:$0xff]  }
  0x23   : > { %578 = vst [vmem:[%s16870_s27 + $0x110] sm:$0xff] %v577_v34   ;;  %582 = vst [vmem:[%s16870_s27 + $0x118] sm:$0xff] %v581_v35   ;;  %v589_v37 = vld [vmem:[%s16865_s26 + $0x428] sm:$0xff]   ;;  %v593_v38 = vld [vmem:[%s16865_s26 + $0x430] sm:$0xff]  }
  0x24   : > { %586 = vst [vmem:[%s16870_s27 + $0x120] sm:$0xff] %v585_v36   ;;  %590 = vst [vmem:[%s16870_s27 + $0x128] sm:$0xff] %v589_v37   ;;  %v597_v39 = vld [vmem:[%s16865_s26 + $0x438] sm:$0xff]   ;;  %v601_v40 = vld [vmem:[%s16865_s26 + $0x500] sm:$0xff]  }
  0x25   : > { %594 = vst [vmem:[%s16870_s27 + $0x130] sm:$0xff] %v593_v38   ;;  %v605_v41 = vld [vmem:[%s16865_s26 + $0x508] sm:$0xff]   ;;  %598 = vst [vmem:[%s16870_s27 + $0x138] sm:$0xff] %v597_v39   ;;  %v609_v42 = vld [vmem:[%s16865_s26 + $0x510] sm:$0xff]  }
  0x26   : > { %602 = vst [vmem:[%s16870_s27 + $0x140] sm:$0xff] %v601_v40   ;;  %606 = vst [vmem:[%s16870_s27 + $0x148] sm:$0xff] %v605_v41   ;;  %v613_v43 = vld [vmem:[%s16865_s26 + $0x518] sm:$0xff]   ;;  %v617_v44 = vld [vmem:[%s16865_s26 + $0x520] sm:$0xff]  }
  0x27   : > { %610 = vst [vmem:[%s16870_s27 + $0x150] sm:$0xff] %v609_v42   ;;  %614 = vst [vmem:[%s16870_s27 + $0x158] sm:$0xff] %v613_v43   ;;  %v621_v45 = vld [vmem:[%s16865_s26 + $0x528] sm:$0xff]   ;;  %v625_v46 = vld [vmem:[%s16865_s26 + $0x530] sm:$0xff]  }
  0x28   : > { %618 = vst [vmem:[%s16870_s27 + $0x160] sm:$0xff] %v617_v44   ;;  %v629_v47 = vld [vmem:[%s16865_s26 + $0x538] sm:$0xff]   ;;  %622 = vst [vmem:[%s16870_s27 + $0x168] sm:$0xff] %v621_v45   ;;  %v633_v48 = vld [vmem:[%s16865_s26 + $0x600] sm:$0xff]  }
  0x29   : > { %626 = vst [vmem:[%s16870_s27 + $0x170] sm:$0xff] %v625_v46   ;;  %630 = vst [vmem:[%s16870_s27 + $0x178] sm:$0xff] %v629_v47   ;;  %v637_v49 = vld [vmem:[%s16865_s26 + $0x608] sm:$0xff]   ;;  %v641_v50 = vld [vmem:[%s16865_s26 + $0x610] sm:$0xff]  }
  0x2a   : > { %634 = vst [vmem:[%s16870_s27 + $0x180] sm:$0xff] %v633_v48   ;;  %638 = vst [vmem:[%s16870_s27 + $0x188] sm:$0xff] %v637_v49   ;;  %v645_v51 = vld [vmem:[%s16865_s26 + $0x618] sm:$0xff]   ;;  %v649_v52 = vld [vmem:[%s16865_s26 + $0x620] sm:$0xff]  }
  0x2b   : > { %642 = vst [vmem:[%s16870_s27 + $0x190] sm:$0xff] %v641_v50   ;;  %v653_v53 = vld [vmem:[%s16865_s26 + $0x628] sm:$0xff]   ;;  %646 = vst [vmem:[%s16870_s27 + $0x198] sm:$0xff] %v645_v51   ;;  %v657_v54 = vld [vmem:[%s16865_s26 + $0x630] sm:$0xff]  }
  0x2c   : > { %650 = vst [vmem:[%s16870_s27 + $0x1a0] sm:$0xff] %v649_v52   ;;  %654 = vst [vmem:[%s16870_s27 + $0x1a8] sm:$0xff] %v653_v53   ;;  %v661_v55 = vld [vmem:[%s16865_s26 + $0x638] sm:$0xff]   ;;  %v665_v56 = vld [vmem:[%s16865_s26 + $0x700] sm:$0xff]  }
  0x2d   : > { %658 = vst [vmem:[%s16870_s27 + $0x1b0] sm:$0xff] %v657_v54   ;;  %662 = vst [vmem:[%s16870_s27 + $0x1b8] sm:$0xff] %v661_v55   ;;  %v669_v57 = vld [vmem:[%s16865_s26 + $0x708] sm:$0xff]   ;;  %v673_v58 = vld [vmem:[%s16865_s26 + $0x710] sm:$0xff]  }
  0x2e   : > { %666 = vst [vmem:[%s16870_s27 + $0x1c0] sm:$0xff] %v665_v56   ;;  %v677_v59 = vld [vmem:[%s16865_s26 + $0x718] sm:$0xff]   ;;  %670 = vst [vmem:[%s16870_s27 + $0x1c8] sm:$0xff] %v669_v57   ;;  %v681_v60 = vld [vmem:[%s16865_s26 + $0x720] sm:$0xff]  }
  0x2f   : > { %674 = vst [vmem:[%s16870_s27 + $0x1d0] sm:$0xff] %v673_v58   ;;  %678 = vst [vmem:[%s16870_s27 + $0x1d8] sm:$0xff] %v677_v59   ;;  %v685_v61 = vld [vmem:[%s16865_s26 + $0x728] sm:$0xff]   ;;  %v689_v62 = vld [vmem:[%s16865_s26 + $0x730] sm:$0xff]  }
  0x30   : > { %682 = vst [vmem:[%s16870_s27 + $0x1e0] sm:$0xff] %v681_v60   ;;  %686 = vst [vmem:[%s16870_s27 + $0x1e8] sm:$0xff] %v685_v61   ;;  %v693_v63 = vld [vmem:[%s16865_s26 + $0x738] sm:$0xff]  }
  0x31   : > { %690 = vst [vmem:[%s16870_s27 + $0x1f0] sm:$0xff] %v689_v62   ;;  %694 = vst [vmem:[%s16870_s27 + $0x1f8] sm:$0xff] %v693_v63  }
  0x32 PF: > { %p12779_p5 = scmp.ge.s32.totalorder %s16746_s15, 1  ;;  %p983_p6 = scmp.lt.s32.totalorder %s16746_s15, 5 }
  0x34   : > { %p984_p7 = pnand %p12779_p5, %p983_p6 }
  0x36   : > { %987 = sbr.rel (%p984_p7) target bundleno = 6241 (0x1861), region = 113 }
  0x3d   : > { %v15866_v0 = vld [vmem:[%s21875_s3 + $0x4] ss:$20 sps:$4 sm:$0xff]   ;;  %s12781_s19 = sshll.u32 %s12772_s16, 4  ;;  %v15868_v1 = vld [vmem:[%s21875_s3] ss:$20 sps:$4 sm:$0xff]   ;;  %v16748_v2 = vmov 0  }
  0x3e   : > { %1329 = vmatprep.mubr.bf16.mxu1 %v16748_v2  ;;  %p1046_p8 = scmp.lt.s32.totalorder %s12781_s19, 63  ;;  %1269 = vmatprep.mubr.bf16.mxu0 %v16748_v2  ;;  %v15869_v3 = vld [vmem:[%s21875_s3 + $0x2c] ss:$20 sps:$4 sm:$0xff]   ;;  %v15871_v4 = vld [vmem:[%s21875_s3 + $0x28] ss:$20 sps:$4 sm:$0xff]   ;;  %vm1212_vm0 = vcmask 261120  }
  0x3f   : > { %15828 = vmatprep.subr.bf16.mxu1 %v15866_v0  ;;  %1237 = vmatprep.subr.bf16.mxu0 %v15866_v0  ;;  %v15875_v5 = vld [vmem:[%s21875_s3 + $0xc] ss:$20 sps:$4 sm:$0xff]   ;;  %v15873_v6 = vld [vmem:[%s21875_s3 + $0x8] ss:$20 sps:$4 sm:$0xff]   ;;  %s990_s24 = sand.u32 1, %s16738_s29   ;;  %v1566_v32 = vld [vmem:[%s21878_s6 + $0x10] sm:$0xff] }
  0x40   : > { %15830 = vmatpush1.bf16.msra.mxu1 %v15868_v1  ;;  %s23221_s19 = smov (!%p1046_p8, %s12781_s19), 63  ;;  %1238 = vmatpush1.bf16.msra.mxu0 %v15868_v1  ;;  %v15879_v8 = vld [vmem:[%s21875_s3 + $0x34] ss:$20 sps:$4 sm:$0xff]   ;;  %v15877_v9 = vld [vmem:[%s21875_s3 + $0x30] ss:$20 sps:$4 sm:$0xff]   ;;  %v1567_v33 = vld [vmem:[%s21878_s6 + $0x18] sm:$0xff] }
  0x41   : > { %15829 = vmatprep.subr.bf16.mxu1 %v15869_v3  ;;  %1239 = vmatprep.subr.bf16.mxu0 %v15869_v3  ;;  %s12782_s27 = sshll.u32 %s23221_s19, 2  ;;  %v17048_v11 = vld [vmem:[%s21877_s5] sm:$0xff]   ;;  %v15886_v14 = vld [vmem:[%s21877_s5 + $0x8] sm:$0xff]   ;;  %v17142_v34 = vpack.c.bf16 %v1567_v33, %v1566_v32  ;;  %v1570_v38 = vld [vmem:[%s21878_s6 + $0x30] sm:$0xff]  ;;  %vm2300_vm1 = vcmask 1043456   ;;  %s12784_s29 = sshll.u32 %s23221_s19, 3 }
  0x42   : > { %15864 = vset.pattern.permute.xlu1 %v16748_v2  ;;  %15865 = vset.pattern.permute.xlu0 %v16748_v2  ;;  %s17026_s21 = scalar_lea.vmem %s21872_s0, %s12782_s27  ;;  %s12780_s27 = sshll.u32 %s990_s24, 9  ;;  %v15896_v25 = vld [vmem:[%s21875_s3 + $0x10] ss:$20 sps:$4 sm:$0xff]   ;;  %v15897_v28 = vld [vmem:[%s21875_s3 + $0x38] ss:$20 sps:$4 sm:$0xff]   ;;  %vm2251_vm2 = vcmask 31744  }
  0x43   : > { %v17032_v7 = vld [vmem:[%s17026_s21 + $0x30] sm:$0xff]   ;;  %v15880_v10 = vld [vmem:[%s17026_s21] sm:$0xff]   ;;  %v17053_v12 = vld [vmem:[%s17026_s21 + $0x38] sm:$0xff]   ;;  %s17055_s18 = scalar_lea.vmem [#allocation2], %s12780_s27  ;;  %22157 = vst [vmem:[#allocation4_spill] sm:$0xff] %v17142_v34  ;;  %s17707_s23 = scalar_lea.vmem %s21874_s2, %s12784_s29  ;;  %vm12476_vm3 = vcmask 523264  }
  0x44   : > { %15831 = vmatpush1.bf16.msra.mxu1 %v15871_v4  ;;  %1240 = vmatpush1.bf16.msra.mxu0 %v15871_v4  ;;  %v15882_v13 = vld [vmem:[%s17026_s21 + $0x8] sm:$0xff]   ;;  %v15883_v15 = vld [vmem:[%s17026_s21 + $0x10] sm:$0xff]   ;;  %v15884_v16 = vld [vmem:[%s17026_s21 + $0x18] sm:$0xff]   ;;  %s16749_s27 = smov 124   ;;  %s16750_s25 = smov 120  }
  0x45   : > { %1350 = vmatprep.subr.bf16.mxu1 %v15875_v5  ;;  %v15885_v17 = vld [vmem:[%s17026_s21 + $0x20] sm:$0xff]   ;;  %v15887_v18 = vld [vmem:[%s17026_s21 + $0x28] sm:$0xff]   ;;  %v15890_v21 = vld [vmem:[%s17055_s18 + $0x10] sm:$0xff]   ;;  %14190 = vmatprep.subr.bf16.mxu0 %v15896_v25  ;;  %s16751_s28 = smov 116   ;;  %s16752_s15 = smov 112  }
  0x46   : > { %v15888_v19 = vld [vmem:[%s17055_s18] sm:$0xff]   ;;  %v15889_v20 = vld [vmem:[%s17055_s18 + $0x8] sm:$0xff]   ;;  %v15891_v22 = vld [vmem:[%s17055_s18 + $0x18] sm:$0xff]   ;;  %s16753_s24 = smov 108   ;;  %s16754_s16 = smov 104  }
  0x47   : > { %12811 = vmatmul.mubr.msk.bf16.vlgmr.msra.gmra.mrb[0].mxu1 %vm1212_vm0, %v17032_v7  ;;  %12805 = vmatmul.mubr.msk.bf16.vlgmr.msra.gmra.mrb[0].mxu0 %vm1212_vm0, %v15880_v10  ;;  %v15892_v23 = vld [vmem:[%s17055_s18 + $0x20] sm:$0xff]   ;;  %v15893_v24 = vld [vmem:[%s17055_s18 + $0x28] sm:$0xff]   ;;  %v15894_v26 = vld [vmem:[%s17055_s18 + $0x30] sm:$0xff]   ;;  %s16755_s22 = smov 100   ;;  %s21844_s26 = scalar_lea.vmem %s21886_s14, %s12784_s29 }
  0x48   : > { %1351 = vmatpush1.bf16.msra.mxu1 %v15873_v6  ;;  %1339 = vmatprep.mubr.bf16.mxu1 %v16748_v2  ;;  %v15895_v27 = vld [vmem:[%s17055_s18 + $0x38] sm:$0xff]   ;;  %v1564_v29 = vld [vmem:[%s21878_s6] sm:$0xff]  ;;  %v1565_v30 = vld [vmem:[%s21878_s6 + $0x8] sm:$0xff] }
  0x49   : > { %1352 = vmatprep.subr.bf16.mxu1 %v15879_v8  ;;  %1279 = vmatprep.mubr.bf16.mxu0 %v16748_v2  ;;  %v17129_v31 = vpack.c.bf16 %v1565_v30, %v1564_v29  ;;  %v1568_v35 = vld [vmem:[%s21878_s6 + $0x20] sm:$0xff]  ;;  %v1569_v36 = vld [vmem:[%s21878_s6 + $0x28] sm:$0xff]  ;;  %v1571_v39 = vld [vmem:[%s21878_s6 + $0x38] sm:$0xff] }
  0x4a   : > { %14191 = vmatpush3.bf16.msra.mxu0 %v15896_v25  ;;  %v17152_v37 = vpack.c.bf16 %v1569_v36, %v1568_v35  ;;  %v17164_v40 = vpack.c.bf16 %v1571_v39, %v1570_v38  ;;  %v1572_v41 = vld [vmem:[%s21878_s6 + $0x40] sm:$0xff]  ;;  %v1573_v42 = vld [vmem:[%s21878_s6 + $0x48] sm:$0xff]  ;;  %v1574_v44 = vld [vmem:[%s21878_s6 + $0x50] sm:$0xff] }
  0x4b   : > { %14192 = vmatprep.subr.bf16.mxu0 %v15897_v28  ;;  %22156 = vst [vmem:[#allocation3_spill] sm:$0xff] %v17129_v31  ;;  %v17174_v43 = vpack.c.bf16 %v1573_v42, %v1572_v41  ;;  %v1575_v45 = vld [vmem:[%s21878_s6 + $0x58] sm:$0xff]  ;;  %v1576_v47 = vld [vmem:[%s21878_s6 + $0x60] sm:$0xff]  ;;  %v1577_v48 = vld [vmem:[%s21878_s6 + $0x68] sm:$0xff] }
  0x4c   : > { %1353 = vmatpush1.bf16.msra.mxu1 %v15877_v9  ;;  %22158 = vst [vmem:[#allocation5_spill] sm:$0xff] %v17152_v37  ;;  %22159 = vst [vmem:[#allocation6_spill] sm:$0xff] %v17164_v40  ;;  %v17184_v46 = vpack.c.bf16 %v1575_v45, %v1574_v44  ;;  %v17194_v49 = vpack.c.bf16 %v1577_v48, %v1576_v47  ;;  %v1578_v50 = vld [vmem:[%s21878_s6 + $0x70] sm:$0xff]  ;;  %v1579_v51 = vld [vmem:[%s21878_s6 + $0x78] sm:$0xff] }
  0x4d   : > { %14210 = vmatprep.subr.bf16.mxu1 %v17048_v11  ;;  %22160 = vst [vmem:[#allocation7_spill] sm:$0xff] %v17174_v43  ;;  %v17204_v52 = vpack.c.bf16 %v1579_v51, %v1578_v50  ;;  %v17251_v9 = vld [vmem:[%s21879_s7] sm:$0xf] }
  0x4e   : > { %14193 = vmatpush3.bf16.msra.mxu0 %v15897_v28  ;;  %22161 = vst [vmem:[#allocation8_spill] sm:$0xff] %v17184_v46  ;;  %22162 = vst [vmem:[#allocation9_spill] sm:$0xff] %v17194_v49 }
  0x4f   : > { %12812 = vmatmul.mubr.msk.bf16.gmra.mrb[4].mxu1 %vm1212_vm0, %v17053_v12  ;;  %12806 = vmatmul.mubr.msk.bf16.gmra.mrb[4].mxu0 %vm1212_vm0, %v15882_v13  ;;  %22163 = vst [vmem:[#allocation10_spill] sm:$0xff] %v17204_v52 }
  0x50   : > { %1382 = vmatprep.mubr.bf16.mxu1 %v16748_v2  ;;  %1289 = vmatprep.mubr.bf16.mxu0 %v16748_v2 }
  0x51   : > { %15477 = vmatprep.subr.bf16.mxu0 %v17129_v31 }
  0x57   : > { %12813 = vmatmul.mubr.msk.bf16.vlgmr.msra.gmra.mrb[8].mxu1 %vm1212_vm0, %v15880_v10  ;;  %12807 = vmatmul.mubr.msk.bf16.gmra.mrb[8].mxu0 %vm1212_vm0, %v15883_v15 }
  0x58   : > { %14211 = vmatpush3.bf16.msra.mxu1 %v17048_v11  ;;  %1392 = vmatprep.mubr.bf16.mxu1 %v16748_v2 }
  0x59   : > { %14212 = vmatprep.subr.bf16.mxu1 %v15886_v14  ;;  %1299 = vmatprep.mubr.bf16.mxu0 %v16748_v2 }
  0x5c   : > { %14213 = vmatpush3.bf16.msra.mxu1 %v15886_v14 }
  0x5d   : > { %14286 = vmatprep.subr.msk.mxu1 %vm2300_vm1, %v17251_v9 }
  0x5f   : > { %12814 = vmatmul.mubr.msk.bf16.gmra.mrb[12].mxu1 %vm1212_vm0, %v15882_v13  ;;  %12808 = vmatmul.mubr.msk.bf16.gmra.mrb[12].mxu0 %vm1212_vm0, %v15884_v16 }
  0x60   : > { %1402 = vmatprep.mubr.bf16.mxu1 %v16748_v2  ;;  %1309 = vmatprep.mubr.bf16.mxu0 %v16748_v2 }
  0x67   : > { %12815 = vmatmul.mubr.msk.bf16.gmra.mrb[16].mxu1 %vm1212_vm0, %v15883_v15  ;;  %12809 = vmatmul.mubr.msk.bf16.gmra.mrb[16].mxu0 %vm1212_vm0, %v15885_v17 }
  0x68   : > { %1412 = vmatprep.mubr.bf16.mxu1 %v16748_v2  ;;  %1319 = vmatprep.mubr.bf16.mxu0 %v16748_v2 }
  0x6f   : > { %12816 = vmatmul.mubr.msk.bf16.gmra.mrb[20].mxu1 %vm1212_vm0, %v15884_v16  ;;  %12810 = vmatmul.mubr.msk.bf16.gmra.mrb[20].mxu0 %vm1212_vm0, %v15887_v18 }
  0x70   : > { %1422 = vmatprep.mubr.bf16.mxu1 %v16748_v2  ;;  %14194 = vmatprep.mubr.msk.bf16.mxu0 %vm1212_vm0, %v15880_v10 }
  0x77   : > { %12817 = vmatmul.mubr.msk.bf16.gmra.mrb[24].mxu1 %vm1212_vm0, %v15885_v17  ;;  %14195 = vmatmul.mubr.msk.bf16.vlgmr.msra.gmra.mrb[24].mxu0 %vm1212_vm0, %v15882_v13 }
  0x78   : > { %1432 = vmatprep.mubr.bf16.mxu1 %v16748_v2  ;;  %14198 = vmatprep.mubr.msk.bf16.mxu0 %vm1212_vm0, %v15883_v15 }
  0x79   : > { %15479 = vmatpush3.bf16.msra.mxu0 %v17129_v31 }
  0x7a   : > { %15481 = vmatprep.subr.bf16.mxu0 %v17142_v34 }
  0x7d   : > { %15483 = vmatpush3.bf16.msra.mxu0 %v17142_v34 }
  0x7e   : > { %15485 = vmatprep.subr.bf16.mxu0 %v17152_v37 }
  0x7f   : > { %12818 = vmatmul.mubr.msk.bf16.gmra.mrb[28].mxu1 %vm1212_vm0, %v15887_v18  ;;  %14199 = vmatmul.mubr.msk.bf16.gmra.mrb[28].mxu0 %vm1212_vm0, %v15884_v16 }
  0x80   : > { %1442 = vmatprep.mubr.bf16.mxu1 %v16748_v2  ;;  %14202 = vmatprep.mubr.msk.bf16.mxu0 %vm1212_vm0, %v15885_v17 }
  0x81   : > { %15487 = vmatpush3.bf16.msra.mxu0 %v17152_v37 }
  0x82   : > { %15489 = vmatprep.subr.bf16.mxu0 %v17164_v40 }
  0x85   : > { %15491 = vmatpush3.bf16.msra.mxu0 %v17164_v40 }
  0x86   : > { %15493 = vmatprep.subr.bf16.mxu0 %v17174_v43 }
  0x87   : > { %12819 = vmatmul.mubr.msk.bf16.gmra.mrb[32].mxu1 %vm1212_vm0, %v17032_v7  ;;  %14203 = vmatmul.mubr.msk.bf16.gmra.mrb[32].mxu0 %vm1212_vm0, %v15887_v18 }
  0x88   : > { %1452 = vmatprep.mubr.bf16.mxu1 %v16748_v2  ;;  %14206 = vmatprep.mubr.msk.bf16.mxu0 %vm1212_vm0, %v17032_v7 }
  0x89   : > { %15495 = vmatpush3.bf16.msra.mxu0 %v17174_v43 }
  0x8a   : > { %15497 = vmatprep.subr.bf16.mxu0 %v17184_v46 }
  0x8d   : > { %15499 = vmatpush3.bf16.msra.mxu0 %v17184_v46 }
  0x8e   : > { %15501 = vmatprep.subr.bf16.mxu0 %v17194_v49 }
  0x8f   : > { %12820 = vmatmul.mubr.msk.bf16.gmra.mrb[36].mxu1 %vm1212_vm0, %v17053_v12  ;;  %14207 = vmatmul.mubr.msk.bf16.gmra.mrb[36].mxu0 %vm1212_vm0, %v17053_v12 }
  0x90   : > { %14214 = vmatprep.mubr.msk.bf16.mxu1 %vm1212_vm0, %v15888_v19 }
  0x91   : > { %15503 = vmatpush3.bf16.msra.mxu0 %v17194_v49 }
  0x92   : > { %15505 = vmatprep.subr.bf16.mxu0 %v17204_v52 }
  0x95   : > { %15507 = vmatpush3.bf16.msra.mxu0 %v17204_v52 }
  0x96   : > { %14312 = vmatprep.subr.msk.mxu0 %vm2300_vm1, %v17251_v9 }
  0x97   : > { %14215 = vmatmul.mubr.msk.bf16.vlgmr.msra.gmra.mrb[40].mxu1 %vm1212_vm0, %v15889_v20 }
  0x98   : > { %14218 = vmatprep.mubr.msk.bf16.mxu1 %vm1212_vm0, %v15890_v21  ;;  %14287 = vmatpush3.msk.msra.mxu1 %vm2300_vm1, %v17251_v9 }
  0x99   : > { %14338 = vmatprep.subr.bf16.mxu1 %v17048_v11 }
  0x9f   : > { %14219 = vmatmul.mubr.msk.bf16.gmra.mrb[44].mxu1 %vm1212_vm0, %v15891_v22 }
  0xa0   : > { %14222 = vmatprep.mubr.msk.bf16.mxu1 %vm1212_vm0, %v15892_v23 }
  0xa7   : > { %14223 = vmatmul.mubr.msk.bf16.gmra.mrb[48].mxu1 %vm1212_vm0, %v15893_v24 }
  0xa8   : > { %14226 = vmatprep.mubr.msk.bf16.mxu1 %vm1212_vm0, %v15894_v26 }
  0xaf   : > { %14227 = vmatmul.mubr.msk.bf16.gmra.mrb[52].mxu1 %vm1212_vm0, %v15895_v27 }
 0x11a   : > { %v17208_v53 = vpop.f32.mrb[0].mxu1  ;;  %v17214_v56 = vpop.f32.mrb[0].mxu0 }
 0x11b   : > { %v17210_v54 = vpop.f32.mrb[1].mxu1  ;;  %v17218_v58 = vpop.f32.mrb[1].mxu0 }
 0x11c   : > { %v17212_v55 = vpop.f32.mrb[2].mxu1  ;;  %v17220_v59 = vpop.f32.mrb[2].mxu0 }
 0x11d   : > { %v17216_v57 = vpop.f32.mrb[3].mxu1  ;;  %v17222_v60 = vpop.f32.mrb[3].mxu0 }
 0x122   : > { %v17224_v61 = vpop.f32.mrb[4].mxu1  ;;  %v17230_v0 = vpop.f32.mrb[4].mxu0 }
 0x123   : > { %v17226_v62 = vpop.f32.mrb[5].mxu1  ;;  %v17234_v2 = vpop.f32.mrb[5].mxu0 }
 0x124   : > { %v17228_v63 = vpop.f32.mrb[6].mxu1  ;;  %v17236_v3 = vpop.f32.mrb[6].mxu0 }
 0x125   : > { %22164 = vst [vmem:[#allocation11_spill] sm:$0xff] %v17228_v63  ;;  %v17232_v1 = vpop.f32.mrb[7].mxu1  ;;  %v17238_v4 = vpop.f32.mrb[7].mxu0 }
 0x12a   : > { %v17240_v5 = vpop.f32.mrb[8].mxu1  ;;  %v17246_v8 = vpop.f32.mrb[8].mxu0 }
 0x12b   : > { %v17242_v6 = vpop.f32.mrb[9].mxu1  ;;  %v17255_v12 = vpop.f32.mrb[9].mxu0 }
 0x12c   : > { %22165 = vst [vmem:[#allocation12_spill] sm:$0xff] %v17242_v6  ;;  %v17244_v7 = vpop.f32.mrb[10].mxu1  ;;  %v17261_v13 = vpop.f32.mrb[10].mxu0 }
 0x12d   : > { %v17253_v10 = vpop.f32.mrb[11].mxu1  ;;  %v17265_v14 = vpop.f32.mrb[11].mxu0 }
 0x12e   : > { %22166 = vst [vmem:[#allocation13_spill] sm:$0xff] %v17253_v10 }
 0x132   : > { %v1394_v15 = vpop.f32.mrb[12].mxu1  ;;  %v17270_v18 = vpop.f32.mrb[12].mxu0 }
 0x133   : > { %v17268_v16 = vpop.f32.mrb[13].mxu1  ;;  %v17274_v20 = vpop.f32.mrb[13].mxu0 }
 0x134   : > { %22167 = vst [vmem:[#allocation14_spill] sm:$0xff] %v17268_v16  ;;  %v1398_v17 = vpop.f32.mrb[14].mxu1  ;;  %v17276_v21 = vpop.f32.mrb[14].mxu0 }
 0x135   : > { %v17272_v19 = vpop.f32.mrb[15].mxu1  ;;  %v17278_v22 = vpop.f32.mrb[15].mxu0 }
 0x136   : > { %22168 = vst [vmem:[#allocation15_spill] sm:$0xff] %v17272_v19 }
 0x13a   : > { %v17280_v23 = vpop.f32.mrb[16].mxu1  ;;  %v17286_v11 = vpop.f32.mrb[16].mxu0 }
 0x13b   : > { %v17282_v24 = vpop.f32.mrb[17].mxu1  ;;  %v17290_v27 = vpop.f32.mrb[17].mxu0 }
 0x13c   : > { %22169 = vst [vmem:[#allocation16_spill] sm:$0xff] %v17282_v24  ;;  %v17284_v25 = vpop.f32.mrb[18].mxu1  ;;  %v17292_v28 = vpop.f32.mrb[18].mxu0 }
 0x13d   : > { %v17288_v26 = vpop.f32.mrb[19].mxu1  ;;  %v17294_v29 = vpop.f32.mrb[19].mxu0 }
 0x13e   : > { %22170 = vst [vmem:[#allocation17_spill] sm:$0xff] %v17288_v26 }
 0x142   : > { %v1414_v30 = vpop.f32.mrb[20].mxu1  ;;  %v17300_v35 = vpop.f32.mrb[20].mxu0 }
 0x143   : > { %v17296_v32 = vpop.f32.mrb[21].mxu1  ;;  %v17304_v38 = vpop.f32.mrb[21].mxu0 }
 0x144   : > { %22171 = vst [vmem:[#allocation18_spill] sm:$0xff] %v17296_v32  ;;  %v17298_v33 = vpop.f32.mrb[22].mxu1  ;;  %v17306_v39 = vpop.f32.mrb[22].mxu0 }
 0x145   : > { %v17302_v36 = vpop.f32.mrb[23].mxu1  ;;  %v17308_v41 = vpop.f32.mrb[23].mxu0 }
 0x146   : > { %22172 = vst [vmem:[#allocation19_spill] sm:$0xff] %v17302_v36  ;;  %v1095_v36 = vlaneseq }
 0x148   : > { %v17328_v26 = vshrl.u32 %v1095_v36, 7 }
 0x14a   : > { %v17310_v42 = vpop.f32.mrb[24].mxu1  ;;  %22177 = vst [vmem:[#allocation24_spill] sm:$0xff] %v17328_v26  ;;  %v17346_v10 = vsub.s32 0, %v17328_v26 }
 0x14b   : > { %v17312_v44 = vpop.f32.mrb[25].mxu1 }
 0x14c   : > { %22173 = vst [vmem:[#allocation20_spill] sm:$0xff] %v17312_v44  ;;  %v17314_v45 = vpop.f32.mrb[26].mxu1  ;;  %22182 = vst [vmem:[#allocation29_spill] sm:$0xff] %v17346_v10 }
 0x14d   : > { %v17316_v47 = vpop.f32.mrb[27].mxu1 }
 0x14e   : > { %22174 = vst [vmem:[#allocation21_spill] sm:$0xff] %v17316_v47  ;;  %v17337_v47 = vsub.s32 1, %v17328_v26 }
 0x150   : > { %22180 = vst [vmem:[#allocation27_spill] sm:$0xff] %v17337_v47 }
 0x152   : > { %v17318_v48 = vpop.f32.mrb[28].mxu1 }
 0x153   : > { %v17320_v50 = vpop.f32.mrb[29].mxu1 }
 0x154   : > { %22175 = vst [vmem:[#allocation22_spill] sm:$0xff] %v17320_v50  ;;  %v17322_v51 = vpop.f32.mrb[30].mxu1  ;;  %v1093_v50 = vld [vmem:[%s21876_s4] sm:$0x1f] }
 0x155   : > { %v17324_v32 = vpop.f32.mrb[31].mxu1 }
 0x156   : > { %22176 = vst [vmem:[#allocation23_spill] sm:$0xff] %v17324_v32  ;;  %v17343_v32 = vsub.s32 2, %v17328_v26 }
 0x158   : > { %22181 = vst [vmem:[#allocation28_spill] sm:$0xff] %v17343_v32  ;;  %v17349_v36 = vrot.slane %v1093_v50, %v17343_v32 }
 0x15a   : > { %v17326_v24 = vpop.f32.mrb[32].mxu1  ;;  %v17361_v49 = vadd.f32 %v1394_v15, %v17349_v36  ;;  %v17440_v63 = vadd.f32 %v1414_v30, %v17349_v36 }
 0x15b   : > { %v17330_v16 = vpop.f32.mrb[33].mxu1 }
 0x15c   : > { %22178 = vst [vmem:[#allocation25_spill] sm:$0xff] %v17330_v16  ;;  %v17332_v44 = vpop.f32.mrb[34].mxu1  ;;  %22184 = vst [vmem:[#allocation31_spill] sm:$0xff] %v17361_v49 }
 0x15d   : > { %v17334_v19 = vpop.f32.mrb[35].mxu1  ;;  %22199 = vst [vmem:[#allocation46_spill] sm:$0xff] %v17440_v63 }
 0x15e   : > { %22179 = vst [vmem:[#allocation26_spill] sm:$0xff] %v17334_v19  ;;  %v17354_v19 = vrot.slane %v1093_v50, %v17337_v47  ;;  %v17374_v47 = vrot.slane %v1093_v50, %v17346_v10 }
 0x160   : > { %v17365_v46 = vadd.f32 %v17218_v58, %v17354_v19  ;;  %v17369_v26 = vadd.f32 %v17234_v2, %v17354_v19  ;;  %v17382_v15 = vadd.f32 %v17222_v60, %v17354_v19  ;;  %v17386_v58 = vadd.f32 %v17238_v4, %v17354_v19 }
 0x161   : > { %v17390_v2 = vadd.f32 %v17244_v7, %v17349_v36  ;;  %v17397_v50 = vadd.f32 %v17210_v54, %v17354_v19  ;;  %v17405_v60 = vadd.f32 %v17220_v59, %v17374_v47  ;;  %v17415_v54 = vadd.f32 %v17255_v12, %v17354_v19 }
 0x162   : > { %v17351_v16 = vpop.f32.mrb[36].mxu1  ;;  %22185 = vst [vmem:[#allocation32_spill] sm:$0xff] %v17365_v46  ;;  %22186 = vst [vmem:[#allocation33_spill] sm:$0xff] %v17369_v26  ;;  %v1797_v4 = vrot.slane %v17369_v26, %v17346_v10  ;;  %v1789_v7 = vrot.slane %v17365_v46, %v17346_v10  ;;  %v1793_v59 = vrot.slane %v17382_v15, %v17346_v10 }
 0x163   : > { %v17356_v6 = vpop.f32.mrb[37].mxu1  ;;  %22189 = vst [vmem:[#allocation36_spill] sm:$0xff] %v17382_v15  ;;  %22190 = vst [vmem:[#allocation37_spill] sm:$0xff] %v17386_v58  ;;  %v2178_v46 = vrot.slane %v17390_v2, %v17346_v10  ;;  %v17431_v34 = vadd.f32 %v17265_v14, %v17354_v19  ;;  %v17435_v15 = vadd.f32 %v17274_v20, %v17354_v19 }
 0x164   : > { %22183 = vst [vmem:[#allocation30_spill] sm:$0xff] %v17356_v6  ;;  %v17358_v52 = vpop.f32.mrb[38].mxu1  ;;  %v17378_v6 = vadd.f32 %v17240_v5, %v17349_v36  ;;  %22191 = vst [vmem:[#allocation38_spill] sm:$0xff] %v17390_v2  ;;  %v17401_v5 = vadd.f32 %v17214_v56, %v17374_v47  ;;  %v1801_v56 = vrot.slane %v17386_v58, %v17346_v10 }
 0x165   : > { %v17371_v32 = vpop.f32.mrb[39].mxu1  ;;  %22193 = vst [vmem:[#allocation40_spill] sm:$0xff] %v17397_v50  ;;  %22195 = vst [vmem:[#allocation42_spill] sm:$0xff] %v17405_v60  ;;  %v17444_v2 = vadd.f32 %v17278_v22, %v17354_v19  ;;  %v17450_v14 = vadd.f32 %v17280_v23, %v17349_v36  ;;  %v17461_v22 = vadd.f32 %v17230_v0, %v17374_v47 }
 0x166   : > { %22187 = vst [vmem:[#allocation34_spill] sm:$0xff] %v17371_v32  ;;  %22188 = vst [vmem:[#allocation35_spill] sm:$0xff] %v17378_v6  ;;  %v17393_v32 = vadd.f32 %v1398_v17, %v17349_v36  ;;  %v2182_v17 = vrot.slane %v17361_v49, %v17346_v10  ;;  %v2174_v26 = vrot.slane %v17378_v6, %v17346_v10 }
 0x167   : > { %22194 = vst [vmem:[#allocation41_spill] sm:$0xff] %v17401_v5  ;;  %22196 = vst [vmem:[#allocation43_spill] sm:$0xff] %v17415_v54  ;;  %v17477_v23 = vadd.f32 %v17261_v13, %v17374_v47  ;;  %v1805_v0 = vrot.slane %v17415_v54, %v17346_v10  ;;  %v17491_v13 = vadd.f32 %v17290_v27, %v17354_v19 }
 0x168   : > { %22192 = vst [vmem:[#allocation39_spill] sm:$0xff] %v17393_v32  ;;  %v2186_v49 = vrot.slane %v17393_v32, %v17346_v10  ;;  %22197 = vst [vmem:[#allocation44_spill] sm:$0xff] %v17431_v34 }
 0x169   : > { %22198 = vst [vmem:[#allocation45_spill] sm:$0xff] %v17435_v15  ;;  %22200 = vst [vmem:[#allocation47_spill] sm:$0xff] %v17444_v2 }
 0x16a   : > { %v14216_v43 = vpop.f32.mrb[40].mxu1  ;;  %22201 = vst [vmem:[#allocation48_spill] sm:$0xff] %v17450_v14  ;;  %22203 = vst [vmem:[#allocation50_spill] sm:$0xff] %v17461_v22 }
 0x16b   : > { %v1852_v40 = vadd.f32 %v14216_v43, %v1797_v4  ;;  %v1723_v37 = vpop.f32.mrb[41].mxu1  ;;  %v17427_v12 = vadd.f32 %v14216_v43, %v2182_v17  ;;  %22207 = vst [vmem:[#allocation54_spill] sm:$0xff] %v17477_v23  ;;  %22208 = vst [vmem:[#allocation55_spill] sm:$0xff] %v17491_v13 }
 0x16c   : > { %v1850_v58 = vadd.f32 %v1789_v7, %v1723_v37  ;;  %v14217_v6 = vpop.f32.mrb[42].mxu1  ;;  %v17437_v4 = vadd.f32 %v2174_v26, %v1723_v37  ;;  %v17457_v26 = vadd.f32 %v17298_v33, %v17349_v36  ;;  %v1809_v33 = vrot.slane %v17431_v34, %v17346_v10 }
 0x16d   : > { %v1853_v43 = vadd.f32 %v14217_v6, %v1801_v56  ;;  %v1726_v17 = vpop.f32.mrb[43].mxu1  ;;  %v17446_v32 = vadd.f32 %v14217_v6, %v2186_v49  ;;  %v17465_v49 = vadd.f32 %v17236_v3, %v17374_v47  ;;  %v17469_v6 = vadd.f32 %v17246_v8, %v17374_v47 }
 0x16e   : > { %v1851_v20 = vadd.f32 %v1793_v59, %v1726_v17  ;;  %v1866_v7 = vmul.f32 %v1850_v58, %v17401_v5  ;;  %v17453_v37 = vadd.f32 %v2178_v46, %v1726_v17  ;;  %22202 = vst [vmem:[#allocation49_spill] sm:$0xff] %v17457_v26  ;;  %v17473_v46 = vadd.f32 %v17284_v25, %v17349_v36 }
 0x16f   : > { %22204 = vst [vmem:[#allocation51_spill] sm:$0xff] %v17465_v49  ;;  %22205 = vst [vmem:[#allocation52_spill] sm:$0xff] %v17469_v6  ;;  %v1813_v3 = vrot.slane %v17435_v15, %v17346_v10  ;;  %v1868_v8 = vmul.f32 %v1852_v40, %v17461_v22  ;;  %v2198_v25 = vrot.slane %v17440_v63, %v17346_v10 }
 0x170   : > { %22206 = vst [vmem:[#allocation53_spill] sm:$0xff] %v17473_v46  ;;  %v1867_v30 = vmul.f32 %v1851_v20, %v17405_v60  ;;  %14262 = vmatprep.mubr.f32.mxu0 %v1866_v7  ;;  %v1817_v56 = vrot.slane %v17444_v2, %v17346_v10  ;;  %v17497_v59 = vadd.f32 %v17304_v38, %v17354_v19 }
 0x171   : > { %v2190_v40 = vrot.slane %v17450_v14, %v17346_v10  ;;  %v2202_v27 = vrot.slane %v17457_v26, %v17346_v10  ;;  %v1869_v2 = vmul.f32 %v1853_v43, %v17465_v49  ;;  %v2194_v38 = vrot.slane %v17473_v46, %v17346_v10 }
 0x172   : > { %v14220_v58 = vpop.f32.mrb[44].mxu1  ;;  %14263 = vmatmul.mubr.f32.vlgmr.msra.gmra.mrb[40].mxu0 %v1867_v30  ;;  %22209 = vst [vmem:[#allocation56_spill] sm:$0xff] %v17497_v59  ;;  %v17525_v43 = vadd.f32 %v17310_v42, %v17349_v36  ;;  %v1829_v42 = vrot.slane %v17497_v59, %v17346_v10 }
 0x173   : > { %v1856_v17 = vadd.f32 %v14220_v58, %v1813_v3  ;;  %v1739_v20 = vpop.f32.mrb[45].mxu1  ;;  %14265 = vmatprep.mubr.f32.mxu0 %v1868_v8  ;;  %14313 = vmatpush3.msk.msra.mxu0 %vm2300_vm1, %v17251_v9  ;;  %v17505_v7 = vadd.f32 %v14220_v58, %v2198_v25  ;;  %v17515_v8 = vadd.f32 %v17318_v48, %v17349_v36 }
 0x174   : > { %v1854_v30 = vadd.f32 %v1805_v0, %v1739_v20  ;;  %v14221_v34 = vpop.f32.mrb[46].mxu1  ;;  %15509 = vmatprep.subr.bf16.mxu0 %v17129_v31  ;;  %v17511_v3 = vadd.f32 %v2190_v40, %v1739_v20  ;;  %v17519_v25 = vadd.f32 %v17308_v41, %v17354_v19  ;;  %22212 = vst [vmem:[#allocation59_spill] sm:$0xff] %v17525_v43 }
 0x175   : > { %22210 = vst [vmem:[#allocation57_spill] sm:$0xff] %v17515_v8  ;;  %v1857_v14 = vadd.f32 %v14221_v34, %v1817_v56  ;;  %v1742_v54 = vpop.f32.mrb[47].mxu1  ;;  %v17521_v0 = vadd.f32 %v14221_v34, %v2202_v27  ;;  %v17532_v48 = vadd.f32 %v17322_v51, %v17349_v36  ;;  %v17536_v41 = vadd.f32 %v17270_v18, %v17374_v47 }
 0x176   : > { %22211 = vst [vmem:[#allocation58_spill] sm:$0xff] %v17519_v25  ;;  %v1855_v58 = vadd.f32 %v1809_v33, %v1742_v54  ;;  %14266 = vmatmul.mubr.f32.gmra.mrb[42].mxu0 %v1869_v2  ;;  %v1870_v40 = vmul.f32 %v1854_v30, %v17469_v6  ;;  %v17528_v20 = vadd.f32 %v2194_v38, %v1742_v54 }
 0x177   : > { %22213 = vst [vmem:[#allocation60_spill] sm:$0xff] %v17532_v48  ;;  %22214 = vst [vmem:[#allocation61_spill] sm:$0xff] %v17536_v41  ;;  %v17540_v34 = vadd.f32 %v17294_v29, %v17354_v19  ;;  %v17546_v2 = vadd.f32 %v17216_v57, %v17354_v19  ;;  %v17550_v54 = vadd.f32 %v17226_v62, %v17354_v19 }
 0x178   : > { %v17554_v51 = vadd.f32 %v17314_v45, %v17349_v36  ;;  %14268 = vmatprep.mubr.f32.mxu0 %v1870_v40  ;;  %v1871_v18 = vmul.f32 %v1855_v58, %v17477_v23  ;;  %v17559_v29 = vadd.f32 %v17276_v21, %v17374_v47  ;;  %v1872_v33 = vmul.f32 %v1856_v17, %v17536_v41 }
 0x179   : > { %22215 = vst [vmem:[#allocation62_spill] sm:$0xff] %v17540_v34  ;;  %22216 = vst [vmem:[#allocation63_spill] sm:$0xff] %v17546_v2  ;;  %v1833_v57 = vrot.slane %v17519_v25, %v17346_v10  ;;  %v2214_v62 = vrot.slane %v17515_v8, %v17346_v10  ;;  %v17568_v56 = vadd.f32 %v17286_v11, %v17374_v47 }
 0x17a   : > { %22217 = vst [vmem:[#allocation64_spill] sm:$0xff] %v17550_v54  ;;  %22218 = vst [vmem:[#allocation65_spill] sm:$0xff] %v17554_v51  ;;  %v17572_v45 = vadd.f32 %v17292_v28, %v17374_v47  ;;  %v14224_v27 = vpop.f32.mrb[48].mxu1  ;;  %14269 = vmatmul.mubr.f32.gmra.mrb[44].mxu0 %v1871_v18  ;;  %v1821_v21 = vrot.slane %v17491_v13, %v17346_v10  ;;  %v2206_v17 = vrot.slane %v17525_v43, %v17346_v10 }
 0x17b   : > { %22219 = vst [vmem:[#allocation66_spill] sm:$0xff] %v17559_v29  ;;  %22220 = vst [vmem:[#allocation67_spill] sm:$0xff] %v17568_v56  ;;  %v1860_v30 = vadd.f32 %v14224_v27, %v1829_v42  ;;  %v1755_v38 = vpop.f32.mrb[49].mxu1  ;;  %14271 = vmatprep.mubr.f32.mxu0 %v1872_v33  ;;  %v1825_v58 = vrot.slane %v17540_v34, %v17346_v10  ;;  %v2218_v11 = vrot.slane %v17532_v48, %v17346_v10 }
 0x17c   : > { %22221 = vst [vmem:[#allocation68_spill] sm:$0xff] %v17572_v45  ;;  %v17582_v40 = vadd.f32 %v14224_v27, %v2214_v62  ;;  %v1858_v28 = vadd.f32 %v1821_v21, %v1755_v38  ;;  %v14225_v25 = vpop.f32.mrb[50].mxu1  ;;  %v1873_v18 = vmul.f32 %v1857_v14, %v17559_v29  ;;  %v2210_v13 = vrot.slane %v17554_v51, %v17346_v10 }
 0x17d   : > { %v17587_v8 = vadd.f32 %v2206_v17, %v1755_v38  ;;  %v17591_v42 = vadd.f32 %v17351_v16, %v17349_v36  ;;  %v17595_v33 = vadd.f32 %v17300_v35, %v17374_v47  ;;  %v1861_v48 = vadd.f32 %v14225_v25, %v1833_v57  ;;  %v1758_v62 = vpop.f32.mrb[51].mxu1 }
 0x17e   : > { %v17597_v27 = vadd.f32 %v14225_v25, %v2218_v11  ;;  %v17601_v14 = vadd.f32 %v17326_v24, %v17349_v36  ;;  %v1859_v21 = vadd.f32 %v1825_v58, %v1758_v62  ;;  %14272 = vmatmul.mubr.f32.gmra.mrb[46].mxu0 %v1873_v18  ;;  %v1874_v17 = vmul.f32 %v1858_v28, %v17568_v56 }
 0x17f   : > { %22222 = vst [vmem:[#allocation69_spill] sm:$0xff] %v17591_v42  ;;  %22223 = vst [vmem:[#allocation70_spill] sm:$0xff] %v17595_v33  ;;  %v17604_v38 = vadd.f32 %v2210_v13, %v1758_v62  ;;  %v17608_v16 = vadd.f32 %v17232_v1, %v17354_v19  ;;  %v17612_v35 = vadd.f32 %v17358_v52, %v17349_v36 }
 0x180   : > { %22224 = vst [vmem:[#allocation71_spill] sm:$0xff] %v17601_v14  ;;  %v17616_v25 = vadd.f32 %v17332_v44, %v17349_v36  ;;  %14274 = vmatprep.mubr.f32.mxu0 %v1874_v17  ;;  %v1875_v24 = vmul.f32 %v1859_v21, %v17572_v45  ;;  %v17621_v57 = vadd.f32 %v17208_v53, %v17374_v47 }
 0x181   : > { %22225 = vst [vmem:[#allocation72_spill] sm:$0xff] %v17608_v16  ;;  %22226 = vst [vmem:[#allocation73_spill] sm:$0xff] %v17612_v35  ;;  %v1845_v13 = vrot.slane %v17550_v54, %v17346_v10  ;;  %v1876_v1 = vmul.f32 %v1860_v30, %v17595_v33  ;;  %v2230_v52 = vrot.slane %v17591_v42, %v17346_v10 }
 0x182   : > { %22227 = vst [vmem:[#allocation74_spill] sm:$0xff] %v17616_v25  ;;  %22228 = vst [vmem:[#allocation75_spill] sm:$0xff] %v17621_v57  ;;  %v17630_v19 = vadd.f32 %v17306_v39, %v17374_v47  ;;  %v14228_v44 = vpop.f32.mrb[52].mxu1  ;;  %14275 = vmatmul.mubr.f32.gmra.mrb[48].mxu0 %v1875_v24  ;;  %v1837_v36 = vrot.slane %v17397_v50, %v17346_v10  ;;  %v1841_v53 = vrot.slane %v17546_v2, %v17346_v10  ;;  %v17750_v50 = vld [vmem:[%s17707_s23 + $0x38] sm:$0xff] }
 0x183   : > { %v2222_v58 = vrot.slane %v17601_v14, %v17346_v10  ;;  %v1864_v11 = vadd.f32 %v14228_v44, %v1845_v13  ;;  %v1771_v30 = vpop.f32.mrb[53].mxu1  ;;  %14277 = vmatprep.mubr.f32.mxu0 %v1876_v1  ;;  %v1849_v28 = vrot.slane %v17608_v16, %v17346_v10  ;;  %v2234_v39 = vrot.slane %v17612_v35, %v17346_v10 }
 0x184   : > { %22229 = vst [vmem:[#allocation76_spill] sm:$0xff] %v17630_v19  ;;  %v17642_v18 = vadd.f32 %v14228_v44, %v2230_v52  ;;  %v1862_v62 = vadd.f32 %v1837_v36, %v1771_v30  ;;  %v14229_v21 = vpop.f32.mrb[54].mxu1  ;;  %v1877_v17 = vmul.f32 %v1861_v48, %v17630_v19  ;;  %v2226_v24 = vrot.slane %v17616_v25, %v17346_v10  ;;  %v17713_v10 = vld [vmem:[%s17707_s23] sm:$0xff] }
 0x185   : > { %v17647_v2 = vadd.f32 %v2222_v58, %v1771_v30  ;;  %v1865_v13 = vadd.f32 %v14229_v21, %v1849_v28  ;;  %v1774_v14 = vpop.f32.mrb[55].mxu1  ;;  %v17649_v1 = vadd.f32 %v14229_v21, %v2234_v39  ;;  %v17653_v16 = vadd.f32 %v17212_v55, %v17374_v47  ;;  %v22232_v30 = vld [vmem:[#allocation11_spill] sm:$0xff]  ;;  %2980 = vrot.lane.b32.xlu0 %v17713_v10, %s16749_s27 }
 0x186   : > { %v1863_v35 = vadd.f32 %v1841_v53, %v1774_v14  ;;  %14278 = vmatmul.mubr.f32.gmra.mrb[50].mxu0 %v1877_v17  ;;  %v1878_v52 = vmul.f32 %v1862_v62, %v17621_v57  ;;  %v17656_v44 = vadd.f32 %v2226_v24, %v1774_v14  ;;  %v17660_v48 = vadd.f32 %v17224_v61, %v17374_v47  ;;  %v17669_v14 = vpop.f32.mrb[24].mxu0 }
 0x187   : > { %22230 = vst [vmem:[#allocation77_spill] sm:$0xff] %v17653_v16  ;;  %v17666_v28 = vadd.f32 %v22232_v30, %v17374_v47  ;;  %22234 = vst [vmem:[#allocation79_spill] sm:$0xff] %v17669_v14  ;;  %v17671_v53 = vpop.f32.mrb[25].mxu0 }
 0x188   : > { %22231 = vst [vmem:[#allocation78_spill] sm:$0xff] %v17660_v48  ;;  %14280 = vmatprep.mubr.f32.mxu0 %v1878_v52  ;;  %v1879_v36 = vmul.f32 %v1863_v35, %v17653_v16  ;;  %v1880_v58 = vmul.f32 %v1864_v11, %v17660_v48  ;;  %22235 = vst [vmem:[#allocation80_spill] sm:$0xff] %v17671_v53  ;;  %v17673_v61 = vpop.f32.mrb[26].mxu0  ;;  %v17734_v53 = vld [vmem:[%s17707_s23 + $0x28] sm:$0xff] }
 0x189   : > { %22233 = vst [vmem:[#allocation11_spill] sm:$0xff] %v17666_v28  ;;  %v1881_v55 = vmul.f32 %v1865_v13, %v17666_v28  ;;  %22236 = vst [vmem:[#allocation81_spill] sm:$0xff] %v17673_v61  ;;  %v17675_v35 = vpop.f32.mrb[27].mxu0 }
 0x18a   : > { %14281 = vmatmul.mubr.f32.gmra.mrb[52].mxu0 %v1879_v36  ;;  %22237 = vst [vmem:[#allocation82_spill] sm:$0xff] %v17675_v35  ;;  %v17677_v11 = vpop.f32.mrb[28].mxu0  ;;  %v17737_v35 = vld [vmem:[%s17707_s23 + $0x20] sm:$0xff] }
 0x18b   : > { %14283 = vmatprep.mubr.f32.mxu0 %v1880_v58  ;;  %22238 = vst [vmem:[#allocation83_spill] sm:$0xff] %v17677_v11  ;;  %v17679_v39 = vpop.f32.mrb[29].mxu0 }
 0x18c   : > { %22239 = vst [vmem:[#allocation84_spill] sm:$0xff] %v17679_v39  ;;  %v17681_v47 = vpop.f32.mrb[30].mxu0 }
 0x18d   : > { %22240 = vst [vmem:[#allocation85_spill] sm:$0xff] %v17681_v47  ;;  %v17683_v62 = vpop.f32.mrb[31].mxu0 }
 0x18e   : > { %14284 = vmatmul.mubr.f32.gmra.mrb[54].mxu0 %v1881_v55  ;;  %22241 = vst [vmem:[#allocation86_spill] sm:$0xff] %v17683_v62  ;;  %v17685_v21 = vpop.f32.mrb[32].mxu0  ;;  %v17710_v55 = vld [vmem:[%s17707_s23 + $0x8] sm:$0xff] }
 0x18f   : > { %22242 = vst [vmem:[#allocation87_spill] sm:$0xff] %v17685_v21  ;;  %v17687_v17 = vpop.f32.mrb[33].mxu0  ;;  %v17718_v21 = vld [vmem:[%s17707_s23 + $0x18] sm:$0xff]  ;;  %2982 = vrot.lane.b32.xlu0 %v17710_v55, %s16749_s27 }
 0x190   : > { %22243 = vst [vmem:[#allocation88_spill] sm:$0xff] %v17687_v17  ;;  %v17689_v24 = vpop.f32.mrb[34].mxu0  ;;  %v17723_v17 = vld [vmem:[%s17707_s23 + $0x10] sm:$0xff] }
 0x191   : > { %22244 = vst [vmem:[#allocation89_spill] sm:$0xff] %v17689_v24  ;;  %v17691_v13 = vpop.f32.mrb[35].mxu0  ;;  %2984 = vrot.lane.b32.xlu1 %v17723_v17, %s16749_s27 }
 0x192   : > { %22245 = vst [vmem:[#allocation90_spill] sm:$0xff] %v17691_v13  ;;  %v17693_v52 = vpop.f32.mrb[36].mxu0 }
 0x193   : > { %22246 = vst [vmem:[#allocation91_spill] sm:$0xff] %v17693_v52  ;;  %v17695_v36 = vpop.f32.mrb[37].mxu0  ;;  %2988 = vrot.lane.b32.xlu0 %v17737_v35, %s16749_s27 }
 0x194   : > { %22247 = vst [vmem:[#allocation92_spill] sm:$0xff] %v17695_v36  ;;  %v17697_v58 = vpop.f32.mrb[38].mxu0 }
 0x195   : > { %22248 = vst [vmem:[#allocation93_spill] sm:$0xff] %v17697_v58  ;;  %v17699_v30 = vpop.f32.mrb[39].mxu0  ;;  %2986 = vrot.lane.b32.xlu1 %v17718_v21, %s16749_s27 }
 0x196   : > { %22249 = vst [vmem:[#allocation94_spill] sm:$0xff] %v17699_v30 }
 0x199   : > { %2990 = vrot.lane.b32.xlu1 %v17734_v53, %s16749_s27 }
 0x19d   : > { %2994 = vrot.lane.b32.xlu1 %v17750_v50, %s16749_s27 }
 0x245   : > { %v14264_v52 = vpop.f32.mrb[40].mxu0 }
 0x246   : > { %v1954_v58 = vadd.f32 %v14264_v52, %v17710_v55  ;;  %v1948_v36 = vpop.f32.mrb[41].mxu0 }
 0x247   : > { %v1949_v30 = vadd.f32 %v1948_v36, %v17713_v10 }
 0x248   : > { %v17720_v24 = vmax.f32 %v1954_v58, -1e+30 }
 0x249   : > { %v17725_v13 = vmax.f32 %v1949_v30, -1e+30  ;;  %v14267_v11 = vpop.f32.mrb[42].mxu0 }
 0x24a   : > { %22250 = vst [vmem:[#allocation95_spill] sm:$0xff] %v17720_v24  ;;  %v2044_v47 = vsub.f32 -1e+30, %v17720_v24  ;;  %v2092_v39 = vsub.f32 %v1954_v58, %v17720_v24  ;;  %v1964_v62 = vadd.f32 %v14267_v11, %v17718_v21  ;;  %v1958_v52 = vpop.f32.mrb[43].mxu0 }
 0x24b   : > { %22251 = vst [vmem:[#allocation96_spill] sm:$0xff] %v17725_v13  ;;  %v2043_v14 = vsub.f32 -1e+30, %v17725_v13  ;;  %v2091_v36 = vsub.f32 %v1949_v30, %v17725_v13  ;;  %v1959_v61 = vadd.f32 %v1958_v52, %v17723_v17 }
 0x24c   : > { %v2061_v28 = vmul.f32 1.442695, %v2044_v47  ;;  %v2109_v48 = vmul.f32 1.442695, %v2092_v39  ;;  %v17739_v16 = vmax.f32 %v1964_v62, -1e+30 }
 0x24d   : > { %v2059_v57 = vmul.f32 1.442695, %v2043_v14  ;;  %v2107_v58 = vmul.f32 1.442695, %v2091_v36  ;;  %v17741_v11 = vmax.f32 %v1959_v61, -1e+30 }
 0x24e   : > { %22252 = vst [vmem:[#allocation97_spill] sm:$0xff] %v17739_v16  ;;  %15954 = vpow2.f32 %v2061_v28  ;;  %v2046_v24 = vsub.f32 -1e+30, %v17739_v16  ;;  %v2094_v30 = vsub.f32 %v1964_v62, %v17739_v16  ;;  %v14270_v52 = vpop.f32.mrb[44].mxu0  ;;  %v17753_v28 = vld [vmem:[%s17707_s23 + $0x30] sm:$0xff] }
 0x24f   : > { %22253 = vst [vmem:[#allocation98_spill] sm:$0xff] %v17741_v11  ;;  %15956 = vpow2.f32 %v2109_v48  ;;  %v2045_v13 = vsub.f32 -1e+30, %v17741_v11  ;;  %v2093_v47 = vsub.f32 %v1959_v61, %v17741_v11  ;;  %v1974_v39 = vadd.f32 %v14270_v52, %v17734_v53  ;;  %v1968_v25 = vpop.f32.mrb[45].mxu0  ;;  %v17766_v11 = vld [vmem:[%s17707_s23 + $0x48] sm:$0xff]  ;;  %2992 = vrot.lane.b32.xlu0 %v17753_v28, %s16749_s27 }
 0x250   : > { %15958 = vpow2.f32 %v2059_v57  ;;  %v2065_v14 = vmul.f32 1.442695, %v2046_v24  ;;  %v2113_v36 = vmul.f32 1.442695, %v2094_v30  ;;  %v1969_v19 = vadd.f32 %v1968_v25, %v17737_v35  ;;  %2998 = vrot.lane.b32.xlu1 %v17766_v11, %s16749_s27 }
 0x251   : > { %15960 = vpow2.f32 %v2107_v58  ;;  %v2063_v62 = vmul.f32 1.442695, %v2045_v13  ;;  %v2111_v48 = vmul.f32 1.442695, %v2093_v47  ;;  %v17755_v16 = vmax.f32 %v1974_v39, -1e+30 }
 0x252   : > { %15962 = vpow2.f32 %v2065_v14  ;;  %v17757_v61 = vmax.f32 %v1969_v19, -1e+30  ;;  %v14273_v52 = vpop.f32.mrb[46].mxu0 }
 0x253   : > { %22254 = vst [vmem:[#allocation99_spill] sm:$0xff] %v17755_v16  ;;  %15964 = vpow2.f32 %v2113_v36  ;;  %v2048_v57 = vsub.f32 -1e+30, %v17755_v16  ;;  %v2096_v24 = vsub.f32 %v1974_v39, %v17755_v16  ;;  %v1984_v25 = vadd.f32 %v14273_v52, %v17750_v50  ;;  %v1978_v30 = vpop.f32.mrb[47].mxu0 }
 0x254   : > { %22255 = vst [vmem:[#allocation100_spill] sm:$0xff] %v17757_v61  ;;  %15966 = vpow2.f32 %v2063_v62  ;;  %v2047_v58 = vsub.f32 -1e+30, %v17757_v61  ;;  %v2095_v13 = vsub.f32 %v1969_v19, %v17757_v61  ;;  %v1979_v47 = vadd.f32 %v1978_v30, %v17753_v28 }
 0x255   : > { %15968 = vpow2.f32 %v2111_v48  ;;  %v2069_v14 = vmul.f32 1.442695, %v2048_v57  ;;  %v2117_v42 = vmul.f32 1.442695, %v2096_v24  ;;  %v17768_v36 = vmax.f32 %v1984_v25, -1e+30 }
 0x256   : > { %v2067_v39 = vmul.f32 1.442695, %v2047_v58  ;;  %v2115_v16 = vmul.f32 1.442695, %v2095_v13  ;;  %v17770_v52 = vmax.f32 %v1979_v47, -1e+30 }
 0x257   : > { %22256 = vst [vmem:[#allocation101_spill] sm:$0xff] %v17768_v36  ;;  %15970 = vpow2.f32 %v2069_v14  ;;  %v2050_v62 = vsub.f32 -1e+30, %v17768_v36  ;;  %v2098_v19 = vsub.f32 %v1984_v25, %v17768_v36  ;;  %v14276_v61 = vpop.f32.mrb[48].mxu0  ;;  %v17778_v58 = vld [vmem:[%s17707_s23 + $0x40] sm:$0xff]  ;;  %v17781_v13 = vld [vmem:[%s17707_s23 + $0x58] sm:$0xff] }
 0x258   : > { %22257 = vst [vmem:[#allocation102_spill] sm:$0xff] %v17770_v52  ;;  %v15955_v30 = vpop.eup %15954  ;;  %15972 = vpow2.f32 %v2117_v42  ;;  %v2049_v48 = vsub.f32 -1e+30, %v17770_v52  ;;  %v2097_v57 = vsub.f32 %v1979_v47, %v17770_v52  ;;  %v1994_v24 = vadd.f32 %v14276_v61, %v17766_v11  ;;  %v1988_v33 = vpop.f32.mrb[49].mxu0  ;;  %2996 = vrot.lane.b32.xlu0 %v17778_v58, %s16749_s27  ;;  %3002 = vrot.lane.b32.xlu1 %v17781_v13, %s16749_s27 }
 0x259   : > { %v15957_v14 = vpop.eup %15956  ;;  %v2140_v54 = vmul.f32 0.0, %v15955_v30  ;;  %15974 = vpow2.f32 %v2067_v39  ;;  %v2073_v45 = vmul.f32 1.442695, %v2050_v62  ;;  %v2121_v25 = vmul.f32 1.442695, %v2098_v19  ;;  %v14279_v36 = vpop.f32.mrb[50].mxu0 }
 0x25a   : > { %v15959_v56 = vpop.eup %15958  ;;  %15976 = vpow2.f32 %v2115_v16  ;;  %v2071_v42 = vmul.f32 1.442695, %v2049_v48  ;;  %v2119_v51 = vmul.f32 1.442695, %v2097_v57  ;;  %v17783_v29 = vmax.f32 %v1994_v24, -1e+30 }
 0x25b   : > { %v15961_v47 = vpop.eup %15960  ;;  %v17785_v52 = vadd.f32 %v15957_v14, %v2140_v54  ;;  %v2139_v61 = vmul.f32 0.0, %v15959_v56  ;;  %15978 = vpow2.f32 %v2073_v45  ;;  %v1989_v43 = vadd.f32 %v1988_v33, %v17778_v58  ;;  %v1998_v34 = vpop.f32.mrb[51].mxu0  ;;  %14288 = vmatprep.mubr.msk.f32.mxu1 %vm2251_vm2, %v15959_v56  ;;  %v17799_v56 = vld [vmem:[%s17707_s23 + $0x50] sm:$0xff]  ;;  %v17805_v57 = vld [vmem:[%s21877_s5] sm:$0xff]  }
 0x25c   : > { %22258 = vst [vmem:[#allocation103_spill] sm:$0xff] %v17783_v29  ;;  %v15963_v39 = vpop.eup %15962  ;;  %15980 = vpow2.f32 %v2121_v25  ;;  %v2052_v62 = vsub.f32 -1e+30, %v17783_v29  ;;  %v2100_v16 = vsub.f32 %v1994_v24, %v17783_v29  ;;  %v2004_v19 = vadd.f32 %v14279_v36, %v17781_v13  ;;  %14314 = vmatprep.mubr.msk.f32.mxu0 %vm2251_vm2, %v15961_v47  ;;  %14289 = vmatmul.mubr.msk.f32.vlgmr.msra.gmra.mrb[56].mxu1 %vm2251_vm2, %v15955_v30  ;;  %v22264_v29 = vld [vmem:[#allocation4_spill] sm:$0xff] }
 0x25d   : > { %22259 = vst [vmem:[#allocation104_spill] sm:$0xff] %v17785_v52  ;;  %v15965_v54 = vpop.eup %15964  ;;  %v17794_v45 = vadd.f32 %v15961_v47, %v2139_v61  ;;  %v2142_v48 = vmul.f32 0.0, %v15963_v39  ;;  %15982 = vpow2.f32 %v2071_v42  ;;  %v17796_v33 = vmax.f32 %v1989_v43, -1e+30  ;;  %14315 = vmatmul.mubr.msk.f32.vlgmr.msra.gmra.mrb[56].mxu0 %vm2251_vm2, %v15957_v14  ;;  %14339 = vmatpush3.bf16.msra.mxu1 %v17805_v57  ;;  %v14282_v36 = vpop.f32.mrb[52].mxu0  ;;  %v16659_v47 = vld [vmem:[%s21877_s5 + $0x8] sm:$0xff]  }
 0x25e   : > { %v15967_v30 = vpop.eup %15966  ;;  %15984 = vpow2.f32 %v2119_v51  ;;  %v2077_v24 = vmul.f32 1.442695, %v2052_v62  ;;  %v2125_v25 = vmul.f32 1.442695, %v2100_v16  ;;  %v17808_v42 = vmax.f32 %v2004_v19, -1e+30  ;;  %14340 = vmatprep.subr.bf16.mxu1 %v16659_v47  ;;  %15511 = vmatpush3.bf16.msra.mxu0 %v17129_v31 }
 0x25f   : > { %22260 = vst [vmem:[#allocation105_spill] sm:$0xff] %v17794_v45  ;;  %22261 = vst [vmem:[#allocation106_spill] sm:$0xff] %v17796_v33  ;;  %v15969_v14 = vpop.eup %15968  ;;  %v17814_v61 = vadd.f32 %v15965_v54, %v2142_v48  ;;  %v2141_v45 = vmul.f32 0.0, %v15967_v30  ;;  %v2051_v52 = vsub.f32 -1e+30, %v17796_v33  ;;  %v2099_v51 = vsub.f32 %v1989_v43, %v17796_v33  ;;  %v17819_v62 = vld [vmem:[%s17707_s23 + $0x68] sm:$0xff]  ;;  %14291 = vmatprep.mubr.msk.f32.mxu1 %vm2251_vm2, %v15967_v30 }
 0x260   : > { %22262 = vst [vmem:[#allocation107_spill] sm:$0xff] %v17808_v42  ;;  %v2008_v16 = vpop.f32.mrb[53].mxu0  ;;  %15513 = vmatprep.subr.bf16.mxu0 %v22264_v29  ;;  %15986 = vpow2.f32 %v2077_v24  ;;  %v2054_v41 = vsub.f32 -1e+30, %v17808_v42  ;;  %v2102_v59 = vsub.f32 %v2004_v19, %v17808_v42  ;;  %v1999_v48 = vadd.f32 %v1998_v34, %v17799_v56  ;;  %14317 = vmatprep.mubr.msk.f32.mxu0 %vm2251_vm2, %v15969_v14  ;;  %v17832_v43 = vld [vmem:[%s17707_s23 + $0x78] sm:$0xff] }
 0x261   : > { %22263 = vst [vmem:[#allocation108_spill] sm:$0xff] %v17814_v61  ;;  %v17827_v61 = vld [vmem:[%s17707_s23 + $0x60] sm:$0xff]  ;;  %14292 = vmatmul.mubr.msk.f32.gmra.mrb[58].mxu1 %vm2251_vm2, %v15963_v39  ;;  %v15971_v33 = vpop.eup %15970  ;;  %v17834_v23 = vadd.f32 %v15969_v14, %v2141_v45  ;;  %15988 = vpow2.f32 %v2125_v25  ;;  %v2075_v30 = vmul.f32 1.442695, %v2051_v52  ;;  %v2123_v24 = vmul.f32 1.442695, %v2099_v51  ;;  %14318 = vmatmul.mubr.msk.f32.gmra.mrb[58].mxu0 %vm2251_vm2, %v15965_v54 }
 0x262   : > { %v14285_v6 = vpop.f32.mrb[54].mxu0  ;;  %14341 = vmatpush3.bf16.msra.mxu1 %v16659_v47  ;;  %v15973_v19 = vpop.eup %15972  ;;  %v2144_v34 = vmul.f32 0.0, %v15971_v33  ;;  %v2081_v42 = vmul.f32 1.442695, %v2054_v41  ;;  %v2129_v31 = vmul.f32 1.442695, %v2102_v59  ;;  %v2014_v46 = vadd.f32 %v14282_v36, %v17819_v62  ;;  %15515 = vmatpush3.bf16.msra.mxu0 %v22264_v29 }
 0x263   : > { %22265 = vst [vmem:[#allocation109_spill] sm:$0xff] %v17834_v23  ;;  %v2018_v49 = vpop.f32.mrb[55].mxu0  ;;  %14414 = vmatprep.subr.msk.mxu1 %vm2300_vm1, %v17251_v9  ;;  %v15975_v39 = vpop.eup %15974  ;;  %15990 = vpow2.f32 %v2075_v30  ;;  %v17841_v52 = vmax.f32 %v1999_v48, -1e+30  ;;  %v2009_v54 = vadd.f32 %v2008_v16, %v17827_v61  ;;  %v2024_v45 = vadd.f32 %v14285_v6, %v17832_v43  ;;  %v22267_v25 = vld [vmem:[#allocation5_spill] sm:$0xff]  ;;  %v22271_v23 = vld [vmem:[#allocation6_spill] sm:$0xff]  ;;  %3000 = vrot.lane.b32.xlu0 %v17799_v56, %s16749_s27 }
 0x264   : > { %15517 = vmatprep.subr.bf16.mxu0 %v22267_v25  ;;  %v15977_v41 = vpop.eup %15976  ;;  %v17846_v59 = vadd.f32 %v15973_v19, %v2144_v34  ;;  %v2143_v36 = vmul.f32 0.0, %v15975_v39  ;;  %15992 = vpow2.f32 %v2123_v24  ;;  %v17848_v47 = vmax.f32 %v2014_v46, -1e+30  ;;  %14294 = vmatprep.mubr.msk.f32.mxu1 %vm2251_vm2, %v15975_v39  ;;  %v17861_v39 = vld [vmem:[%s17707_s23 + $0x70] sm:$0xff] }
 0x265   : > { %22266 = vst [vmem:[#allocation110_spill] sm:$0xff] %v17841_v52  ;;  %v15979_v9 = vpop.eup %15978  ;;  %15994 = vpow2.f32 %v2081_v42  ;;  %v2053_v14 = vsub.f32 -1e+30, %v17841_v52  ;;  %v2101_v51 = vsub.f32 %v1999_v48, %v17841_v52  ;;  %v17853_v16 = vmax.f32 %v2009_v54, -1e+30  ;;  %14320 = vmatprep.mubr.msk.f32.mxu0 %vm2251_vm2, %v15977_v41  ;;  %14295 = vmatmul.mubr.msk.f32.gmra.mrb[60].mxu1 %vm2251_vm2, %v15971_v33 }
 0x266   : > { %22268 = vst [vmem:[#allocation5_spill] sm:$0xff] %v17846_v59  ;;  %v15981_v6 = vpop.eup %15980  ;;  %v17857_v30 = vadd.f32 %v15977_v41, %v2143_v36  ;;  %v2146_v24 = vmul.f32 0.0, %v15979_v9  ;;  %15996 = vpow2.f32 %v2129_v31  ;;  %v2056_v34 = vsub.f32 -1e+30, %v17848_v47  ;;  %14321 = vmatmul.mubr.msk.f32.gmra.mrb[60].mxu0 %vm2251_vm2, %v15973_v19  ;;  %3006 = vrot.lane.b32.xlu1 %v17819_v62, %s16749_s27 }
 0x267   : > { %22269 = vst [vmem:[#allocation111_spill] sm:$0xff] %v17853_v16  ;;  %v15983_v42 = vpop.eup %15982  ;;  %v2079_v59 = vmul.f32 1.442695, %v2053_v14  ;;  %v2127_v48 = vmul.f32 1.442695, %v2101_v51  ;;  %v2104_v52 = vsub.f32 %v2014_v46, %v17848_v47  ;;  %15519 = vmatpush3.bf16.msra.mxu0 %v22267_v25  ;;  %3004 = vrot.lane.b32.xlu0 %v17827_v61, %s16749_s27 }
 0x268   : > { %22270 = vst [vmem:[#allocation112_spill] sm:$0xff] %v17857_v30  ;;  %v2055_v29 = vsub.f32 -1e+30, %v17853_v16  ;;  %v15985_v33 = vpop.eup %15984  ;;  %v17867_v41 = vadd.f32 %v15981_v6, %v2146_v24  ;;  %v2145_v36 = vmul.f32 0.0, %v15983_v42  ;;  %v2085_v31 = vmul.f32 1.442695, %v2056_v34  ;;  %14297 = vmatprep.mubr.msk.f32.mxu1 %vm2251_vm2, %v15983_v42  ;;  %15521 = vmatprep.subr.bf16.mxu0 %v22271_v23 }
 0x269   : > { %v2103_v30 = vsub.f32 %v2009_v54, %v17853_v16  ;;  %15998 = vpow2.f32 %v2079_v59  ;;  %v2133_v19 = vmul.f32 1.442695, %v2104_v52  ;;  %v17872_v51 = vmax.f32 %v2024_v45, -1e+30  ;;  %14323 = vmatprep.mubr.msk.f32.mxu0 %vm2251_vm2, %v15985_v33  ;;  %14298 = vmatmul.mubr.msk.f32.gmra.mrb[62].mxu1 %vm2251_vm2, %v15979_v9  ;;  %v22272_v9 = vld [vmem:[#allocation7_spill] sm:$0xff] }
 0x26a   : > { %v2083_v14 = vmul.f32 1.442695, %v2055_v29  ;;  %v15987_v46 = vpop.eup %15986  ;;  %v17876_v24 = vadd.f32 %v15985_v33, %v2145_v36  ;;  %16000 = vpow2.f32 %v2127_v48  ;;  %v2019_v54 = vadd.f32 %v2018_v49, %v17861_v39  ;;  %14324 = vmatmul.mubr.msk.f32.gmra.mrb[62].mxu0 %vm2251_vm2, %v15981_v6  ;;  %3010 = vrot.lane.b32.xlu1 %v17832_v43, %s16749_s27 }
 0x26b   : > { %v2131_v34 = vmul.f32 1.442695, %v2103_v30  ;;  %v15989_v42 = vpop.eup %15988  ;;  %v2148_v16 = vmul.f32 0.0, %v15987_v46  ;;  %16002 = vpow2.f32 %v2085_v31  ;;  %v2058_v29 = vsub.f32 -1e+30, %v17872_v51  ;;  %15523 = vmatpush3.bf16.msra.mxu0 %v22271_v23  ;;  %3008 = vrot.lane.b32.xlu0 %v17861_v39, %s16749_s27 }
 0x26c   : > { %v2106_v52 = vsub.f32 %v2024_v45, %v17872_v51  ;;  %16004 = vpow2.f32 %v2133_v19  ;;  %v17883_v59 = vmax.f32 %v2019_v54, -1e+30  ;;  %15525 = vmatprep.subr.bf16.mxu0 %v22272_v9 }
 0x26d   : > { %v15991_v48 = vpop.eup %15990  ;;  %v17886_v30 = vadd.f32 %v15989_v42, %v2148_v16  ;;  %16006 = vpow2.f32 %v2083_v14  ;;  %v2089_v49 = vmul.f32 1.442695, %v2058_v29 }
 0x26e   : > { %v2137_v6 = vmul.f32 1.442695, %v2106_v52  ;;  %v15993_v33 = vpop.eup %15992  ;;  %v2147_v36 = vmul.f32 0.0, %v15991_v48  ;;  %16008 = vpow2.f32 %v2131_v34  ;;  %v2057_v31 = vsub.f32 -1e+30, %v17883_v59  ;;  %14300 = vmatprep.mubr.msk.f32.mxu1 %vm2251_vm2, %v15991_v48  ;;  %v22274_v52 = vld [vmem:[#allocation8_spill] sm:$0xff] }
 0x26f   : > { %22273 = vst [vmem:[#allocation6_spill] sm:$0xff] %v17886_v30  ;;  %v2105_v45 = vsub.f32 %v2019_v54, %v17883_v59  ;;  %v15995_v19 = vpop.eup %15994  ;;  %16010 = vpow2.f32 %v2089_v49  ;;  %14326 = vmatprep.mubr.msk.f32.mxu0 %vm2251_vm2, %v15993_v33  ;;  %14301 = vmatmul.mubr.msk.f32.gmra.mrb[64].mxu1 %vm2251_vm2, %v15987_v46 }
 0x270   : > { %v15997_v16 = vpop.eup %15996  ;;  %v17893_v30 = vadd.f32 %v15993_v33, %v2147_v36  ;;  %v2150_v14 = vmul.f32 0.0, %v15995_v19  ;;  %v2087_v29 = vmul.f32 1.442695, %v2057_v31  ;;  %14327 = vmatmul.mubr.msk.f32.gmra.mrb[64].mxu0 %vm2251_vm2, %v15989_v42  ;;  %16012 = vpow2.f32 %v2137_v6 }
 0x271   : > { %v2135_v34 = vmul.f32 1.442695, %v2105_v45  ;;  %15527 = vmatpush3.bf16.msra.mxu0 %v22272_v9 }
 0x272   : > { %v17897_v54 = vadd.f32 %v15997_v16, %v2150_v14  ;;  %16014 = vpow2.f32 %v2087_v29  ;;  %15529 = vmatprep.subr.bf16.mxu0 %v22274_v52 }
 0x273   : > { %v15999_v48 = vpop.eup %15998  ;;  %16016 = vpow2.f32 %v2135_v34  ;;  %v22277_v34 = vld [vmem:[#allocation9_spill] sm:$0xff] }
 0x274   : > { %v16001_v49 = vpop.eup %16000  ;;  %v2149_v46 = vmul.f32 0.0, %v15999_v48  ;;  %14303 = vmatprep.mubr.msk.f32.mxu1 %vm2251_vm2, %v15999_v48 }
 0x275   : > { %v16003_v33 = vpop.eup %16002  ;;  %14329 = vmatprep.mubr.msk.f32.mxu0 %vm2251_vm2, %v16001_v49  ;;  %14304 = vmatmul.mubr.msk.f32.gmra.mrb[66].mxu1 %vm2251_vm2, %v15995_v19 }
 0x276   : > { %v16005_v42 = vpop.eup %16004  ;;  %v17903_v6 = vadd.f32 %v16001_v49, %v2149_v46  ;;  %v2152_v36 = vmul.f32 0.0, %v16003_v33  ;;  %14330 = vmatmul.mubr.msk.f32.gmra.mrb[66].mxu0 %vm2251_vm2, %v15997_v16  ;;  %v15898_v46 = vld [vmem:[%s17055_s18 + $0x40] sm:$0xff]  }
 0x277   : > { %v16007_v31 = vpop.eup %16006  ;;  %15531 = vmatpush3.bf16.msra.mxu0 %v22274_v52 }
 0x278   : > { %22275 = vst [vmem:[#allocation7_spill] sm:$0xff] %v17903_v6  ;;  %v16009_v45 = vpop.eup %16008  ;;  %v17907_v14 = vadd.f32 %v16005_v42, %v2152_v36  ;;  %v2151_v29 = vmul.f32 0.0, %v16007_v31  ;;  %14306 = vmatprep.mubr.msk.f32.mxu1 %vm2251_vm2, %v16007_v31  ;;  %15533 = vmatprep.subr.bf16.mxu0 %v22277_v34 }
 0x279   : > { %v16011_v48 = vpop.eup %16010  ;;  %14332 = vmatprep.mubr.msk.f32.mxu0 %vm2251_vm2, %v16009_v45  ;;  %14307 = vmatmul.mubr.msk.f32.gmra.mrb[68].mxu1 %vm2251_vm2, %v16003_v33  ;;  %v15899_v33 = vld [vmem:[%s17055_s18 + $0x48] sm:$0xff]  }
 0x27a   : > { %22276 = vst [vmem:[#allocation113_spill] sm:$0xff] %v17907_v14  ;;  %v17913_v19 = vadd.f32 %v16009_v45, %v2151_v29  ;;  %v2154_v16 = vmul.f32 0.0, %v16011_v48  ;;  %14333 = vmatmul.mubr.msk.f32.gmra.mrb[68].mxu0 %vm2251_vm2, %v16005_v42  ;;  %v16013_v49 = vpop.eup %16012  ;;  %v22278_v14 = vld [vmem:[#allocation10_spill] sm:$0xff]  ;;  %v15900_v45 = vld [vmem:[%s17055_s18 + $0x50] sm:$0xff]   ;;  %v17934_v29 = vld [vmem:[%s21879_s7] sm:$0xf] }
 0x27b   : > { %15535 = vmatpush3.bf16.msra.mxu0 %v22277_v34 }
 0x27c   : > { %v16015_v36 = vpop.eup %16014  ;;  %v17918_v31 = vadd.f32 %v16013_v49, %v2154_v16  ;;  %15537 = vmatprep.subr.bf16.mxu0 %v22278_v14  ;;  %v15904_v16 = vld [vmem:[%s17055_s18 + $0x70] sm:$0xff]  }
 0x27d   : > { %v16017_v6 = vpop.eup %16016  ;;  %v2153_v52 = vmul.f32 0.0, %v16015_v36  ;;  %14309 = vmatprep.mubr.msk.f32.mxu1 %vm2251_vm2, %v16015_v36 }
 0x27e   : > { %14335 = vmatprep.mubr.msk.f32.mxu0 %vm2251_vm2, %v16017_v6  ;;  %14310 = vmatmul.mubr.msk.f32.gmra.mrb[70].mxu1 %vm2251_vm2, %v16011_v48  ;;  %v15903_v48 = vld [vmem:[%s17055_s18 + $0x68] sm:$0xff]  }
 0x27f   : > { %v17925_v42 = vadd.f32 %v16017_v6, %v2153_v52  ;;  %14336 = vmatmul.mubr.msk.f32.gmra.mrb[70].mxu0 %vm2251_vm2, %v16013_v49  ;;  %14342 = vmatprep.mubr.msk.bf16.mxu1 %vm1212_vm0, %v15898_v46  ;;  %v15901_v52 = vld [vmem:[%s17055_s18 + $0x58] sm:$0xff]   ;;  %v15902_v6 = vld [vmem:[%s17055_s18 + $0x60] sm:$0xff]  }
 0x280   : > { %15539 = vmatpush3.bf16.msra.mxu0 %v22278_v14  ;;  %v15905_v49 = vld [vmem:[%s17055_s18 + $0x78] sm:$0xff]  }
 0x281   : > { %14440 = vmatprep.subr.msk.mxu0 %vm2300_vm1, %v17934_v29 }
 0x282   : > { %14343 = vmatmul.mubr.msk.bf16.vlgmr.msra.gmra.mrb[72].mxu1 %vm1212_vm0, %v15899_v33 }
 0x283   : > { %14346 = vmatprep.mubr.msk.bf16.mxu1 %vm1212_vm0, %v15900_v45  ;;  %14415 = vmatpush3.msk.msra.mxu1 %vm2300_vm1, %v17934_v29 }
 0x284   : > { %14466 = vmatprep.subr.bf16.mxu1 %v17805_v57 }
 0x28a   : > { %14347 = vmatmul.mubr.msk.bf16.gmra.mrb[76].mxu1 %vm1212_vm0, %v15901_v52 }
 0x28b   : > { %14350 = vmatprep.mubr.msk.bf16.mxu1 %vm1212_vm0, %v15902_v6 }
 0x292   : > { %14351 = vmatmul.mubr.msk.bf16.gmra.mrb[80].mxu1 %vm1212_vm0, %v15903_v48 }
 0x293   : > { %14354 = vmatprep.mubr.msk.bf16.mxu1 %vm1212_vm0, %v15904_v16 }
 0x29a   : > { %14355 = vmatmul.mubr.msk.bf16.gmra.mrb[84].mxu1 %vm1212_vm0, %v15905_v49 }
 0x32f   : > { %v14290_v10 = vpop.f32.mrb[56].mxu1 }
 0x330   : > { %v2643_v50 = vmul.f32 0.0, %v14290_v10  ;;  %v14316_v53 = vpop.f32.mrb[56].mxu0  ;;  %v2370_v35 = vpop.f32.mrb[57].mxu1 }
 0x331   : > { %v2659_v21 = vmul.f32 %v14316_v53, %v17453_v37  ;;  %v2642_v17 = vmul.f32 0.0, %v2370_v35  ;;  %v2563_v55 = vpop.f32.mrb[57].mxu0 }
 0x332   : > { %v2658_v11 = vmul.f32 %v2563_v55, %v17437_v4 }
 0x333   : > { %v17971_v58 = vadd.f32 %v2659_v21, %v2643_v50 }
 0x334   : > { %v14293_v28 = vpop.f32.mrb[58].mxu1  ;;  %v14319_v56 = vpop.f32.mrb[58].mxu0  ;;  %v17973_v62 = vadd.f32 %v2658_v11, %v2642_v17 }
 0x335   : > { %v2645_v13 = vmul.f32 0.0, %v14293_v28  ;;  %v2380_v61 = vpop.f32.mrb[59].mxu1  ;;  %v2661_v43 = vmul.f32 %v14319_v56, %v17446_v32  ;;  %v2573_v46 = vpop.f32.mrb[59].mxu0 }
 0x336   : > { %v2644_v39 = vmul.f32 0.0, %v2380_v61  ;;  %v2660_v36 = vmul.f32 %v2573_v46, %v17427_v12 }
 0x337   : > { %v17977_v33 = vadd.f32 %v2661_v43, %v2645_v13 }
 0x338   : > { %v14296_v37 = vpop.f32.mrb[60].mxu1  ;;  %v17979_v45 = vadd.f32 %v2660_v36, %v2644_v39 }
 0x339   : > { %v2647_v4 = vmul.f32 0.0, %v14296_v37  ;;  %v14322_v52 = vpop.f32.mrb[60].mxu0  ;;  %v2390_v6 = vpop.f32.mrb[61].mxu1 }
 0x33a   : > { %v2663_v48 = vmul.f32 %v14322_v52, %v17528_v20  ;;  %v2646_v16 = vmul.f32 0.0, %v2390_v6  ;;  %v2583_v49 = vpop.f32.mrb[61].mxu0 }
 0x33b   : > { %v2662_v10 = vmul.f32 %v2583_v49, %v17511_v3 }
 0x33c   : > { %v14299_v50 = vpop.f32.mrb[62].mxu1  ;;  %v17983_v32 = vadd.f32 %v2663_v48, %v2647_v4 }
 0x33d   : > { %v2649_v53 = vmul.f32 0.0, %v14299_v50  ;;  %v14325_v35 = vpop.f32.mrb[62].mxu0  ;;  %v2400_v12 = vpop.f32.mrb[63].mxu1  ;;  %v17985_v21 = vadd.f32 %v2662_v10, %v2646_v16 }
 0x33e   : > { %v2665_v17 = vmul.f32 %v14325_v35, %v17521_v0  ;;  %v2648_v55 = vmul.f32 0.0, %v2400_v12  ;;  %v2593_v11 = vpop.f32.mrb[63].mxu0 }
 0x33f   : > { %v2664_v28 = vmul.f32 %v2593_v11, %v17505_v7 }
 0x340   : > { %v17989_v13 = vadd.f32 %v2665_v17, %v2649_v53 }
 0x341   : > { %v17991_v20 = vadd.f32 %v2664_v28, %v2648_v55 }
 0x342   : > { %v14302_v56 = vpop.f32.mrb[64].mxu1 }
 0x343   : > { %v2651_v3 = vmul.f32 0.0, %v14302_v56  ;;  %v14328_v61 = vpop.f32.mrb[64].mxu0  ;;  %v2410_v43 = vpop.f32.mrb[65].mxu1 }
 0x344   : > { %v2667_v39 = vmul.f32 %v14328_v61, %v17604_v38  ;;  %v2650_v46 = vmul.f32 0.0, %v2410_v43  ;;  %v2603_v36 = vpop.f32.mrb[65].mxu0 }
 0x345   : > { %v2666_v37 = vmul.f32 %v2603_v36, %v17587_v8 }
 0x346   : > { %v17995_v4 = vadd.f32 %v2667_v39, %v2651_v3 }
 0x347   : > { %v17997_v0 = vadd.f32 %v2666_v37, %v2650_v46 }
 0x348   : > { %v14305_v52 = vpop.f32.mrb[66].mxu1 }
 0x349   : > { %v2653_v7 = vmul.f32 0.0, %v14305_v52  ;;  %v14331_v6 = vpop.f32.mrb[66].mxu0  ;;  %v2420_v48 = vpop.f32.mrb[67].mxu1 }
 0x34a   : > { %v2669_v16 = vmul.f32 %v14331_v6, %v17597_v27  ;;  %v2652_v49 = vmul.f32 0.0, %v2420_v48  ;;  %v2613_v10 = vpop.f32.mrb[67].mxu0  ;;  %v22285_v48 = vld [vmem:[#allocation31_spill] sm:$0xff] }
 0x34b   : > { %v2668_v50 = vmul.f32 %v2613_v10, %v17582_v40 }
 0x34c   : > { %v14308_v53 = vpop.f32.mrb[68].mxu1  ;;  %v18001_v38 = vadd.f32 %v2669_v16, %v2653_v7  ;;  %v22283_v7 = vld [vmem:[#allocation27_spill] sm:$0xff] }
 0x34d   : > { %v2655_v35 = vmul.f32 0.0, %v14308_v53  ;;  %v14334_v12 = vpop.f32.mrb[68].mxu0  ;;  %v2430_v8 = vpop.f32.mrb[69].mxu1  ;;  %v18003_v17 = vadd.f32 %v2668_v50, %v2652_v49  ;;  %v22286_v49 = vld [vmem:[#allocation32_spill] sm:$0xff]  ;;  %v22287_v50 = vld [vmem:[#allocation37_spill] sm:$0xff] }
 0x34e   : > { %22279 = vst [vmem:[#allocation9_spill] sm:$0xff] %v18001_v38  ;;  %v2671_v55 = vmul.f32 %v14334_v12, %v17656_v44  ;;  %v2654_v11 = vmul.f32 0.0, %v2430_v8  ;;  %v2623_v28 = vpop.f32.mrb[69].mxu0  ;;  %v22284_v44 = vld [vmem:[#allocation33_spill] sm:$0xff]  ;;  %v2871_v10 = vrot.slane %v22286_v49, %v22283_v7  ;;  %v2883_v53 = vrot.slane %v22287_v50, %v22283_v7  ;;  %v22293_v50 = vld [vmem:[#allocation38_spill] sm:$0xff] }
 0x34f   : > { %22280 = vst [vmem:[#allocation10_spill] sm:$0xff] %v18003_v17  ;;  %v2670_v56 = vmul.f32 %v2623_v28, %v17647_v2  ;;  %v2879_v6 = vrot.slane %v22284_v44, %v22283_v7  ;;  %v3328_v2 = vrot.slane %v22285_v48, %v22283_v7  ;;  %v3324_v49 = vrot.slane %v22293_v50, %v22283_v7 }
 0x350   : > { %v18007_v3 = vadd.f32 %v2671_v55, %v2655_v35  ;;  %v22288_v35 = vld [vmem:[#allocation35_spill] sm:$0xff] }
 0x351   : > { %v14311_v27 = vpop.f32.mrb[70].mxu1  ;;  %v18009_v61 = vadd.f32 %v2670_v56, %v2654_v11  ;;  %v22290_v55 = vld [vmem:[#allocation39_spill] sm:$0xff] }
 0x352   : > { %22281 = vst [vmem:[#allocation114_spill] sm:$0xff] %v18007_v3  ;;  %v2657_v40 = vmul.f32 0.0, %v14311_v27  ;;  %v14337_v43 = vpop.f32.mrb[70].mxu0  ;;  %v2440_v39 = vpop.f32.mrb[71].mxu1  ;;  %v3332_v11 = vrot.slane %v22290_v55, %v22283_v7  ;;  %v22304_v55 = vld [vmem:[#allocation61_spill] sm:$0xff] }
 0x353   : > { %22282 = vst [vmem:[#allocation115_spill] sm:$0xff] %v18009_v61  ;;  %v2673_v46 = vmul.f32 %v14337_v43, %v17649_v1  ;;  %v2656_v36 = vmul.f32 0.0, %v2440_v39  ;;  %v2633_v37 = vpop.f32.mrb[71].mxu0  ;;  %v3320_v1 = vrot.slane %v22288_v35, %v22283_v7  ;;  %v22292_v39 = vld [vmem:[#allocation36_spill] sm:$0xff] }
 0x354   : > { %v2672_v52 = vmul.f32 %v2633_v37, %v17642_v18  ;;  %v2875_v37 = vrot.slane %v22292_v39, %v22283_v7 }
 0x355   : > { %v14344_v16 = vpop.f32.mrb[72].mxu1  ;;  %v18023_v12 = vadd.f32 %v2673_v46, %v2657_v40 }
 0x356   : > { %v2934_v8 = vadd.f32 %v14344_v16, %v2879_v6  ;;  %v2805_v18 = vpop.f32.mrb[73].mxu1  ;;  %v18027_v28 = vadd.f32 %v14344_v16, %v3328_v2  ;;  %v18029_v56 = vadd.f32 %v2672_v52, %v2656_v36  ;;  %v2895_v52 = vrot.slane %v17435_v15, %v22283_v7 }
 0x357   : > { %22289 = vst [vmem:[#allocation116_spill] sm:$0xff] %v18023_v12  ;;  %v2932_v27 = vadd.f32 %v2871_v10, %v2805_v18  ;;  %v14345_v43 = vpop.f32.mrb[74].mxu1  ;;  %v18035_v35 = vadd.f32 %v3320_v1, %v2805_v18  ;;  %v3344_v1 = vrot.slane %v17440_v63, %v22283_v7  ;;  %v22294_v18 = vld [vmem:[#allocation43_spill] sm:$0xff] }
 0x358   : > { %22291 = vst [vmem:[#allocation117_spill] sm:$0xff] %v18029_v56  ;;  %v2935_v40 = vadd.f32 %v14345_v43, %v2883_v53  ;;  %v2808_v46 = vpop.f32.mrb[75].mxu1  ;;  %v18037_v6 = vadd.f32 %v14345_v43, %v3332_v11  ;;  %v2950_v10 = vmul.f32 %v2934_v8, %v17461_v22  ;;  %v2887_v11 = vrot.slane %v22294_v18, %v22283_v7  ;;  %v22296_v43 = vld [vmem:[#allocation44_spill] sm:$0xff] }
 0x359   : > { %v2933_v48 = vadd.f32 %v2875_v37, %v2808_v46  ;;  %v2948_v2 = vmul.f32 %v2932_v27, %v17401_v5  ;;  %v18040_v16 = vadd.f32 %v3324_v49, %v2808_v46  ;;  %v22295_v27 = vld [vmem:[#allocation47_spill] sm:$0xff]  ;;  %v22297_v37 = vld [vmem:[#allocation48_spill] sm:$0xff]  ;;  %v3348_v8 = vrot.slane %v17457_v26, %v22283_v7 }
 0x35a   : > { %v2899_v49 = vrot.slane %v22295_v27, %v22283_v7  ;;  %v3336_v46 = vrot.slane %v22297_v37, %v22283_v7  ;;  %v22298_v27 = vld [vmem:[#allocation51_spill] sm:$0xff]  ;;  %v22301_v26 = vld [vmem:[#allocation52_spill] sm:$0xff] }
 0x35b   : > { %v2949_v36 = vmul.f32 %v2933_v48, %v17405_v60  ;;  %14390 = vmatprep.mubr.f32.mxu0 %v2948_v2  ;;  %v2891_v48 = vrot.slane %v22296_v43, %v22283_v7  ;;  %v2951_v22 = vmul.f32 %v2935_v40, %v22298_v27  ;;  %v22299_v43 = vld [vmem:[#allocation53_spill] sm:$0xff]  ;;  %v22300_v5 = vld [vmem:[#allocation3_spill] sm:$0xff]  ;;  %v22303_v27 = vld [vmem:[#allocation56_spill] sm:$0xff] }
 0x35c   : > { %v3340_v60 = vrot.slane %v22299_v43, %v22283_v7  ;;  %v2911_v43 = vrot.slane %v22303_v27, %v22283_v7  ;;  %v22310_v27 = vld [vmem:[#allocation60_spill] sm:$0xff] }
 0x35d   : > { %v14348_v53 = vpop.f32.mrb[76].mxu1  ;;  %14391 = vmatmul.mubr.f32.vlgmr.msra.gmra.mrb[72].mxu0 %v2949_v36 }
 0x35e   : > { %v2938_v2 = vadd.f32 %v14348_v53, %v2895_v52  ;;  %v2821_v15 = vpop.f32.mrb[77].mxu1  ;;  %14393 = vmatprep.mubr.f32.mxu0 %v2950_v10  ;;  %14441 = vmatpush3.msk.msra.mxu0 %vm2300_vm1, %v17934_v29  ;;  %v18060_v36 = vadd.f32 %v14348_v53, %v3344_v1 }
 0x35f   : > { %v2936_v18 = vadd.f32 %v2887_v11, %v2821_v15  ;;  %v14349_v63 = vpop.f32.mrb[78].mxu1  ;;  %15541 = vmatprep.subr.bf16.mxu0 %v22300_v5  ;;  %v18066_v52 = vadd.f32 %v3336_v46, %v2821_v15  ;;  %v22302_v11 = vld [vmem:[#allocation54_spill] sm:$0xff]  ;;  %v22305_v15 = vld [vmem:[#allocation57_spill] sm:$0xff] }
 0x360   : > { %v2939_v10 = vadd.f32 %v14349_v63, %v2899_v49  ;;  %v2824_v37 = vpop.f32.mrb[79].mxu1  ;;  %v18068_v50 = vadd.f32 %v14349_v63, %v3348_v8  ;;  %v2954_v44 = vmul.f32 %v2938_v2, %v22304_v55  ;;  %v3360_v49 = vrot.slane %v22305_v15, %v22283_v7  ;;  %v22306_v63 = vld [vmem:[#allocation55_spill] sm:$0xff] }
 0x361   : > { %v2937_v39 = vadd.f32 %v2891_v48, %v2824_v37  ;;  %14394 = vmatmul.mubr.f32.gmra.mrb[74].mxu0 %v2951_v22  ;;  %v2952_v1 = vmul.f32 %v2936_v18, %v22301_v26  ;;  %v18071_v53 = vadd.f32 %v3340_v60, %v2824_v37  ;;  %v2903_v22 = vrot.slane %v22306_v63, %v22283_v7  ;;  %v22307_v18 = vld [vmem:[#allocation62_spill] sm:$0xff]  ;;  %v22308_v48 = vld [vmem:[#allocation59_spill] sm:$0xff] }
 0x362   : > { %v2907_v60 = vrot.slane %v22307_v18, %v22283_v7  ;;  %v3352_v37 = vrot.slane %v22308_v48, %v22283_v7  ;;  %v3364_v15 = vrot.slane %v22310_v27, %v22283_v7  ;;  %v22312_v63 = vld [vmem:[#allocation66_spill] sm:$0xff]  ;;  %v22313_v18 = vld [vmem:[#allocation65_spill] sm:$0xff] }
 0x363   : > { %14396 = vmatprep.mubr.f32.mxu0 %v2952_v1  ;;  %v2953_v40 = vmul.f32 %v2937_v39, %v22302_v11  ;;  %v22309_v1 = vld [vmem:[#allocation58_spill] sm:$0xff]  ;;  %v2955_v26 = vmul.f32 %v2939_v10, %v22312_v63  ;;  %v3356_v56 = vrot.slane %v22313_v18, %v22283_v7  ;;  %v22318_v10 = vld [vmem:[#allocation64_spill] sm:$0xff] }
 0x364   : > { %v2915_v2 = vrot.slane %v22309_v1, %v22283_v7  ;;  %v22316_v1 = vld [vmem:[#allocation67_spill] sm:$0xff]  ;;  %v22319_v63 = vld [vmem:[#allocation70_spill] sm:$0xff] }
 0x365   : > { %v14352_v46 = vpop.f32.mrb[80].mxu1  ;;  %14397 = vmatmul.mubr.f32.gmra.mrb[76].mxu0 %v2953_v40 }
 0x366   : > { %v2942_v39 = vadd.f32 %v14352_v46, %v2911_v43  ;;  %v2837_v8 = vpop.f32.mrb[81].mxu1  ;;  %14399 = vmatprep.mubr.f32.mxu0 %v2954_v44  ;;  %v18089_v55 = vadd.f32 %v14352_v46, %v3360_v49  ;;  %v22317_v49 = vld [vmem:[#allocation68_spill] sm:$0xff] }
 0x367   : > { %v2940_v40 = vadd.f32 %v2903_v22, %v2837_v8  ;;  %v14353_v11 = vpop.f32.mrb[82].mxu1  ;;  %v18094_v12 = vadd.f32 %v3352_v37, %v2837_v8  ;;  %v2927_v22 = vrot.slane %v22318_v10, %v22283_v7  ;;  %v22320_v37 = vld [vmem:[#allocation69_spill] sm:$0xff] }
 0x368   : > { %22311 = vst [vmem:[#allocation3_spill] sm:$0xff] %v18089_v55  ;;  %v2943_v43 = vadd.f32 %v14353_v11, %v2915_v2  ;;  %v2840_v48 = vpop.f32.mrb[83].mxu1  ;;  %v18096_v44 = vadd.f32 %v14353_v11, %v3364_v15  ;;  %v2958_v18 = vmul.f32 %v2942_v39, %v22319_v63  ;;  %v3376_v8 = vrot.slane %v22320_v37, %v22283_v7  ;;  %v22321_v11 = vld [vmem:[#allocation40_spill] sm:$0xff]  ;;  %v22322_v15 = vld [vmem:[#allocation63_spill] sm:$0xff]  ;;  %v22325_v10 = vld [vmem:[#allocation73_spill] sm:$0xff] }
 0x369   : > { %22314 = vst [vmem:[#allocation118_spill] sm:$0xff] %v18094_v12  ;;  %v2941_v61 = vadd.f32 %v2907_v60, %v2840_v48  ;;  %14400 = vmatmul.mubr.f32.gmra.mrb[78].mxu0 %v2955_v26  ;;  %v2956_v3 = vmul.f32 %v2940_v40, %v22316_v1  ;;  %v18099_v27 = vadd.f32 %v3356_v56, %v2840_v48  ;;  %v22324_v40 = vld [vmem:[#allocation72_spill] sm:$0xff] }
 0x36a   : > { %22315 = vst [vmem:[#allocation119_spill] sm:$0xff] %v18096_v44  ;;  %v2919_v26 = vrot.slane %v22321_v11, %v22283_v7  ;;  %v2923_v56 = vrot.slane %v22322_v15, %v22283_v7  ;;  %v2931_v39 = vrot.slane %v22324_v40, %v22283_v7  ;;  %v3380_v37 = vrot.slane %v22325_v10, %v22283_v7  ;;  %v22327_v11 = vld [vmem:[#allocation76_spill] sm:$0xff]  ;;  %v22328_v15 = vld [vmem:[#allocation74_spill] sm:$0xff]  ;;  %v22331_v40 = vld [vmem:[#allocation75_spill] sm:$0xff] }
 0x36b   : > { %14402 = vmatprep.mubr.f32.mxu0 %v2956_v3  ;;  %v2957_v46 = vmul.f32 %v2941_v61, %v22317_v49  ;;  %v22323_v3 = vld [vmem:[#allocation71_spill] sm:$0xff]  ;;  %v2959_v1 = vmul.f32 %v2943_v43, %v22327_v11  ;;  %v3372_v55 = vrot.slane %v22328_v15, %v22283_v7  ;;  %v22340_v11 = vld [vmem:[#allocation97_spill] sm:$0xff] }
 0x36c   : > { %v3368_v60 = vrot.slane %v22323_v3, %v22283_v7  ;;  %v22335_v7 = vld [vmem:[#allocation11_spill] sm:$0xff] }
 0x36d   : > { %v14356_v2 = vpop.f32.mrb[84].mxu1  ;;  %14403 = vmatmul.mubr.f32.gmra.mrb[80].mxu0 %v2957_v46 }
 0x36e   : > { %v2946_v61 = vadd.f32 %v14356_v2, %v2927_v22  ;;  %v2853_v48 = vpop.f32.mrb[85].mxu1  ;;  %14405 = vmatprep.mubr.f32.mxu0 %v2958_v18  ;;  %v18117_v63 = vadd.f32 %v14356_v2, %v3376_v8  ;;  %v22333_v8 = vld [vmem:[#allocation77_spill] sm:$0xff] }
 0x36f   : > { %v2944_v46 = vadd.f32 %v2919_v26, %v2853_v48  ;;  %v14357_v49 = vpop.f32.mrb[86].mxu1  ;;  %v18122_v17 = vadd.f32 %v3368_v60, %v2853_v48  ;;  %v22334_v26 = vld [vmem:[#allocation78_spill] sm:$0xff]  ;;  %v2985_v48 = vpop.permute.xlu1 %2984 }
 0x370   : > { %22326 = vst [vmem:[#allocation120_spill] sm:$0xff] %v18117_v63  ;;  %v2947_v22 = vadd.f32 %v14357_v49, %v2931_v39  ;;  %v2856_v3 = vpop.f32.mrb[87].mxu1  ;;  %v18124_v18 = vadd.f32 %v14357_v49, %v3380_v37  ;;  %v2962_v43 = vmul.f32 %v2946_v61, %v22334_v26  ;;  %v2981_v39 = vpop.permute.xlu0 %2980 }
 0x371   : > { %22329 = vst [vmem:[#allocation121_spill] sm:$0xff] %v18122_v17  ;;  %v2945_v44 = vadd.f32 %v2923_v56, %v2856_v3  ;;  %14406 = vmatmul.mubr.f32.gmra.mrb[82].mxu0 %v2959_v1  ;;  %v2960_v38 = vmul.f32 %v2944_v46, %v22331_v40  ;;  %v18127_v10 = vadd.f32 %v3372_v55, %v2856_v3  ;;  %v22336_v3 = vld [vmem:[#allocation95_spill] sm:$0xff] }
 0x372   : > { %22330 = vst [vmem:[#allocation122_spill] sm:$0xff] %v18124_v18  ;;  %v2963_v60 = vmul.f32 %v2947_v22, %v22335_v7 }
 0x373   : > { %22332 = vst [vmem:[#allocation123_spill] sm:$0xff] %v18127_v10  ;;  %14408 = vmatprep.mubr.f32.mxu0 %v2960_v38  ;;  %v2961_v2 = vmul.f32 %v2945_v44, %v22333_v8  ;;  %v2987_v49 = vpop.permute.xlu1 %2986  ;;  %v22338_v8 = vld [vmem:[#allocation96_spill] sm:$0xff]  ;;  %v22342_v10 = vld [vmem:[#allocation98_spill] sm:$0xff] }
 0x374   : > { %v2983_v37 = vpop.permute.xlu0 %2982 }
 0x375   : > { %14409 = vmatmul.mubr.f32.gmra.mrb[84].mxu0 %v2961_v2 }
 0x376   : > { %14411 = vmatprep.mubr.f32.mxu0 %v2962_v43 }
 0x377   : > { %v2991_v56 = vpop.permute.xlu1 %2990 }
 0x378   : > { %v2989_v44 = vpop.permute.xlu0 %2988 }
 0x379   : > { %14412 = vmatmul.mubr.f32.gmra.mrb[86].mxu0 %v2963_v60 }
 0x37b   : > { %v2995_v43 = vpop.permute.xlu1 %2994 }
 0x430   : > { %v14392_v1 = vpop.f32.mrb[72].mxu0 }
 0x431   : > { %v3100_v15 = vadd.f32 %v14392_v1, %v2983_v37  ;;  %v3094_v46 = vpop.f32.mrb[73].mxu0 }
 0x432   : > { %v3095_v55 = vadd.f32 %v3094_v46, %v2981_v39 }
 0x433   : > { %v18133_v38 = vmax.f32 %v22336_v3, %v3100_v15 }
 0x434   : > { %v18136_v61 = vmax.f32 %v22338_v8, %v3095_v55  ;;  %v14395_v2 = vpop.f32.mrb[74].mxu0 }
 0x435   : > { %22337 = vst [vmem:[#allocation95_spill] sm:$0xff] %v18133_v38  ;;  %v3190_v22 = vsub.f32 %v22336_v3, %v18133_v38  ;;  %v3238_v60 = vsub.f32 %v3100_v15, %v18133_v38  ;;  %v3110_v7 = vadd.f32 %v14395_v2, %v2987_v49  ;;  %v3104_v26 = vpop.f32.mrb[75].mxu0 }
 0x436   : > { %22339 = vst [vmem:[#allocation96_spill] sm:$0xff] %v18136_v61  ;;  %v3189_v37 = vsub.f32 %v22338_v8, %v18136_v61  ;;  %v3237_v39 = vsub.f32 %v3095_v55, %v18136_v61  ;;  %v3105_v1 = vadd.f32 %v3104_v26, %v2985_v48  ;;  %v2993_v26 = vpop.permute.xlu0 %2992 }
 0x437   : > { %v3207_v46 = vmul.f32 1.442695, %v3190_v22  ;;  %v3255_v40 = vmul.f32 1.442695, %v3238_v60  ;;  %v18145_v63 = vmax.f32 %v22340_v11, %v3110_v7  ;;  %v2999_v60 = vpop.permute.xlu1 %2998 }
 0x438   : > { %v3205_v18 = vmul.f32 1.442695, %v3189_v37  ;;  %v3253_v17 = vmul.f32 1.442695, %v3237_v39  ;;  %v18148_v12 = vmax.f32 %v22342_v10, %v3105_v1  ;;  %v14398_v3 = vpop.f32.mrb[76].mxu0 }
 0x439   : > { %22341 = vst [vmem:[#allocation97_spill] sm:$0xff] %v18145_v63  ;;  %16018 = vpow2.f32 %v3207_v46  ;;  %v3192_v15 = vsub.f32 %v22340_v11, %v18145_v63  ;;  %v3240_v8 = vsub.f32 %v3110_v7, %v18145_v63  ;;  %v3120_v49 = vadd.f32 %v14398_v3, %v2991_v56  ;;  %v3114_v55 = vpop.f32.mrb[77].mxu0  ;;  %v22344_v46 = vld [vmem:[#allocation99_spill] sm:$0xff]  ;;  %v22346_v56 = vld [vmem:[#allocation100_spill] sm:$0xff] }
 0x43a   : > { %22343 = vst [vmem:[#allocation98_spill] sm:$0xff] %v18148_v12  ;;  %16020 = vpow2.f32 %v3255_v40  ;;  %v3191_v48 = vsub.f32 %v22342_v10, %v18148_v12  ;;  %v3239_v2 = vsub.f32 %v3105_v1, %v18148_v12  ;;  %v3115_v22 = vadd.f32 %v3114_v55, %v2989_v44 }
 0x43b   : > { %16022 = vpow2.f32 %v3205_v18  ;;  %v3211_v37 = vmul.f32 1.442695, %v3192_v15  ;;  %v3259_v39 = vmul.f32 1.442695, %v3240_v8  ;;  %v18157_v61 = vmax.f32 %v22344_v46, %v3120_v49 }
 0x43c   : > { %16024 = vpow2.f32 %v3253_v17  ;;  %v3209_v11 = vmul.f32 1.442695, %v3191_v48  ;;  %v3257_v7 = vmul.f32 1.442695, %v3239_v2  ;;  %v18160_v3 = vmax.f32 %v22346_v56, %v3115_v22  ;;  %v14401_v40 = vpop.f32.mrb[78].mxu0  ;;  %v22348_v2 = vld [vmem:[#allocation101_spill] sm:$0xff] }
 0x43d   : > { %22345 = vst [vmem:[#allocation99_spill] sm:$0xff] %v18157_v61  ;;  %16026 = vpow2.f32 %v3211_v37  ;;  %v3194_v10 = vsub.f32 %v22344_v46, %v18157_v61  ;;  %v3242_v44 = vsub.f32 %v3120_v49, %v18157_v61  ;;  %v3130_v1 = vadd.f32 %v14401_v40, %v2995_v43  ;;  %v3124_v18 = vpop.f32.mrb[79].mxu0  ;;  %v2997_v37 = vpop.permute.xlu0 %2996  ;;  %v22350_v49 = vld [vmem:[#allocation102_spill] sm:$0xff] }
 0x43e   : > { %22347 = vst [vmem:[#allocation100_spill] sm:$0xff] %v18160_v3  ;;  %16028 = vpow2.f32 %v3259_v39  ;;  %v3193_v15 = vsub.f32 %v22346_v56, %v18160_v3  ;;  %v3241_v17 = vsub.f32 %v3115_v22, %v18160_v3  ;;  %v3125_v8 = vadd.f32 %v3124_v18, %v2993_v26  ;;  %v3003_v40 = vpop.permute.xlu1 %3002  ;;  %v22352_v3 = vld [vmem:[#allocation103_spill] sm:$0xff] }
 0x43f   : > { %16030 = vpow2.f32 %v3209_v11  ;;  %v3215_v55 = vmul.f32 1.442695, %v3194_v10  ;;  %v3263_v48 = vmul.f32 1.442695, %v3242_v44  ;;  %v18169_v12 = vmax.f32 %v22348_v2, %v3130_v1 }
 0x440   : > { %16032 = vpow2.f32 %v3257_v7  ;;  %v3213_v46 = vmul.f32 1.442695, %v3193_v15  ;;  %v3261_v63 = vmul.f32 1.442695, %v3241_v17  ;;  %v18172_v43 = vmax.f32 %v22350_v49, %v3125_v8  ;;  %v14404_v39 = vpop.f32.mrb[80].mxu0 }
 0x441   : > { %22349 = vst [vmem:[#allocation101_spill] sm:$0xff] %v18169_v12  ;;  %16034 = vpow2.f32 %v3215_v55  ;;  %v3196_v22 = vsub.f32 %v22348_v2, %v18169_v12  ;;  %v3244_v26 = vsub.f32 %v3130_v1, %v18169_v12  ;;  %v3140_v11 = vadd.f32 %v14404_v39, %v2999_v60  ;;  %v3134_v56 = vpop.f32.mrb[81].mxu0  ;;  %v22354_v2 = vld [vmem:[#allocation104_spill] sm:$0xff] }
 0x442   : > { %22351 = vst [vmem:[#allocation102_spill] sm:$0xff] %v18172_v43  ;;  %16036 = vpow2.f32 %v3263_v48  ;;  %v3195_v10 = vsub.f32 %v22350_v49, %v18172_v43  ;;  %v3243_v7 = vsub.f32 %v3125_v8, %v18172_v43  ;;  %v3135_v44 = vadd.f32 %v3134_v56, %v2997_v37 }
 0x443   : > { %v16019_v18 = vpop.eup %16018  ;;  %16038 = vpow2.f32 %v3213_v46  ;;  %v3219_v15 = vmul.f32 1.442695, %v3196_v22  ;;  %v3267_v17 = vmul.f32 1.442695, %v3244_v26  ;;  %v18181_v55 = vmax.f32 %v22352_v3, %v3140_v11  ;;  %v22355_v46 = vld [vmem:[#allocation106_spill] sm:$0xff]  ;;  %v3001_v22 = vpop.permute.xlu0 %3000 }
 0x444   : > { %v16021_v61 = vpop.eup %16020  ;;  %v3286_v38 = vmul.f32 %v16019_v18, %v22354_v2  ;;  %16040 = vpow2.f32 %v3261_v63  ;;  %v3217_v60 = vmul.f32 1.442695, %v3195_v10  ;;  %v3265_v1 = vmul.f32 1.442695, %v3243_v7  ;;  %v14407_v48 = vpop.f32.mrb[82].mxu0  ;;  %v22358_v2 = vld [vmem:[#allocation105_spill] sm:$0xff] }
 0x445   : > { %22353 = vst [vmem:[#allocation103_spill] sm:$0xff] %v18181_v55  ;;  %v16023_v39 = vpop.eup %16022  ;;  %16042 = vpow2.f32 %v3219_v15  ;;  %v3198_v8 = vsub.f32 %v22352_v3, %v18181_v55  ;;  %v3246_v37 = vsub.f32 %v3140_v11, %v18181_v55  ;;  %v18188_v49 = vmax.f32 %v22355_v46, %v3135_v44  ;;  %v3144_v26 = vpop.f32.mrb[83].mxu0 }
 0x446   : > { %v16025_v56 = vpop.eup %16024  ;;  %v18190_v43 = vadd.f32 %v16021_v61, %v3286_v38  ;;  %v3285_v63 = vmul.f32 %v16023_v39, %v22358_v2  ;;  %16044 = vpow2.f32 %v3267_v17  ;;  %v3150_v10 = vadd.f32 %v14407_v48, %v3003_v40  ;;  %14416 = vmatprep.mubr.msk.f32.mxu1 %vm2251_vm2, %v16023_v39  ;;  %v3007_v7 = vpop.permute.xlu1 %3006  ;;  %v22360_v2 = vld [vmem:[#allocation108_spill] sm:$0xff] }
 0x447   : > { %22356 = vst [vmem:[#allocation104_spill] sm:$0xff] %v18188_v49  ;;  %v16027_v15 = vpop.eup %16026  ;;  %16046 = vpow2.f32 %v3217_v60  ;;  %v3223_v3 = vmul.f32 1.442695, %v3198_v8  ;;  %v3271_v12 = vmul.f32 1.442695, %v3246_v37  ;;  %v3197_v11 = vsub.f32 %v22355_v46, %v18188_v49  ;;  %14442 = vmatprep.mubr.msk.f32.mxu0 %vm2251_vm2, %v16025_v56  ;;  %14417 = vmatmul.mubr.msk.f32.vlgmr.msra.gmra.mrb[88].mxu1 %vm2251_vm2, %v16019_v18  ;;  %v22361_v8 = vld [vmem:[#allocation107_spill] sm:$0xff] }
 0x448   : > { %22357 = vst [vmem:[#allocation106_spill] sm:$0xff] %v18190_v43  ;;  %v16029_v38 = vpop.eup %16028  ;;  %v18198_v43 = vadd.f32 %v16025_v56, %v3285_v63  ;;  %v3288_v17 = vmul.f32 %v16027_v15, %v22360_v2  ;;  %16048 = vpow2.f32 %v3265_v1  ;;  %v3245_v40 = vsub.f32 %v3135_v44, %v18188_v49  ;;  %14443 = vmatmul.mubr.msk.f32.vlgmr.msra.gmra.mrb[88].mxu0 %vm2251_vm2, %v16021_v61  ;;  %v14410_v60 = vpop.f32.mrb[84].mxu0  ;;  %v18210_v56 = vld [vmem:[%s21877_s5 + $0x8] sm:$0xff]   ;;  %v22364_v44 = vld [vmem:[#allocation109_spill] sm:$0xff]  ;;  %v22366_v2 = vld [vmem:[#allocation110_spill] sm:$0xff] }
 0x449   : > { %14467 = vmatpush3.bf16.msra.mxu1 %v17805_v57  ;;  %v16031_v48 = vpop.eup %16030  ;;  %16050 = vpow2.f32 %v3223_v3  ;;  %v3221_v39 = vmul.f32 1.442695, %v3197_v11  ;;  %v18205_v37 = vmax.f32 %v22361_v8, %v3150_v10  ;;  %v3145_v18 = vadd.f32 %v3144_v26, %v3001_v22  ;;  %v3154_v46 = vpop.f32.mrb[85].mxu0  ;;  %15543 = vmatpush3.bf16.msra.mxu0 %v22300_v5  ;;  %v22365_v22 = vld [vmem:[#allocation4_spill] sm:$0xff] }
 0x44a   : > { %22359 = vst [vmem:[#allocation105_spill] sm:$0xff] %v18198_v43  ;;  %14468 = vmatprep.subr.bf16.mxu1 %v18210_v56  ;;  %v16033_v61 = vpop.eup %16032  ;;  %v18214_v57 = vadd.f32 %v16029_v38, %v3288_v17  ;;  %v3287_v1 = vmul.f32 %v16031_v48, %v22364_v44  ;;  %16052 = vpow2.f32 %v3271_v12  ;;  %v3269_v63 = vmul.f32 1.442695, %v3245_v40  ;;  %14419 = vmatprep.mubr.msk.f32.mxu1 %vm2251_vm2, %v16031_v48  ;;  %v3005_v17 = vpop.permute.xlu0 %3004  ;;  %v22368_v48 = vld [vmem:[#allocation5_spill] sm:$0xff] }
 0x44b   : > { %22362 = vst [vmem:[#allocation108_spill] sm:$0xff] %v18205_v37  ;;  %15545 = vmatprep.subr.bf16.mxu0 %v22365_v22  ;;  %v16035_v26 = vpop.eup %16034  ;;  %16054 = vpow2.f32 %v3221_v39  ;;  %v3200_v3 = vsub.f32 %v22361_v8, %v18205_v37  ;;  %v3248_v11 = vsub.f32 %v3150_v10, %v18205_v37  ;;  %v18223_v43 = vmax.f32 %v22366_v2, %v3145_v18  ;;  %v3011_v8 = vpop.permute.xlu1 %3010 }
 0x44c   : > { %22363 = vst [vmem:[#allocation107_spill] sm:$0xff] %v18214_v57  ;;  %14445 = vmatprep.mubr.msk.f32.mxu0 %vm2251_vm2, %v16033_v61  ;;  %14420 = vmatmul.mubr.msk.f32.gmra.mrb[90].mxu1 %vm2251_vm2, %v16027_v15  ;;  %v16037_v12 = vpop.eup %16036  ;;  %v18227_v40 = vadd.f32 %v16033_v61, %v3287_v1  ;;  %v3290_v44 = vmul.f32 %v16035_v26, %v22368_v48  ;;  %16056 = vpow2.f32 %v3269_v63  ;;  %v14413_v57 = vpop.f32.mrb[86].mxu0 }
 0x44d   : > { %22367 = vst [vmem:[#allocation109_spill] sm:$0xff] %v18223_v43  ;;  %v3160_v39 = vadd.f32 %v14410_v60, %v3007_v7  ;;  %14446 = vmatmul.mubr.msk.f32.gmra.mrb[90].mxu0 %vm2251_vm2, %v16029_v38  ;;  %14469 = vmatpush3.bf16.msra.mxu1 %v18210_v56  ;;  %v16039_v10 = vpop.eup %16038  ;;  %v3227_v37 = vmul.f32 1.442695, %v3200_v3  ;;  %v3275_v49 = vmul.f32 1.442695, %v3248_v11  ;;  %v3199_v55 = vsub.f32 %v22366_v2, %v18223_v43  ;;  %v3164_v61 = vpop.f32.mrb[87].mxu0 }
 0x44e   : > { %v3247_v15 = vsub.f32 %v3145_v18, %v18223_v43  ;;  %15547 = vmatpush3.bf16.msra.mxu0 %v22365_v22  ;;  %14542 = vmatprep.subr.msk.mxu1 %vm2300_vm1, %v17934_v29  ;;  %v16041_v7 = vpop.eup %16040  ;;  %v18238_v38 = vadd.f32 %v16037_v12, %v3290_v44  ;;  %v22369_v60 = vld [vmem:[#allocation112_spill] sm:$0xff]  ;;  %v3155_v3 = vadd.f32 %v3154_v46, %v3005_v17 }
 0x44f   : > { %v3289_v1 = vmul.f32 %v16039_v10, %v22369_v60  ;;  %v18242_v63 = vmax.f32 %v17848_v47, %v3160_v39  ;;  %14422 = vmatprep.mubr.msk.f32.mxu1 %vm2251_vm2, %v16039_v10  ;;  %v16043_v11 = vpop.eup %16042  ;;  %16058 = vpow2.f32 %v3227_v37  ;;  %v3225_v18 = vmul.f32 1.442695, %v3199_v55  ;;  %14448 = vmatprep.mubr.msk.f32.mxu0 %vm2251_vm2, %v16041_v7 }
 0x450   : > { %v3273_v2 = vmul.f32 1.442695, %v3247_v15  ;;  %v3170_v48 = vadd.f32 %v14413_v57, %v3011_v8  ;;  %14423 = vmatmul.mubr.msk.f32.gmra.mrb[92].mxu1 %vm2251_vm2, %v16035_v26  ;;  %v16045_v43 = vpop.eup %16044  ;;  %v3292_v60 = vmul.f32 %v16043_v11, %v17867_v41  ;;  %16060 = vpow2.f32 %v3275_v49  ;;  %15549 = vmatprep.subr.bf16.mxu0 %v22267_v25  ;;  %v22370_v57 = vld [vmem:[#allocation111_spill] sm:$0xff] }
 0x451   : > { %v18247_v44 = vadd.f32 %v16041_v7, %v3289_v1  ;;  %v3202_v46 = vsub.f32 %v17848_v47, %v18242_v63  ;;  %14449 = vmatmul.mubr.msk.f32.gmra.mrb[92].mxu0 %vm2251_vm2, %v16037_v12  ;;  %v16047_v55 = vpop.eup %16046  ;;  %16062 = vpow2.f32 %v3225_v18  ;;  %v3250_v37 = vsub.f32 %v3160_v39, %v18242_v63  ;;  %v3009_v1 = vpop.permute.xlu0 %3008 }
 0x452   : > { %v18256_v17 = vmax.f32 %v22370_v57, %v3155_v3  ;;  %v18259_v26 = vmax.f32 %v17872_v51, %v3170_v48  ;;  %15551 = vmatpush3.bf16.msra.mxu0 %v22267_v25  ;;  %v16049_v41 = vpop.eup %16048  ;;  %v18262_v49 = vadd.f32 %v16045_v43, %v3292_v60  ;;  %v3291_v47 = vmul.f32 %v16047_v55, %v17876_v24 }
 0x453   : > { %16064 = vpow2.f32 %v3273_v2  ;;  %v3231_v12 = vmul.f32 1.442695, %v3202_v46  ;;  %14425 = vmatprep.mubr.msk.f32.mxu1 %vm2251_vm2, %v16047_v55  ;;  %15553 = vmatprep.subr.bf16.mxu0 %v22271_v23  ;;  %v16051_v39 = vpop.eup %16050  ;;  %v3279_v8 = vmul.f32 1.442695, %v3250_v37  ;;  %v22372_v2 = vld [vmem:[#allocation6_spill] sm:$0xff] }
 0x454   : > { %22371 = vst [vmem:[#allocation110_spill] sm:$0xff] %v18256_v17  ;;  %v3201_v10 = vsub.f32 %v22370_v57, %v18256_v17  ;;  %v3249_v15 = vsub.f32 %v3155_v3, %v18256_v17  ;;  %v3204_v7 = vsub.f32 %v17872_v51, %v18259_v26  ;;  %14451 = vmatprep.mubr.msk.f32.mxu0 %vm2251_vm2, %v16049_v41  ;;  %v16053_v24 = vpop.eup %16052 }
 0x455   : > { %14426 = vmatmul.mubr.msk.f32.gmra.mrb[94].mxu1 %vm2251_vm2, %v16043_v11  ;;  %v18274_v18 = vadd.f32 %v16049_v41, %v3291_v47  ;;  %v3294_v60 = vmul.f32 %v16051_v39, %v22372_v2  ;;  %16066 = vpow2.f32 %v3231_v12  ;;  %v3252_v46 = vsub.f32 %v3170_v48, %v18259_v26  ;;  %14452 = vmatmul.mubr.msk.f32.gmra.mrb[94].mxu0 %vm2251_vm2, %v16045_v43  ;;  %v16055_v55 = vpop.eup %16054 }
 0x456   : > { %v3229_v3 = vmul.f32 1.442695, %v3201_v10  ;;  %v3277_v37 = vmul.f32 1.442695, %v3249_v15  ;;  %v3235_v57 = vmul.f32 1.442695, %v3204_v7  ;;  %15555 = vmatpush3.bf16.msra.mxu0 %v22271_v23  ;;  %v16057_v51 = vpop.eup %16056  ;;  %v3293_v11 = vmul.f32 %v16055_v55, %v17893_v30  ;;  %14428 = vmatprep.mubr.msk.f32.mxu1 %vm2251_vm2, %v16055_v55 }
 0x457   : > { %v18280_v17 = vadd.f32 %v16053_v24, %v3294_v60  ;;  %16068 = vpow2.f32 %v3279_v8  ;;  %v3165_v41 = vadd.f32 %v3164_v61, %v3009_v1  ;;  %15557 = vmatprep.subr.bf16.mxu0 %v22272_v9  ;;  %v3283_v48 = vmul.f32 1.442695, %v3252_v46  ;;  %14454 = vmatprep.mubr.msk.f32.mxu0 %vm2251_vm2, %v16057_v51  ;;  %v22373_v10 = vld [vmem:[#allocation8_spill] sm:$0xff]  ;;  %v22375_v55 = vld [vmem:[#allocation113_spill] sm:$0xff] }
 0x458   : > { %16070 = vpow2.f32 %v3229_v3  ;;  %v18287_v43 = vadd.f32 %v16057_v51, %v3293_v11 }
 0x459   : > { %14429 = vmatmul.mubr.msk.f32.gmra.mrb[96].mxu1 %vm2251_vm2, %v16051_v39  ;;  %16072 = vpow2.f32 %v3277_v37  ;;  %v18290_v47 = vmax.f32 %v17883_v59, %v3165_v41  ;;  %14455 = vmatmul.mubr.msk.f32.gmra.mrb[96].mxu0 %vm2251_vm2, %v16053_v24  ;;  %v16059_v30 = vpop.eup %16058  ;;  %v22374_v24 = vld [vmem:[#allocation7_spill] sm:$0xff] }
 0x45a   : > { %16074 = vpow2.f32 %v3235_v57  ;;  %15559 = vmatpush3.bf16.msra.mxu0 %v22272_v9  ;;  %v16061_v61 = vpop.eup %16060  ;;  %v3296_v12 = vmul.f32 %v16059_v30, %v17897_v54 }
 0x45b   : > { %v3203_v8 = vsub.f32 %v17883_v59, %v18290_v47  ;;  %v3251_v39 = vsub.f32 %v3165_v41, %v18290_v47  ;;  %15561 = vmatprep.subr.bf16.mxu0 %v22373_v10  ;;  %v16063_v15 = vpop.eup %16062  ;;  %16076 = vpow2.f32 %v3283_v48 }
 0x45c   : > { %v18299_v1 = vadd.f32 %v16061_v61, %v3296_v12  ;;  %v3295_v2 = vmul.f32 %v16063_v15, %v22374_v24  ;;  %14431 = vmatprep.mubr.msk.f32.mxu1 %vm2251_vm2, %v16063_v15 }
 0x45d   : > { %v16065_v7 = vpop.eup %16064  ;;  %v3233_v60 = vmul.f32 1.442695, %v3203_v8  ;;  %v3281_v46 = vmul.f32 1.442695, %v3251_v39  ;;  %14432 = vmatmul.mubr.msk.f32.gmra.mrb[98].mxu1 %vm2251_vm2, %v16059_v30 }
 0x45e   : > { %14457 = vmatprep.mubr.msk.f32.mxu0 %vm2251_vm2, %v16065_v7  ;;  %v18305_v54 = vadd.f32 %v16065_v7, %v3295_v2  ;;  %15563 = vmatpush3.bf16.msra.mxu0 %v22373_v10  ;;  %v18346_v2 = vld [vmem:[%s21877_s5] sm:$0xff]  }
 0x45f   : > { %v16067_v59 = vpop.eup %16066  ;;  %16078 = vpow2.f32 %v3233_v60  ;;  %14458 = vmatmul.mubr.msk.f32.gmra.mrb[98].mxu0 %vm2251_vm2, %v16061_v61  ;;  %15565 = vmatprep.subr.bf16.mxu0 %v22277_v34  ;;  %v15909_v60 = vld [vmem:[%s17055_s18 + $0x98] sm:$0xff]  }
 0x460   : > { %v3298_v3 = vmul.f32 %v16067_v59, %v22375_v55  ;;  %16080 = vpow2.f32 %v3281_v46  ;;  %v15910_v46 = vld [vmem:[%s17055_s18 + $0xa0] sm:$0xff]   ;;  %v15912_v55 = vld [vmem:[%s17055_s18 + $0xb0] sm:$0xff]  }
 0x461   : > { %v16069_v37 = vpop.eup %16068 }
 0x462   : > { %v16071_v57 = vpop.eup %16070  ;;  %v18311_v51 = vadd.f32 %v16069_v37, %v3298_v3  ;;  %15567 = vmatpush3.bf16.msra.mxu0 %v22277_v34  ;;  %v18360_v3 = vld [vmem:[%s17707_s23 + $0x8] sm:$0xff] }
 0x463   : > { %v16073_v11 = vpop.eup %16072  ;;  %v3297_v41 = vmul.f32 %v16071_v57, %v17913_v19  ;;  %14434 = vmatprep.mubr.msk.f32.mxu1 %vm2251_vm2, %v16071_v57  ;;  %15569 = vmatprep.subr.bf16.mxu0 %v22278_v14  ;;  %v15906_v19 = vld [vmem:[%s17055_s18 + $0x80] sm:$0xff]   ;;  %v18370_v57 = vld [vmem:[%s17707_s23 + $0x18] sm:$0xff] }
 0x464   : > { %v16075_v48 = vpop.eup %16074  ;;  %14460 = vmatprep.mubr.msk.f32.mxu0 %vm2251_vm2, %v16073_v11  ;;  %14435 = vmatmul.mubr.msk.f32.gmra.mrb[100].mxu1 %vm2251_vm2, %v16067_v59  ;;  %v15911_v59 = vld [vmem:[%s17055_s18 + $0xa8] sm:$0xff]  }
 0x465   : > { %v18317_v30 = vadd.f32 %v16073_v11, %v3297_v41  ;;  %v3300_v61 = vmul.f32 %v16075_v48, %v17918_v31  ;;  %14461 = vmatmul.mubr.msk.f32.gmra.mrb[100].mxu0 %vm2251_vm2, %v16069_v37  ;;  %v16077_v12 = vpop.eup %16076  ;;  %v15907_v31 = vld [vmem:[%s17055_s18 + $0x88] sm:$0xff]   ;;  %4107 = vrot.lane.b32.xlu1 %v18360_v3, %s16750_s25  ;;  %v18365_v37 = vld [vmem:[%s17707_s23] sm:$0xff]  ;;  %v18375_v11 = vld [vmem:[%s17707_s23 + $0x10] sm:$0xff] }
 0x466   : > { %15571 = vmatpush3.bf16.msra.mxu0 %v22278_v14  ;;  %4105 = vrot.lane.b32.xlu0 %v18365_v37, %s16750_s25  ;;  %v18380_v41 = vld [vmem:[%s17707_s23 + $0x28] sm:$0xff] }
 0x467   : > { %v18322_v8 = vadd.f32 %v16077_v12, %v3300_v61  ;;  %14568 = vmatprep.subr.msk.mxu0 %vm2300_vm1, %v17934_v29  ;;  %22376 = vst [vmem:[#allocation5_spill] sm:$0xff] %v18380_v41  ;;  %v18390_v61 = vld [vmem:[%s17707_s23 + $0x38] sm:$0xff] }
 0x468   : > { %22378 = vst [vmem:[#allocation111_spill] sm:$0xff] %v18390_v61 }
 0x469   : > { %v16079_v39 = vpop.eup %16078  ;;  %4111 = vrot.lane.b32.xlu1 %v18370_v57, %s16750_s25 }
 0x46a   : > { %v16081_v15 = vpop.eup %16080  ;;  %v3299_v7 = vmul.f32 %v16079_v39, %v17925_v42  ;;  %14437 = vmatprep.mubr.msk.f32.mxu1 %vm2251_vm2, %v16079_v39  ;;  %v15908_v42 = vld [vmem:[%s17055_s18 + $0x90] sm:$0xff]   ;;  %4109 = vrot.lane.b32.xlu0 %v18375_v11, %s16750_s25  ;;  %v18405_v39 = vld [vmem:[%s17707_s23 + $0x40] sm:$0xff] }
 0x46b   : > { %14463 = vmatprep.mubr.msk.f32.mxu0 %vm2251_vm2, %v16081_v15  ;;  %14438 = vmatmul.mubr.msk.f32.gmra.mrb[102].mxu1 %vm2251_vm2, %v16075_v48  ;;  %v18385_v48 = vld [vmem:[%s17707_s23 + $0x20] sm:$0xff]  ;;  %22381 = vst [vmem:[#allocation7_spill] sm:$0xff] %v18405_v39 }
 0x46c   : > { %v18332_v24 = vadd.f32 %v16081_v15, %v3299_v7  ;;  %14464 = vmatmul.mubr.msk.f32.gmra.mrb[102].mxu0 %vm2251_vm2, %v16077_v12  ;;  %14470 = vmatprep.mubr.msk.bf16.mxu1 %vm1212_vm0, %v15906_v19  ;;  %22377 = vst [vmem:[#allocation112_spill] sm:$0xff] %v18385_v48  ;;  %v18395_v12 = vld [vmem:[%s17707_s23 + $0x30] sm:$0xff]  ;;  %v18400_v19 = vld [vmem:[%s17707_s23 + $0x48] sm:$0xff]  ;;  %v18410_v15 = vld [vmem:[%s17707_s23 + $0x58] sm:$0xff] }
 0x46d   : > { %4115 = vrot.lane.b32.xlu1 %v18380_v41, %s16750_s25  ;;  %22379 = vst [vmem:[#allocation6_spill] sm:$0xff] %v18395_v12  ;;  %22380 = vst [vmem:[#allocation8_spill] sm:$0xff] %v18400_v19  ;;  %v18415_v7 = vld [vmem:[%s17707_s23 + $0x50] sm:$0xff] }
 0x46e   : > { %4113 = vrot.lane.b32.xlu0 %v18385_v48, %s16750_s25  ;;  %22382 = vst [vmem:[#allocation113_spill] sm:$0xff] %v18410_v15  ;;  %22383 = vst [vmem:[#allocation124_spill] sm:$0xff] %v18415_v7 }
 0x46f   : > { %14471 = vmatmul.mubr.msk.bf16.vlgmr.msra.gmra.mrb[104].mxu1 %vm1212_vm0, %v15907_v31  ;;  %v18420_v31 = vld [vmem:[%s17707_s23 + $0x68] sm:$0xff] }
 0x470   : > { %14474 = vmatprep.mubr.msk.bf16.mxu1 %vm1212_vm0, %v15908_v42  ;;  %14543 = vmatpush3.msk.msra.mxu1 %vm2300_vm1, %v17934_v29  ;;  %v15913_v29 = vld [vmem:[%s17055_s18 + $0xb8] sm:$0xff]   ;;  %22384 = vst [vmem:[#allocation125_spill] sm:$0xff] %v18420_v31  ;;  %v18425_v42 = vld [vmem:[%s17707_s23 + $0x60] sm:$0xff] }
 0x471   : > { %14594 = vmatprep.subr.bf16.mxu1 %v18346_v2  ;;  %4119 = vrot.lane.b32.xlu1 %v18390_v61, %s16750_s25  ;;  %22385 = vst [vmem:[#allocation126_spill] sm:$0xff] %v18425_v42 }
 0x472   : > { %4117 = vrot.lane.b32.xlu0 %v18395_v12, %s16750_s25 }
 0x475   : > { %4123 = vrot.lane.b32.xlu1 %v18400_v19, %s16750_s25 }
 0x476   : > { %4121 = vrot.lane.b32.xlu0 %v18405_v39, %s16750_s25 }
 0x477   : > { %14475 = vmatmul.mubr.msk.bf16.gmra.mrb[108].mxu1 %vm1212_vm0, %v15909_v60  ;;  %v18430_v60 = vld [vmem:[%s17707_s23 + $0x78] sm:$0xff] }
 0x478   : > { %14478 = vmatprep.mubr.msk.bf16.mxu1 %vm1212_vm0, %v15910_v46  ;;  %22386 = vst [vmem:[#allocation127_spill] sm:$0xff] %v18430_v60  ;;  %v18435_v46 = vld [vmem:[%s17707_s23 + $0x70] sm:$0xff] }
 0x479   : > { %4127 = vrot.lane.b32.xlu1 %v18410_v15, %s16750_s25  ;;  %22387 = vst [vmem:[#allocation128_spill] sm:$0xff] %v18435_v46 }
 0x47a   : > { %4125 = vrot.lane.b32.xlu0 %v18415_v7, %s16750_s25 }
 0x47d   : > { %4131 = vrot.lane.b32.xlu1 %v18420_v31, %s16750_s25 }
 0x47e   : > { %4129 = vrot.lane.b32.xlu0 %v18425_v42, %s16750_s25 }
 0x47f   : > { %14479 = vmatmul.mubr.msk.bf16.gmra.mrb[112].mxu1 %vm1212_vm0, %v15911_v59 }
 0x480   : > { %14482 = vmatprep.mubr.msk.bf16.mxu1 %vm1212_vm0, %v15912_v55 }
 0x481   : > { %4135 = vrot.lane.b32.xlu1 %v18430_v60, %s16750_s25 }
 0x482   : > { %4133 = vrot.lane.b32.xlu0 %v18435_v46, %s16750_s25 }
 0x485   : > { %5232 = vrot.lane.b32.xlu1 %v18360_v3, %s16751_s28  ;;  %v22509_v3 = vld [vmem:[#allocation124_spill] sm:$0xff] }
 0x486   : > { %5230 = vrot.lane.b32.xlu0 %v18365_v37, %s16751_s28  ;;  %v22510_v37 = vld [vmem:[#allocation125_spill] sm:$0xff] }
 0x487   : > { %14483 = vmatmul.mubr.msk.bf16.gmra.mrb[116].mxu1 %vm1212_vm0, %v15913_v29 }
 0x489   : > { %5236 = vrot.lane.b32.xlu1 %v18370_v57, %s16751_s28  ;;  %v22511_v57 = vld [vmem:[#allocation126_spill] sm:$0xff] }
 0x48a   : > { %5234 = vrot.lane.b32.xlu0 %v18375_v11, %s16751_s28  ;;  %v22512_v11 = vld [vmem:[#allocation127_spill] sm:$0xff] }
 0x51a   : > { %v14418_v59 = vpop.f32.mrb[88].mxu1 }
 0x51b   : > { %v3784_v55 = vmul.f32 %v14418_v59, %v17971_v58  ;;  %v14444_v29 = vpop.f32.mrb[88].mxu0  ;;  %v3511_v31 = vpop.f32.mrb[89].mxu1 }
 0x51c   : > { %v3800_v7 = vmul.f32 %v14444_v29, %v18040_v16  ;;  %v3783_v15 = vmul.f32 %v3511_v31, %v17973_v62  ;;  %v3704_v42 = vpop.f32.mrb[89].mxu0 }
 0x51d   : > { %v3799_v39 = vmul.f32 %v3704_v42, %v18035_v35 }
 0x51e   : > { %v18443_v12 = vadd.f32 %v3800_v7, %v3784_v55 }
 0x51f   : > { %v14421_v19 = vpop.f32.mrb[90].mxu1  ;;  %v18446_v46 = vadd.f32 %v3799_v39, %v3783_v15 }
 0x520   : > { %v3786_v60 = vmul.f32 %v14421_v19, %v17977_v33  ;;  %v14447_v61 = vpop.f32.mrb[90].mxu0  ;;  %v3521_v48 = vpop.f32.mrb[91].mxu1 }
 0x521   : > { %v3802_v58 = vmul.f32 %v14447_v61, %v18037_v6  ;;  %v3785_v59 = vmul.f32 %v3521_v48, %v17979_v45  ;;  %v3714_v41 = vpop.f32.mrb[91].mxu0 }
 0x522   : > { %v3801_v16 = vmul.f32 %v3714_v41, %v18027_v28 }
 0x523   : > { %v14424_v62 = vpop.f32.mrb[92].mxu1  ;;  %v18451_v31 = vadd.f32 %v3802_v58, %v3786_v60 }
 0x524   : > { %v3788_v35 = vmul.f32 %v14424_v62, %v17983_v32  ;;  %v14450_v7 = vpop.f32.mrb[92].mxu0  ;;  %v3531_v42 = vpop.f32.mrb[93].mxu1  ;;  %v18454_v55 = vadd.f32 %v3801_v16, %v3785_v59 }
 0x525   : > { %v3804_v33 = vmul.f32 %v14450_v7, %v18071_v53  ;;  %v3787_v19 = vmul.f32 %v3531_v42, %v17985_v21  ;;  %v3724_v39 = vpop.f32.mrb[93].mxu0 }
 0x526   : > { %22388 = vst [vmem:[#allocation129_spill] sm:$0xff] %v18454_v55  ;;  %v3803_v6 = vmul.f32 %v3724_v39, %v18066_v52 }
 0x527   : > { %v18459_v48 = vadd.f32 %v3804_v33, %v3788_v35 }
 0x528   : > { %v14427_v45 = vpop.f32.mrb[94].mxu1  ;;  %v14453_v41 = vpop.f32.mrb[94].mxu0  ;;  %v18462_v15 = vadd.f32 %v3803_v6, %v3787_v19  ;;  %v22396_v19 = vld [vmem:[#allocation9_spill] sm:$0xff] }
 0x529   : > { %22389 = vst [vmem:[#allocation130_spill] sm:$0xff] %v18459_v48  ;;  %v3790_v28 = vmul.f32 %v14427_v45, %v17989_v13  ;;  %v3541_v61 = vpop.f32.mrb[95].mxu1  ;;  %v3806_v32 = vmul.f32 %v14453_v41, %v18068_v50  ;;  %v3734_v29 = vpop.f32.mrb[95].mxu0  ;;  %v22393_v50 = vld [vmem:[#allocation118_spill] sm:$0xff]  ;;  %v22397_v45 = vld [vmem:[#allocation119_spill] sm:$0xff] }
 0x52a   : > { %22390 = vst [vmem:[#allocation131_spill] sm:$0xff] %v18462_v15  ;;  %v3789_v60 = vmul.f32 %v3541_v61, %v17991_v20  ;;  %v3805_v53 = vmul.f32 %v3734_v29, %v18060_v36  ;;  %v22398_v41 = vld [vmem:[#allocation10_spill] sm:$0xff]  ;;  %v22453_v15 = vld [vmem:[#allocation65_spill] sm:$0xff] }
 0x52b   : > { %v18467_v58 = vadd.f32 %v3806_v32, %v3790_v28 }
 0x52c   : > { %v14430_v21 = vpop.f32.mrb[96].mxu1  ;;  %v14456_v59 = vpop.f32.mrb[96].mxu0  ;;  %v18470_v62 = vadd.f32 %v3805_v53, %v3789_v60 }
 0x52d   : > { %22391 = vst [vmem:[#allocation132_spill] sm:$0xff] %v18467_v58  ;;  %v3792_v52 = vmul.f32 %v14430_v21, %v17995_v4  ;;  %v3551_v16 = vpop.f32.mrb[97].mxu1  ;;  %v3808_v13 = vmul.f32 %v14456_v59, %v18099_v27  ;;  %v3744_v7 = vpop.f32.mrb[97].mxu0  ;;  %v22399_v27 = vld [vmem:[#allocation3_spill] sm:$0xff]  ;;  %v22402_v21 = vld [vmem:[#allocation114_spill] sm:$0xff] }
 0x52e   : > { %22392 = vst [vmem:[#allocation133_spill] sm:$0xff] %v18470_v62  ;;  %v3791_v35 = vmul.f32 %v3551_v16, %v17997_v0  ;;  %v3807_v42 = vmul.f32 %v3744_v7, %v22393_v50  ;;  %v22404_v7 = vld [vmem:[#allocation115_spill] sm:$0xff] }
 0x52f   : > { %v18475_v20 = vadd.f32 %v3808_v13, %v3792_v52  ;;  %v22403_v13 = vld [vmem:[#allocation123_spill] sm:$0xff] }
 0x530   : > { %v18477_v33 = vadd.f32 %v3807_v42, %v3791_v35  ;;  %v14433_v36 = vpop.f32.mrb[98].mxu1 }
 0x531   : > { %22394 = vst [vmem:[#allocation118_spill] sm:$0xff] %v18475_v20  ;;  %v3794_v39 = vmul.f32 %v14433_v36, %v22396_v19  ;;  %v3561_v4 = vpop.f32.mrb[99].mxu1  ;;  %v22405_v36 = vld [vmem:[#allocation121_spill] sm:$0xff]  ;;  %v22439_v20 = vld [vmem:[#allocation52_spill] sm:$0xff] }
 0x532   : > { %22395 = vst [vmem:[#allocation134_spill] sm:$0xff] %v18477_v33  ;;  %v14459_v6 = vpop.f32.mrb[98].mxu0  ;;  %v3793_v61 = vmul.f32 %v3561_v4, %v22398_v41 }
 0x533   : > { %v3810_v28 = vmul.f32 %v14459_v6, %v22397_v45  ;;  %v3754_v32 = vpop.f32.mrb[99].mxu0  ;;  %v22408_v45 = vld [vmem:[#allocation116_spill] sm:$0xff] }
 0x534   : > { %v3809_v60 = vmul.f32 %v3754_v32, %v22399_v27  ;;  %v22409_v32 = vld [vmem:[#allocation122_spill] sm:$0xff] }
 0x535   : > { %v18483_v0 = vadd.f32 %v3810_v28, %v3794_v39 }
 0x536   : > { %v18485_v29 = vadd.f32 %v3809_v60, %v3793_v61  ;;  %v22410_v60 = vld [vmem:[#allocation117_spill] sm:$0xff] }
 0x537   : > { %22400 = vst [vmem:[#allocation9_spill] sm:$0xff] %v18483_v0  ;;  %v14436_v53 = vpop.f32.mrb[100].mxu1 }
 0x538   : > { %22401 = vst [vmem:[#allocation119_spill] sm:$0xff] %v18485_v29  ;;  %v3796_v52 = vmul.f32 %v14436_v53, %v22402_v21  ;;  %v14462_v59 = vpop.f32.mrb[100].mxu0  ;;  %v3571_v16 = vpop.f32.mrb[101].mxu1 }
 0x539   : > { %v3812_v35 = vmul.f32 %v14462_v59, %v22403_v13  ;;  %v3795_v50 = vmul.f32 %v3571_v16, %v22404_v7  ;;  %v3764_v42 = vpop.f32.mrb[101].mxu0  ;;  %v22411_v59 = vld [vmem:[#allocation120_spill] sm:$0xff]  ;;  %v22413_v7 = vld [vmem:[#allocation33_spill] sm:$0xff] }
 0x53a   : > { %v3811_v19 = vmul.f32 %v3764_v42, %v22405_v36  ;;  %v22412_v16 = vld [vmem:[#allocation28_spill] sm:$0xff] }
 0x53b   : > { %v18491_v6 = vadd.f32 %v3812_v35, %v3796_v52  ;;  %v4020_v29 = vrot.slane %v22413_v7, %v22412_v16  ;;  %v22414_v52 = vld [vmem:[#allocation31_spill] sm:$0xff]  ;;  %v22415_v42 = vld [vmem:[#allocation32_spill] sm:$0xff] }
 0x53c   : > { %v18493_v4 = vadd.f32 %v3811_v19, %v3795_v50  ;;  %v4453_v35 = vrot.slane %v22414_v52, %v22412_v16  ;;  %v4012_v36 = vrot.slane %v22415_v42, %v22412_v16  ;;  %v22416_v19 = vld [vmem:[#allocation35_spill] sm:$0xff] }
 0x53d   : > { %22406 = vst [vmem:[#allocation10_spill] sm:$0xff] %v18491_v6 }
 0x53e   : > { %22407 = vst [vmem:[#allocation3_spill] sm:$0xff] %v18493_v4  ;;  %v14439_v39 = vpop.f32.mrb[102].mxu1 }
 0x53f   : > { %v3798_v28 = vmul.f32 %v14439_v39, %v22408_v45  ;;  %v14465_v41 = vpop.f32.mrb[102].mxu0  ;;  %v3581_v61 = vpop.f32.mrb[103].mxu1  ;;  %v4445_v39 = vrot.slane %v22416_v19, %v22412_v16  ;;  %v22417_v45 = vld [vmem:[#allocation37_spill] sm:$0xff]  ;;  %v22422_v19 = vld [vmem:[#allocation36_spill] sm:$0xff] }
 0x540   : > { %v3814_v27 = vmul.f32 %v14465_v41, %v22409_v32  ;;  %v3797_v53 = vmul.f32 %v3581_v61, %v22410_v60  ;;  %v3774_v21 = vpop.f32.mrb[103].mxu0  ;;  %v4024_v41 = vrot.slane %v22417_v45, %v22412_v16  ;;  %v4016_v0 = vrot.slane %v22422_v19, %v22412_v16  ;;  %v22423_v45 = vld [vmem:[#allocation38_spill] sm:$0xff] }
 0x541   : > { %v3813_v13 = vmul.f32 %v3774_v21, %v22411_v59  ;;  %v22420_v59 = vld [vmem:[#allocation39_spill] sm:$0xff] }
 0x542   : > { %v14472_v50 = vpop.f32.mrb[104].mxu1  ;;  %v18509_v61 = vadd.f32 %v3814_v27, %v3798_v28  ;;  %v4457_v7 = vrot.slane %v22420_v59, %v22412_v16  ;;  %v4449_v28 = vrot.slane %v22423_v45, %v22412_v16 }
 0x543   : > { %v4075_v32 = vadd.f32 %v14472_v50, %v4020_v29  ;;  %v18511_v60 = vadd.f32 %v14472_v50, %v4453_v35  ;;  %v3946_v21 = vpop.f32.mrb[105].mxu1  ;;  %v18515_v52 = vadd.f32 %v3813_v13, %v3797_v53  ;;  %v22424_v50 = vld [vmem:[#allocation41_spill] sm:$0xff]  ;;  %v22425_v53 = vld [vmem:[#allocation42_spill] sm:$0xff] }
 0x544   : > { %22418 = vst [vmem:[#allocation114_spill] sm:$0xff] %v18509_v61  ;;  %v4073_v4 = vadd.f32 %v4012_v36, %v3946_v21  ;;  %v18517_v6 = vadd.f32 %v4445_v39, %v3946_v21  ;;  %v14473_v42 = vpop.f32.mrb[106].mxu1  ;;  %v22426_v36 = vld [vmem:[#allocation50_spill] sm:$0xff]  ;;  %v22427_v21 = vld [vmem:[#allocation45_spill] sm:$0xff] }
 0x545   : > { %22419 = vst [vmem:[#allocation123_spill] sm:$0xff] %v18511_v60  ;;  %22421 = vst [vmem:[#allocation115_spill] sm:$0xff] %v18515_v52  ;;  %v4076_v27 = vadd.f32 %v14473_v42, %v4024_v41  ;;  %v18523_v29 = vadd.f32 %v14473_v42, %v4457_v7  ;;  %v3949_v35 = vpop.f32.mrb[107].mxu1  ;;  %v4091_v39 = vmul.f32 %v4075_v32, %v22426_v36  ;;  %v22428_v52 = vld [vmem:[#allocation46_spill] sm:$0xff]  ;;  %v22429_v7 = vld [vmem:[#allocation43_spill] sm:$0xff] }
 0x546   : > { %v4089_v61 = vmul.f32 %v4073_v4, %v22424_v50  ;;  %v4074_v33 = vadd.f32 %v4016_v0, %v3949_v35  ;;  %v18526_v59 = vadd.f32 %v4449_v28, %v3949_v35  ;;  %v4036_v19 = vrot.slane %v22427_v21, %v22412_v16  ;;  %v22430_v0 = vld [vmem:[#allocation48_spill] sm:$0xff]  ;;  %v22431_v28 = vld [vmem:[#allocation47_spill] sm:$0xff]  ;;  %v22482_v60 = vld [vmem:[#allocation98_spill] sm:$0xff] }
 0x547   : > { %v4469_v45 = vrot.slane %v22428_v52, %v22412_v16  ;;  %v4028_v42 = vrot.slane %v22429_v7, %v22412_v16  ;;  %v4461_v4 = vrot.slane %v22430_v0, %v22412_v16  ;;  %v22434_v52 = vld [vmem:[#allocation49_spill] sm:$0xff]  ;;  %v18549_v7 = vld [vmem:[%s21879_s7] sm:$0xf] }
 0x548   : > { %v4090_v13 = vmul.f32 %v4074_v33, %v22425_v53  ;;  %14518 = vmatprep.mubr.f32.mxu0 %v4089_v61  ;;  %v4040_v33 = vrot.slane %v22431_v28, %v22412_v16  ;;  %v22432_v61 = vld [vmem:[#allocation44_spill] sm:$0xff]  ;;  %v22435_v28 = vld [vmem:[#allocation51_spill] sm:$0xff] }
 0x549   : > { %v4032_v32 = vrot.slane %v22432_v61, %v22412_v16  ;;  %v4092_v0 = vmul.f32 %v4076_v27, %v22435_v28  ;;  %v22441_v27 = vld [vmem:[#allocation54_spill] sm:$0xff]  ;;  %v22443_v28 = vld [vmem:[#allocation56_spill] sm:$0xff] }
 0x54a   : > { %v14476_v41 = vpop.f32.mrb[108].mxu1  ;;  %14519 = vmatmul.mubr.f32.vlgmr.msra.gmra.mrb[104].mxu0 %v4090_v13  ;;  %v4473_v13 = vrot.slane %v22434_v52, %v22412_v16 }
 0x54b   : > { %v4079_v35 = vadd.f32 %v14476_v41, %v4036_v19  ;;  %v18542_v36 = vadd.f32 %v14476_v41, %v4469_v45  ;;  %v3962_v21 = vpop.f32.mrb[109].mxu1  ;;  %14521 = vmatprep.mubr.f32.mxu0 %v4091_v39  ;;  %14569 = vmatpush3.msk.msra.mxu0 %vm2300_vm1, %v18549_v7  ;;  %v22437_v45 = vld [vmem:[#allocation53_spill] sm:$0xff] }
 0x54c   : > { %v4077_v53 = vadd.f32 %v4028_v42, %v3962_v21  ;;  %v18554_v61 = vadd.f32 %v4461_v4, %v3962_v21  ;;  %v14477_v19 = vpop.f32.mrb[110].mxu1  ;;  %v4465_v39 = vrot.slane %v22437_v45, %v22412_v16  ;;  %15573 = vmatprep.subr.bf16.mxu0 %v22300_v5  ;;  %v22442_v21 = vld [vmem:[#allocation61_spill] sm:$0xff]  ;;  %v4052_v45 = vrot.slane %v22443_v28, %v22412_v16  ;;  %v22449_v28 = vld [vmem:[#allocation58_spill] sm:$0xff] }
 0x54d   : > { %22433 = vst [vmem:[#allocation121_spill] sm:$0xff] %v18542_v36  ;;  %v4080_v41 = vadd.f32 %v14477_v19, %v4040_v33  ;;  %v18559_v52 = vadd.f32 %v14477_v19, %v4473_v13  ;;  %v3965_v50 = vpop.f32.mrb[111].mxu1  ;;  %v4095_v4 = vmul.f32 %v4079_v35, %v22442_v21  ;;  %v22445_v19 = vld [vmem:[#allocation55_spill] sm:$0xff]  ;;  %v4056_v21 = vrot.slane %v22449_v28, %v22412_v16 }
 0x54e   : > { %22436 = vst [vmem:[#allocation116_spill] sm:$0xff] %v18554_v61  ;;  %v4093_v36 = vmul.f32 %v4077_v53, %v22439_v20  ;;  %v4078_v62 = vadd.f32 %v4032_v32, %v3965_v50  ;;  %v18562_v58 = vadd.f32 %v4465_v39, %v3965_v50  ;;  %14522 = vmatmul.mubr.f32.gmra.mrb[106].mxu0 %v4092_v0  ;;  %v22444_v61 = vld [vmem:[#allocation57_spill] sm:$0xff]  ;;  %v22446_v50 = vld [vmem:[#allocation59_spill] sm:$0xff]  ;;  %v22447_v0 = vld [vmem:[#allocation62_spill] sm:$0xff] }
 0x54f   : > { %22438 = vst [vmem:[#allocation122_spill] sm:$0xff] %v18559_v52  ;;  %v4485_v33 = vrot.slane %v22444_v61, %v22412_v16  ;;  %v4044_v53 = vrot.slane %v22445_v19, %v22412_v16  ;;  %v4477_v32 = vrot.slane %v22446_v50, %v22412_v16  ;;  %v22450_v61 = vld [vmem:[#allocation60_spill] sm:$0xff] }
 0x550   : > { %22440 = vst [vmem:[#allocation117_spill] sm:$0xff] %v18562_v58  ;;  %v4094_v42 = vmul.f32 %v4078_v62, %v22441_v27  ;;  %14524 = vmatprep.mubr.f32.mxu0 %v4093_v36  ;;  %v4048_v62 = vrot.slane %v22447_v0, %v22412_v16  ;;  %v22451_v27 = vld [vmem:[#allocation66_spill] sm:$0xff]  ;;  %v4481_v0 = vrot.slane %v22453_v15, %v22412_v16  ;;  %v22460_v15 = vld [vmem:[#allocation69_spill] sm:$0xff] }
 0x551   : > { %v4096_v20 = vmul.f32 %v4080_v41, %v22451_v27  ;;  %v22458_v41 = vld [vmem:[#allocation70_spill] sm:$0xff] }
 0x552   : > { %v14480_v13 = vpop.f32.mrb[112].mxu1  ;;  %14525 = vmatmul.mubr.f32.gmra.mrb[108].mxu0 %v4094_v42  ;;  %v4489_v42 = vrot.slane %v22450_v61, %v22412_v16  ;;  %v22457_v61 = vld [vmem:[#allocation68_spill] sm:$0xff] }
 0x553   : > { %v4083_v36 = vadd.f32 %v14480_v13, %v4052_v45  ;;  %v18576_v39 = vadd.f32 %v14480_v13, %v4485_v33  ;;  %v3978_v35 = vpop.f32.mrb[113].mxu1  ;;  %14527 = vmatprep.mubr.f32.mxu0 %v4095_v4  ;;  %v22455_v4 = vld [vmem:[#allocation67_spill] sm:$0xff] }
 0x554   : > { %v4081_v19 = vadd.f32 %v4044_v53, %v3978_v35  ;;  %v18583_v52 = vadd.f32 %v4477_v32, %v3978_v35  ;;  %v14481_v50 = vpop.f32.mrb[114].mxu1  ;;  %v22459_v32 = vld [vmem:[#allocation64_spill] sm:$0xff] }
 0x555   : > { %22448 = vst [vmem:[#allocation120_spill] sm:$0xff] %v18576_v39  ;;  %v4084_v45 = vadd.f32 %v14481_v50, %v4056_v21  ;;  %v18587_v33 = vadd.f32 %v14481_v50, %v4489_v42  ;;  %v3981_v13 = vpop.f32.mrb[115].mxu1  ;;  %v4099_v53 = vmul.f32 %v4083_v36, %v22458_v41  ;;  %v4068_v35 = vrot.slane %v22459_v32, %v22412_v16  ;;  %v22461_v42 = vld [vmem:[#allocation40_spill] sm:$0xff] }
 0x556   : > { %22452 = vst [vmem:[#allocation135_spill] sm:$0xff] %v18583_v52  ;;  %v4097_v39 = vmul.f32 %v4081_v19, %v22455_v4  ;;  %v4082_v58 = vadd.f32 %v4048_v62, %v3981_v13  ;;  %v18590_v28 = vadd.f32 %v4481_v0, %v3981_v13  ;;  %14528 = vmatmul.mubr.f32.gmra.mrb[110].mxu0 %v4096_v20  ;;  %v22462_v0 = vld [vmem:[#allocation71_spill] sm:$0xff]  ;;  %v22465_v32 = vld [vmem:[#allocation72_spill] sm:$0xff] }
 0x557   : > { %22454 = vst [vmem:[#allocation136_spill] sm:$0xff] %v18587_v33  ;;  %v4501_v21 = vrot.slane %v22460_v15, %v22412_v16  ;;  %v4060_v19 = vrot.slane %v22461_v42, %v22412_v16  ;;  %v4493_v62 = vrot.slane %v22462_v0, %v22412_v16  ;;  %v22463_v20 = vld [vmem:[#allocation63_spill] sm:$0xff]  ;;  %v4072_v41 = vrot.slane %v22465_v32, %v22412_v16  ;;  %v22466_v15 = vld [vmem:[#allocation73_spill] sm:$0xff]  ;;  %v22469_v33 = vld [vmem:[#allocation74_spill] sm:$0xff] }
 0x558   : > { %22456 = vst [vmem:[#allocation137_spill] sm:$0xff] %v18590_v28  ;;  %v4098_v48 = vmul.f32 %v4082_v58, %v22457_v61  ;;  %14530 = vmatprep.mubr.f32.mxu0 %v4097_v39  ;;  %v4064_v58 = vrot.slane %v22463_v20, %v22412_v16  ;;  %v22467_v61 = vld [vmem:[#allocation76_spill] sm:$0xff]  ;;  %v4497_v20 = vrot.slane %v22469_v33, %v22412_v16 }
 0x559   : > { %v4100_v4 = vmul.f32 %v4084_v45, %v22467_v61  ;;  %v22474_v45 = vld [vmem:[#allocation78_spill] sm:$0xff]  ;;  %v22480_v61 = vld [vmem:[#allocation97_spill] sm:$0xff] }
 0x55a   : > { %v14484_v50 = vpop.f32.mrb[116].mxu1  ;;  %14531 = vmatmul.mubr.f32.gmra.mrb[112].mxu0 %v4098_v48  ;;  %v4505_v48 = vrot.slane %v22466_v15, %v22412_v16  ;;  %v22473_v15 = vld [vmem:[#allocation77_spill] sm:$0xff] }
 0x55b   : > { %v4087_v39 = vadd.f32 %v14484_v50, %v4068_v35  ;;  %v18604_v13 = vadd.f32 %v14484_v50, %v4501_v21  ;;  %v3994_v36 = vpop.f32.mrb[117].mxu1  ;;  %14533 = vmatprep.mubr.f32.mxu0 %v4099_v53  ;;  %v22471_v53 = vld [vmem:[#allocation75_spill] sm:$0xff] }
 0x55c   : > { %v4085_v42 = vadd.f32 %v4060_v19, %v3994_v36  ;;  %v18611_v27 = vadd.f32 %v4493_v62, %v3994_v36  ;;  %v14485_v0 = vpop.f32.mrb[118].mxu1  ;;  %v22475_v62 = vld [vmem:[#allocation11_spill] sm:$0xff] }
 0x55d   : > { %22464 = vst [vmem:[#allocation138_spill] sm:$0xff] %v18604_v13  ;;  %v4088_v35 = vadd.f32 %v14485_v0, %v4072_v41  ;;  %v18615_v21 = vadd.f32 %v14485_v0, %v4505_v48  ;;  %v3997_v50 = vpop.f32.mrb[119].mxu1  ;;  %v4103_v19 = vmul.f32 %v4087_v39, %v22474_v45  ;;  %v4108_v41 = vpop.permute.xlu1 %4107 }
 0x55e   : > { %22468 = vst [vmem:[#allocation139_spill] sm:$0xff] %v18611_v27  ;;  %v4101_v13 = vmul.f32 %v4085_v42, %v22471_v53  ;;  %v4086_v52 = vadd.f32 %v4064_v58, %v3997_v50  ;;  %v18618_v32 = vadd.f32 %v4497_v20, %v3997_v50  ;;  %14534 = vmatmul.mubr.f32.gmra.mrb[114].mxu0 %v4100_v4  ;;  %v4106_v0 = vpop.permute.xlu0 %4105  ;;  %v22476_v4 = vld [vmem:[#allocation95_spill] sm:$0xff] }
 0x55f   : > { %22470 = vst [vmem:[#allocation140_spill] sm:$0xff] %v18615_v21  ;;  %v4104_v36 = vmul.f32 %v4088_v35, %v22475_v62 }
 0x560   : > { %22472 = vst [vmem:[#allocation141_spill] sm:$0xff] %v18618_v32  ;;  %v4102_v28 = vmul.f32 %v4086_v52, %v22473_v15  ;;  %14536 = vmatprep.mubr.f32.mxu0 %v4101_v13  ;;  %v22478_v13 = vld [vmem:[#allocation96_spill] sm:$0xff] }
 0x561   : > { %v4112_v48 = vpop.permute.xlu1 %4111 }
 0x562   : > { %14537 = vmatmul.mubr.f32.gmra.mrb[116].mxu0 %v4102_v28  ;;  %v4110_v16 = vpop.permute.xlu0 %4109 }
 0x563   : > { %14539 = vmatprep.mubr.f32.mxu0 %v4103_v19 }
 0x565   : > { %v4116_v33 = vpop.permute.xlu1 %4115 }
 0x566   : > { %14540 = vmatmul.mubr.f32.gmra.mrb[118].mxu0 %v4104_v36  ;;  %v4114_v52 = vpop.permute.xlu0 %4113 }
 0x569   : > { %v4120_v19 = vpop.permute.xlu1 %4119 }
 0x61d   : > { %v14520_v42 = vpop.f32.mrb[104].mxu0 }
 0x61e   : > { %v4225_v58 = vadd.f32 %v14520_v42, %v4108_v41  ;;  %v4219_v20 = vpop.f32.mrb[105].mxu0 }
 0x61f   : > { %v4220_v50 = vadd.f32 %v4219_v20, %v4106_v0 }
 0x620   : > { %v18624_v53 = vmax.f32 %v22476_v4, %v4225_v58 }
 0x621   : > { %v18627_v39 = vmax.f32 %v22478_v13, %v4220_v50  ;;  %v14523_v28 = vpop.f32.mrb[106].mxu0 }
 0x622   : > { %22477 = vst [vmem:[#allocation95_spill] sm:$0xff] %v18624_v53  ;;  %v4315_v35 = vsub.f32 %v22476_v4, %v18624_v53  ;;  %v4363_v36 = vsub.f32 %v4225_v58, %v18624_v53  ;;  %v4235_v62 = vadd.f32 %v14523_v28, %v4112_v48  ;;  %v4229_v45 = vpop.f32.mrb[107].mxu0 }
 0x623   : > { %22479 = vst [vmem:[#allocation96_spill] sm:$0xff] %v18627_v39  ;;  %v4314_v41 = vsub.f32 %v22478_v13, %v18627_v39  ;;  %v4362_v0 = vsub.f32 %v4220_v50, %v18627_v39  ;;  %v4230_v42 = vadd.f32 %v4229_v45, %v4110_v16  ;;  %v4118_v16 = vpop.permute.xlu0 %4117 }
 0x624   : > { %v4332_v20 = vmul.f32 1.442695, %v4315_v35  ;;  %v4380_v15 = vmul.f32 1.442695, %v4363_v36  ;;  %v18636_v21 = vmax.f32 %v22480_v61, %v4235_v62  ;;  %v4124_v36 = vpop.permute.xlu1 %4123 }
 0x625   : > { %v4330_v27 = vmul.f32 1.442695, %v4314_v41  ;;  %v4378_v32 = vmul.f32 1.442695, %v4362_v0  ;;  %v18639_v55 = vmax.f32 %v22482_v60, %v4230_v42  ;;  %v14526_v4 = vpop.f32.mrb[108].mxu0 }
 0x626   : > { %22481 = vst [vmem:[#allocation97_spill] sm:$0xff] %v18636_v21  ;;  %16082 = vpow2.f32 %v4332_v20  ;;  %v4317_v48 = vsub.f32 %v22480_v61, %v18636_v21  ;;  %v4365_v58 = vsub.f32 %v4235_v62, %v18636_v21  ;;  %v4245_v13 = vadd.f32 %v14526_v4, %v4116_v33  ;;  %v4239_v50 = vpop.f32.mrb[109].mxu0  ;;  %v22484_v20 = vld [vmem:[#allocation99_spill] sm:$0xff]  ;;  %v22486_v33 = vld [vmem:[#allocation100_spill] sm:$0xff] }
 0x627   : > { %22483 = vst [vmem:[#allocation98_spill] sm:$0xff] %v18639_v55  ;;  %16084 = vpow2.f32 %v4380_v15  ;;  %v4316_v45 = vsub.f32 %v22482_v60, %v18639_v55  ;;  %v4364_v28 = vsub.f32 %v4230_v42, %v18639_v55  ;;  %v4240_v35 = vadd.f32 %v4239_v50, %v4114_v52 }
 0x628   : > { %16086 = vpow2.f32 %v4330_v27  ;;  %v4336_v41 = vmul.f32 1.442695, %v4317_v48  ;;  %v4384_v0 = vmul.f32 1.442695, %v4365_v58  ;;  %v18648_v39 = vmax.f32 %v22484_v20, %v4245_v13 }
 0x629   : > { %16088 = vpow2.f32 %v4378_v32  ;;  %v4334_v61 = vmul.f32 1.442695, %v4316_v45  ;;  %v4382_v62 = vmul.f32 1.442695, %v4364_v28  ;;  %v18651_v4 = vmax.f32 %v22486_v33, %v4240_v35  ;;  %v14529_v15 = vpop.f32.mrb[110].mxu0  ;;  %v22488_v28 = vld [vmem:[#allocation101_spill] sm:$0xff] }
 0x62a   : > { %22485 = vst [vmem:[#allocation99_spill] sm:$0xff] %v18648_v39  ;;  %16090 = vpow2.f32 %v4336_v41  ;;  %v4319_v60 = vsub.f32 %v22484_v20, %v18648_v39  ;;  %v4367_v52 = vsub.f32 %v4245_v13, %v18648_v39  ;;  %v4255_v42 = vadd.f32 %v14529_v15, %v4120_v19  ;;  %v4249_v27 = vpop.f32.mrb[111].mxu0  ;;  %v4122_v41 = vpop.permute.xlu0 %4121  ;;  %v22490_v13 = vld [vmem:[#allocation102_spill] sm:$0xff] }
 0x62b   : > { %22487 = vst [vmem:[#allocation100_spill] sm:$0xff] %v18651_v4  ;;  %16092 = vpow2.f32 %v4384_v0  ;;  %v4318_v48 = vsub.f32 %v22486_v33, %v18651_v4  ;;  %v4366_v32 = vsub.f32 %v4240_v35, %v18651_v4  ;;  %v4250_v58 = vadd.f32 %v4249_v27, %v4118_v16  ;;  %v4128_v15 = vpop.permute.xlu1 %4127  ;;  %v22492_v4 = vld [vmem:[#allocation103_spill] sm:$0xff] }
 0x62c   : > { %16094 = vpow2.f32 %v4334_v61  ;;  %v4340_v50 = vmul.f32 1.442695, %v4319_v60  ;;  %v4388_v45 = vmul.f32 1.442695, %v4367_v52  ;;  %v18660_v55 = vmax.f32 %v22488_v28, %v4255_v42 }
 0x62d   : > { %16096 = vpow2.f32 %v4382_v62  ;;  %v4338_v20 = vmul.f32 1.442695, %v4318_v48  ;;  %v4386_v21 = vmul.f32 1.442695, %v4366_v32  ;;  %v18663_v19 = vmax.f32 %v22490_v13, %v4250_v58  ;;  %v14532_v0 = vpop.f32.mrb[112].mxu0 }
 0x62e   : > { %22489 = vst [vmem:[#allocation101_spill] sm:$0xff] %v18660_v55  ;;  %16098 = vpow2.f32 %v4340_v50  ;;  %v4321_v35 = vsub.f32 %v22488_v28, %v18660_v55  ;;  %v4369_v16 = vsub.f32 %v4255_v42, %v18660_v55  ;;  %v4265_v61 = vadd.f32 %v14532_v0, %v4124_v36  ;;  %v4259_v33 = vpop.f32.mrb[113].mxu0  ;;  %v22493_v28 = vld [vmem:[#allocation106_spill] sm:$0xff] }
 0x62f   : > { %22491 = vst [vmem:[#allocation102_spill] sm:$0xff] %v18663_v19  ;;  %16100 = vpow2.f32 %v4388_v45  ;;  %v4320_v60 = vsub.f32 %v22490_v13, %v18663_v19  ;;  %v4368_v62 = vsub.f32 %v4250_v58, %v18663_v19  ;;  %v4260_v52 = vadd.f32 %v4259_v33, %v4122_v41 }
 0x630   : > { %v16083_v27 = vpop.eup %16082  ;;  %16102 = vpow2.f32 %v4338_v20  ;;  %v4344_v48 = vmul.f32 1.442695, %v4321_v35  ;;  %v4392_v32 = vmul.f32 1.442695, %v4369_v16  ;;  %v18672_v50 = vmax.f32 %v22492_v4, %v4265_v61  ;;  %v22494_v20 = vld [vmem:[#allocation104_spill] sm:$0xff]  ;;  %v4126_v35 = vpop.permute.xlu0 %4125 }
 0x631   : > { %v16085_v39 = vpop.eup %16084  ;;  %v4411_v53 = vmul.f32 %v16083_v27, %v22493_v28  ;;  %16104 = vpow2.f32 %v4386_v21  ;;  %v4342_v36 = vmul.f32 1.442695, %v4320_v60  ;;  %v4390_v42 = vmul.f32 1.442695, %v4368_v62  ;;  %v14535_v45 = vpop.f32.mrb[114].mxu0  ;;  %v22496_v28 = vld [vmem:[#allocation105_spill] sm:$0xff] }
 0x632   : > { %v16087_v0 = vpop.eup %16086  ;;  %16106 = vpow2.f32 %v4344_v48  ;;  %v4323_v58 = vsub.f32 %v22492_v4, %v18672_v50  ;;  %v4371_v41 = vsub.f32 %v4265_v61, %v18672_v50  ;;  %v18679_v13 = vmax.f32 %v22494_v20, %v4260_v52  ;;  %v4269_v16 = vpop.f32.mrb[115].mxu0 }
 0x633   : > { %v16089_v33 = vpop.eup %16088  ;;  %v18681_v19 = vadd.f32 %v16085_v39, %v4411_v53  ;;  %v4410_v21 = vmul.f32 %v16087_v0, %v22496_v28  ;;  %16108 = vpow2.f32 %v4392_v32  ;;  %v4275_v60 = vadd.f32 %v14535_v45, %v4128_v15  ;;  %14544 = vmatprep.mubr.msk.f32.mxu1 %vm2251_vm2, %v16087_v0  ;;  %v4132_v62 = vpop.permute.xlu1 %4131  ;;  %v22497_v28 = vld [vmem:[#allocation107_spill] sm:$0xff] }
 0x634   : > { %v16091_v48 = vpop.eup %16090  ;;  %16110 = vpow2.f32 %v4342_v36  ;;  %v4348_v4 = vmul.f32 1.442695, %v4323_v58  ;;  %v4396_v55 = vmul.f32 1.442695, %v4371_v41  ;;  %v4322_v61 = vsub.f32 %v22494_v20, %v18679_v13  ;;  %14570 = vmatprep.mubr.msk.f32.mxu0 %vm2251_vm2, %v16089_v33  ;;  %14545 = vmatmul.mubr.msk.f32.vlgmr.msra.gmra.mrb[120].mxu1 %vm2251_vm2, %v16083_v27  ;;  %v22498_v58 = vld [vmem:[#allocation108_spill] sm:$0xff] }
 0x635   : > { %22495 = vst [vmem:[#allocation103_spill] sm:$0xff] %v18681_v19  ;;  %v16093_v53 = vpop.eup %16092  ;;  %v18689_v19 = vadd.f32 %v16089_v33, %v4410_v21  ;;  %v4413_v32 = vmul.f32 %v16091_v48, %v22497_v28  ;;  %16112 = vpow2.f32 %v4390_v42  ;;  %v4370_v15 = vsub.f32 %v4260_v52, %v18679_v13  ;;  %14571 = vmatmul.mubr.msk.f32.vlgmr.msra.gmra.mrb[120].mxu0 %vm2251_vm2, %v16085_v39  ;;  %v14538_v36 = vpop.f32.mrb[116].mxu0 }
 0x636   : > { %14595 = vmatpush3.bf16.msra.mxu1 %v18346_v2  ;;  %v16095_v45 = vpop.eup %16094  ;;  %16114 = vpow2.f32 %v4348_v4  ;;  %v4346_v0 = vmul.f32 1.442695, %v4322_v61  ;;  %v18696_v41 = vmax.f32 %v22498_v58, %v4275_v60  ;;  %v4270_v27 = vadd.f32 %v4269_v16, %v4126_v35  ;;  %v4279_v20 = vpop.f32.mrb[117].mxu0  ;;  %15575 = vmatpush3.bf16.msra.mxu0 %v22300_v5  ;;  %v22499_v16 = vld [vmem:[#allocation109_spill] sm:$0xff] }
 0x637   : > { %14596 = vmatprep.subr.bf16.mxu1 %v18210_v56  ;;  %v16097_v42 = vpop.eup %16096  ;;  %v18700_v33 = vadd.f32 %v16093_v53, %v4413_v32  ;;  %v4412_v39 = vmul.f32 %v16095_v45, %v18227_v40  ;;  %16116 = vpow2.f32 %v4396_v55  ;;  %v4394_v52 = vmul.f32 1.442695, %v4370_v15  ;;  %14547 = vmatprep.mubr.msk.f32.mxu1 %vm2251_vm2, %v16095_v45  ;;  %v4130_v61 = vpop.permute.xlu0 %4129 }
 0x638   : > { %15577 = vmatprep.subr.bf16.mxu0 %v22365_v22  ;;  %v16099_v21 = vpop.eup %16098  ;;  %16118 = vpow2.f32 %v4346_v0  ;;  %v4325_v35 = vsub.f32 %v22498_v58, %v18696_v41  ;;  %v4373_v56 = vsub.f32 %v4275_v60, %v18696_v41  ;;  %v18709_v4 = vmax.f32 %v22499_v16, %v4270_v27  ;;  %14573 = vmatprep.mubr.msk.f32.mxu0 %vm2251_vm2, %v16097_v42  ;;  %v4136_v15 = vpop.permute.xlu1 %4135  ;;  %v18720_v60 = vld [vmem:[%s21877_s5 + $0x8] sm:$0xff]  }
 0x639   : > { %14548 = vmatmul.mubr.msk.f32.gmra.mrb[122].mxu1 %vm2251_vm2, %v16091_v48  ;;  %v16101_v40 = vpop.eup %16100  ;;  %v18713_v55 = vadd.f32 %v16097_v42, %v4412_v39  ;;  %v4415_v28 = vmul.f32 %v16099_v21, %v18238_v38  ;;  %16120 = vpow2.f32 %v4394_v52  ;;  %v4285_v32 = vadd.f32 %v14538_v36, %v4132_v62  ;;  %14574 = vmatmul.mubr.msk.f32.gmra.mrb[122].mxu0 %vm2251_vm2, %v16093_v53  ;;  %v14541_v45 = vpop.f32.mrb[118].mxu0 }
 0x63a   : > { %22500 = vst [vmem:[#allocation106_spill] sm:$0xff] %v18709_v4  ;;  %14597 = vmatpush3.bf16.msra.mxu1 %v18720_v60  ;;  %v16103_v0 = vpop.eup %16102  ;;  %v4352_v48 = vmul.f32 1.442695, %v4325_v35  ;;  %v4400_v58 = vmul.f32 1.442695, %v4373_v56  ;;  %v4324_v42 = vsub.f32 %v22499_v16, %v18709_v4  ;;  %v4372_v38 = vsub.f32 %v4270_v27, %v18709_v4  ;;  %v4289_v62 = vpop.f32.mrb[119].mxu0  ;;  %15579 = vmatpush3.bf16.msra.mxu0 %v22365_v22 }
 0x63b   : > { %14670 = vmatprep.subr.msk.mxu1 %vm2300_vm1, %v18549_v7  ;;  %v16105_v53 = vpop.eup %16104  ;;  %v18729_v36 = vadd.f32 %v16101_v40, %v4415_v28  ;;  %v4414_v39 = vmul.f32 %v16103_v0, %v18247_v44  ;;  %v18733_v52 = vmax.f32 %v18242_v63, %v4285_v32  ;;  %v4280_v35 = vadd.f32 %v4279_v20, %v4130_v61 }
 0x63c   : > { %14550 = vmatprep.mubr.msk.f32.mxu1 %vm2251_vm2, %v16103_v0  ;;  %v16107_v56 = vpop.eup %16106  ;;  %16122 = vpow2.f32 %v4352_v48  ;;  %v4350_v27 = vmul.f32 1.442695, %v4324_v42  ;;  %v4398_v16 = vmul.f32 1.442695, %v4372_v38  ;;  %v4295_v4 = vadd.f32 %v14541_v45, %v4136_v15  ;;  %14576 = vmatprep.mubr.msk.f32.mxu0 %vm2251_vm2, %v16105_v53  ;;  %v22501_v45 = vld [vmem:[#allocation110_spill] sm:$0xff] }
 0x63d   : > { %14551 = vmatmul.mubr.msk.f32.gmra.mrb[124].mxu1 %vm2251_vm2, %v16099_v21  ;;  %v16109_v22 = vpop.eup %16108  ;;  %v18738_v28 = vadd.f32 %v16105_v53, %v4414_v39  ;;  %v4417_v44 = vmul.f32 %v16107_v56, %v18262_v49  ;;  %16124 = vpow2.f32 %v4400_v58  ;;  %v4327_v20 = vsub.f32 %v18242_v63, %v18733_v52  ;;  %14577 = vmatmul.mubr.msk.f32.gmra.mrb[124].mxu0 %vm2251_vm2, %v16101_v40  ;;  %v4134_v39 = vpop.permute.xlu0 %4133 }
 0x63e   : > { %15581 = vmatprep.subr.bf16.mxu0 %v22267_v25  ;;  %v16111_v61 = vpop.eup %16110  ;;  %16126 = vpow2.f32 %v4350_v27  ;;  %v4375_v15 = vsub.f32 %v4285_v32, %v18733_v52  ;;  %v18747_v0 = vmax.f32 %v22501_v45, %v4280_v35  ;;  %v18750_v21 = vmax.f32 %v18259_v26, %v4295_v4 }
 0x63f   : > { %15583 = vmatpush3.bf16.msra.mxu0 %v22267_v25  ;;  %v16113_v49 = vpop.eup %16112  ;;  %v18753_v48 = vadd.f32 %v16109_v22, %v4417_v44  ;;  %v4416_v63 = vmul.f32 %v16111_v61, %v18274_v18  ;;  %16128 = vpow2.f32 %v4398_v16  ;;  %v4356_v40 = vmul.f32 1.442695, %v4327_v20  ;;  %14553 = vmatprep.mubr.msk.f32.mxu1 %vm2251_vm2, %v16111_v61 }
 0x640   : > { %15585 = vmatprep.subr.bf16.mxu0 %v22271_v23  ;;  %v16115_v32 = vpop.eup %16114  ;;  %v4404_v58 = vmul.f32 1.442695, %v4375_v15  ;;  %v4326_v42 = vsub.f32 %v22501_v45, %v18747_v0  ;;  %v4374_v38 = vsub.f32 %v4280_v35, %v18747_v0  ;;  %v4329_v53 = vsub.f32 %v18259_v26, %v18750_v21  ;;  %14579 = vmatprep.mubr.msk.f32.mxu0 %vm2251_vm2, %v16113_v49 }
 0x641   : > { %14554 = vmatmul.mubr.msk.f32.gmra.mrb[126].mxu1 %vm2251_vm2, %v16107_v56  ;;  %v16117_v18 = vpop.eup %16116  ;;  %v18765_v27 = vadd.f32 %v16113_v49, %v4416_v63  ;;  %v4419_v16 = vmul.f32 %v16115_v32, %v18280_v17  ;;  %16130 = vpow2.f32 %v4356_v40  ;;  %v4377_v44 = vsub.f32 %v4295_v4, %v18750_v21  ;;  %14580 = vmatmul.mubr.msk.f32.gmra.mrb[126].mxu0 %vm2251_vm2, %v16109_v22 }
 0x642   : > { %v16119_v20 = vpop.eup %16118  ;;  %v4354_v35 = vmul.f32 1.442695, %v4326_v42  ;;  %v4402_v61 = vmul.f32 1.442695, %v4374_v38  ;;  %v4360_v15 = vmul.f32 1.442695, %v4329_v53  ;;  %16132 = vpow2.f32 %v4404_v58 }
 0x643   : > { %15587 = vmatpush3.bf16.msra.mxu0 %v22271_v23  ;;  %v16121_v26 = vpop.eup %16120  ;;  %v18771_v45 = vadd.f32 %v16117_v18, %v4419_v16  ;;  %v4418_v56 = vmul.f32 %v16119_v20, %v18287_v43  ;;  %v4290_v49 = vadd.f32 %v4289_v62, %v4134_v39  ;;  %14556 = vmatprep.mubr.msk.f32.mxu1 %vm2251_vm2, %v16119_v20  ;;  %v4408_v17 = vmul.f32 1.442695, %v4377_v44 }
 0x644   : > { %15589 = vmatprep.subr.bf16.mxu0 %v22272_v9  ;;  %16134 = vpow2.f32 %v4354_v35  ;;  %14582 = vmatprep.mubr.msk.f32.mxu0 %vm2251_vm2, %v16121_v26 }
 0x645   : > { %14557 = vmatmul.mubr.msk.f32.gmra.mrb[128].mxu1 %vm2251_vm2, %v16115_v32  ;;  %v18778_v22 = vadd.f32 %v16121_v26, %v4418_v56  ;;  %16136 = vpow2.f32 %v4402_v61  ;;  %v18781_v4 = vmax.f32 %v18290_v47, %v4290_v49  ;;  %14583 = vmatmul.mubr.msk.f32.gmra.mrb[128].mxu0 %vm2251_vm2, %v16117_v18 }
 0x646   : > { %v16123_v43 = vpop.eup %16122  ;;  %16138 = vpow2.f32 %v4360_v15 }
 0x647   : > { %15591 = vmatpush3.bf16.msra.mxu0 %v22272_v9  ;;  %v16125_v62 = vpop.eup %16124  ;;  %v4421_v63 = vmul.f32 %v16123_v43, %v18299_v1  ;;  %v4328_v40 = vsub.f32 %v18290_v47, %v18781_v4  ;;  %v4376_v32 = vsub.f32 %v4290_v49, %v18781_v4  ;;  %16140 = vpow2.f32 %v4408_v17 }
 0x648   : > { %15593 = vmatprep.subr.bf16.mxu0 %v22373_v10  ;;  %v16127_v58 = vpop.eup %16126 }
 0x649   : > { %v16129_v42 = vpop.eup %16128  ;;  %v18790_v38 = vadd.f32 %v16125_v62, %v4421_v63  ;;  %v4420_v53 = vmul.f32 %v16127_v58, %v18305_v54  ;;  %v4358_v39 = vmul.f32 1.442695, %v4328_v40  ;;  %v4406_v18 = vmul.f32 1.442695, %v4376_v32  ;;  %14559 = vmatprep.mubr.msk.f32.mxu1 %vm2251_vm2, %v16127_v58  ;;  %v15917_v40 = vld [vmem:[%s17055_s18 + $0xd8] sm:$0xff]   ;;  %v15918_v32 = vld [vmem:[%s17055_s18 + $0xe0] sm:$0xff]  }
 0x64a   : > { %14585 = vmatprep.mubr.msk.f32.mxu0 %vm2251_vm2, %v16129_v42  ;;  %14560 = vmatmul.mubr.msk.f32.gmra.mrb[130].mxu1 %vm2251_vm2, %v16123_v43  ;;  %v15919_v58 = vld [vmem:[%s17055_s18 + $0xe8] sm:$0xff]  }
 0x64b   : > { %v16131_v47 = vpop.eup %16130  ;;  %v18796_v1 = vadd.f32 %v16129_v42, %v4420_v53  ;;  %16142 = vpow2.f32 %v4358_v39  ;;  %14586 = vmatmul.mubr.msk.f32.gmra.mrb[130].mxu0 %vm2251_vm2, %v16125_v62  ;;  %v15920_v42 = vld [vmem:[%s17055_s18 + $0xf0] sm:$0xff]   ;;  %v15921_v53 = vld [vmem:[%s17055_s18 + $0xf8] sm:$0xff]   ;;  %v22503_v39 = vld [vmem:[#allocation112_spill] sm:$0xff] }
 0x64c   : > { %v4423_v16 = vmul.f32 %v16131_v47, %v18311_v51  ;;  %16144 = vpow2.f32 %v4406_v18  ;;  %15595 = vmatpush3.bf16.msra.mxu0 %v22373_v10  ;;  %v16133_v54 = vpop.eup %16132  ;;  %5238 = vrot.lane.b32.xlu0 %v22503_v39, %s16751_s28  ;;  %v22504_v18 = vld [vmem:[#allocation111_spill] sm:$0xff] }
 0x64d   : > { %15597 = vmatprep.subr.bf16.mxu0 %v22277_v34 }
 0x64e   : > { %v16135_v44 = vpop.eup %16134  ;;  %v18802_v20 = vadd.f32 %v16133_v54, %v4423_v16  ;;  %v22506_v16 = vld [vmem:[#allocation8_spill] sm:$0xff] }
 0x64f   : > { %v16137_v35 = vpop.eup %16136  ;;  %v4422_v61 = vmul.f32 %v16135_v44, %v18317_v30  ;;  %14562 = vmatprep.mubr.msk.f32.mxu1 %vm2251_vm2, %v16135_v44  ;;  %v15914_v30 = vld [vmem:[%s17055_s18 + $0xc0] sm:$0xff]   ;;  %v22508_v44 = vld [vmem:[#allocation113_spill] sm:$0xff] }
 0x650   : > { %v16139_v15 = vpop.eup %16138  ;;  %14588 = vmatprep.mubr.msk.f32.mxu0 %vm2251_vm2, %v16137_v35  ;;  %14563 = vmatmul.mubr.msk.f32.gmra.mrb[132].mxu1 %vm2251_vm2, %v16131_v47  ;;  %v22505_v47 = vld [vmem:[#allocation6_spill] sm:$0xff] }
 0x651   : > { %v18808_v51 = vadd.f32 %v16137_v35, %v4422_v61  ;;  %v4425_v26 = vmul.f32 %v16139_v15, %v18322_v8  ;;  %14589 = vmatmul.mubr.msk.f32.gmra.mrb[132].mxu0 %vm2251_vm2, %v16133_v54  ;;  %v16141_v56 = vpop.eup %16140  ;;  %v15915_v8 = vld [vmem:[%s17055_s18 + $0xc8] sm:$0xff]   ;;  %5242 = vrot.lane.b32.xlu0 %v22505_v47, %s16751_s28  ;;  %v22507_v54 = vld [vmem:[#allocation7_spill] sm:$0xff] }
 0x652   : > { %15599 = vmatpush3.bf16.msra.mxu0 %v22277_v34  ;;  %v22513_v35 = vld [vmem:[#allocation128_spill] sm:$0xff] }
 0x653   : > { %v18813_v49 = vadd.f32 %v16141_v56, %v4425_v26  ;;  %15601 = vmatprep.subr.bf16.mxu0 %v22278_v14 }
 0x655   : > { %v16143_v17 = vpop.eup %16142  ;;  %5246 = vrot.lane.b32.xlu0 %v22507_v54, %s16751_s28 }
 0x656   : > { %v16145_v43 = vpop.eup %16144  ;;  %v4424_v62 = vmul.f32 %v16143_v17, %v18332_v24  ;;  %14565 = vmatprep.mubr.msk.f32.mxu1 %vm2251_vm2, %v16143_v17  ;;  %15603 = vmatpush3.bf16.msra.mxu0 %v22278_v14  ;;  %v15916_v24 = vld [vmem:[%s17055_s18 + $0xd0] sm:$0xff]  }
 0x657   : > { %14591 = vmatprep.mubr.msk.f32.mxu0 %vm2251_vm2, %v16145_v43  ;;  %14566 = vmatmul.mubr.msk.f32.gmra.mrb[134].mxu1 %vm2251_vm2, %v16139_v15 }
 0x658   : > { %v18823_v63 = vadd.f32 %v16145_v43, %v4424_v62  ;;  %14592 = vmatmul.mubr.msk.f32.gmra.mrb[134].mxu0 %vm2251_vm2, %v16141_v56  ;;  %14598 = vmatprep.mubr.msk.bf16.mxu1 %vm1212_vm0, %v15914_v30 }
 0x659   : > { %14696 = vmatprep.subr.msk.mxu0 %vm2300_vm1, %v18549_v7  ;;  %5250 = vrot.lane.b32.xlu0 %v22509_v3, %s16751_s28 }
 0x65b   : > { %14599 = vmatmul.mubr.msk.bf16.vlgmr.msra.gmra.mrb[136].mxu1 %vm1212_vm0, %v15915_v8 }
 0x65c   : > { %14602 = vmatprep.mubr.msk.bf16.mxu1 %vm1212_vm0, %v15916_v24  ;;  %14671 = vmatpush3.msk.msra.mxu1 %vm2300_vm1, %v18549_v7 }
 0x65d   : > { %14722 = vmatprep.subr.bf16.mxu1 %v18346_v2  ;;  %v22502_v2 = vld [vmem:[#allocation5_spill] sm:$0xff]  ;;  %5254 = vrot.lane.b32.xlu0 %v22511_v57, %s16751_s28  ;;  %v22518_v57 = vld [vmem:[#allocation131_spill] sm:$0xff] }
 0x65e   : > { %5240 = vrot.lane.b32.xlu1 %v22502_v2, %s16751_s28 }
 0x661   : > { %5258 = vrot.lane.b32.xlu0 %v22513_v35, %s16751_s28 }
 0x662   : > { %5244 = vrot.lane.b32.xlu1 %v22504_v18, %s16751_s28 }
 0x663   : > { %14603 = vmatmul.mubr.msk.bf16.gmra.mrb[140].mxu1 %vm1212_vm0, %v15917_v40 }
 0x664   : > { %14606 = vmatprep.mubr.msk.bf16.mxu1 %vm1212_vm0, %v15918_v32 }
 0x666   : > { %5248 = vrot.lane.b32.xlu1 %v22506_v16, %s16751_s28 }
 0x66a   : > { %5252 = vrot.lane.b32.xlu1 %v22508_v44, %s16751_s28 }
 0x66b   : > { %14607 = vmatmul.mubr.msk.bf16.gmra.mrb[144].mxu1 %vm1212_vm0, %v15919_v58 }
 0x66c   : > { %14610 = vmatprep.mubr.msk.bf16.mxu1 %vm1212_vm0, %v15920_v42 }
 0x66e   : > { %5256 = vrot.lane.b32.xlu1 %v22510_v37, %s16751_s28 }
 0x672   : > { %5260 = vrot.lane.b32.xlu1 %v22512_v11, %s16751_s28 }
 0x673   : > { %14611 = vmatmul.mubr.msk.bf16.gmra.mrb[148].mxu1 %vm1212_vm0, %v15921_v53  ;;  %v22514_v53 = vld [vmem:[#allocation129_spill] sm:$0xff] }
 0x707   : > { %v14546_v61 = vpop.f32.mrb[120].mxu1 }
 0x708   : > { %v4909_v15 = vmul.f32 %v14546_v61, %v18443_v12  ;;  %v14572_v26 = vpop.f32.mrb[120].mxu0  ;;  %v4636_v56 = vpop.f32.mrb[121].mxu1 }
 0x709   : > { %v4925_v30 = vmul.f32 %v14572_v26, %v18526_v59  ;;  %v4908_v17 = vmul.f32 %v4636_v56, %v18446_v46  ;;  %v4829_v43 = vpop.f32.mrb[121].mxu0  ;;  %v22515_v59 = vld [vmem:[#allocation123_spill] sm:$0xff]  ;;  %v22521_v56 = vld [vmem:[#allocation132_spill] sm:$0xff] }
 0x70a   : > { %v4924_v62 = vmul.f32 %v4829_v43, %v18517_v6  ;;  %v22516_v6 = vld [vmem:[#allocation130_spill] sm:$0xff] }
 0x70b   : > { %v18865_v24 = vadd.f32 %v4925_v30, %v4909_v15 }
 0x70c   : > { %v14549_v8 = vpop.f32.mrb[122].mxu1  ;;  %v14575_v32 = vpop.f32.mrb[122].mxu0  ;;  %v18868_v42 = vadd.f32 %v4924_v62, %v4908_v17 }
 0x70d   : > { %v4911_v40 = vmul.f32 %v14549_v8, %v18451_v31  ;;  %v4646_v58 = vpop.f32.mrb[123].mxu1  ;;  %v4927_v12 = vmul.f32 %v14575_v32, %v18523_v29  ;;  %v4839_v39 = vpop.f32.mrb[123].mxu0  ;;  %v22517_v31 = vld [vmem:[#allocation117_spill] sm:$0xff]  ;;  %v22519_v29 = vld [vmem:[#allocation116_spill] sm:$0xff]  ;;  %v22523_v8 = vld [vmem:[#allocation122_spill] sm:$0xff] }
 0x70e   : > { %v4910_v2 = vmul.f32 %v4646_v58, %v22514_v53  ;;  %v4926_v18 = vmul.f32 %v4839_v39, %v22515_v59  ;;  %v22524_v32 = vld [vmem:[#allocation133_spill] sm:$0xff] }
 0x70f   : > { %v18873_v47 = vadd.f32 %v4927_v12, %v4911_v40  ;;  %v22525_v53 = vld [vmem:[#allocation121_spill] sm:$0xff] }
 0x710   : > { %v14552_v46 = vpop.f32.mrb[124].mxu1  ;;  %v14578_v54 = vpop.f32.mrb[124].mxu0  ;;  %v18876_v3 = vadd.f32 %v4926_v18, %v4910_v2  ;;  %v22527_v18 = vld [vmem:[#allocation118_spill] sm:$0xff] }
 0x711   : > { %v4913_v16 = vmul.f32 %v14552_v46, %v22516_v6  ;;  %v4656_v44 = vpop.f32.mrb[125].mxu1  ;;  %v4929_v37 = vmul.f32 %v14578_v54, %v22517_v31  ;;  %v4849_v35 = vpop.f32.mrb[125].mxu0 }
 0x712   : > { %v4912_v11 = vmul.f32 %v4656_v44, %v22518_v57  ;;  %v4928_v61 = vmul.f32 %v4849_v35, %v22519_v29  ;;  %v22529_v44 = vld [vmem:[#allocation137_spill] sm:$0xff]  ;;  %v22531_v35 = vld [vmem:[#allocation135_spill] sm:$0xff] }
 0x713   : > { %v18881_v26 = vadd.f32 %v4929_v37, %v4913_v16  ;;  %v22530_v37 = vld [vmem:[#allocation134_spill] sm:$0xff] }
 0x714   : > { %v14555_v15 = vpop.f32.mrb[126].mxu1  ;;  %v14581_v17 = vpop.f32.mrb[126].mxu0  ;;  %v18884_v62 = vadd.f32 %v4928_v61, %v4912_v11 }
 0x715   : > { %22520 = vst [vmem:[#allocation104_spill] sm:$0xff] %v18881_v26  ;;  %v4915_v30 = vmul.f32 %v14555_v15, %v22521_v56  ;;  %v4666_v43 = vpop.f32.mrb[127].mxu1  ;;  %v4931_v40 = vmul.f32 %v14581_v17, %v22523_v8  ;;  %v4859_v12 = vpop.f32.mrb[127].mxu0  ;;  %v22620_v26 = vld [vmem:[#allocation98_spill] sm:$0xff] }
 0x716   : > { %22522 = vst [vmem:[#allocation105_spill] sm:$0xff] %v18884_v62  ;;  %v4914_v58 = vmul.f32 %v4666_v43, %v22524_v32  ;;  %v4930_v2 = vmul.f32 %v4859_v12, %v22525_v53 }
 0x717   : > { %v18889_v59 = vadd.f32 %v4931_v40, %v4915_v30  ;;  %v22534_v30 = vld [vmem:[#allocation9_spill] sm:$0xff]  ;;  %v22535_v40 = vld [vmem:[#allocation136_spill] sm:$0xff] }
 0x718   : > { %v14558_v39 = vpop.f32.mrb[128].mxu1  ;;  %v14584_v6 = vpop.f32.mrb[128].mxu0  ;;  %v18892_v54 = vadd.f32 %v4930_v2, %v4914_v58  ;;  %v22536_v58 = vld [vmem:[#allocation119_spill] sm:$0xff]  ;;  %v22537_v2 = vld [vmem:[#allocation120_spill] sm:$0xff] }
 0x719   : > { %22526 = vst [vmem:[#allocation107_spill] sm:$0xff] %v18889_v59  ;;  %v4917_v46 = vmul.f32 %v14558_v39, %v22527_v18  ;;  %v4676_v16 = vpop.f32.mrb[129].mxu1  ;;  %v4933_v31 = vmul.f32 %v14584_v6, %v22529_v44  ;;  %v4869_v11 = vpop.f32.mrb[129].mxu0 }
 0x71a   : > { %22528 = vst [vmem:[#allocation108_spill] sm:$0xff] %v18892_v54  ;;  %v4916_v57 = vmul.f32 %v4676_v16, %v22530_v37  ;;  %v4932_v29 = vmul.f32 %v4869_v11, %v22531_v35  ;;  %v22540_v16 = vld [vmem:[#allocation10_spill] sm:$0xff]  ;;  %v22542_v35 = vld [vmem:[#allocation3_spill] sm:$0xff]  ;;  %v22576_v54 = vld [vmem:[#allocation53_spill] sm:$0xff] }
 0x71b   : > { %v18897_v61 = vadd.f32 %v4933_v31, %v4917_v46 }
 0x71c   : > { %v18899_v15 = vadd.f32 %v4932_v29, %v4916_v57  ;;  %v22541_v57 = vld [vmem:[#allocation141_spill] sm:$0xff] }
 0x71d   : > { %22532 = vst [vmem:[#allocation109_spill] sm:$0xff] %v18897_v61  ;;  %v14561_v56 = vpop.f32.mrb[130].mxu1 }
 0x71e   : > { %22533 = vst [vmem:[#allocation110_spill] sm:$0xff] %v18899_v15  ;;  %v4919_v17 = vmul.f32 %v14561_v56, %v22534_v30  ;;  %v14587_v43 = vpop.f32.mrb[130].mxu0  ;;  %v4686_v8 = vpop.f32.mrb[131].mxu1  ;;  %v22543_v30 = vld [vmem:[#allocation139_spill] sm:$0xff] }
 0x71f   : > { %v4935_v32 = vmul.f32 %v14587_v43, %v22535_v40  ;;  %v4918_v12 = vmul.f32 %v4686_v8, %v22536_v58  ;;  %v4879_v53 = vpop.f32.mrb[131].mxu0 }
 0x720   : > { %v4934_v39 = vmul.f32 %v4879_v53, %v22537_v2  ;;  %v22547_v2 = vld [vmem:[#allocation24_spill] sm:$0xff] }
 0x721   : > { %v18905_v18 = vadd.f32 %v4935_v32, %v4919_v17  ;;  %v22546_v32 = vld [vmem:[#allocation114_spill] sm:$0xff] }
 0x722   : > { %v18907_v6 = vadd.f32 %v4934_v39, %v4918_v12  ;;  %v18919_v39 = vsub.s32 3, %v22547_v2 }
 0x723   : > { %22538 = vst [vmem:[#allocation5_spill] sm:$0xff] %v18905_v18  ;;  %v14564_v46 = vpop.f32.mrb[132].mxu1 }
 0x724   : > { %22539 = vst [vmem:[#allocation112_spill] sm:$0xff] %v18907_v6  ;;  %v4921_v44 = vmul.f32 %v14564_v46, %v22540_v16  ;;  %v14590_v31 = vpop.f32.mrb[132].mxu0  ;;  %v4696_v37 = vpop.f32.mrb[133].mxu1  ;;  %22548 = vst [vmem:[#allocation8_spill] sm:$0xff] %v18919_v39  ;;  %v22549_v46 = vld [vmem:[#allocation140_spill] sm:$0xff] }
 0x725   : > { %v4937_v11 = vmul.f32 %v14590_v31, %v22541_v57  ;;  %v4920_v29 = vmul.f32 %v4696_v37, %v22542_v35  ;;  %v4889_v56 = vpop.f32.mrb[133].mxu0  ;;  %v22550_v31 = vld [vmem:[#allocation115_spill] sm:$0xff]  ;;  %v22551_v35 = vld [vmem:[#allocation138_spill] sm:$0xff] }
 0x726   : > { %v4936_v43 = vmul.f32 %v4889_v56, %v22543_v30 }
 0x727   : > { %v18913_v8 = vadd.f32 %v4937_v11, %v4921_v44  ;;  %v22552_v44 = vld [vmem:[#allocation33_spill] sm:$0xff] }
 0x728   : > { %v18915_v40 = vadd.f32 %v4936_v43, %v4920_v29  ;;  %v5145_v11 = vrot.slane %v22552_v44, %v18919_v39  ;;  %v22553_v29 = vld [vmem:[#allocation31_spill] sm:$0xff]  ;;  %v22554_v43 = vld [vmem:[#allocation32_spill] sm:$0xff] }
 0x729   : > { %22544 = vst [vmem:[#allocation111_spill] sm:$0xff] %v18913_v8  ;;  %v5578_v56 = vrot.slane %v22553_v29, %v18919_v39  ;;  %v22559_v44 = vld [vmem:[#allocation39_spill] sm:$0xff] }
 0x72a   : > { %22545 = vst [vmem:[#allocation6_spill] sm:$0xff] %v18915_v40  ;;  %v14567_v17 = vpop.f32.mrb[134].mxu1  ;;  %v5582_v40 = vrot.slane %v22559_v44, %v18919_v39 }
 0x72b   : > { %v4923_v58 = vmul.f32 %v14567_v17, %v22546_v32  ;;  %v14593_v12 = vpop.f32.mrb[134].mxu0  ;;  %v4706_v53 = vpop.f32.mrb[135].mxu1  ;;  %v5137_v17 = vrot.slane %v22554_v43, %v18919_v39  ;;  %v22555_v32 = vld [vmem:[#allocation35_spill] sm:$0xff] }
 0x72c   : > { %v4939_v16 = vmul.f32 %v14593_v12, %v22549_v46  ;;  %v4922_v57 = vmul.f32 %v4706_v53, %v22550_v31  ;;  %v4899_v37 = vpop.f32.mrb[135].mxu0  ;;  %v5570_v2 = vrot.slane %v22555_v32, %v18919_v39  ;;  %v22556_v12 = vld [vmem:[#allocation37_spill] sm:$0xff]  ;;  %v22561_v32 = vld [vmem:[#allocation36_spill] sm:$0xff] }
 0x72d   : > { %v4938_v6 = vmul.f32 %v4899_v37, %v22551_v35  ;;  %v5149_v46 = vrot.slane %v22556_v12, %v18919_v39  ;;  %v5141_v15 = vrot.slane %v22561_v32, %v18919_v39  ;;  %v22562_v12 = vld [vmem:[#allocation38_spill] sm:$0xff] }
 0x72e   : > { %v14600_v30 = vpop.f32.mrb[136].mxu1  ;;  %v18934_v53 = vadd.f32 %v4939_v16, %v4923_v58  ;;  %v5574_v58 = vrot.slane %v22562_v12, %v18919_v39 }
 0x72f   : > { %v5200_v31 = vadd.f32 %v14600_v30, %v5145_v11  ;;  %v18936_v37 = vadd.f32 %v14600_v30, %v5578_v56  ;;  %v5071_v35 = vpop.f32.mrb[137].mxu1  ;;  %v18940_v29 = vadd.f32 %v4938_v6, %v4922_v57  ;;  %v22563_v30 = vld [vmem:[#allocation41_spill] sm:$0xff]  ;;  %v22564_v6 = vld [vmem:[#allocation42_spill] sm:$0xff] }
 0x730   : > { %22557 = vst [vmem:[#allocation7_spill] sm:$0xff] %v18934_v53  ;;  %v5198_v8 = vadd.f32 %v5137_v17, %v5071_v35  ;;  %v18942_v18 = vadd.f32 %v5570_v2, %v5071_v35  ;;  %v14601_v43 = vpop.f32.mrb[138].mxu1  ;;  %v22565_v2 = vld [vmem:[#allocation50_spill] sm:$0xff]  ;;  %v22566_v35 = vld [vmem:[#allocation45_spill] sm:$0xff] }
 0x731   : > { %22558 = vst [vmem:[#allocation113_spill] sm:$0xff] %v18936_v37  ;;  %22560 = vst [vmem:[#allocation124_spill] sm:$0xff] %v18940_v29  ;;  %v5201_v16 = vadd.f32 %v14601_v43, %v5149_v46  ;;  %v18948_v11 = vadd.f32 %v14601_v43, %v5582_v40  ;;  %v5074_v56 = vpop.f32.mrb[139].mxu1  ;;  %v5216_v17 = vmul.f32 %v5200_v31, %v22565_v2  ;;  %v22567_v29 = vld [vmem:[#allocation46_spill] sm:$0xff]  ;;  %v22568_v40 = vld [vmem:[#allocation43_spill] sm:$0xff] }
 0x732   : > { %v5214_v53 = vmul.f32 %v5198_v8, %v22563_v30  ;;  %v5199_v61 = vadd.f32 %v5141_v15, %v5074_v56  ;;  %v18951_v44 = vadd.f32 %v5574_v58, %v5074_v56  ;;  %v5161_v32 = vrot.slane %v22566_v35, %v18919_v39  ;;  %v22569_v15 = vld [vmem:[#allocation48_spill] sm:$0xff]  ;;  %v22570_v58 = vld [vmem:[#allocation47_spill] sm:$0xff] }
 0x733   : > { %v5594_v12 = vrot.slane %v22567_v29, %v18919_v39  ;;  %v5153_v43 = vrot.slane %v22568_v40, %v18919_v39  ;;  %v5586_v8 = vrot.slane %v22569_v15, %v18919_v39  ;;  %v22573_v29 = vld [vmem:[#allocation49_spill] sm:$0xff]  ;;  %v22574_v40 = vld [vmem:[#allocation51_spill] sm:$0xff] }
 0x734   : > { %v5215_v57 = vmul.f32 %v5199_v61, %v22564_v6  ;;  %14646 = vmatprep.mubr.f32.mxu0 %v5214_v53  ;;  %v5165_v61 = vrot.slane %v22570_v58, %v18919_v39  ;;  %v22571_v53 = vld [vmem:[#allocation44_spill] sm:$0xff]  ;;  %v5217_v6 = vmul.f32 %v5201_v16, %v22574_v40  ;;  %v22583_v40 = vld [vmem:[#allocation57_spill] sm:$0xff] }
 0x735   : > { %v5157_v31 = vrot.slane %v22571_v53, %v18919_v39  ;;  %v5590_v53 = vrot.slane %v22576_v54, %v18919_v39 }
 0x736   : > { %v14604_v46 = vpop.f32.mrb[140].mxu1  ;;  %14647 = vmatmul.mubr.f32.vlgmr.msra.gmra.mrb[136].mxu0 %v5215_v57  ;;  %v5598_v57 = vrot.slane %v22573_v29, %v18919_v39 }
 0x737   : > { %v5204_v56 = vadd.f32 %v14604_v46, %v5161_v32  ;;  %v18967_v2 = vadd.f32 %v14604_v46, %v5594_v12  ;;  %v5087_v35 = vpop.f32.mrb[141].mxu1  ;;  %14649 = vmatprep.mubr.f32.mxu0 %v5216_v17  ;;  %14697 = vmatpush3.msk.msra.mxu0 %vm2300_vm1, %v18549_v7  ;;  %v22578_v46 = vld [vmem:[#allocation52_spill] sm:$0xff]  ;;  %v22580_v7 = vld [vmem:[#allocation54_spill] sm:$0xff] }
 0x738   : > { %v5202_v15 = vadd.f32 %v5153_v43, %v5087_v35  ;;  %v18974_v30 = vadd.f32 %v5586_v8, %v5087_v35  ;;  %v14605_v58 = vpop.f32.mrb[142].mxu1  ;;  %15605 = vmatprep.subr.bf16.mxu0 %v22300_v5  ;;  %v22581_v35 = vld [vmem:[#allocation61_spill] sm:$0xff]  ;;  %v22582_v8 = vld [vmem:[#allocation56_spill] sm:$0xff] }
 0x739   : > { %22572 = vst [vmem:[#allocation125_spill] sm:$0xff] %v18967_v2  ;;  %v5205_v32 = vadd.f32 %v14605_v58, %v5165_v61  ;;  %v18979_v12 = vadd.f32 %v14605_v58, %v5598_v57  ;;  %v5090_v17 = vpop.f32.mrb[143].mxu1  ;;  %v5220_v43 = vmul.f32 %v5204_v56, %v22581_v35  ;;  %v5177_v54 = vrot.slane %v22582_v8, %v18919_v39  ;;  %v22584_v57 = vld [vmem:[#allocation55_spill] sm:$0xff]  ;;  %v22588_v8 = vld [vmem:[#allocation58_spill] sm:$0xff] }
 0x73a   : > { %22575 = vst [vmem:[#allocation126_spill] sm:$0xff] %v18974_v30  ;;  %v5218_v29 = vmul.f32 %v5202_v15, %v22578_v46  ;;  %v5203_v2 = vadd.f32 %v5157_v31, %v5090_v17  ;;  %v18982_v59 = vadd.f32 %v5590_v53, %v5090_v17  ;;  %14650 = vmatmul.mubr.f32.gmra.mrb[138].mxu0 %v5217_v6  ;;  %v22585_v53 = vld [vmem:[#allocation59_spill] sm:$0xff]  ;;  %v22586_v6 = vld [vmem:[#allocation62_spill] sm:$0xff]  ;;  %v22592_v30 = vld [vmem:[#allocation65_spill] sm:$0xff] }
 0x73b   : > { %22577 = vst [vmem:[#allocation127_spill] sm:$0xff] %v18979_v12  ;;  %v5610_v61 = vrot.slane %v22583_v40, %v18919_v39  ;;  %v5169_v15 = vrot.slane %v22584_v57, %v18919_v39  ;;  %v5602_v31 = vrot.slane %v22585_v53, %v18919_v39  ;;  %v5181_v35 = vrot.slane %v22588_v8, %v18919_v39  ;;  %v22589_v40 = vld [vmem:[#allocation60_spill] sm:$0xff] }
 0x73c   : > { %22579 = vst [vmem:[#allocation128_spill] sm:$0xff] %v18982_v59  ;;  %v5219_v16 = vmul.f32 %v5203_v2, %v22580_v7  ;;  %14652 = vmatprep.mubr.f32.mxu0 %v5218_v29  ;;  %v5173_v2 = vrot.slane %v22586_v6, %v18919_v39  ;;  %v22590_v7 = vld [vmem:[#allocation66_spill] sm:$0xff]  ;;  %v5606_v6 = vrot.slane %v22592_v30, %v18919_v39  ;;  %v22599_v30 = vld [vmem:[#allocation69_spill] sm:$0xff] }
 0x73d   : > { %v5221_v46 = vmul.f32 %v5205_v32, %v22590_v7  ;;  %v22597_v32 = vld [vmem:[#allocation70_spill] sm:$0xff] }
 0x73e   : > { %v14608_v58 = vpop.f32.mrb[144].mxu1  ;;  %14653 = vmatmul.mubr.f32.gmra.mrb[140].mxu0 %v5219_v16  ;;  %v5614_v16 = vrot.slane %v22589_v40, %v18919_v39  ;;  %v22596_v40 = vld [vmem:[#allocation68_spill] sm:$0xff] }
 0x73f   : > { %v5208_v29 = vadd.f32 %v14608_v58, %v5177_v54  ;;  %v18996_v17 = vadd.f32 %v14608_v58, %v5610_v61  ;;  %v5103_v56 = vpop.f32.mrb[145].mxu1  ;;  %14655 = vmatprep.mubr.f32.mxu0 %v5220_v43  ;;  %v22594_v43 = vld [vmem:[#allocation67_spill] sm:$0xff] }
 0x740   : > { %v5206_v57 = vadd.f32 %v5169_v15, %v5103_v56  ;;  %v19003_v12 = vadd.f32 %v5602_v31, %v5103_v56  ;;  %v14609_v53 = vpop.f32.mrb[146].mxu1  ;;  %v22598_v31 = vld [vmem:[#allocation64_spill] sm:$0xff] }
 0x741   : > { %22587 = vst [vmem:[#allocation129_spill] sm:$0xff] %v18996_v17  ;;  %v5209_v54 = vadd.f32 %v14609_v53, %v5181_v35  ;;  %v19007_v61 = vadd.f32 %v14609_v53, %v5614_v16  ;;  %v5106_v58 = vpop.f32.mrb[147].mxu1  ;;  %v5224_v15 = vmul.f32 %v5208_v29, %v22597_v32  ;;  %v5193_v56 = vrot.slane %v22598_v31, %v18919_v39  ;;  %v22600_v16 = vld [vmem:[#allocation40_spill] sm:$0xff] }
 0x742   : > { %22591 = vst [vmem:[#allocation123_spill] sm:$0xff] %v19003_v12  ;;  %v5222_v17 = vmul.f32 %v5206_v57, %v22594_v43  ;;  %v5207_v62 = vadd.f32 %v5173_v2, %v5106_v58  ;;  %v19010_v8 = vadd.f32 %v5606_v6, %v5106_v58  ;;  %14656 = vmatmul.mubr.f32.gmra.mrb[142].mxu0 %v5221_v46  ;;  %v22601_v6 = vld [vmem:[#allocation71_spill] sm:$0xff]  ;;  %v22604_v31 = vld [vmem:[#allocation72_spill] sm:$0xff] }
 0x743   : > { %22593 = vst [vmem:[#allocation130_spill] sm:$0xff] %v19007_v61  ;;  %v5626_v35 = vrot.slane %v22599_v30, %v18919_v39  ;;  %v5185_v57 = vrot.slane %v22600_v16, %v18919_v39  ;;  %v5618_v2 = vrot.slane %v22601_v6, %v18919_v39  ;;  %v22602_v46 = vld [vmem:[#allocation63_spill] sm:$0xff]  ;;  %v5197_v32 = vrot.slane %v22604_v31, %v18919_v39  ;;  %v22605_v30 = vld [vmem:[#allocation73_spill] sm:$0xff]  ;;  %v22608_v61 = vld [vmem:[#allocation74_spill] sm:$0xff] }
 0x744   : > { %22595 = vst [vmem:[#allocation117_spill] sm:$0xff] %v19010_v8  ;;  %v5223_v59 = vmul.f32 %v5207_v62, %v22596_v40  ;;  %14658 = vmatprep.mubr.f32.mxu0 %v5222_v17  ;;  %v5189_v62 = vrot.slane %v22602_v46, %v18919_v39  ;;  %v22606_v40 = vld [vmem:[#allocation76_spill] sm:$0xff]  ;;  %v5622_v46 = vrot.slane %v22608_v61, %v18919_v39 }
 0x745   : > { %v5225_v43 = vmul.f32 %v5209_v54, %v22606_v40  ;;  %v22613_v54 = vld [vmem:[#allocation78_spill] sm:$0xff]  ;;  %v22618_v40 = vld [vmem:[#allocation97_spill] sm:$0xff] }
 0x746   : > { %v14612_v53 = vpop.f32.mrb[148].mxu1  ;;  %14659 = vmatmul.mubr.f32.gmra.mrb[144].mxu0 %v5223_v59  ;;  %v5630_v59 = vrot.slane %v22605_v30, %v18919_v39  ;;  %v22612_v30 = vld [vmem:[#allocation77_spill] sm:$0xff] }
 0x747   : > { %v5212_v17 = vadd.f32 %v14612_v53, %v5193_v56  ;;  %v19024_v58 = vadd.f32 %v14612_v53, %v5626_v35  ;;  %v5119_v29 = vpop.f32.mrb[149].mxu1  ;;  %14661 = vmatprep.mubr.f32.mxu0 %v5224_v15  ;;  %v22610_v15 = vld [vmem:[#allocation75_spill] sm:$0xff] }
 0x748   : > { %v5210_v16 = vadd.f32 %v5185_v57, %v5119_v29  ;;  %v19031_v7 = vadd.f32 %v5618_v2, %v5119_v29  ;;  %v14613_v6 = vpop.f32.mrb[150].mxu1  ;;  %v22614_v2 = vld [vmem:[#allocation11_spill] sm:$0xff] }
 0x749   : > { %22603 = vst [vmem:[#allocation131_spill] sm:$0xff] %v19024_v58  ;;  %v5213_v56 = vadd.f32 %v14613_v6, %v5197_v32  ;;  %v19035_v35 = vadd.f32 %v14613_v6, %v5630_v59  ;;  %v5122_v53 = vpop.f32.mrb[151].mxu1  ;;  %v5228_v57 = vmul.f32 %v5212_v17, %v22613_v54  ;;  %v5233_v32 = vpop.permute.xlu1 %5232 }
 0x74a   : > { %22607 = vst [vmem:[#allocation116_spill] sm:$0xff] %v19031_v7  ;;  %v5226_v58 = vmul.f32 %v5210_v16, %v22610_v15  ;;  %v5211_v12 = vadd.f32 %v5189_v62, %v5122_v53  ;;  %v19038_v31 = vadd.f32 %v5622_v46, %v5122_v53  ;;  %14662 = vmatmul.mubr.f32.gmra.mrb[146].mxu0 %v5225_v43  ;;  %v5231_v6 = vpop.permute.xlu0 %5230  ;;  %v22615_v43 = vld [vmem:[#allocation95_spill] sm:$0xff] }
 0x74b   : > { %22609 = vst [vmem:[#allocation132_spill] sm:$0xff] %v19035_v35  ;;  %v5229_v29 = vmul.f32 %v5213_v56, %v22614_v2 }
 0x74c   : > { %22611 = vst [vmem:[#allocation122_spill] sm:$0xff] %v19038_v31  ;;  %v5227_v8 = vmul.f32 %v5211_v12, %v22612_v30  ;;  %14664 = vmatprep.mubr.f32.mxu0 %v5226_v58  ;;  %v22616_v58 = vld [vmem:[#allocation96_spill] sm:$0xff] }
 0x74d   : > { %v5237_v59 = vpop.permute.xlu1 %5236 }
 0x74e   : > { %14665 = vmatmul.mubr.f32.gmra.mrb[148].mxu0 %v5227_v8  ;;  %v5235_v39 = vpop.permute.xlu0 %5234 }
 0x74f   : > { %14667 = vmatprep.mubr.f32.mxu0 %v5228_v57 }
 0x751   : > { %v5241_v61 = vpop.permute.xlu1 %5240 }
 0x752   : > { %14668 = vmatmul.mubr.f32.gmra.mrb[150].mxu0 %v5229_v29  ;;  %v5239_v12 = vpop.permute.xlu0 %5238 }
 0x755   : > { %v5245_v57 = vpop.permute.xlu1 %5244 }
 0x809   : > { %v14648_v16 = vpop.f32.mrb[136].mxu0 }
 0x80a   : > { %v5350_v62 = vadd.f32 %v14648_v16, %v5233_v32  ;;  %v5344_v46 = vpop.f32.mrb[137].mxu0 }
 0x80b   : > { %v5345_v53 = vadd.f32 %v5344_v46, %v5231_v6 }
 0x80c   : > { %v19044_v15 = vmax.f32 %v22615_v43, %v5350_v62 }
 0x80d   : > { %v19047_v17 = vmax.f32 %v22616_v58, %v5345_v53  ;;  %v14651_v8 = vpop.f32.mrb[138].mxu0 }
 0x80e   : > { %v5440_v56 = vsub.f32 %v22615_v43, %v19044_v15  ;;  %v5488_v29 = vsub.f32 %v5350_v62, %v19044_v15  ;;  %v5360_v2 = vadd.f32 %v14651_v8, %v5237_v59  ;;  %v5354_v54 = vpop.f32.mrb[139].mxu0 }
 0x80f   : > { %22617 = vst [vmem:[#allocation133_spill] sm:$0xff] %v19047_v17  ;;  %v5439_v32 = vsub.f32 %v22616_v58, %v19047_v17  ;;  %v5487_v6 = vsub.f32 %v5345_v53, %v19047_v17  ;;  %v5355_v16 = vadd.f32 %v5354_v54, %v5235_v39  ;;  %v5243_v39 = vpop.permute.xlu0 %5242 }
 0x810   : > { %v5457_v46 = vmul.f32 1.442695, %v5440_v56  ;;  %v5505_v30 = vmul.f32 1.442695, %v5488_v29  ;;  %v19056_v35 = vmax.f32 %v22618_v40, %v5360_v2  ;;  %v5249_v29 = vpop.permute.xlu1 %5248 }
 0x811   : > { %v5455_v7 = vmul.f32 1.442695, %v5439_v32  ;;  %v5503_v31 = vmul.f32 1.442695, %v5487_v6  ;;  %v19059_v37 = vmax.f32 %v22620_v26, %v5355_v16  ;;  %v14654_v43 = vpop.f32.mrb[140].mxu0 }
 0x812   : > { %22619 = vst [vmem:[#allocation121_spill] sm:$0xff] %v19056_v35  ;;  %16146 = vpow2.f32 %v5457_v46  ;;  %v5442_v59 = vsub.f32 %v22618_v40, %v19056_v35  ;;  %v5490_v62 = vsub.f32 %v5360_v2, %v19056_v35  ;;  %v5370_v58 = vadd.f32 %v14654_v43, %v5241_v61  ;;  %v5364_v53 = vpop.f32.mrb[141].mxu0  ;;  %v22622_v46 = vld [vmem:[#allocation99_spill] sm:$0xff]  ;;  %v22624_v61 = vld [vmem:[#allocation100_spill] sm:$0xff] }
 0x813   : > { %22621 = vst [vmem:[#allocation118_spill] sm:$0xff] %v19059_v37  ;;  %16148 = vpow2.f32 %v5505_v30  ;;  %v5441_v54 = vsub.f32 %v22620_v26, %v19059_v37  ;;  %v5489_v8 = vsub.f32 %v5355_v16, %v19059_v37  ;;  %v5365_v56 = vadd.f32 %v5364_v53, %v5239_v12 }
 0x814   : > { %16150 = vpow2.f32 %v5455_v7  ;;  %v5461_v32 = vmul.f32 1.442695, %v5442_v59  ;;  %v5509_v6 = vmul.f32 1.442695, %v5490_v62  ;;  %v19068_v17 = vmax.f32 %v22622_v46, %v5370_v58 }
 0x815   : > { %16152 = vpow2.f32 %v5503_v31  ;;  %v5459_v40 = vmul.f32 1.442695, %v5441_v54  ;;  %v5507_v2 = vmul.f32 1.442695, %v5489_v8  ;;  %v19071_v43 = vmax.f32 %v22624_v61, %v5365_v56  ;;  %v14657_v30 = vpop.f32.mrb[142].mxu0  ;;  %v22626_v8 = vld [vmem:[#allocation101_spill] sm:$0xff] }
 0x816   : > { %22623 = vst [vmem:[#allocation137_spill] sm:$0xff] %v19068_v17  ;;  %16154 = vpow2.f32 %v5461_v32  ;;  %v5444_v26 = vsub.f32 %v22622_v46, %v19068_v17  ;;  %v5492_v12 = vsub.f32 %v5370_v58, %v19068_v17  ;;  %v5380_v16 = vadd.f32 %v14657_v30, %v5245_v57  ;;  %v5374_v7 = vpop.f32.mrb[143].mxu0  ;;  %v5247_v32 = vpop.permute.xlu0 %5246  ;;  %v22627_v58 = vld [vmem:[#allocation102_spill] sm:$0xff] }
 0x817   : > { %22625 = vst [vmem:[#allocation134_spill] sm:$0xff] %v19071_v43  ;;  %16156 = vpow2.f32 %v5509_v6  ;;  %v5443_v59 = vsub.f32 %v22624_v61, %v19071_v43  ;;  %v5491_v31 = vsub.f32 %v5365_v56, %v19071_v43  ;;  %v5375_v62 = vadd.f32 %v5374_v7, %v5243_v39  ;;  %v5253_v30 = vpop.permute.xlu1 %5252 }
 0x818   : > { %16158 = vpow2.f32 %v5459_v40  ;;  %v5465_v53 = vmul.f32 1.442695, %v5444_v26  ;;  %v5513_v54 = vmul.f32 1.442695, %v5492_v12  ;;  %v19080_v37 = vmax.f32 %v22626_v8, %v5380_v16 }
 0x819   : > { %16160 = vpow2.f32 %v5507_v2  ;;  %v5463_v46 = vmul.f32 1.442695, %v5443_v59  ;;  %v5511_v35 = vmul.f32 1.442695, %v5491_v31  ;;  %v19083_v57 = vmax.f32 %v22627_v58, %v5375_v62  ;;  %v14660_v6 = vpop.f32.mrb[144].mxu0 }
 0x81a   : > { %16162 = vpow2.f32 %v5465_v53  ;;  %v5446_v56 = vsub.f32 %v22626_v8, %v19080_v37  ;;  %v5494_v39 = vsub.f32 %v5380_v16, %v19080_v37  ;;  %v5390_v40 = vadd.f32 %v14660_v6, %v5249_v29  ;;  %v5384_v61 = vpop.f32.mrb[145].mxu0  ;;  %v22628_v8 = vld [vmem:[#allocation103_spill] sm:$0xff] }
 0x81b   : > { %16164 = vpow2.f32 %v5513_v54  ;;  %v5445_v26 = vsub.f32 %v22627_v58, %v19083_v57  ;;  %v5493_v2 = vsub.f32 %v5375_v62, %v19083_v57  ;;  %v5385_v12 = vadd.f32 %v5384_v61, %v5247_v32  ;;  %v5251_v58 = vpop.permute.xlu0 %5250 }
 0x81c   : > { %v16147_v7 = vpop.eup %16146  ;;  %16166 = vpow2.f32 %v5463_v46  ;;  %v5469_v59 = vmul.f32 1.442695, %v5446_v56  ;;  %v5517_v31 = vmul.f32 1.442695, %v5494_v39  ;;  %v19092_v53 = vmax.f32 %v18672_v50, %v5390_v40 }
 0x81d   : > { %v16149_v43 = vpop.eup %16148  ;;  %v5536_v17 = vmul.f32 %v16147_v7, %v22628_v8  ;;  %16168 = vpow2.f32 %v5511_v35  ;;  %v5467_v29 = vmul.f32 1.442695, %v5445_v26  ;;  %v5515_v16 = vmul.f32 1.442695, %v5493_v2  ;;  %v14663_v54 = vpop.f32.mrb[146].mxu0 }
 0x81e   : > { %v16151_v6 = vpop.eup %16150  ;;  %16170 = vpow2.f32 %v5469_v59  ;;  %v5448_v62 = vsub.f32 %v18672_v50, %v19092_v53  ;;  %v5496_v32 = vsub.f32 %v5390_v40, %v19092_v53  ;;  %v19099_v46 = vmax.f32 %v18679_v13, %v5385_v12  ;;  %v5394_v56 = vpop.f32.mrb[147].mxu0 }
 0x81f   : > { %v16153_v39 = vpop.eup %16152  ;;  %v19101_v61 = vadd.f32 %v16149_v43, %v5536_v17  ;;  %v5535_v35 = vmul.f32 %v16151_v6, %v18689_v19  ;;  %16172 = vpow2.f32 %v5517_v31  ;;  %v5400_v26 = vadd.f32 %v14663_v54, %v5253_v30  ;;  %14672 = vmatprep.mubr.msk.f32.mxu1 %vm2251_vm2, %v16151_v6  ;;  %v5257_v2 = vpop.permute.xlu1 %5256  ;;  %v19117_v31 = vld [vmem:[%s21877_s5] sm:$0xff]  }
 0x820   : > { %v16155_v59 = vpop.eup %16154  ;;  %16174 = vpow2.f32 %v5467_v29  ;;  %v5473_v50 = vmul.f32 1.442695, %v5448_v62  ;;  %v5521_v8 = vmul.f32 1.442695, %v5496_v32  ;;  %v5447_v40 = vsub.f32 %v18679_v13, %v19099_v46  ;;  %14698 = vmatprep.mubr.msk.f32.mxu0 %vm2251_vm2, %v16153_v39  ;;  %14673 = vmatmul.mubr.msk.f32.vlgmr.msra.gmra.mrb[152].mxu1 %vm2251_vm2, %v16147_v7  ;;  %v22632_v32 = vld [vmem:[#allocation4_spill] sm:$0xff] }
 0x821   : > { %22629 = vst [vmem:[#allocation135_spill] sm:$0xff] %v19101_v61  ;;  %v16157_v17 = vpop.eup %16156  ;;  %v19109_v61 = vadd.f32 %v16153_v39, %v5535_v35  ;;  %v5538_v19 = vmul.f32 %v16155_v59, %v18700_v33  ;;  %16176 = vpow2.f32 %v5515_v16  ;;  %v5495_v30 = vsub.f32 %v5385_v12, %v19099_v46  ;;  %14699 = vmatmul.mubr.msk.f32.vlgmr.msra.gmra.mrb[152].mxu0 %vm2251_vm2, %v16149_v43  ;;  %v14666_v13 = vpop.f32.mrb[148].mxu0  ;;  %v22633_v35 = vld [vmem:[#allocation106_spill] sm:$0xff] }
 0x822   : > { %14723 = vmatpush3.bf16.msra.mxu1 %v19117_v31  ;;  %v16159_v29 = vpop.eup %16158  ;;  %16178 = vpow2.f32 %v5473_v50  ;;  %v5471_v7 = vmul.f32 1.442695, %v5447_v40  ;;  %v19121_v54 = vmax.f32 %v18696_v41, %v5400_v26  ;;  %v5395_v33 = vadd.f32 %v5394_v56, %v5251_v58  ;;  %v5404_v16 = vpop.f32.mrb[149].mxu0  ;;  %15607 = vmatpush3.bf16.msra.mxu0 %v22300_v5 }
 0x823   : > { %14724 = vmatprep.subr.bf16.mxu1 %v18720_v60  ;;  %v16161_v43 = vpop.eup %16160  ;;  %v19125_v12 = vadd.f32 %v16157_v17, %v5538_v19  ;;  %v5537_v6 = vmul.f32 %v16159_v29, %v18713_v55  ;;  %16180 = vpow2.f32 %v5521_v8  ;;  %v5519_v62 = vmul.f32 1.442695, %v5495_v30  ;;  %14675 = vmatprep.mubr.msk.f32.mxu1 %vm2251_vm2, %v16159_v29  ;;  %v5255_v40 = vpop.permute.xlu0 %5254 }
 0x824   : > { %22630 = vst [vmem:[#allocation9_spill] sm:$0xff] %v19121_v54  ;;  %15609 = vmatprep.subr.bf16.mxu0 %v22632_v32  ;;  %v16163_v39 = vpop.eup %16162  ;;  %16182 = vpow2.f32 %v5471_v7  ;;  %v5450_v58 = vsub.f32 %v18696_v41, %v19121_v54  ;;  %v5498_v56 = vsub.f32 %v5400_v26, %v19121_v54  ;;  %v19134_v50 = vmax.f32 %v22633_v35, %v5395_v33  ;;  %v5261_v41 = vpop.permute.xlu1 %5260 }
 0x825   : > { %22631 = vst [vmem:[#allocation136_spill] sm:$0xff] %v19125_v12  ;;  %14701 = vmatprep.mubr.msk.f32.mxu0 %vm2251_vm2, %v16161_v43  ;;  %14676 = vmatmul.mubr.msk.f32.gmra.mrb[154].mxu1 %vm2251_vm2, %v16155_v59  ;;  %v16165_v55 = vpop.eup %16164  ;;  %v19138_v8 = vadd.f32 %v16161_v43, %v5537_v6  ;;  %v5540_v19 = vmul.f32 %v16163_v39, %v18729_v36  ;;  %16184 = vpow2.f32 %v5519_v62  ;;  %v14669_v29 = vpop.f32.mrb[150].mxu0  ;;  %v19150_v36 = vld [vmem:[%s21879_s7] sm:$0xf] }
 0x826   : > { %v5410_v30 = vadd.f32 %v14666_v13, %v5257_v2  ;;  %14702 = vmatmul.mubr.msk.f32.gmra.mrb[154].mxu0 %vm2251_vm2, %v16157_v17  ;;  %14725 = vmatpush3.bf16.msra.mxu1 %v18720_v60  ;;  %v16167_v26 = vpop.eup %16166  ;;  %v5477_v7 = vmul.f32 1.442695, %v5450_v58  ;;  %v5525_v54 = vmul.f32 1.442695, %v5498_v56  ;;  %v5449_v12 = vsub.f32 %v22633_v35, %v19134_v50  ;;  %v5414_v43 = vpop.f32.mrb[151].mxu0 }
 0x827   : > { %v5497_v59 = vsub.f32 %v5395_v33, %v19134_v50  ;;  %15611 = vmatpush3.bf16.msra.mxu0 %v22632_v32  ;;  %14798 = vmatprep.subr.msk.mxu1 %vm2300_vm1, %v19150_v36  ;;  %v16169_v60 = vpop.eup %16168  ;;  %v19154_v2 = vadd.f32 %v16165_v55, %v5540_v19  ;;  %v5539_v17 = vmul.f32 %v16167_v26, %v18738_v28 }
 0x828   : > { %v19158_v13 = vmax.f32 %v18733_v52, %v5410_v30  ;;  %v5405_v33 = vadd.f32 %v5404_v16, %v5255_v40  ;;  %14678 = vmatprep.mubr.msk.f32.mxu1 %vm2251_vm2, %v16167_v26  ;;  %v16171_v6 = vpop.eup %16170  ;;  %16186 = vpow2.f32 %v5477_v7  ;;  %v5475_v62 = vmul.f32 1.442695, %v5449_v12  ;;  %14704 = vmatprep.mubr.msk.f32.mxu0 %vm2251_vm2, %v16169_v60 }
 0x829   : > { %v5523_v58 = vmul.f32 1.442695, %v5497_v59  ;;  %v5420_v56 = vadd.f32 %v14669_v29, %v5261_v41  ;;  %14679 = vmatmul.mubr.msk.f32.gmra.mrb[156].mxu1 %vm2251_vm2, %v16163_v39  ;;  %v16173_v35 = vpop.eup %16172  ;;  %v19163_v19 = vadd.f32 %v16169_v60, %v5539_v17  ;;  %v5542_v28 = vmul.f32 %v16171_v6, %v18753_v48  ;;  %15613 = vmatprep.subr.bf16.mxu0 %v22267_v25  ;;  %v5259_v60 = vpop.permute.xlu0 %5258 }
 0x82a   : > { %16188 = vpow2.f32 %v5525_v54  ;;  %v5452_v16 = vsub.f32 %v18733_v52, %v19158_v13  ;;  %14705 = vmatmul.mubr.msk.f32.gmra.mrb[156].mxu0 %vm2251_vm2, %v16165_v55  ;;  %v16175_v12 = vpop.eup %16174  ;;  %v5500_v40 = vsub.f32 %v5410_v30, %v19158_v13  ;;  %v19172_v41 = vmax.f32 %v18747_v0, %v5405_v33 }
 0x82b   : > { %16190 = vpow2.f32 %v5475_v62  ;;  %v19175_v39 = vmax.f32 %v18750_v21, %v5420_v56  ;;  %15615 = vmatpush3.bf16.msra.mxu0 %v22267_v25  ;;  %v16177_v48 = vpop.eup %16176  ;;  %v19178_v54 = vadd.f32 %v16173_v35, %v5542_v28  ;;  %v5541_v52 = vmul.f32 %v16175_v12, %v18765_v27  ;;  %14681 = vmatprep.mubr.msk.f32.mxu1 %vm2251_vm2, %v16175_v12 }
 0x82c   : > { %16192 = vpow2.f32 %v5523_v58  ;;  %v5481_v55 = vmul.f32 1.442695, %v5452_v16  ;;  %15617 = vmatprep.subr.bf16.mxu0 %v22271_v23  ;;  %v16179_v30 = vpop.eup %16178  ;;  %v5529_v29 = vmul.f32 1.442695, %v5500_v40  ;;  %v5451_v26 = vsub.f32 %v18747_v0, %v19172_v41  ;;  %14707 = vmatprep.mubr.msk.f32.mxu0 %vm2251_vm2, %v16177_v48 }
 0x82d   : > { %v5499_v7 = vsub.f32 %v5405_v33, %v19172_v41  ;;  %v5454_v59 = vsub.f32 %v18750_v21, %v19175_v39  ;;  %14682 = vmatmul.mubr.msk.f32.gmra.mrb[158].mxu1 %vm2251_vm2, %v16171_v6  ;;  %v16181_v27 = vpop.eup %16180  ;;  %v19190_v17 = vadd.f32 %v16177_v48, %v5541_v52  ;;  %v5544_v62 = vmul.f32 %v16179_v30, %v18771_v45 }
 0x82e   : > { %16194 = vpow2.f32 %v5481_v55  ;;  %v5502_v58 = vsub.f32 %v5420_v56, %v19175_v39  ;;  %14708 = vmatmul.mubr.msk.f32.gmra.mrb[158].mxu0 %vm2251_vm2, %v16173_v35  ;;  %v16183_v0 = vpop.eup %16182  ;;  %v5479_v33 = vmul.f32 1.442695, %v5451_v26  ;;  %v5415_v40 = vadd.f32 %v5414_v43, %v5259_v60 }
 0x82f   : > { %v5527_v28 = vmul.f32 1.442695, %v5499_v7  ;;  %v5485_v16 = vmul.f32 1.442695, %v5454_v59  ;;  %15619 = vmatpush3.bf16.msra.mxu0 %v22271_v23  ;;  %v16185_v21 = vpop.eup %16184  ;;  %v19196_v12 = vadd.f32 %v16181_v27, %v5544_v62  ;;  %v5543_v6 = vmul.f32 %v16183_v0, %v18778_v22  ;;  %14684 = vmatprep.mubr.msk.f32.mxu1 %vm2251_vm2, %v16183_v0 }
 0x830   : > { %16196 = vpow2.f32 %v5529_v29  ;;  %15621 = vmatprep.subr.bf16.mxu0 %v22272_v9  ;;  %v5533_v45 = vmul.f32 1.442695, %v5502_v58  ;;  %14710 = vmatprep.mubr.msk.f32.mxu0 %vm2251_vm2, %v16185_v21  ;;  %v19206_v35 = vmax.f32 %v18781_v4, %v5415_v40 }
 0x831   : > { %16198 = vpow2.f32 %v5479_v33  ;;  %14685 = vmatmul.mubr.msk.f32.gmra.mrb[160].mxu1 %vm2251_vm2, %v16179_v30  ;;  %v19203_v56 = vadd.f32 %v16185_v21, %v5543_v6 }
 0x832   : > { %16200 = vpow2.f32 %v5527_v28  ;;  %14711 = vmatmul.mubr.msk.f32.gmra.mrb[160].mxu0 %vm2251_vm2, %v16181_v27  ;;  %v16187_v22 = vpop.eup %16186  ;;  %v5453_v52 = vsub.f32 %v18781_v4, %v19206_v35  ;;  %v5501_v55 = vsub.f32 %v5415_v40, %v19206_v35 }
 0x833   : > { %16202 = vpow2.f32 %v5485_v16  ;;  %15623 = vmatpush3.bf16.msra.mxu0 %v22272_v9  ;;  %v5546_v48 = vmul.f32 %v16187_v22, %v18790_v38 }
 0x834   : > { %v16189_v43 = vpop.eup %16188  ;;  %15625 = vmatprep.subr.bf16.mxu0 %v22373_v10  ;;  %16204 = vpow2.f32 %v5533_v45  ;;  %v5483_v59 = vmul.f32 1.442695, %v5453_v52  ;;  %v5531_v60 = vmul.f32 1.442695, %v5501_v55  ;;  %v15926_v52 = vld [vmem:[%s17055_s18 + $0x120] sm:$0xff]   ;;  %v15927_v55 = vld [vmem:[%s17055_s18 + $0x128] sm:$0xff]  }
 0x835   : > { %v16191_v30 = vpop.eup %16190  ;;  %v19215_v26 = vadd.f32 %v16189_v43, %v5546_v48  ;;  %v15925_v48 = vld [vmem:[%s17055_s18 + $0x118] sm:$0xff]  }
 0x836   : > { %v16193_v29 = vpop.eup %16192  ;;  %v5545_v7 = vmul.f32 %v16191_v30, %v18796_v1  ;;  %14687 = vmatprep.mubr.msk.f32.mxu1 %vm2251_vm2, %v16191_v30  ;;  %16206 = vpow2.f32 %v5483_v59  ;;  %v15928_v30 = vld [vmem:[%s17055_s18 + $0x130] sm:$0xff]   ;;  %v19276_v59 = vld [vmem:[%s17707_s23] sm:$0xff] }
 0x837   : > { %14713 = vmatprep.mubr.msk.f32.mxu0 %vm2251_vm2, %v16193_v29  ;;  %14688 = vmatmul.mubr.msk.f32.gmra.mrb[162].mxu1 %vm2251_vm2, %v16187_v22  ;;  %16208 = vpow2.f32 %v5531_v60  ;;  %v19281_v60 = vld [vmem:[%s17707_s23 + $0x18] sm:$0xff] }
 0x838   : > { %v16195_v4 = vpop.eup %16194  ;;  %v19221_v38 = vadd.f32 %v16193_v29, %v5545_v7  ;;  %14714 = vmatmul.mubr.msk.f32.gmra.mrb[162].mxu0 %vm2251_vm2, %v16189_v43  ;;  %v15929_v29 = vld [vmem:[%s17055_s18 + $0x138] sm:$0xff]   ;;  %v19271_v7 = vld [vmem:[%s17707_s23 + $0x8] sm:$0xff]  ;;  %6355 = vrot.lane.b32.xlu0 %v19276_v59, %s16752_s15 }
 0x839   : > { %v5548_v27 = vmul.f32 %v16195_v4, %v18802_v20  ;;  %15627 = vmatpush3.bf16.msra.mxu0 %v22373_v10  ;;  %6357 = vrot.lane.b32.xlu1 %v19271_v7, %s16752_s15 }
 0x83a   : > { %v16197_v1 = vpop.eup %16196  ;;  %15629 = vmatprep.subr.bf16.mxu0 %v22277_v34 }
 0x83b   : > { %v16199_v62 = vpop.eup %16198  ;;  %v19227_v58 = vadd.f32 %v16197_v1, %v5548_v27  ;;  %v19291_v27 = vld [vmem:[%s17707_s23 + $0x28] sm:$0xff] }
 0x83c   : > { %v16201_v0 = vpop.eup %16200  ;;  %v5547_v33 = vmul.f32 %v16199_v62, %v18808_v51  ;;  %14690 = vmatprep.mubr.msk.f32.mxu1 %vm2251_vm2, %v16199_v62  ;;  %v15922_v51 = vld [vmem:[%s17055_s18 + $0x100] sm:$0xff]   ;;  %22634 = vst [vmem:[#allocation119_spill] sm:$0xff] %v19291_v27  ;;  %v19301_v62 = vld [vmem:[%s17707_s23 + $0x38] sm:$0xff] }
 0x83d   : > { %v16203_v28 = vpop.eup %16202  ;;  %14716 = vmatprep.mubr.msk.f32.mxu0 %vm2251_vm2, %v16201_v0  ;;  %14691 = vmatmul.mubr.msk.f32.gmra.mrb[164].mxu1 %vm2251_vm2, %v16195_v4  ;;  %v19286_v4 = vld [vmem:[%s17707_s23 + $0x10] sm:$0xff]  ;;  %22636 = vst [vmem:[#allocation10_spill] sm:$0xff] %v19301_v62 }
 0x83e   : > { %v19233_v20 = vadd.f32 %v16201_v0, %v5547_v33  ;;  %v5550_v16 = vmul.f32 %v16203_v28, %v18813_v49  ;;  %14717 = vmatmul.mubr.msk.f32.gmra.mrb[164].mxu0 %vm2251_vm2, %v16197_v1  ;;  %v16205_v21 = vpop.eup %16204  ;;  %v15923_v49 = vld [vmem:[%s17055_s18 + $0x108] sm:$0xff]   ;;  %6361 = vrot.lane.b32.xlu1 %v19281_v60, %s16752_s15  ;;  %v19296_v1 = vld [vmem:[%s17707_s23 + $0x20] sm:$0xff]  ;;  %v19306_v0 = vld [vmem:[%s17707_s23 + $0x30] sm:$0xff] }
 0x83f   : > { %15631 = vmatpush3.bf16.msra.mxu0 %v22277_v34  ;;  %6359 = vrot.lane.b32.xlu0 %v19286_v4, %s16752_s15  ;;  %22635 = vst [vmem:[#allocation120_spill] sm:$0xff] %v19296_v1  ;;  %22637 = vst [vmem:[#allocation141_spill] sm:$0xff] %v19306_v0  ;;  %v19311_v33 = vld [vmem:[%s17707_s23 + $0x48] sm:$0xff] }
 0x840   : > { %v19238_v6 = vadd.f32 %v16205_v21, %v5550_v16  ;;  %15633 = vmatprep.subr.bf16.mxu0 %v22278_v14  ;;  %v16207_v40 = vpop.eup %16206  ;;  %22638 = vst [vmem:[#allocation3_spill] sm:$0xff] %v19311_v33  ;;  %v19321_v16 = vld [vmem:[%s17707_s23 + $0x58] sm:$0xff] }
 0x841   : > { %v16209_v45 = vpop.eup %16208  ;;  %v5549_v22 = vmul.f32 %v16207_v40, %v18823_v63  ;;  %14693 = vmatprep.mubr.msk.f32.mxu1 %vm2251_vm2, %v16207_v40  ;;  %v15924_v63 = vld [vmem:[%s17055_s18 + $0x110] sm:$0xff]   ;;  %22640 = vst [vmem:[#allocation114_spill] sm:$0xff] %v19321_v16  ;;  %v19336_v40 = vld [vmem:[%s17707_s23 + $0x60] sm:$0xff] }
 0x842   : > { %14719 = vmatprep.mubr.msk.f32.mxu0 %vm2251_vm2, %v16209_v45  ;;  %14694 = vmatmul.mubr.msk.f32.gmra.mrb[166].mxu1 %vm2251_vm2, %v16203_v28  ;;  %v19316_v28 = vld [vmem:[%s17707_s23 + $0x40] sm:$0xff]  ;;  %22643 = vst [vmem:[#allocation138_spill] sm:$0xff] %v19336_v40 }
 0x843   : > { %15635 = vmatpush3.bf16.msra.mxu0 %v22278_v14  ;;  %v19248_v43 = vadd.f32 %v16209_v45, %v5549_v22  ;;  %14726 = vmatprep.mubr.msk.bf16.mxu1 %vm1212_vm0, %v15922_v51  ;;  %22639 = vst [vmem:[#allocation139_spill] sm:$0xff] %v19316_v28  ;;  %v19331_v51 = vld [vmem:[%s17707_s23 + $0x68] sm:$0xff]  ;;  %v19341_v45 = vld [vmem:[%s17707_s23 + $0x78] sm:$0xff]  ;;  %v19346_v22 = vld [vmem:[%s17707_s23 + $0x70] sm:$0xff] }
 0x844   : > { %14720 = vmatmul.mubr.msk.f32.gmra.mrb[166].mxu0 %vm2251_vm2, %v16205_v21  ;;  %14824 = vmatprep.subr.msk.mxu0 %vm2300_vm1, %v19150_v36  ;;  %v19326_v21 = vld [vmem:[%s17707_s23 + $0x50] sm:$0xff]  ;;  %22642 = vst [vmem:[#allocation115_spill] sm:$0xff] %v19331_v51  ;;  %22644 = vst [vmem:[#allocation95_spill] sm:$0xff] %v19341_v45 }
 0x845   : > { %6365 = vrot.lane.b32.xlu1 %v19291_v27, %s16752_s15  ;;  %6363 = vrot.lane.b32.xlu0 %v19296_v1, %s16752_s15  ;;  %22641 = vst [vmem:[#allocation140_spill] sm:$0xff] %v19326_v21  ;;  %22645 = vst [vmem:[#allocation96_spill] sm:$0xff] %v19346_v22 }
 0x846   : > { %14727 = vmatmul.mubr.msk.bf16.vlgmr.msra.gmra.mrb[168].mxu1 %vm1212_vm0, %v15923_v49 }
 0x847   : > { %14730 = vmatprep.mubr.msk.bf16.mxu1 %vm1212_vm0, %v15924_v63  ;;  %14799 = vmatpush3.msk.msra.mxu1 %vm2300_vm1, %v19150_v36 }
 0x848   : > { %14850 = vmatprep.subr.bf16.mxu1 %v19117_v31 }
 0x849   : > { %6369 = vrot.lane.b32.xlu1 %v19301_v62, %s16752_s15  ;;  %6367 = vrot.lane.b32.xlu0 %v19306_v0, %s16752_s15 }
 0x84d   : > { %6373 = vrot.lane.b32.xlu1 %v19311_v33, %s16752_s15  ;;  %6371 = vrot.lane.b32.xlu0 %v19316_v28, %s16752_s15 }
 0x84e   : > { %14731 = vmatmul.mubr.msk.bf16.gmra.mrb[172].mxu1 %vm1212_vm0, %v15925_v48 }
 0x84f   : > { %14734 = vmatprep.mubr.msk.bf16.mxu1 %vm1212_vm0, %v15926_v52 }
 0x851   : > { %6377 = vrot.lane.b32.xlu1 %v19321_v16, %s16752_s15  ;;  %6375 = vrot.lane.b32.xlu0 %v19326_v21, %s16752_s15 }
 0x855   : > { %6381 = vrot.lane.b32.xlu1 %v19331_v51, %s16752_s15  ;;  %6379 = vrot.lane.b32.xlu0 %v19336_v40, %s16752_s15 }
 0x856   : > { %14735 = vmatmul.mubr.msk.bf16.gmra.mrb[176].mxu1 %vm1212_vm0, %v15927_v55 }
 0x857   : > { %14738 = vmatprep.mubr.msk.bf16.mxu1 %vm1212_vm0, %v15928_v30 }
 0x859   : > { %6385 = vrot.lane.b32.xlu1 %v19341_v45, %s16752_s15  ;;  %6383 = vrot.lane.b32.xlu0 %v19346_v22, %s16752_s15 }
 0x85d   : > { %7482 = vrot.lane.b32.xlu1 %v19271_v7, %s16753_s24  ;;  %7480 = vrot.lane.b32.xlu0 %v19276_v59, %s16753_s24  ;;  %v22773_v7 = vld [vmem:[#allocation140_spill] sm:$0xff]  ;;  %v22774_v59 = vld [vmem:[#allocation115_spill] sm:$0xff] }
 0x85e   : > { %14739 = vmatmul.mubr.msk.bf16.gmra.mrb[180].mxu1 %vm1212_vm0, %v15929_v29 }
 0x861   : > { %7486 = vrot.lane.b32.xlu1 %v19281_v60, %s16753_s24  ;;  %7484 = vrot.lane.b32.xlu0 %v19286_v4, %s16753_s24  ;;  %v22775_v60 = vld [vmem:[#allocation138_spill] sm:$0xff]  ;;  %v22776_v4 = vld [vmem:[#allocation95_spill] sm:$0xff] }
 0x8f3   : > { %v14674_v49 = vpop.f32.mrb[152].mxu1 }
 0x8f4   : > { %v6034_v63 = vmul.f32 %v14674_v49, %v18865_v24  ;;  %v14700_v48 = vpop.f32.mrb[152].mxu0  ;;  %v5761_v52 = vpop.f32.mrb[153].mxu1 }
 0x8f5   : > { %v6050_v55 = vmul.f32 %v14700_v48, %v18951_v44  ;;  %v6033_v30 = vmul.f32 %v5761_v52, %v18868_v42  ;;  %v5954_v29 = vpop.f32.mrb[153].mxu0  ;;  %v22648_v44 = vld [vmem:[#allocation113_spill] sm:$0xff] }
 0x8f6   : > { %v6049_v40 = vmul.f32 %v5954_v29, %v18942_v18  ;;  %v22650_v18 = vld [vmem:[#allocation104_spill] sm:$0xff] }
 0x8f7   : > { %v19354_v21 = vadd.f32 %v6050_v55, %v6034_v63 }
 0x8f8   : > { %v14677_v51 = vpop.f32.mrb[154].mxu1  ;;  %v19357_v22 = vadd.f32 %v6049_v40, %v6033_v30  ;;  %v22653_v40 = vld [vmem:[#allocation105_spill] sm:$0xff] }
 0x8f9   : > { %22646 = vst [vmem:[#allocation97_spill] sm:$0xff] %v19354_v21  ;;  %v6036_v45 = vmul.f32 %v14677_v51, %v18873_v47  ;;  %v14703_v16 = vpop.f32.mrb[154].mxu0  ;;  %v5771_v28 = vpop.f32.mrb[155].mxu1  ;;  %v22652_v47 = vld [vmem:[#allocation128_spill] sm:$0xff] }
 0x8fa   : > { %22647 = vst [vmem:[#allocation98_spill] sm:$0xff] %v19357_v22  ;;  %v6052_v24 = vmul.f32 %v14703_v16, %v18948_v11  ;;  %v6035_v49 = vmul.f32 %v5771_v28, %v18876_v3  ;;  %v5964_v33 = vpop.f32.mrb[155].mxu0  ;;  %v22654_v11 = vld [vmem:[#allocation126_spill] sm:$0xff] }
 0x8fb   : > { %v6051_v48 = vmul.f32 %v5964_v33, %v22648_v44  ;;  %v22656_v33 = vld [vmem:[#allocation107_spill] sm:$0xff] }
 0x8fc   : > { %v14680_v42 = vpop.f32.mrb[156].mxu1  ;;  %v19362_v52 = vadd.f32 %v6052_v24, %v6036_v45 }
 0x8fd   : > { %v6038_v29 = vmul.f32 %v14680_v42, %v22650_v18  ;;  %v14706_v63 = vpop.f32.mrb[156].mxu0  ;;  %v5781_v55 = vpop.f32.mrb[157].mxu1  ;;  %v19365_v21 = vadd.f32 %v6051_v48, %v6035_v49  ;;  %v22658_v42 = vld [vmem:[#allocation127_spill] sm:$0xff]  ;;  %v22659_v49 = vld [vmem:[#allocation108_spill] sm:$0xff] }
 0x8fe   : > { %22649 = vst [vmem:[#allocation99_spill] sm:$0xff] %v19362_v52  ;;  %v6054_v51 = vmul.f32 %v14706_v63, %v22652_v47  ;;  %v6037_v30 = vmul.f32 %v5781_v55, %v22653_v40  ;;  %v5974_v22 = vpop.f32.mrb[157].mxu0  ;;  %v22660_v63 = vld [vmem:[#allocation125_spill] sm:$0xff] }
 0x8ff   : > { %22651 = vst [vmem:[#allocation100_spill] sm:$0xff] %v19365_v21  ;;  %v6053_v16 = vmul.f32 %v5974_v22, %v22654_v11  ;;  %v22662_v22 = vld [vmem:[#allocation109_spill] sm:$0xff] }
 0x900   : > { %v14683_v3 = vpop.f32.mrb[158].mxu1  ;;  %v19370_v28 = vadd.f32 %v6054_v51, %v6038_v29 }
 0x901   : > { %v6040_v44 = vmul.f32 %v14683_v3, %v22656_v33  ;;  %v14709_v45 = vpop.f32.mrb[158].mxu0  ;;  %v5791_v24 = vpop.f32.mrb[159].mxu1  ;;  %v19373_v52 = vadd.f32 %v6053_v16, %v6037_v30  ;;  %v22664_v3 = vld [vmem:[#allocation117_spill] sm:$0xff]  ;;  %v22665_v30 = vld [vmem:[#allocation110_spill] sm:$0xff] }
 0x902   : > { %22655 = vst [vmem:[#allocation101_spill] sm:$0xff] %v19370_v28  ;;  %v6056_v18 = vmul.f32 %v14709_v45, %v22658_v42  ;;  %v6039_v48 = vmul.f32 %v5791_v24, %v22659_v49  ;;  %v5984_v21 = vpop.f32.mrb[159].mxu0  ;;  %v22666_v45 = vld [vmem:[#allocation123_spill] sm:$0xff] }
 0x903   : > { %22657 = vst [vmem:[#allocation102_spill] sm:$0xff] %v19373_v52  ;;  %v6055_v47 = vmul.f32 %v5984_v21, %v22660_v63 }
 0x904   : > { %v14686_v55 = vpop.f32.mrb[160].mxu1  ;;  %v19378_v40 = vadd.f32 %v6056_v18, %v6040_v44  ;;  %v22669_v44 = vld [vmem:[#allocation5_spill] sm:$0xff] }
 0x905   : > { %v6042_v11 = vmul.f32 %v14686_v55, %v22662_v22  ;;  %v14712_v29 = vpop.f32.mrb[160].mxu0  ;;  %v5801_v51 = vpop.f32.mrb[161].mxu1  ;;  %v19381_v28 = vadd.f32 %v6055_v47, %v6039_v48  ;;  %v22670_v22 = vld [vmem:[#allocation130_spill] sm:$0xff]  ;;  %v22671_v48 = vld [vmem:[#allocation112_spill] sm:$0xff] }
 0x906   : > { %22661 = vst [vmem:[#allocation103_spill] sm:$0xff] %v19378_v40  ;;  %v6058_v33 = vmul.f32 %v14712_v29, %v22664_v3  ;;  %v6041_v16 = vmul.f32 %v5801_v51, %v22665_v30  ;;  %v5994_v52 = vpop.f32.mrb[161].mxu0  ;;  %v22672_v29 = vld [vmem:[#allocation129_spill] sm:$0xff] }
 0x907   : > { %22663 = vst [vmem:[#allocation4_spill] sm:$0xff] %v19381_v28  ;;  %v6057_v42 = vmul.f32 %v5994_v52, %v22666_v45 }
 0x908   : > { %v19386_v24 = vadd.f32 %v6058_v33, %v6042_v11  ;;  %v22675_v11 = vld [vmem:[#allocation111_spill] sm:$0xff] }
 0x909   : > { %v19388_v49 = vadd.f32 %v6057_v42, %v6041_v16  ;;  %v22676_v42 = vld [vmem:[#allocation122_spill] sm:$0xff] }
 0x90a   : > { %22667 = vst [vmem:[#allocation106_spill] sm:$0xff] %v19386_v24  ;;  %v14689_v21 = vpop.f32.mrb[162].mxu1 }
 0x90b   : > { %22668 = vst [vmem:[#allocation113_spill] sm:$0xff] %v19388_v49  ;;  %v6044_v18 = vmul.f32 %v14689_v21, %v22669_v44  ;;  %v14715_v63 = vpop.f32.mrb[162].mxu0  ;;  %v5811_v55 = vpop.f32.mrb[163].mxu1  ;;  %v22677_v44 = vld [vmem:[#allocation6_spill] sm:$0xff] }
 0x90c   : > { %v6060_v40 = vmul.f32 %v14715_v63, %v22670_v22  ;;  %v6043_v47 = vmul.f32 %v5811_v55, %v22671_v48  ;;  %v6004_v28 = vpop.f32.mrb[163].mxu0  ;;  %v22678_v63 = vld [vmem:[#allocation116_spill] sm:$0xff] }
 0x90d   : > { %v6059_v3 = vmul.f32 %v6004_v28, %v22672_v29 }
 0x90e   : > { %v19394_v51 = vadd.f32 %v6060_v40, %v6044_v18  ;;  %v22681_v40 = vld [vmem:[#allocation7_spill] sm:$0xff] }
 0x90f   : > { %v19396_v30 = vadd.f32 %v6059_v3, %v6043_v47  ;;  %v22682_v3 = vld [vmem:[#allocation24_spill] sm:$0xff] }
 0x910   : > { %22673 = vst [vmem:[#allocation104_spill] sm:$0xff] %v19394_v51  ;;  %v14692_v52 = vpop.f32.mrb[164].mxu1 }
 0x911   : > { %22674 = vst [vmem:[#allocation128_spill] sm:$0xff] %v19396_v30  ;;  %v6046_v33 = vmul.f32 %v14692_v52, %v22675_v11  ;;  %v14718_v16 = vpop.f32.mrb[164].mxu0  ;;  %v5821_v45 = vpop.f32.mrb[165].mxu1  ;;  %v19408_v52 = vsub.s32 4, %v22682_v3  ;;  %v22684_v11 = vld [vmem:[#allocation132_spill] sm:$0xff] }
 0x912   : > { %v6062_v21 = vmul.f32 %v14718_v16, %v22676_v42  ;;  %v6045_v49 = vmul.f32 %v5821_v45, %v22677_v44  ;;  %v6014_v24 = vpop.f32.mrb[165].mxu0  ;;  %v22685_v16 = vld [vmem:[#allocation124_spill] sm:$0xff]  ;;  %v22686_v44 = vld [vmem:[#allocation131_spill] sm:$0xff] }
 0x913   : > { %v6061_v22 = vmul.f32 %v6014_v24, %v22678_v63  ;;  %22683 = vst [vmem:[#allocation107_spill] sm:$0xff] %v19408_v52  ;;  %v22687_v24 = vld [vmem:[#allocation33_spill] sm:$0xff] }
 0x914   : > { %v19402_v55 = vadd.f32 %v6062_v21, %v6046_v33  ;;  %v6270_v33 = vrot.slane %v22687_v24, %v19408_v52  ;;  %v22694_v24 = vld [vmem:[#allocation39_spill] sm:$0xff] }
 0x915   : > { %v19404_v48 = vadd.f32 %v6061_v22, %v6045_v49  ;;  %v14695_v28 = vpop.f32.mrb[166].mxu1  ;;  %v22688_v49 = vld [vmem:[#allocation31_spill] sm:$0xff]  ;;  %v22689_v22 = vld [vmem:[#allocation32_spill] sm:$0xff] }
 0x916   : > { %22679 = vst [vmem:[#allocation105_spill] sm:$0xff] %v19402_v55  ;;  %v6048_v18 = vmul.f32 %v14695_v28, %v22681_v40  ;;  %v5831_v29 = vpop.f32.mrb[167].mxu1  ;;  %v6703_v21 = vrot.slane %v22688_v49, %v19408_v52  ;;  %v6262_v28 = vrot.slane %v22689_v22, %v19408_v52  ;;  %v22690_v40 = vld [vmem:[#allocation35_spill] sm:$0xff] }
 0x917   : > { %22680 = vst [vmem:[#allocation126_spill] sm:$0xff] %v19404_v48  ;;  %v14721_v47 = vpop.f32.mrb[166].mxu0  ;;  %v6047_v42 = vmul.f32 %v5831_v29, %v22685_v16  ;;  %v6695_v3 = vrot.slane %v22690_v40, %v19408_v52  ;;  %v6707_v48 = vrot.slane %v22694_v24, %v19408_v52  ;;  %v22697_v40 = vld [vmem:[#allocation36_spill] sm:$0xff] }
 0x918   : > { %v6064_v30 = vmul.f32 %v14721_v47, %v22684_v11  ;;  %v6024_v45 = vpop.f32.mrb[167].mxu0  ;;  %v22691_v47 = vld [vmem:[#allocation37_spill] sm:$0xff]  ;;  %v6266_v62 = vrot.slane %v22697_v40, %v19408_v52 }
 0x919   : > { %v6063_v51 = vmul.f32 %v6024_v45, %v22686_v44  ;;  %v14728_v63 = vpop.f32.mrb[168].mxu1  ;;  %v6274_v11 = vrot.slane %v22691_v47, %v19408_v52  ;;  %v22698_v47 = vld [vmem:[#allocation38_spill] sm:$0xff] }
 0x91a   : > { %v19423_v29 = vadd.f32 %v6064_v30, %v6048_v18  ;;  %v6325_v16 = vadd.f32 %v14728_v63, %v6270_v33  ;;  %v19425_v45 = vadd.f32 %v14728_v63, %v6703_v21  ;;  %v6196_v44 = vpop.f32.mrb[169].mxu1  ;;  %v6699_v30 = vrot.slane %v22698_v47, %v19408_v52  ;;  %v22700_v63 = vld [vmem:[#allocation41_spill] sm:$0xff] }
 0x91b   : > { %v19429_v49 = vadd.f32 %v6063_v51, %v6047_v42  ;;  %v6323_v55 = vadd.f32 %v6262_v28, %v6196_v44  ;;  %v19431_v0 = vadd.f32 %v6695_v3, %v6196_v44  ;;  %v14729_v22 = vpop.f32.mrb[170].mxu1  ;;  %v22702_v51 = vld [vmem:[#allocation42_spill] sm:$0xff]  ;;  %v22704_v44 = vld [vmem:[#allocation45_spill] sm:$0xff] }
 0x91c   : > { %22692 = vst [vmem:[#allocation127_spill] sm:$0xff] %v19423_v29  ;;  %22693 = vst [vmem:[#allocation108_spill] sm:$0xff] %v19425_v45  ;;  %v6326_v18 = vadd.f32 %v14729_v22, %v6274_v11  ;;  %v19437_v33 = vadd.f32 %v14729_v22, %v6707_v48  ;;  %v6199_v21 = vpop.f32.mrb[171].mxu1  ;;  %v22703_v3 = vld [vmem:[#allocation50_spill] sm:$0xff]  ;;  %v6286_v40 = vrot.slane %v22704_v44, %v19408_v52  ;;  %v22706_v48 = vld [vmem:[#allocation43_spill] sm:$0xff] }
 0x91d   : > { %22695 = vst [vmem:[#allocation125_spill] sm:$0xff] %v19429_v49  ;;  %22696 = vst [vmem:[#allocation109_spill] sm:$0xff] %v19431_v0  ;;  %v6339_v29 = vmul.f32 %v6323_v55, %v22700_v63  ;;  %v6324_v45 = vadd.f32 %v6266_v62, %v6199_v21  ;;  %v19440_v24 = vadd.f32 %v6699_v30, %v6199_v21  ;;  %v22705_v49 = vld [vmem:[#allocation46_spill] sm:$0xff]  ;;  %v22707_v62 = vld [vmem:[#allocation48_spill] sm:$0xff] }
 0x91e   : > { %22699 = vst [vmem:[#allocation117_spill] sm:$0xff] %v19437_v33  ;;  %v6341_v28 = vmul.f32 %v6325_v16, %v22703_v3  ;;  %v6719_v47 = vrot.slane %v22705_v49, %v19408_v52  ;;  %v6278_v22 = vrot.slane %v22706_v48, %v19408_v52  ;;  %v6711_v55 = vrot.slane %v22707_v62, %v19408_v52  ;;  %v22708_v30 = vld [vmem:[#allocation47_spill] sm:$0xff]  ;;  %v22711_v49 = vld [vmem:[#allocation49_spill] sm:$0xff] }
 0x91f   : > { %22701 = vst [vmem:[#allocation110_spill] sm:$0xff] %v19440_v24  ;;  %v6340_v42 = vmul.f32 %v6324_v45, %v22702_v51  ;;  %14774 = vmatprep.mubr.f32.mxu0 %v6339_v29  ;;  %v6290_v45 = vrot.slane %v22708_v30, %v19408_v52  ;;  %v22709_v29 = vld [vmem:[#allocation44_spill] sm:$0xff]  ;;  %v22712_v48 = vld [vmem:[#allocation51_spill] sm:$0xff]  ;;  %v22714_v33 = vld [vmem:[#allocation53_spill] sm:$0xff] }
 0x920   : > { %v6282_v16 = vrot.slane %v22709_v29, %v19408_v52  ;;  %v6342_v51 = vmul.f32 %v6326_v18, %v22712_v48  ;;  %v6715_v29 = vrot.slane %v22714_v33, %v19408_v52  ;;  %v22718_v18 = vld [vmem:[#allocation54_spill] sm:$0xff]  ;;  %v22720_v48 = vld [vmem:[#allocation56_spill] sm:$0xff] }
 0x921   : > { %v14732_v11 = vpop.f32.mrb[172].mxu1  ;;  %14775 = vmatmul.mubr.f32.vlgmr.msra.gmra.mrb[168].mxu0 %v6340_v42  ;;  %v6723_v42 = vrot.slane %v22711_v49, %v19408_v52  ;;  %v6302_v33 = vrot.slane %v22720_v48, %v19408_v52  ;;  %v22726_v48 = vld [vmem:[#allocation58_spill] sm:$0xff] }
 0x922   : > { %v6329_v21 = vadd.f32 %v14732_v11, %v6286_v40  ;;  %v19456_v3 = vadd.f32 %v14732_v11, %v6719_v47  ;;  %v6212_v44 = vpop.f32.mrb[173].mxu1  ;;  %14777 = vmatprep.mubr.f32.mxu0 %v6341_v28  ;;  %14825 = vmatpush3.msk.msra.mxu0 %vm2300_vm1, %v19150_v36  ;;  %v22716_v11 = vld [vmem:[#allocation52_spill] sm:$0xff] }
 0x923   : > { %v6327_v62 = vadd.f32 %v6278_v22, %v6212_v44  ;;  %v19463_v63 = vadd.f32 %v6711_v55, %v6212_v44  ;;  %v14733_v30 = vpop.f32.mrb[174].mxu1  ;;  %15637 = vmatprep.subr.bf16.mxu0 %v22300_v5  ;;  %v22719_v44 = vld [vmem:[#allocation61_spill] sm:$0xff] }
 0x924   : > { %22710 = vst [vmem:[#allocation123_spill] sm:$0xff] %v19456_v3  ;;  %v6330_v40 = vadd.f32 %v14733_v30, %v6290_v45  ;;  %v19468_v47 = vadd.f32 %v14733_v30, %v6723_v42  ;;  %v6215_v28 = vpop.f32.mrb[175].mxu1  ;;  %v6345_v55 = vmul.f32 %v6329_v21, %v22719_v44  ;;  %v22722_v42 = vld [vmem:[#allocation55_spill] sm:$0xff]  ;;  %v6306_v44 = vrot.slane %v22726_v48, %v19408_v52 }
 0x925   : > { %22713 = vst [vmem:[#allocation5_spill] sm:$0xff] %v19463_v63  ;;  %v6343_v49 = vmul.f32 %v6327_v62, %v22716_v11  ;;  %v6328_v3 = vadd.f32 %v6282_v16, %v6215_v28  ;;  %v19471_v0 = vadd.f32 %v6715_v29, %v6215_v28  ;;  %14778 = vmatmul.mubr.f32.gmra.mrb[170].mxu0 %v6342_v51  ;;  %v22721_v63 = vld [vmem:[#allocation57_spill] sm:$0xff]  ;;  %v22723_v29 = vld [vmem:[#allocation59_spill] sm:$0xff]  ;;  %v22724_v51 = vld [vmem:[#allocation62_spill] sm:$0xff] }
 0x926   : > { %22715 = vst [vmem:[#allocation130_spill] sm:$0xff] %v19468_v47  ;;  %v6735_v45 = vrot.slane %v22721_v63, %v19408_v52  ;;  %v6294_v62 = vrot.slane %v22722_v42, %v19408_v52  ;;  %v6727_v16 = vrot.slane %v22723_v29, %v19408_v52  ;;  %v22727_v63 = vld [vmem:[#allocation60_spill] sm:$0xff] }
 0x927   : > { %22717 = vst [vmem:[#allocation112_spill] sm:$0xff] %v19471_v0  ;;  %v6344_v22 = vmul.f32 %v6328_v3, %v22718_v18  ;;  %14780 = vmatprep.mubr.f32.mxu0 %v6343_v49  ;;  %v6298_v3 = vrot.slane %v22724_v51, %v19408_v52  ;;  %v22728_v18 = vld [vmem:[#allocation66_spill] sm:$0xff]  ;;  %v22730_v0 = vld [vmem:[#allocation65_spill] sm:$0xff] }
 0x928   : > { %v6346_v11 = vmul.f32 %v6330_v40, %v22728_v18  ;;  %v6731_v51 = vrot.slane %v22730_v0, %v19408_v52  ;;  %v22735_v40 = vld [vmem:[#allocation70_spill] sm:$0xff]  ;;  %v22737_v0 = vld [vmem:[#allocation69_spill] sm:$0xff] }
 0x929   : > { %v14736_v30 = vpop.f32.mrb[176].mxu1  ;;  %14781 = vmatmul.mubr.f32.gmra.mrb[172].mxu0 %v6344_v22  ;;  %v6739_v22 = vrot.slane %v22727_v63, %v19408_v52  ;;  %v22734_v63 = vld [vmem:[#allocation68_spill] sm:$0xff] }
 0x92a   : > { %v6333_v49 = vadd.f32 %v14736_v30, %v6302_v33  ;;  %v19485_v28 = vadd.f32 %v14736_v30, %v6735_v45  ;;  %v6228_v21 = vpop.f32.mrb[177].mxu1  ;;  %14783 = vmatprep.mubr.f32.mxu0 %v6345_v55  ;;  %v22732_v55 = vld [vmem:[#allocation67_spill] sm:$0xff] }
 0x92b   : > { %v6331_v42 = vadd.f32 %v6294_v62, %v6228_v21  ;;  %v19492_v47 = vadd.f32 %v6727_v16, %v6228_v21  ;;  %v14737_v29 = vpop.f32.mrb[178].mxu1  ;;  %v22736_v16 = vld [vmem:[#allocation64_spill] sm:$0xff] }
 0x92c   : > { %22725 = vst [vmem:[#allocation129_spill] sm:$0xff] %v19485_v28  ;;  %v6334_v33 = vadd.f32 %v14737_v29, %v6306_v44  ;;  %v19496_v45 = vadd.f32 %v14737_v29, %v6739_v22  ;;  %v6231_v30 = vpop.f32.mrb[179].mxu1  ;;  %v6349_v62 = vmul.f32 %v6333_v49, %v22735_v40  ;;  %v6318_v21 = vrot.slane %v22736_v16, %v19408_v52  ;;  %v22738_v22 = vld [vmem:[#allocation40_spill] sm:$0xff] }
 0x92d   : > { %22729 = vst [vmem:[#allocation111_spill] sm:$0xff] %v19492_v47  ;;  %v6347_v28 = vmul.f32 %v6331_v42, %v22732_v55  ;;  %v6332_v24 = vadd.f32 %v6298_v3, %v6231_v30  ;;  %v19499_v48 = vadd.f32 %v6731_v51, %v6231_v30  ;;  %14784 = vmatmul.mubr.f32.gmra.mrb[174].mxu0 %v6346_v11  ;;  %v22739_v51 = vld [vmem:[#allocation71_spill] sm:$0xff]  ;;  %v22742_v16 = vld [vmem:[#allocation72_spill] sm:$0xff] }
 0x92e   : > { %22731 = vst [vmem:[#allocation122_spill] sm:$0xff] %v19496_v45  ;;  %v6751_v44 = vrot.slane %v22737_v0, %v19408_v52  ;;  %v6310_v42 = vrot.slane %v22738_v22, %v19408_v52  ;;  %v6743_v3 = vrot.slane %v22739_v51, %v19408_v52  ;;  %v22740_v11 = vld [vmem:[#allocation63_spill] sm:$0xff]  ;;  %v6322_v40 = vrot.slane %v22742_v16, %v19408_v52  ;;  %v22743_v0 = vld [vmem:[#allocation73_spill] sm:$0xff]  ;;  %v22746_v45 = vld [vmem:[#allocation74_spill] sm:$0xff] }
 0x92f   : > { %22733 = vst [vmem:[#allocation6_spill] sm:$0xff] %v19499_v48  ;;  %v6348_v1 = vmul.f32 %v6332_v24, %v22734_v63  ;;  %14786 = vmatprep.mubr.f32.mxu0 %v6347_v28  ;;  %v6314_v24 = vrot.slane %v22740_v11, %v19408_v52  ;;  %v22744_v63 = vld [vmem:[#allocation76_spill] sm:$0xff]  ;;  %v6747_v11 = vrot.slane %v22746_v45, %v19408_v52 }
 0x930   : > { %v6350_v55 = vmul.f32 %v6334_v33, %v22744_v63  ;;  %v22751_v33 = vld [vmem:[#allocation78_spill] sm:$0xff] }
 0x931   : > { %v14740_v29 = vpop.f32.mrb[180].mxu1  ;;  %14787 = vmatmul.mubr.f32.gmra.mrb[176].mxu0 %v6348_v1  ;;  %v6755_v1 = vrot.slane %v22743_v0, %v19408_v52  ;;  %v22750_v0 = vld [vmem:[#allocation77_spill] sm:$0xff] }
 0x932   : > { %v6337_v28 = vadd.f32 %v14740_v29, %v6318_v21  ;;  %v19513_v30 = vadd.f32 %v14740_v29, %v6751_v44  ;;  %v6244_v49 = vpop.f32.mrb[181].mxu1  ;;  %14789 = vmatprep.mubr.f32.mxu0 %v6349_v62  ;;  %v22748_v62 = vld [vmem:[#allocation75_spill] sm:$0xff] }
 0x933   : > { %v6335_v22 = vadd.f32 %v6310_v42, %v6244_v49  ;;  %v19520_v18 = vadd.f32 %v6743_v3, %v6244_v49  ;;  %v14741_v51 = vpop.f32.mrb[182].mxu1  ;;  %v22752_v3 = vld [vmem:[#allocation11_spill] sm:$0xff] }
 0x934   : > { %22741 = vst [vmem:[#allocation116_spill] sm:$0xff] %v19513_v30  ;;  %v6338_v21 = vadd.f32 %v14741_v51, %v6322_v40  ;;  %v19524_v44 = vadd.f32 %v14741_v51, %v6755_v1  ;;  %v6247_v29 = vpop.f32.mrb[183].mxu1  ;;  %v6353_v42 = vmul.f32 %v6337_v28, %v22751_v33  ;;  %v6358_v40 = vpop.permute.xlu1 %6357 }
 0x935   : > { %22745 = vst [vmem:[#allocation7_spill] sm:$0xff] %v19520_v18  ;;  %v6351_v30 = vmul.f32 %v6335_v22, %v22748_v62  ;;  %v6336_v47 = vadd.f32 %v6314_v24, %v6247_v29  ;;  %v19527_v16 = vadd.f32 %v6747_v11, %v6247_v29  ;;  %14790 = vmatmul.mubr.f32.gmra.mrb[178].mxu0 %v6350_v55  ;;  %v6356_v51 = vpop.permute.xlu0 %6355  ;;  %v22755_v62 = vld [vmem:[#allocation121_spill] sm:$0xff] }
 0x936   : > { %22747 = vst [vmem:[#allocation132_spill] sm:$0xff] %v19524_v44  ;;  %v6354_v49 = vmul.f32 %v6338_v21, %v22752_v3 }
 0x937   : > { %22749 = vst [vmem:[#allocation124_spill] sm:$0xff] %v19527_v16  ;;  %v6352_v48 = vmul.f32 %v6336_v47, %v22750_v0  ;;  %14792 = vmatprep.mubr.f32.mxu0 %v6351_v30  ;;  %v22753_v30 = vld [vmem:[#allocation133_spill] sm:$0xff]  ;;  %v22756_v16 = vld [vmem:[#allocation118_spill] sm:$0xff] }
 0x938   : > { %v6362_v1 = vpop.permute.xlu1 %6361 }
 0x939   : > { %14793 = vmatmul.mubr.f32.gmra.mrb[180].mxu0 %v6352_v48  ;;  %v6360_v52 = vpop.permute.xlu0 %6359 }
 0x93a   : > { %14795 = vmatprep.mubr.f32.mxu0 %v6353_v42 }
 0x93c   : > { %v6366_v45 = vpop.permute.xlu1 %6365 }
 0x93d   : > { %14796 = vmatmul.mubr.f32.gmra.mrb[182].mxu0 %v6354_v49  ;;  %v6364_v47 = vpop.permute.xlu0 %6363 }
 0x940   : > { %v6370_v42 = vpop.permute.xlu1 %6369 }
 0x9f4   : > { %v14776_v22 = vpop.f32.mrb[168].mxu0 }
 0x9f5   : > { %v6475_v24 = vadd.f32 %v14776_v22, %v6358_v40  ;;  %v6469_v11 = vpop.f32.mrb[169].mxu0 }
 0x9f6   : > { %v6470_v29 = vadd.f32 %v6469_v11, %v6356_v51 }
 0x9f7   : > { %v19533_v55 = vmax.f32 %v19044_v15, %v6475_v24 }
 0x9f8   : > { %v19536_v28 = vmax.f32 %v22753_v30, %v6470_v29  ;;  %v14779_v48 = vpop.f32.mrb[170].mxu0 }
 0x9f9   : > { %v6565_v21 = vsub.f32 %v19044_v15, %v19533_v55  ;;  %v6613_v49 = vsub.f32 %v6475_v24, %v19533_v55  ;;  %v6485_v3 = vadd.f32 %v14779_v48, %v6362_v1  ;;  %v6479_v33 = vpop.f32.mrb[171].mxu0 }
 0x9fa   : > { %22754 = vst [vmem:[#allocation131_spill] sm:$0xff] %v19536_v28  ;;  %v6564_v40 = vsub.f32 %v22753_v30, %v19536_v28  ;;  %v6612_v51 = vsub.f32 %v6470_v29, %v19536_v28  ;;  %v6480_v22 = vadd.f32 %v6479_v33, %v6360_v52  ;;  %v6368_v52 = vpop.permute.xlu0 %6367 }
 0x9fb   : > { %v6582_v11 = vmul.f32 1.442695, %v6565_v21  ;;  %v6630_v0 = vmul.f32 1.442695, %v6613_v49  ;;  %v19545_v63 = vmax.f32 %v22755_v62, %v6485_v3  ;;  %v6374_v49 = vpop.permute.xlu1 %6373 }
 0x9fc   : > { %v6580_v44 = vmul.f32 1.442695, %v6564_v40  ;;  %v6628_v18 = vmul.f32 1.442695, %v6612_v51  ;;  %v19548_v27 = vmax.f32 %v22756_v16, %v6480_v22  ;;  %v14782_v15 = vpop.f32.mrb[172].mxu0 }
 0x9fd   : > { %16210 = vpow2.f32 %v6582_v11  ;;  %v6567_v1 = vsub.f32 %v22755_v62, %v19545_v63  ;;  %v6615_v24 = vsub.f32 %v6485_v3, %v19545_v63  ;;  %v6495_v30 = vadd.f32 %v14782_v15, %v6366_v45  ;;  %v6489_v29 = vpop.f32.mrb[173].mxu0  ;;  %v22758_v11 = vld [vmem:[#allocation137_spill] sm:$0xff]  ;;  %v22759_v45 = vld [vmem:[#allocation134_spill] sm:$0xff] }
 0x9fe   : > { %22757 = vst [vmem:[#allocation133_spill] sm:$0xff] %v19548_v27  ;;  %16212 = vpow2.f32 %v6630_v0  ;;  %v6566_v33 = vsub.f32 %v22756_v16, %v19548_v27  ;;  %v6614_v48 = vsub.f32 %v6480_v22, %v19548_v27  ;;  %v6490_v21 = vadd.f32 %v6489_v29, %v6364_v47 }
 0x9ff   : > { %16214 = vpow2.f32 %v6580_v44  ;;  %v6586_v40 = vmul.f32 1.442695, %v6567_v1  ;;  %v6634_v51 = vmul.f32 1.442695, %v6615_v24  ;;  %v19557_v28 = vmax.f32 %v22758_v11, %v6495_v30 }
 0xa00   : > { %16216 = vpow2.f32 %v6628_v18  ;;  %v6584_v62 = vmul.f32 1.442695, %v6566_v33  ;;  %v6632_v3 = vmul.f32 1.442695, %v6614_v48  ;;  %v19560_v15 = vmax.f32 %v22759_v45, %v6490_v21  ;;  %v14785_v0 = vpop.f32.mrb[174].mxu0 }
 0xa01   : > { %16218 = vpow2.f32 %v6586_v40  ;;  %v6569_v16 = vsub.f32 %v22758_v11, %v19557_v28  ;;  %v6617_v47 = vsub.f32 %v6495_v30, %v19557_v28  ;;  %v6505_v22 = vadd.f32 %v14785_v0, %v6370_v42  ;;  %v6499_v44 = vpop.f32.mrb[175].mxu0  ;;  %v6372_v40 = vpop.permute.xlu0 %6371 }
 0xa02   : > { %22760 = vst [vmem:[#allocation121_spill] sm:$0xff] %v19560_v15  ;;  %16220 = vpow2.f32 %v6634_v51  ;;  %v6568_v1 = vsub.f32 %v22759_v45, %v19560_v15  ;;  %v6616_v18 = vsub.f32 %v6490_v21, %v19560_v15  ;;  %v6500_v24 = vadd.f32 %v6499_v44, %v6368_v52  ;;  %v6378_v51 = vpop.permute.xlu1 %6377 }
 0xa03   : > { %16222 = vpow2.f32 %v6584_v62  ;;  %v6590_v29 = vmul.f32 1.442695, %v6569_v16  ;;  %v6638_v33 = vmul.f32 1.442695, %v6617_v47  ;;  %v19569_v48 = vmax.f32 %v19080_v37, %v6505_v22 }
 0xa04   : > { %16224 = vpow2.f32 %v6632_v3  ;;  %v6588_v11 = vmul.f32 1.442695, %v6568_v1  ;;  %v6636_v27 = vmul.f32 1.442695, %v6616_v18  ;;  %v19572_v42 = vmax.f32 %v19083_v57, %v6500_v24  ;;  %v14788_v30 = vpop.f32.mrb[176].mxu0 }
 0xa05   : > { %16226 = vpow2.f32 %v6590_v29  ;;  %v6571_v21 = vsub.f32 %v19080_v37, %v19569_v48  ;;  %v6619_v52 = vsub.f32 %v6505_v22, %v19569_v48  ;;  %v6515_v62 = vadd.f32 %v14788_v30, %v6374_v49  ;;  %v6509_v45 = vpop.f32.mrb[177].mxu0  ;;  %v22761_v37 = vld [vmem:[#allocation135_spill] sm:$0xff] }
 0xa06   : > { %16228 = vpow2.f32 %v6638_v33  ;;  %v6570_v0 = vsub.f32 %v19083_v57, %v19572_v42  ;;  %v6618_v3 = vsub.f32 %v6500_v24, %v19572_v42  ;;  %v6510_v16 = vadd.f32 %v6509_v45, %v6372_v40 }
 0xa07   : > { %v16211_v47 = vpop.eup %16210  ;;  %16230 = vpow2.f32 %v6588_v11  ;;  %v6594_v44 = vmul.f32 1.442695, %v6571_v21  ;;  %v6642_v1 = vmul.f32 1.442695, %v6619_v52  ;;  %v19581_v18 = vmax.f32 %v19092_v53, %v6515_v62  ;;  %v6376_v11 = vpop.permute.xlu0 %6375 }
 0xa08   : > { %v16213_v29 = vpop.eup %16212  ;;  %v6661_v15 = vmul.f32 %v16211_v47, %v22761_v37  ;;  %16232 = vpow2.f32 %v6636_v27  ;;  %v6592_v49 = vmul.f32 1.442695, %v6570_v0  ;;  %v6640_v22 = vmul.f32 1.442695, %v6618_v3  ;;  %v14791_v33 = vpop.f32.mrb[178].mxu0 }
 0xa09   : > { %v16215_v30 = vpop.eup %16214  ;;  %16234 = vpow2.f32 %v6594_v44  ;;  %v6573_v57 = vsub.f32 %v19092_v53, %v19581_v18  ;;  %v6621_v24 = vsub.f32 %v6515_v62, %v19581_v18  ;;  %v19588_v40 = vmax.f32 %v19099_v46, %v6510_v16  ;;  %v6519_v21 = vpop.f32.mrb[179].mxu0 }
 0xa0a   : > { %v16217_v52 = vpop.eup %16216  ;;  %v19590_v45 = vadd.f32 %v16213_v29, %v6661_v15  ;;  %v6660_v27 = vmul.f32 %v16215_v30, %v19109_v61  ;;  %16236 = vpow2.f32 %v6642_v1  ;;  %v6525_v0 = vadd.f32 %v14791_v33, %v6378_v51  ;;  %14800 = vmatprep.mubr.msk.f32.mxu1 %vm2251_vm2, %v16215_v30  ;;  %v6382_v3 = vpop.permute.xlu1 %6381  ;;  %v22763_v61 = vld [vmem:[#allocation136_spill] sm:$0xff]  ;;  %v22764_v30 = vld [vmem:[#allocation9_spill] sm:$0xff] }
 0xa0b   : > { %v16219_v44 = vpop.eup %16218  ;;  %16238 = vpow2.f32 %v6592_v49  ;;  %v6598_v53 = vmul.f32 1.442695, %v6573_v57  ;;  %v6646_v37 = vmul.f32 1.442695, %v6621_v24  ;;  %v6572_v62 = vsub.f32 %v19099_v46, %v19588_v40  ;;  %14826 = vmatprep.mubr.msk.f32.mxu0 %vm2251_vm2, %v16217_v52  ;;  %14801 = vmatmul.mubr.msk.f32.vlgmr.msra.gmra.mrb[184].mxu1 %vm2251_vm2, %v16211_v47 }
 0xa0c   : > { %22762 = vst [vmem:[#allocation118_spill] sm:$0xff] %v19590_v45  ;;  %v16221_v15 = vpop.eup %16220  ;;  %v19598_v45 = vadd.f32 %v16217_v52, %v6660_v27  ;;  %v6663_v1 = vmul.f32 %v16219_v44, %v22763_v61  ;;  %16240 = vpow2.f32 %v6640_v22  ;;  %v6620_v51 = vsub.f32 %v6510_v16, %v19588_v40  ;;  %14827 = vmatmul.mubr.msk.f32.vlgmr.msra.gmra.mrb[184].mxu0 %vm2251_vm2, %v16213_v29  ;;  %v14794_v49 = vpop.f32.mrb[180].mxu0  ;;  %v19610_v52 = vld [vmem:[%s21877_s5 + $0x8] sm:$0xff]  }
 0xa0d   : > { %14851 = vmatpush3.bf16.msra.mxu1 %v19117_v31  ;;  %v16223_v33 = vpop.eup %16222  ;;  %16242 = vpow2.f32 %v6598_v53  ;;  %v6596_v46 = vmul.f32 1.442695, %v6572_v62  ;;  %v19605_v57 = vmax.f32 %v22764_v30, %v6525_v0  ;;  %v6520_v47 = vadd.f32 %v6519_v21, %v6376_v11  ;;  %v6529_v24 = vpop.f32.mrb[181].mxu0  ;;  %15639 = vmatpush3.bf16.msra.mxu0 %v22300_v5 }
 0xa0e   : > { %14852 = vmatprep.subr.bf16.mxu1 %v19610_v52  ;;  %v16225_v16 = vpop.eup %16224  ;;  %v19614_v31 = vadd.f32 %v16221_v15, %v6663_v1  ;;  %v6662_v29 = vmul.f32 %v16223_v33, %v19138_v8  ;;  %16244 = vpow2.f32 %v6646_v37  ;;  %v6644_v22 = vmul.f32 1.442695, %v6620_v51  ;;  %14803 = vmatprep.mubr.msk.f32.mxu1 %vm2251_vm2, %v16223_v33  ;;  %v6380_v62 = vpop.permute.xlu0 %6379 }
 0xa0f   : > { %22765 = vst [vmem:[#allocation137_spill] sm:$0xff] %v19605_v57  ;;  %15641 = vmatprep.subr.bf16.mxu0 %v22632_v32  ;;  %v16227_v11 = vpop.eup %16226  ;;  %16246 = vpow2.f32 %v6596_v46  ;;  %v6575_v21 = vsub.f32 %v22764_v30, %v19605_v57  ;;  %v6623_v27 = vsub.f32 %v6525_v0, %v19605_v57  ;;  %v19623_v53 = vmax.f32 %v19134_v50, %v6520_v47  ;;  %v6386_v51 = vpop.permute.xlu1 %6385 }
 0xa10   : > { %14829 = vmatprep.mubr.msk.f32.mxu0 %vm2251_vm2, %v16225_v16  ;;  %14804 = vmatmul.mubr.msk.f32.gmra.mrb[186].mxu1 %vm2251_vm2, %v16219_v44  ;;  %v16229_v8 = vpop.eup %16228  ;;  %v19627_v37 = vadd.f32 %v16225_v16, %v6662_v29  ;;  %v6665_v61 = vmul.f32 %v16227_v11, %v19154_v2  ;;  %16248 = vpow2.f32 %v6644_v22  ;;  %v6535_v1 = vadd.f32 %v14794_v49, %v6382_v3  ;;  %v14797_v33 = vpop.f32.mrb[182].mxu0 }
 0xa11   : > { %14830 = vmatmul.mubr.msk.f32.gmra.mrb[186].mxu0 %vm2251_vm2, %v16221_v15  ;;  %14853 = vmatpush3.bf16.msra.mxu1 %v19610_v52  ;;  %v16231_v0 = vpop.eup %16230  ;;  %v6602_v46 = vmul.f32 1.442695, %v6575_v21  ;;  %v6650_v30 = vmul.f32 1.442695, %v6623_v27  ;;  %v6574_v57 = vsub.f32 %v19134_v50, %v19623_v53  ;;  %v6622_v44 = vsub.f32 %v6520_v47, %v19623_v53  ;;  %v6539_v16 = vpop.f32.mrb[183].mxu0 }
 0xa12   : > { %15643 = vmatpush3.bf16.msra.mxu0 %v22632_v32  ;;  %14926 = vmatprep.subr.msk.mxu1 %vm2300_vm1, %v19150_v36  ;;  %v16233_v2 = vpop.eup %16232  ;;  %v19638_v3 = vadd.f32 %v16229_v8, %v6665_v61  ;;  %v6664_v15 = vmul.f32 %v16231_v0, %v19163_v19  ;;  %v19642_v49 = vmax.f32 %v19158_v13, %v6535_v1 }
 0xa13   : > { %v6530_v29 = vadd.f32 %v6529_v24, %v6380_v62  ;;  %14806 = vmatprep.mubr.msk.f32.mxu1 %vm2251_vm2, %v16231_v0  ;;  %v16235_v50 = vpop.eup %16234  ;;  %16250 = vpow2.f32 %v6602_v46  ;;  %v6600_v47 = vmul.f32 1.442695, %v6574_v57  ;;  %v6648_v22 = vmul.f32 1.442695, %v6622_v44  ;;  %14832 = vmatprep.mubr.msk.f32.mxu0 %vm2251_vm2, %v16233_v2  ;;  %v6384_v44 = vpop.permute.xlu0 %6383 }
 0xa14   : > { %v6545_v21 = vadd.f32 %v14797_v33, %v6386_v51  ;;  %14807 = vmatmul.mubr.msk.f32.gmra.mrb[188].mxu1 %vm2251_vm2, %v16227_v11  ;;  %v16237_v36 = vpop.eup %16236  ;;  %v19647_v27 = vadd.f32 %v16233_v2, %v6664_v15  ;;  %v6667_v19 = vmul.f32 %v16235_v50, %v19178_v54  ;;  %16252 = vpow2.f32 %v6650_v30  ;;  %15645 = vmatprep.subr.bf16.mxu0 %v22267_v25 }
 0xa15   : > { %v6577_v24 = vsub.f32 %v19158_v13, %v19642_v49  ;;  %14833 = vmatmul.mubr.msk.f32.gmra.mrb[188].mxu0 %vm2251_vm2, %v16229_v8  ;;  %v16239_v57 = vpop.eup %16238  ;;  %16254 = vpow2.f32 %v6600_v47  ;;  %v6625_v62 = vsub.f32 %v6535_v1, %v19642_v49  ;;  %v19656_v61 = vmax.f32 %v19172_v41, %v6530_v29 }
 0xa16   : > { %v19659_v11 = vmax.f32 %v19175_v39, %v6545_v21  ;;  %15647 = vmatpush3.bf16.msra.mxu0 %v22267_v25  ;;  %v16241_v54 = vpop.eup %16240  ;;  %v19662_v51 = vadd.f32 %v16237_v36, %v6667_v19  ;;  %v6666_v13 = vmul.f32 %v16239_v57, %v19190_v17  ;;  %16256 = vpow2.f32 %v6648_v22  ;;  %14809 = vmatprep.mubr.msk.f32.mxu1 %vm2251_vm2, %v16239_v57 }
 0xa17   : > { %v6606_v8 = vmul.f32 1.442695, %v6577_v24  ;;  %15649 = vmatprep.subr.bf16.mxu0 %v22271_v23  ;;  %v16243_v1 = vpop.eup %16242  ;;  %v6654_v33 = vmul.f32 1.442695, %v6625_v62  ;;  %v6576_v0 = vsub.f32 %v19172_v41, %v19656_v61  ;;  %v6624_v46 = vsub.f32 %v6530_v29, %v19656_v61  ;;  %14835 = vmatprep.mubr.msk.f32.mxu0 %vm2251_vm2, %v16241_v54 }
 0xa18   : > { %v6579_v30 = vsub.f32 %v19175_v39, %v19659_v11  ;;  %14810 = vmatmul.mubr.msk.f32.gmra.mrb[190].mxu1 %vm2251_vm2, %v16235_v50  ;;  %v16245_v17 = vpop.eup %16244  ;;  %v19674_v2 = vadd.f32 %v16241_v54, %v6666_v13  ;;  %v6669_v15 = vmul.f32 %v16243_v1, %v19196_v12  ;;  %v6627_v47 = vsub.f32 %v6545_v21, %v19659_v11 }
 0xa19   : > { %16258 = vpow2.f32 %v6606_v8  ;;  %14836 = vmatmul.mubr.msk.f32.gmra.mrb[190].mxu0 %vm2251_vm2, %v16237_v36  ;;  %v16247_v41 = vpop.eup %16246  ;;  %v6604_v29 = vmul.f32 1.442695, %v6576_v0  ;;  %v6652_v22 = vmul.f32 1.442695, %v6624_v46  ;;  %v6540_v57 = vadd.f32 %v6539_v16, %v6384_v44 }
 0xa1a   : > { %v6610_v19 = vmul.f32 1.442695, %v6579_v30  ;;  %15651 = vmatpush3.bf16.msra.mxu0 %v22271_v23  ;;  %v16249_v39 = vpop.eup %16248  ;;  %v19680_v24 = vadd.f32 %v16245_v17, %v6669_v15  ;;  %v6668_v50 = vmul.f32 %v16247_v41, %v19203_v56  ;;  %16260 = vpow2.f32 %v6654_v33  ;;  %14812 = vmatprep.mubr.msk.f32.mxu1 %vm2251_vm2, %v16247_v41 }
 0xa1b   : > { %15653 = vmatprep.subr.bf16.mxu0 %v22272_v9  ;;  %16262 = vpow2.f32 %v6604_v29  ;;  %v6658_v12 = vmul.f32 1.442695, %v6627_v47  ;;  %14838 = vmatprep.mubr.msk.f32.mxu0 %vm2251_vm2, %v16249_v39  ;;  %v19690_v36 = vmax.f32 %v19206_v35, %v6540_v57 }
 0xa1c   : > { %14813 = vmatmul.mubr.msk.f32.gmra.mrb[192].mxu1 %vm2251_vm2, %v16243_v1  ;;  %v19687_v21 = vadd.f32 %v16249_v39, %v6668_v50  ;;  %16264 = vpow2.f32 %v6652_v22 }
 0xa1d   : > { %14839 = vmatmul.mubr.msk.f32.gmra.mrb[192].mxu0 %vm2251_vm2, %v16245_v17  ;;  %v16251_v56 = vpop.eup %16250  ;;  %16266 = vpow2.f32 %v6610_v19  ;;  %v6578_v54 = vsub.f32 %v19206_v35, %v19690_v36  ;;  %v6626_v13 = vsub.f32 %v6540_v57, %v19690_v36 }
 0xa1e   : > { %15655 = vmatpush3.bf16.msra.mxu0 %v22272_v9  ;;  %v16253_v16 = vpop.eup %16252  ;;  %v6671_v62 = vmul.f32 %v16251_v56, %v19215_v26  ;;  %16268 = vpow2.f32 %v6658_v12 }
 0xa1f   : > { %15657 = vmatprep.subr.bf16.mxu0 %v22373_v10  ;;  %v16255_v8 = vpop.eup %16254  ;;  %v6608_v46 = vmul.f32 1.442695, %v6578_v54  ;;  %v6656_v30 = vmul.f32 1.442695, %v6626_v13  ;;  %v15933_v54 = vld [vmem:[%s17055_s18 + $0x158] sm:$0xff]   ;;  %v15934_v13 = vld [vmem:[%s17055_s18 + $0x160] sm:$0xff]  }
 0xa20   : > { %v16257_v1 = vpop.eup %16256  ;;  %v19699_v33 = vadd.f32 %v16253_v16, %v6671_v62  ;;  %v6670_v0 = vmul.f32 %v16255_v8, %v19221_v38  ;;  %14815 = vmatprep.mubr.msk.f32.mxu1 %vm2251_vm2, %v16255_v8  ;;  %v19751_v62 = vld [vmem:[%s21877_s5] sm:$0xff]   ;;  %v15935_v8 = vld [vmem:[%s17055_s18 + $0x168] sm:$0xff]  }
 0xa21   : > { %14841 = vmatprep.mubr.msk.f32.mxu0 %vm2251_vm2, %v16257_v1  ;;  %14816 = vmatmul.mubr.msk.f32.gmra.mrb[194].mxu1 %vm2251_vm2, %v16251_v56  ;;  %16270 = vpow2.f32 %v6608_v46  ;;  %v22766_v46 = vld [vmem:[#allocation119_spill] sm:$0xff] }
 0xa22   : > { %v19705_v26 = vadd.f32 %v16257_v1, %v6670_v0  ;;  %14842 = vmatmul.mubr.msk.f32.gmra.mrb[194].mxu0 %vm2251_vm2, %v16253_v16  ;;  %16272 = vpow2.f32 %v6656_v30  ;;  %v19740_v16 = vld [vmem:[%s21879_s7] sm:$0xf]  ;;  %v15936_v1 = vld [vmem:[%s17055_s18 + $0x170] sm:$0xff]   ;;  %v15937_v0 = vld [vmem:[%s17055_s18 + $0x178] sm:$0xff]   ;;  %7490 = vrot.lane.b32.xlu1 %v22766_v46, %s16753_s24 }
 0xa23   : > { %v16259_v35 = vpop.eup %16258  ;;  %15659 = vmatpush3.bf16.msra.mxu0 %v22373_v10  ;;  %v22767_v30 = vld [vmem:[#allocation120_spill] sm:$0xff]  ;;  %v22782_v46 = vld [vmem:[#allocation99_spill] sm:$0xff] }
 0xa24   : > { %v6673_v44 = vmul.f32 %v16259_v35, %v19227_v58  ;;  %v16261_v38 = vpop.eup %16260  ;;  %15661 = vmatprep.subr.bf16.mxu0 %v22277_v34  ;;  %7488 = vrot.lane.b32.xlu0 %v22767_v30, %s16753_s24 }
 0xa25   : > { %v16263_v17 = vpop.eup %16262 }
 0xa26   : > { %v19711_v15 = vadd.f32 %v16261_v38, %v6673_v44  ;;  %v16265_v47 = vpop.eup %16264  ;;  %v6672_v41 = vmul.f32 %v16263_v17, %v19233_v20  ;;  %14818 = vmatprep.mubr.msk.f32.mxu1 %vm2251_vm2, %v16263_v17  ;;  %v15930_v20 = vld [vmem:[%s17055_s18 + $0x140] sm:$0xff]   ;;  %v22769_v44 = vld [vmem:[#allocation141_spill] sm:$0xff] }
 0xa27   : > { %v16267_v29 = vpop.eup %16266  ;;  %14844 = vmatprep.mubr.msk.f32.mxu0 %vm2251_vm2, %v16265_v47  ;;  %14819 = vmatmul.mubr.msk.f32.gmra.mrb[196].mxu1 %vm2251_vm2, %v16259_v35  ;;  %v22768_v35 = vld [vmem:[#allocation10_spill] sm:$0xff]  ;;  %v22771_v17 = vld [vmem:[#allocation139_spill] sm:$0xff] }
 0xa28   : > { %v19717_v58 = vadd.f32 %v16265_v47, %v6672_v41  ;;  %v6675_v22 = vmul.f32 %v16267_v29, %v19238_v6  ;;  %14845 = vmatmul.mubr.msk.f32.gmra.mrb[196].mxu0 %vm2251_vm2, %v16261_v38  ;;  %v16269_v19 = vpop.eup %16268  ;;  %v15931_v6 = vld [vmem:[%s17055_s18 + $0x148] sm:$0xff]   ;;  %7494 = vrot.lane.b32.xlu1 %v22768_v35, %s16753_s24  ;;  %v22770_v38 = vld [vmem:[#allocation3_spill] sm:$0xff]  ;;  %v22772_v47 = vld [vmem:[#allocation114_spill] sm:$0xff] }
 0xa29   : > { %15663 = vmatpush3.bf16.msra.mxu0 %v22277_v34  ;;  %7492 = vrot.lane.b32.xlu0 %v22769_v44, %s16753_s24  ;;  %v22777_v41 = vld [vmem:[#allocation96_spill] sm:$0xff] }
 0xa2a   : > { %v19722_v39 = vadd.f32 %v16269_v19, %v6675_v22  ;;  %15665 = vmatprep.subr.bf16.mxu0 %v22278_v14  ;;  %v22778_v22 = vld [vmem:[#allocation97_spill] sm:$0xff] }
 0xa2b   : > { %v16271_v50 = vpop.eup %16270 }
 0xa2c   : > { %v16273_v57 = vpop.eup %16272  ;;  %v6674_v12 = vmul.f32 %v16271_v50, %v19248_v43  ;;  %14821 = vmatprep.mubr.msk.f32.mxu1 %vm2251_vm2, %v16271_v50  ;;  %v15932_v43 = vld [vmem:[%s17055_s18 + $0x150] sm:$0xff]   ;;  %7498 = vrot.lane.b32.xlu1 %v22770_v38, %s16753_s24 }
 0xa2d   : > { %15667 = vmatpush3.bf16.msra.mxu0 %v22278_v14  ;;  %14847 = vmatprep.mubr.msk.f32.mxu0 %vm2251_vm2, %v16273_v57 }
 0xa2e   : > { %14822 = vmatmul.mubr.msk.f32.gmra.mrb[198].mxu1 %vm2251_vm2, %v16267_v29  ;;  %v19732_v56 = vadd.f32 %v16273_v57, %v6674_v12  ;;  %14848 = vmatmul.mubr.msk.f32.gmra.mrb[198].mxu0 %vm2251_vm2, %v16269_v19  ;;  %v22779_v57 = vld [vmem:[#allocation110_spill] sm:$0xff] }
 0xa2f   : > { %14854 = vmatprep.mubr.msk.bf16.mxu1 %vm1212_vm0, %v15930_v20  ;;  %14952 = vmatprep.subr.msk.mxu0 %vm2300_vm1, %v19740_v16 }
 0xa30   : > { %7496 = vrot.lane.b32.xlu0 %v22771_v17, %s16753_s24  ;;  %7502 = vrot.lane.b32.xlu1 %v22772_v47, %s16753_s24  ;;  %v22784_v17 = vld [vmem:[#allocation117_spill] sm:$0xff] }
 0xa32   : > { %14855 = vmatmul.mubr.msk.bf16.vlgmr.msra.gmra.mrb[200].mxu1 %vm1212_vm0, %v15931_v6  ;;  %v22780_v6 = vld [vmem:[#allocation98_spill] sm:$0xff] }
 0xa33   : > { %14858 = vmatprep.mubr.msk.bf16.mxu1 %vm1212_vm0, %v15932_v43  ;;  %14927 = vmatpush3.msk.msra.mxu1 %vm2300_vm1, %v19740_v16 }
 0xa34   : > { %14978 = vmatprep.subr.bf16.mxu1 %v19751_v62  ;;  %7500 = vrot.lane.b32.xlu0 %v22773_v7, %s16753_s24  ;;  %v22785_v7 = vld [vmem:[#allocation100_spill] sm:$0xff] }
 0xa35   : > { %7506 = vrot.lane.b32.xlu1 %v22774_v59, %s16753_s24 }
 0xa38   : > { %7504 = vrot.lane.b32.xlu0 %v22775_v60, %s16753_s24 }
 0xa39   : > { %7510 = vrot.lane.b32.xlu1 %v22776_v4, %s16753_s24  ;;  %v22786_v4 = vld [vmem:[#allocation108_spill] sm:$0xff] }
 0xa3a   : > { %14859 = vmatmul.mubr.msk.bf16.gmra.mrb[204].mxu1 %vm1212_vm0, %v15933_v54 }
 0xa3b   : > { %14862 = vmatprep.mubr.msk.bf16.mxu1 %vm1212_vm0, %v15934_v13  ;;  %v22781_v13 = vld [vmem:[#allocation109_spill] sm:$0xff] }
 0xa3c   : > { %7508 = vrot.lane.b32.xlu0 %v22777_v41, %s16753_s24 }
 0xa42   : > { %14863 = vmatmul.mubr.msk.bf16.gmra.mrb[208].mxu1 %vm1212_vm0, %v15935_v8 }
 0xa43   : > { %14866 = vmatprep.mubr.msk.bf16.mxu1 %vm1212_vm0, %v15936_v1 }
 0xa4a   : > { %14867 = vmatmul.mubr.msk.bf16.gmra.mrb[212].mxu1 %vm1212_vm0, %v15937_v0 }
 0xade   : > { %v14802_v29 = vpop.f32.mrb[184].mxu1 }
 0xadf   : > { %v7159_v19 = vmul.f32 %v14802_v29, %v22778_v22  ;;  %v14828_v20 = vpop.f32.mrb[184].mxu0  ;;  %v6886_v50 = vpop.f32.mrb[185].mxu1 }
 0xae0   : > { %v7175_v12 = vmul.f32 %v14828_v20, %v22779_v57  ;;  %v7158_v43 = vmul.f32 %v6886_v50, %v22780_v6  ;;  %v7079_v54 = vpop.f32.mrb[185].mxu0  ;;  %v22788_v20 = vld [vmem:[#allocation101_spill] sm:$0xff]  ;;  %v22790_v6 = vld [vmem:[#allocation112_spill] sm:$0xff] }
 0xae1   : > { %v7174_v8 = vmul.f32 %v7079_v54, %v22781_v13 }
 0xae2   : > { %v19784_v0 = vadd.f32 %v7175_v12, %v7159_v19 }
 0xae3   : > { %v14805_v1 = vpop.f32.mrb[186].mxu1  ;;  %v19787_v38 = vadd.f32 %v7174_v8, %v7158_v43  ;;  %v22791_v43 = vld [vmem:[#allocation102_spill] sm:$0xff] }
 0xae4   : > { %v7161_v30 = vmul.f32 %v14805_v1, %v22782_v46  ;;  %v14831_v35 = vpop.f32.mrb[186].mxu0  ;;  %v6896_v44 = vpop.f32.mrb[187].mxu1  ;;  %v22792_v1 = vld [vmem:[#allocation5_spill] sm:$0xff] }
 0xae5   : > { %22783 = vst [vmem:[#allocation134_spill] sm:$0xff] %v19787_v38  ;;  %v7177_v47 = vmul.f32 %v14831_v35, %v22784_v17  ;;  %v7160_v59 = vmul.f32 %v6896_v44, %v22785_v7  ;;  %v7089_v60 = vpop.f32.mrb[187].mxu0  ;;  %v22794_v17 = vld [vmem:[#allocation103_spill] sm:$0xff] }
 0xae6   : > { %v7176_v41 = vmul.f32 %v7089_v60, %v22786_v4  ;;  %v22796_v4 = vld [vmem:[#allocation130_spill] sm:$0xff] }
 0xae7   : > { %v14808_v29 = vpop.f32.mrb[188].mxu1  ;;  %v19792_v22 = vadd.f32 %v7177_v47, %v7161_v30 }
 0xae8   : > { %v7163_v50 = vmul.f32 %v14808_v29, %v22788_v20  ;;  %v14834_v19 = vpop.f32.mrb[188].mxu0  ;;  %v6906_v57 = vpop.f32.mrb[189].mxu1  ;;  %v19795_v12 = vadd.f32 %v7176_v41, %v7160_v59  ;;  %v22797_v59 = vld [vmem:[#allocation4_spill] sm:$0xff] }
 0xae9   : > { %22787 = vst [vmem:[#allocation135_spill] sm:$0xff] %v19792_v22  ;;  %v7179_v54 = vmul.f32 %v14834_v19, %v22790_v6  ;;  %v7162_v13 = vmul.f32 %v6906_v57, %v22791_v43  ;;  %v7099_v8 = vpop.f32.mrb[189].mxu0  ;;  %v22798_v19 = vld [vmem:[#allocation123_spill] sm:$0xff] }
 0xaea   : > { %22789 = vst [vmem:[#allocation136_spill] sm:$0xff] %v19795_v12  ;;  %v7178_v46 = vmul.f32 %v7099_v8, %v22792_v1  ;;  %v22800_v8 = vld [vmem:[#allocation106_spill] sm:$0xff] }
 0xaeb   : > { %v14811_v35 = vpop.f32.mrb[190].mxu1  ;;  %v19800_v44 = vadd.f32 %v7179_v54, %v7163_v50 }
 0xaec   : > { %v7165_v7 = vmul.f32 %v14811_v35, %v22794_v17  ;;  %v14837_v30 = vpop.f32.mrb[190].mxu0  ;;  %v6916_v47 = vpop.f32.mrb[191].mxu1  ;;  %v19803_v60 = vadd.f32 %v7178_v46, %v7162_v13  ;;  %v22802_v35 = vld [vmem:[#allocation6_spill] sm:$0xff]  ;;  %v22803_v13 = vld [vmem:[#allocation113_spill] sm:$0xff] }
 0xaed   : > { %22793 = vst [vmem:[#allocation9_spill] sm:$0xff] %v19800_v44  ;;  %v7181_v29 = vmul.f32 %v14837_v30, %v22796_v4  ;;  %v7164_v41 = vmul.f32 %v6916_v47, %v22797_v59  ;;  %v7109_v20 = vpop.f32.mrb[191].mxu0  ;;  %v22804_v30 = vld [vmem:[#allocation111_spill] sm:$0xff] }
 0xaee   : > { %22795 = vst [vmem:[#allocation119_spill] sm:$0xff] %v19803_v60  ;;  %v7180_v6 = vmul.f32 %v7109_v20, %v22798_v19 }
 0xaef   : > { %v14814_v57 = vpop.f32.mrb[192].mxu1  ;;  %v19808_v43 = vadd.f32 %v7181_v29, %v7165_v7  ;;  %v22807_v7 = vld [vmem:[#allocation104_spill] sm:$0xff] }
 0xaf0   : > { %v7167_v1 = vmul.f32 %v14814_v57, %v22800_v8  ;;  %v14840_v50 = vpop.f32.mrb[192].mxu0  ;;  %v6926_v54 = vpop.f32.mrb[193].mxu1  ;;  %v19811_v44 = vadd.f32 %v7180_v6, %v7164_v41  ;;  %v22808_v8 = vld [vmem:[#allocation122_spill] sm:$0xff]  ;;  %v22809_v41 = vld [vmem:[#allocation128_spill] sm:$0xff] }
 0xaf1   : > { %22799 = vst [vmem:[#allocation120_spill] sm:$0xff] %v19808_v43  ;;  %v7183_v17 = vmul.f32 %v14840_v50, %v22802_v35  ;;  %v7166_v46 = vmul.f32 %v6926_v54, %v22803_v13  ;;  %v7119_v60 = vpop.f32.mrb[193].mxu0  ;;  %v22810_v50 = vld [vmem:[#allocation129_spill] sm:$0xff] }
 0xaf2   : > { %22801 = vst [vmem:[#allocation10_spill] sm:$0xff] %v19811_v44  ;;  %v7182_v4 = vmul.f32 %v7119_v60, %v22804_v30 }
 0xaf3   : > { %v19816_v47 = vadd.f32 %v7183_v17, %v7167_v1  ;;  %v22813_v1 = vld [vmem:[#allocation105_spill] sm:$0xff] }
 0xaf4   : > { %v19818_v59 = vadd.f32 %v7182_v4, %v7166_v46  ;;  %v14817_v20 = vpop.f32.mrb[194].mxu1  ;;  %v22814_v4 = vld [vmem:[#allocation124_spill] sm:$0xff] }
 0xaf5   : > { %22805 = vst [vmem:[#allocation141_spill] sm:$0xff] %v19816_v47  ;;  %v7169_v29 = vmul.f32 %v14817_v20, %v22807_v7  ;;  %v14843_v19 = vpop.f32.mrb[194].mxu0  ;;  %v6936_v57 = vpop.f32.mrb[195].mxu1  ;;  %v22815_v7 = vld [vmem:[#allocation126_spill] sm:$0xff] }
 0xaf6   : > { %22806 = vst [vmem:[#allocation3_spill] sm:$0xff] %v19818_v59  ;;  %v7185_v43 = vmul.f32 %v14843_v19, %v22808_v8  ;;  %v7168_v6 = vmul.f32 %v6936_v57, %v22809_v41  ;;  %v7129_v44 = vpop.f32.mrb[195].mxu0  ;;  %v22816_v19 = vld [vmem:[#allocation7_spill] sm:$0xff] }
 0xaf7   : > { %v7184_v35 = vmul.f32 %v7129_v44, %v22810_v50 }
 0xaf8   : > { %v19824_v54 = vadd.f32 %v7185_v43, %v7169_v29  ;;  %v22819_v43 = vld [vmem:[#allocation127_spill] sm:$0xff] }
 0xaf9   : > { %v19826_v13 = vadd.f32 %v7184_v35, %v7168_v6  ;;  %v22820_v35 = vld [vmem:[#allocation24_spill] sm:$0xff] }
 0xafa   : > { %22811 = vst [vmem:[#allocation139_spill] sm:$0xff] %v19824_v54  ;;  %v14820_v60 = vpop.f32.mrb[196].mxu1 }
 0xafb   : > { %22812 = vst [vmem:[#allocation114_spill] sm:$0xff] %v19826_v13  ;;  %v7171_v17 = vmul.f32 %v14820_v60, %v22813_v1  ;;  %v14846_v46 = vpop.f32.mrb[196].mxu0  ;;  %v6946_v30 = vpop.f32.mrb[197].mxu1  ;;  %v19838_v60 = vsub.s32 5, %v22820_v35  ;;  %v22822_v1 = vld [vmem:[#allocation132_spill] sm:$0xff] }
 0xafc   : > { %v7187_v20 = vmul.f32 %v14846_v46, %v22814_v4  ;;  %v7170_v59 = vmul.f32 %v6946_v30, %v22815_v7  ;;  %v7139_v47 = vpop.f32.mrb[197].mxu0  ;;  %v22823_v46 = vld [vmem:[#allocation125_spill] sm:$0xff]  ;;  %v22824_v7 = vld [vmem:[#allocation116_spill] sm:$0xff] }
 0xafd   : > { %v7186_v8 = vmul.f32 %v7139_v47, %v22816_v19  ;;  %22821 = vst [vmem:[#allocation138_spill] sm:$0xff] %v19838_v60  ;;  %v22825_v47 = vld [vmem:[#allocation33_spill] sm:$0xff] }
 0xafe   : > { %v19832_v57 = vadd.f32 %v7187_v20, %v7171_v17  ;;  %v7395_v17 = vrot.slane %v22825_v47, %v19838_v60  ;;  %v22832_v47 = vld [vmem:[#allocation39_spill] sm:$0xff] }
 0xaff   : > { %v19834_v41 = vadd.f32 %v7186_v8, %v7170_v59  ;;  %v22826_v59 = vld [vmem:[#allocation31_spill] sm:$0xff]  ;;  %v22827_v8 = vld [vmem:[#allocation32_spill] sm:$0xff] }
 0xb00   : > { %22817 = vst [vmem:[#allocation140_spill] sm:$0xff] %v19832_v57  ;;  %v7828_v20 = vrot.slane %v22826_v59, %v19838_v60 }
 0xb01   : > { %22818 = vst [vmem:[#allocation115_spill] sm:$0xff] %v19834_v41  ;;  %v14823_v44 = vpop.f32.mrb[198].mxu1  ;;  %v14849_v6 = vpop.f32.mrb[198].mxu0  ;;  %v7832_v41 = vrot.slane %v22832_v47, %v19838_v60 }
 0xb02   : > { %v7173_v29 = vmul.f32 %v14823_v44, %v22819_v43  ;;  %v6956_v50 = vpop.f32.mrb[199].mxu1  ;;  %v7189_v13 = vmul.f32 %v14849_v6, %v22822_v1  ;;  %v7149_v30 = vpop.f32.mrb[199].mxu0  ;;  %v7387_v44 = vrot.slane %v22827_v8, %v19838_v60  ;;  %v22828_v43 = vld [vmem:[#allocation35_spill] sm:$0xff]  ;;  %v22829_v6 = vld [vmem:[#allocation37_spill] sm:$0xff] }
 0xb03   : > { %v7172_v4 = vmul.f32 %v6956_v50, %v22823_v46  ;;  %v7188_v54 = vmul.f32 %v7149_v30, %v22824_v7  ;;  %v7820_v35 = vrot.slane %v22828_v43, %v19838_v60  ;;  %v7399_v1 = vrot.slane %v22829_v6, %v19838_v60  ;;  %v22835_v43 = vld [vmem:[#allocation36_spill] sm:$0xff]  ;;  %v22836_v6 = vld [vmem:[#allocation38_spill] sm:$0xff] }
 0xb04   : > { %v19853_v50 = vadd.f32 %v7189_v13, %v7173_v29  ;;  %v7391_v22 = vrot.slane %v22835_v43, %v19838_v60  ;;  %v7824_v13 = vrot.slane %v22836_v6, %v19838_v60 }
 0xb05   : > { %v14856_v19 = vpop.f32.mrb[200].mxu1  ;;  %v19859_v59 = vadd.f32 %v7188_v54, %v7172_v4  ;;  %v22840_v54 = vld [vmem:[#allocation42_spill] sm:$0xff] }
 0xb06   : > { %22830 = vst [vmem:[#allocation95_spill] sm:$0xff] %v19853_v50  ;;  %v7450_v46 = vadd.f32 %v14856_v19, %v7395_v17  ;;  %v19855_v30 = vadd.f32 %v14856_v19, %v7828_v20  ;;  %v7321_v7 = vpop.f32.mrb[201].mxu1  ;;  %v22838_v19 = vld [vmem:[#allocation41_spill] sm:$0xff] }
 0xb07   : > { %22833 = vst [vmem:[#allocation97_spill] sm:$0xff] %v19859_v59  ;;  %v7448_v57 = vadd.f32 %v7387_v44, %v7321_v7  ;;  %v19861_v12 = vadd.f32 %v7820_v35, %v7321_v7  ;;  %v14857_v8 = vpop.f32.mrb[202].mxu1  ;;  %v22841_v35 = vld [vmem:[#allocation50_spill] sm:$0xff]  ;;  %v22842_v7 = vld [vmem:[#allocation45_spill] sm:$0xff] }
 0xb08   : > { %22831 = vst [vmem:[#allocation96_spill] sm:$0xff] %v19855_v30  ;;  %v7451_v29 = vadd.f32 %v14857_v8, %v7399_v1  ;;  %v19867_v17 = vadd.f32 %v14857_v8, %v7832_v41  ;;  %v7324_v20 = vpop.f32.mrb[203].mxu1  ;;  %v7466_v44 = vmul.f32 %v7450_v46, %v22841_v35  ;;  %v7411_v43 = vrot.slane %v22842_v7, %v19838_v60  ;;  %v22843_v59 = vld [vmem:[#allocation46_spill] sm:$0xff]  ;;  %v22844_v41 = vld [vmem:[#allocation43_spill] sm:$0xff] }
 0xb09   : > { %22834 = vst [vmem:[#allocation110_spill] sm:$0xff] %v19861_v12  ;;  %v7464_v50 = vmul.f32 %v7448_v57, %v22838_v19  ;;  %v7449_v30 = vadd.f32 %v7391_v22, %v7324_v20  ;;  %v19870_v47 = vadd.f32 %v7824_v13, %v7324_v20  ;;  %v7844_v6 = vrot.slane %v22843_v59, %v19838_v60  ;;  %v22845_v22 = vld [vmem:[#allocation48_spill] sm:$0xff]  ;;  %v22846_v13 = vld [vmem:[#allocation47_spill] sm:$0xff]  ;;  %v22849_v59 = vld [vmem:[#allocation49_spill] sm:$0xff] }
 0xb0a   : > { %22837 = vst [vmem:[#allocation98_spill] sm:$0xff] %v19867_v17  ;;  %v7403_v8 = vrot.slane %v22844_v41, %v19838_v60  ;;  %v7836_v57 = vrot.slane %v22845_v22, %v19838_v60  ;;  %v22850_v41 = vld [vmem:[#allocation51_spill] sm:$0xff]  ;;  %v22852_v17 = vld [vmem:[#allocation53_spill] sm:$0xff] }
 0xb0b   : > { %22839 = vst [vmem:[#allocation109_spill] sm:$0xff] %v19870_v47  ;;  %v7465_v4 = vmul.f32 %v7449_v30, %v22840_v54  ;;  %14902 = vmatprep.mubr.f32.mxu0 %v7464_v50  ;;  %v7415_v30 = vrot.slane %v22846_v13, %v19838_v60  ;;  %v22847_v50 = vld [vmem:[#allocation44_spill] sm:$0xff]  ;;  %v7467_v54 = vmul.f32 %v7451_v29, %v22850_v41  ;;  %v22856_v29 = vld [vmem:[#allocation54_spill] sm:$0xff] }
 0xb0c   : > { %v7407_v46 = vrot.slane %v22847_v50, %v19838_v60  ;;  %v7840_v50 = vrot.slane %v22852_v17, %v19838_v60  ;;  %v22858_v41 = vld [vmem:[#allocation56_spill] sm:$0xff] }
 0xb0d   : > { %v14860_v1 = vpop.f32.mrb[204].mxu1  ;;  %14903 = vmatmul.mubr.f32.vlgmr.msra.gmra.mrb[200].mxu0 %v7465_v4  ;;  %v7848_v4 = vrot.slane %v22849_v59, %v19838_v60  ;;  %v7427_v17 = vrot.slane %v22858_v41, %v19838_v60  ;;  %v22864_v41 = vld [vmem:[#allocation58_spill] sm:$0xff] }
 0xb0e   : > { %v7454_v20 = vadd.f32 %v14860_v1, %v7411_v43  ;;  %v19886_v35 = vadd.f32 %v14860_v1, %v7844_v6  ;;  %v7337_v7 = vpop.f32.mrb[205].mxu1  ;;  %14905 = vmatprep.mubr.f32.mxu0 %v7466_v44  ;;  %14953 = vmatpush3.msk.msra.mxu0 %vm2300_vm1, %v19740_v16  ;;  %v22854_v1 = vld [vmem:[#allocation52_spill] sm:$0xff] }
 0xb0f   : > { %v7452_v22 = vadd.f32 %v7403_v8, %v7337_v7  ;;  %v19893_v19 = vadd.f32 %v7836_v57, %v7337_v7  ;;  %v14861_v13 = vpop.f32.mrb[206].mxu1  ;;  %15669 = vmatprep.subr.bf16.mxu0 %v22300_v5  ;;  %v22857_v7 = vld [vmem:[#allocation61_spill] sm:$0xff] }
 0xb10   : > { %22848 = vst [vmem:[#allocation99_spill] sm:$0xff] %v19886_v35  ;;  %v7455_v43 = vadd.f32 %v14861_v13, %v7415_v30  ;;  %v19898_v6 = vadd.f32 %v14861_v13, %v7848_v4  ;;  %v7340_v44 = vpop.f32.mrb[207].mxu1  ;;  %v7470_v57 = vmul.f32 %v7454_v20, %v22857_v7  ;;  %v22860_v4 = vld [vmem:[#allocation55_spill] sm:$0xff]  ;;  %v7431_v7 = vrot.slane %v22864_v41, %v19838_v60 }
 0xb11   : > { %22851 = vst [vmem:[#allocation117_spill] sm:$0xff] %v19893_v19  ;;  %v7468_v59 = vmul.f32 %v7452_v22, %v22854_v1  ;;  %v7453_v35 = vadd.f32 %v7407_v46, %v7340_v44  ;;  %v19901_v12 = vadd.f32 %v7840_v50, %v7340_v44  ;;  %14906 = vmatmul.mubr.f32.gmra.mrb[202].mxu0 %v7467_v54  ;;  %v22859_v19 = vld [vmem:[#allocation57_spill] sm:$0xff]  ;;  %v22861_v50 = vld [vmem:[#allocation59_spill] sm:$0xff]  ;;  %v22862_v54 = vld [vmem:[#allocation62_spill] sm:$0xff] }
 0xb12   : > { %22853 = vst [vmem:[#allocation100_spill] sm:$0xff] %v19898_v6  ;;  %v7860_v30 = vrot.slane %v22859_v19, %v19838_v60  ;;  %v7419_v22 = vrot.slane %v22860_v4, %v19838_v60  ;;  %v7852_v46 = vrot.slane %v22861_v50, %v19838_v60  ;;  %v22865_v19 = vld [vmem:[#allocation60_spill] sm:$0xff] }
 0xb13   : > { %22855 = vst [vmem:[#allocation108_spill] sm:$0xff] %v19901_v12  ;;  %v7469_v8 = vmul.f32 %v7453_v35, %v22856_v29  ;;  %14908 = vmatprep.mubr.f32.mxu0 %v7468_v59  ;;  %v7423_v35 = vrot.slane %v22862_v54, %v19838_v60  ;;  %v22866_v29 = vld [vmem:[#allocation66_spill] sm:$0xff]  ;;  %v22868_v12 = vld [vmem:[#allocation65_spill] sm:$0xff] }
 0xb14   : > { %v7471_v1 = vmul.f32 %v7455_v43, %v22866_v29  ;;  %v7856_v54 = vrot.slane %v22868_v12, %v19838_v60  ;;  %v22873_v43 = vld [vmem:[#allocation70_spill] sm:$0xff]  ;;  %v22875_v12 = vld [vmem:[#allocation69_spill] sm:$0xff] }
 0xb15   : > { %v14864_v13 = vpop.f32.mrb[208].mxu1  ;;  %14909 = vmatmul.mubr.f32.gmra.mrb[204].mxu0 %v7469_v8  ;;  %v7864_v8 = vrot.slane %v22865_v19, %v19838_v60  ;;  %v22872_v19 = vld [vmem:[#allocation68_spill] sm:$0xff] }
 0xb16   : > { %v7458_v59 = vadd.f32 %v14864_v13, %v7427_v17  ;;  %v19915_v44 = vadd.f32 %v14864_v13, %v7860_v30  ;;  %v7353_v20 = vpop.f32.mrb[209].mxu1  ;;  %14911 = vmatprep.mubr.f32.mxu0 %v7470_v57  ;;  %v22870_v57 = vld [vmem:[#allocation67_spill] sm:$0xff] }
 0xb17   : > { %v7456_v4 = vadd.f32 %v7419_v22, %v7353_v20  ;;  %v19922_v6 = vadd.f32 %v7852_v46, %v7353_v20  ;;  %v14865_v50 = vpop.f32.mrb[210].mxu1  ;;  %v22874_v46 = vld [vmem:[#allocation64_spill] sm:$0xff] }
 0xb18   : > { %22863 = vst [vmem:[#allocation101_spill] sm:$0xff] %v19915_v44  ;;  %v7459_v17 = vadd.f32 %v14865_v50, %v7431_v7  ;;  %v19926_v30 = vadd.f32 %v14865_v50, %v7864_v8  ;;  %v7356_v13 = vpop.f32.mrb[211].mxu1  ;;  %v7474_v22 = vmul.f32 %v7458_v59, %v22873_v43  ;;  %v7443_v20 = vrot.slane %v22874_v46, %v19838_v60  ;;  %v22876_v8 = vld [vmem:[#allocation40_spill] sm:$0xff] }
 0xb19   : > { %22867 = vst [vmem:[#allocation112_spill] sm:$0xff] %v19922_v6  ;;  %v7472_v44 = vmul.f32 %v7456_v4, %v22870_v57  ;;  %v7457_v38 = vadd.f32 %v7423_v35, %v7356_v13  ;;  %v19929_v41 = vadd.f32 %v7856_v54, %v7356_v13  ;;  %14912 = vmatmul.mubr.f32.gmra.mrb[206].mxu0 %v7471_v1  ;;  %v22877_v54 = vld [vmem:[#allocation71_spill] sm:$0xff]  ;;  %v22880_v46 = vld [vmem:[#allocation72_spill] sm:$0xff] }
 0xb1a   : > { %22869 = vst [vmem:[#allocation102_spill] sm:$0xff] %v19926_v30  ;;  %v7876_v7 = vrot.slane %v22875_v12, %v19838_v60  ;;  %v7435_v4 = vrot.slane %v22876_v8, %v19838_v60  ;;  %v7868_v35 = vrot.slane %v22877_v54, %v19838_v60  ;;  %v22878_v1 = vld [vmem:[#allocation63_spill] sm:$0xff]  ;;  %v7447_v43 = vrot.slane %v22880_v46, %v19838_v60  ;;  %v22881_v12 = vld [vmem:[#allocation73_spill] sm:$0xff]  ;;  %v22884_v30 = vld [vmem:[#allocation74_spill] sm:$0xff] }
 0xb1b   : > { %22871 = vst [vmem:[#allocation5_spill] sm:$0xff] %v19929_v41  ;;  %v7473_v47 = vmul.f32 %v7457_v38, %v22872_v19  ;;  %14914 = vmatprep.mubr.f32.mxu0 %v7472_v44  ;;  %v7439_v38 = vrot.slane %v22878_v1, %v19838_v60  ;;  %v22882_v19 = vld [vmem:[#allocation76_spill] sm:$0xff]  ;;  %v7872_v1 = vrot.slane %v22884_v30, %v19838_v60 }
 0xb1c   : > { %v7475_v57 = vmul.f32 %v7459_v17, %v22882_v19  ;;  %v22889_v17 = vld [vmem:[#allocation78_spill] sm:$0xff] }
 0xb1d   : > { %v14868_v50 = vpop.f32.mrb[212].mxu1  ;;  %14915 = vmatmul.mubr.f32.gmra.mrb[208].mxu0 %v7473_v47  ;;  %v7880_v47 = vrot.slane %v22881_v12, %v19838_v60  ;;  %v22888_v12 = vld [vmem:[#allocation77_spill] sm:$0xff] }
 0xb1e   : > { %v7462_v44 = vadd.f32 %v14868_v50, %v7443_v20  ;;  %v19943_v13 = vadd.f32 %v14868_v50, %v7876_v7  ;;  %v7369_v59 = vpop.f32.mrb[213].mxu1  ;;  %14917 = vmatprep.mubr.f32.mxu0 %v7474_v22  ;;  %v22886_v22 = vld [vmem:[#allocation75_spill] sm:$0xff] }
 0xb1f   : > { %v7460_v8 = vadd.f32 %v7435_v4, %v7369_v59  ;;  %v19950_v29 = vadd.f32 %v7868_v35, %v7369_v59  ;;  %v14869_v54 = vpop.f32.mrb[214].mxu1  ;;  %v22890_v35 = vld [vmem:[#allocation11_spill] sm:$0xff] }
 0xb20   : > { %22879 = vst [vmem:[#allocation103_spill] sm:$0xff] %v19943_v13  ;;  %v7463_v20 = vadd.f32 %v14869_v54, %v7447_v43  ;;  %v19954_v7 = vadd.f32 %v14869_v54, %v7880_v47  ;;  %v7372_v50 = vpop.f32.mrb[215].mxu1  ;;  %v7478_v4 = vmul.f32 %v7462_v44, %v22889_v17  ;;  %v7483_v43 = vpop.permute.xlu1 %7482 }
 0xb21   : > { %22883 = vst [vmem:[#allocation130_spill] sm:$0xff] %v19950_v29  ;;  %v7476_v13 = vmul.f32 %v7460_v8, %v22886_v22  ;;  %v7461_v6 = vadd.f32 %v7439_v38, %v7372_v50  ;;  %v19957_v46 = vadd.f32 %v7872_v1, %v7372_v50  ;;  %14918 = vmatmul.mubr.f32.gmra.mrb[210].mxu0 %v7475_v57  ;;  %v7481_v54 = vpop.permute.xlu0 %7480  ;;  %v22892_v29 = vld [vmem:[#allocation133_spill] sm:$0xff] }
 0xb22   : > { %22885 = vst [vmem:[#allocation4_spill] sm:$0xff] %v19954_v7  ;;  %v7479_v59 = vmul.f32 %v7463_v20, %v22890_v35 }
 0xb23   : > { %22887 = vst [vmem:[#allocation123_spill] sm:$0xff] %v19957_v46  ;;  %v7477_v41 = vmul.f32 %v7461_v6, %v22888_v12  ;;  %14920 = vmatprep.mubr.f32.mxu0 %v7476_v13  ;;  %v22891_v13 = vld [vmem:[#allocation131_spill] sm:$0xff] }
 0xb24   : > { %v7487_v47 = vpop.permute.xlu1 %7486 }
 0xb25   : > { %14921 = vmatmul.mubr.f32.gmra.mrb[212].mxu0 %v7477_v41  ;;  %v7485_v60 = vpop.permute.xlu0 %7484 }
 0xb26   : > { %14923 = vmatprep.mubr.f32.mxu0 %v7478_v4 }
 0xb28   : > { %v7491_v30 = vpop.permute.xlu1 %7490 }
 0xb29   : > { %14924 = vmatmul.mubr.f32.gmra.mrb[214].mxu0 %v7479_v59  ;;  %v7489_v6 = vpop.permute.xlu0 %7488 }
 0xb2c   : > { %v7495_v4 = vpop.permute.xlu1 %7494 }
 0xbe0   : > { %v14904_v8 = vpop.f32.mrb[200].mxu0 }
 0xbe1   : > { %v7600_v38 = vadd.f32 %v14904_v8, %v7483_v43  ;;  %v7594_v1 = vpop.f32.mrb[201].mxu0 }
 0xbe2   : > { %v7595_v50 = vadd.f32 %v7594_v1, %v7481_v54 }
 0xbe3   : > { %v19963_v57 = vmax.f32 %v19533_v55, %v7600_v38 }
 0xbe4   : > { %v19966_v44 = vmax.f32 %v22891_v13, %v7595_v50  ;;  %v14907_v41 = vpop.f32.mrb[202].mxu0 }
 0xbe5   : > { %v7690_v20 = vsub.f32 %v19533_v55, %v19963_v57  ;;  %v7738_v59 = vsub.f32 %v7600_v38, %v19963_v57  ;;  %v7610_v35 = vadd.f32 %v14907_v41, %v7487_v47  ;;  %v7604_v17 = vpop.f32.mrb[203].mxu0 }
 0xbe6   : > { %v7689_v43 = vsub.f32 %v22891_v13, %v19966_v44  ;;  %v7737_v54 = vsub.f32 %v7595_v50, %v19966_v44  ;;  %v7605_v8 = vadd.f32 %v7604_v17, %v7485_v60  ;;  %v7493_v60 = vpop.permute.xlu0 %7492 }
 0xbe7   : > { %v7707_v1 = vmul.f32 1.442695, %v7690_v20  ;;  %v7755_v12 = vmul.f32 1.442695, %v7738_v59  ;;  %v19975_v22 = vmax.f32 %v19545_v63, %v7610_v35  ;;  %v7499_v59 = vpop.permute.xlu1 %7498 }
 0xbe8   : > { %v7705_v19 = vmul.f32 1.442695, %v7689_v43  ;;  %v7753_v7 = vmul.f32 1.442695, %v7737_v54  ;;  %v19978_v46 = vmax.f32 %v22892_v29, %v7605_v8  ;;  %v14910_v55 = vpop.f32.mrb[204].mxu0 }
 0xbe9   : > { %16274 = vpow2.f32 %v7707_v1  ;;  %v7692_v47 = vsub.f32 %v19545_v63, %v19975_v22  ;;  %v7740_v38 = vsub.f32 %v7610_v35, %v19975_v22  ;;  %v7620_v13 = vadd.f32 %v14910_v55, %v7491_v30  ;;  %v7614_v50 = vpop.f32.mrb[205].mxu0  ;;  %v22894_v30 = vld [vmem:[#allocation121_spill] sm:$0xff] }
 0xbea   : > { %22893 = vst [vmem:[#allocation106_spill] sm:$0xff] %v19978_v46  ;;  %16276 = vpow2.f32 %v7755_v12  ;;  %v7691_v17 = vsub.f32 %v22892_v29, %v19978_v46  ;;  %v7739_v41 = vsub.f32 %v7605_v8, %v19978_v46  ;;  %v7615_v20 = vadd.f32 %v7614_v50, %v7489_v6 }
 0xbeb   : > { %16278 = vpow2.f32 %v7705_v19  ;;  %v7711_v43 = vmul.f32 1.442695, %v7692_v47  ;;  %v7759_v54 = vmul.f32 1.442695, %v7740_v38  ;;  %v19987_v1 = vmax.f32 %v19557_v28, %v7620_v13 }
 0xbec   : > { %16280 = vpow2.f32 %v7753_v7  ;;  %v7709_v63 = vmul.f32 1.442695, %v7691_v17  ;;  %v7757_v35 = vmul.f32 1.442695, %v7739_v41  ;;  %v19990_v55 = vmax.f32 %v22894_v30, %v7615_v20  ;;  %v14913_v12 = vpop.f32.mrb[206].mxu0 }
 0xbed   : > { %16282 = vpow2.f32 %v7711_v43  ;;  %v7694_v29 = vsub.f32 %v19557_v28, %v19987_v1  ;;  %v7742_v6 = vsub.f32 %v7620_v13, %v19987_v1  ;;  %v7630_v8 = vadd.f32 %v14913_v12, %v7495_v4  ;;  %v7624_v19 = vpop.f32.mrb[207].mxu0  ;;  %v7497_v43 = vpop.permute.xlu0 %7496 }
 0xbee   : > { %22895 = vst [vmem:[#allocation6_spill] sm:$0xff] %v19990_v55  ;;  %16284 = vpow2.f32 %v7759_v54  ;;  %v7693_v47 = vsub.f32 %v22894_v30, %v19990_v55  ;;  %v7741_v7 = vsub.f32 %v7615_v20, %v19990_v55  ;;  %v7625_v38 = vadd.f32 %v7624_v19, %v7493_v60  ;;  %v7503_v54 = vpop.permute.xlu1 %7502 }
 0xbef   : > { %16286 = vpow2.f32 %v7709_v63  ;;  %v7715_v50 = vmul.f32 1.442695, %v7694_v29  ;;  %v7763_v17 = vmul.f32 1.442695, %v7742_v6  ;;  %v19999_v41 = vmax.f32 %v19569_v48, %v7630_v8 }
 0xbf0   : > { %16288 = vpow2.f32 %v7757_v35  ;;  %v7713_v28 = vmul.f32 1.442695, %v7693_v47  ;;  %v7761_v46 = vmul.f32 1.442695, %v7741_v7  ;;  %v20002_v4 = vmax.f32 %v19572_v42, %v7625_v38  ;;  %v14916_v13 = vpop.f32.mrb[208].mxu0 }
 0xbf1   : > { %16290 = vpow2.f32 %v7715_v50  ;;  %v7696_v20 = vsub.f32 %v19569_v48, %v19999_v41  ;;  %v7744_v60 = vsub.f32 %v7630_v8, %v19999_v41  ;;  %v7640_v63 = vadd.f32 %v14916_v13, %v7499_v59  ;;  %v7634_v30 = vpop.f32.mrb[209].mxu0  ;;  %v22896_v48 = vld [vmem:[#allocation118_spill] sm:$0xff] }
 0xbf2   : > { %16292 = vpow2.f32 %v7763_v17  ;;  %v7695_v12 = vsub.f32 %v19572_v42, %v20002_v4  ;;  %v7743_v35 = vsub.f32 %v7625_v38, %v20002_v4  ;;  %v7635_v29 = vadd.f32 %v7634_v30, %v7497_v43 }
 0xbf3   : > { %v16275_v6 = vpop.eup %16274  ;;  %16294 = vpow2.f32 %v7713_v28  ;;  %v7719_v19 = vmul.f32 1.442695, %v7696_v20  ;;  %v7767_v47 = vmul.f32 1.442695, %v7744_v60  ;;  %v20011_v7 = vmax.f32 %v19581_v18, %v7640_v63  ;;  %v7501_v28 = vpop.permute.xlu0 %7500 }
 0xbf4   : > { %v16277_v50 = vpop.eup %16276  ;;  %v7786_v55 = vmul.f32 %v16275_v6, %v22896_v48  ;;  %16296 = vpow2.f32 %v7761_v46  ;;  %v7717_v59 = vmul.f32 1.442695, %v7695_v12  ;;  %v7765_v8 = vmul.f32 1.442695, %v7743_v35  ;;  %v14919_v17 = vpop.f32.mrb[210].mxu0 }
 0xbf5   : > { %v16279_v13 = vpop.eup %16278  ;;  %16298 = vpow2.f32 %v7719_v19  ;;  %v7698_v42 = vsub.f32 %v19581_v18, %v20011_v7  ;;  %v7746_v38 = vsub.f32 %v7640_v63, %v20011_v7  ;;  %v20018_v43 = vmax.f32 %v19588_v40, %v7635_v29  ;;  %v7644_v20 = vpop.f32.mrb[211].mxu0 }
 0xbf6   : > { %v16281_v60 = vpop.eup %16280  ;;  %v20020_v30 = vadd.f32 %v16277_v50, %v7786_v55  ;;  %v7785_v46 = vmul.f32 %v16279_v13, %v19598_v45  ;;  %16300 = vpow2.f32 %v7767_v47  ;;  %v7650_v12 = vadd.f32 %v14919_v17, %v7503_v54  ;;  %14928 = vmatprep.mubr.msk.f32.mxu1 %vm2251_vm2, %v16279_v13  ;;  %v7507_v35 = vpop.permute.xlu1 %7506  ;;  %v22898_v17 = vld [vmem:[#allocation137_spill] sm:$0xff] }
 0xbf7   : > { %v16283_v19 = vpop.eup %16282  ;;  %16302 = vpow2.f32 %v7717_v59  ;;  %v7723_v18 = vmul.f32 1.442695, %v7698_v42  ;;  %v7771_v48 = vmul.f32 1.442695, %v7746_v38  ;;  %v7697_v63 = vsub.f32 %v19588_v40, %v20018_v43  ;;  %14954 = vmatprep.mubr.msk.f32.mxu0 %vm2251_vm2, %v16281_v60  ;;  %14929 = vmatmul.mubr.msk.f32.vlgmr.msra.gmra.mrb[216].mxu1 %vm2251_vm2, %v16275_v6 }
 0xbf8   : > { %22897 = vst [vmem:[#allocation113_spill] sm:$0xff] %v20020_v30  ;;  %v16285_v55 = vpop.eup %16284  ;;  %v20028_v30 = vadd.f32 %v16281_v60, %v7785_v46  ;;  %v7788_v45 = vmul.f32 %v16283_v19, %v19614_v31  ;;  %16304 = vpow2.f32 %v7765_v8  ;;  %v7745_v54 = vsub.f32 %v7635_v29, %v20018_v43  ;;  %14955 = vmatmul.mubr.msk.f32.vlgmr.msra.gmra.mrb[216].mxu0 %vm2251_vm2, %v16277_v50  ;;  %v14922_v47 = vpop.f32.mrb[212].mxu0 }
 0xbf9   : > { %14979 = vmatpush3.bf16.msra.mxu1 %v19751_v62  ;;  %v16287_v59 = vpop.eup %16286  ;;  %16306 = vpow2.f32 %v7723_v18  ;;  %v7721_v40 = vmul.f32 1.442695, %v7697_v63  ;;  %v20035_v13 = vmax.f32 %v22898_v17, %v7650_v12  ;;  %v7645_v6 = vadd.f32 %v7644_v20, %v7501_v28  ;;  %v7654_v42 = vpop.f32.mrb[213].mxu0  ;;  %15671 = vmatpush3.bf16.msra.mxu0 %v22300_v5 }
 0xbfa   : > { %14980 = vmatprep.subr.bf16.mxu1 %v19610_v52  ;;  %v16289_v31 = vpop.eup %16288  ;;  %v20039_v8 = vadd.f32 %v16285_v55, %v7788_v45  ;;  %v7787_v29 = vmul.f32 %v16287_v59, %v19627_v37  ;;  %16308 = vpow2.f32 %v7771_v48  ;;  %v7769_v50 = vmul.f32 1.442695, %v7745_v54  ;;  %14931 = vmatprep.mubr.msk.f32.mxu1 %vm2251_vm2, %v16287_v59  ;;  %v7505_v60 = vpop.permute.xlu0 %7504 }
 0xbfb   : > { %15673 = vmatprep.subr.bf16.mxu0 %v22632_v32  ;;  %v16291_v38 = vpop.eup %16290  ;;  %16310 = vpow2.f32 %v7721_v40  ;;  %v7700_v28 = vsub.f32 %v22898_v17, %v20035_v13  ;;  %v7748_v52 = vsub.f32 %v7650_v12, %v20035_v13  ;;  %v20048_v20 = vmax.f32 %v19623_v53, %v7645_v6  ;;  %14957 = vmatprep.mubr.msk.f32.mxu0 %vm2251_vm2, %v16289_v31  ;;  %v7511_v63 = vpop.permute.xlu1 %7510  ;;  %v20059_v12 = vld [vmem:[%s21877_s5 + $0x8] sm:$0xff]  }
 0xbfc   : > { %14932 = vmatmul.mubr.msk.f32.gmra.mrb[218].mxu1 %vm2251_vm2, %v16283_v19  ;;  %v16293_v37 = vpop.eup %16292  ;;  %v20052_v46 = vadd.f32 %v16289_v31, %v7787_v29  ;;  %v7790_v18 = vmul.f32 %v16291_v38, %v19638_v3  ;;  %16312 = vpow2.f32 %v7769_v50  ;;  %v7660_v48 = vadd.f32 %v14922_v47, %v7507_v35  ;;  %14958 = vmatmul.mubr.msk.f32.gmra.mrb[218].mxu0 %vm2251_vm2, %v16285_v55  ;;  %v14925_v45 = vpop.f32.mrb[214].mxu0 }
 0xbfd   : > { %14981 = vmatpush3.bf16.msra.mxu1 %v20059_v12  ;;  %v16295_v54 = vpop.eup %16294  ;;  %v7727_v19 = vmul.f32 1.442695, %v7700_v28  ;;  %v7775_v59 = vmul.f32 1.442695, %v7748_v52  ;;  %v7699_v40 = vsub.f32 %v19623_v53, %v20048_v20  ;;  %v7747_v3 = vsub.f32 %v7645_v6, %v20048_v20  ;;  %v7664_v35 = vpop.f32.mrb[215].mxu0  ;;  %15675 = vmatpush3.bf16.msra.mxu0 %v22632_v32 }
 0xbfe   : > { %15054 = vmatprep.subr.msk.mxu1 %vm2300_vm1, %v19740_v16  ;;  %v16297_v55 = vpop.eup %16296  ;;  %v20068_v47 = vadd.f32 %v16293_v37, %v7790_v18  ;;  %v7789_v17 = vmul.f32 %v16295_v54, %v19647_v27  ;;  %v20072_v31 = vmax.f32 %v19642_v49, %v7660_v48  ;;  %v7655_v29 = vadd.f32 %v7654_v42, %v7505_v60 }
 0xbff   : > { %14934 = vmatprep.mubr.msk.f32.mxu1 %vm2251_vm2, %v16295_v54  ;;  %v16299_v53 = vpop.eup %16298  ;;  %16314 = vpow2.f32 %v7727_v19  ;;  %v7725_v6 = vmul.f32 1.442695, %v7699_v40  ;;  %v7773_v50 = vmul.f32 1.442695, %v7747_v3  ;;  %v7670_v28 = vadd.f32 %v14925_v45, %v7511_v63  ;;  %14960 = vmatprep.mubr.msk.f32.mxu0 %vm2251_vm2, %v16297_v55 }
 0xc00   : > { %14935 = vmatmul.mubr.msk.f32.gmra.mrb[220].mxu1 %vm2251_vm2, %v16291_v38  ;;  %v16301_v52 = vpop.eup %16300  ;;  %v20077_v18 = vadd.f32 %v16297_v55, %v7789_v17  ;;  %v7792_v27 = vmul.f32 %v16299_v53, %v19662_v51  ;;  %16316 = vpow2.f32 %v7775_v59  ;;  %v7702_v42 = vsub.f32 %v19642_v49, %v20072_v31  ;;  %14961 = vmatmul.mubr.msk.f32.gmra.mrb[220].mxu0 %vm2251_vm2, %v16293_v37  ;;  %v7509_v55 = vpop.permute.xlu0 %7508 }
 0xc01   : > { %15677 = vmatprep.subr.bf16.mxu0 %v22267_v25  ;;  %v16303_v60 = vpop.eup %16302  ;;  %16318 = vpow2.f32 %v7725_v6  ;;  %v7750_v63 = vsub.f32 %v7660_v48, %v20072_v31  ;;  %v20086_v45 = vmax.f32 %v19656_v61, %v7655_v29  ;;  %v20089_v38 = vmax.f32 %v19659_v11, %v7670_v28 }
 0xc02   : > { %15679 = vmatpush3.bf16.msra.mxu0 %v22267_v25  ;;  %v16305_v51 = vpop.eup %16304  ;;  %v20092_v54 = vadd.f32 %v16301_v52, %v7792_v27  ;;  %v7791_v49 = vmul.f32 %v16303_v60, %v19674_v2  ;;  %16320 = vpow2.f32 %v7773_v50  ;;  %v7731_v37 = vmul.f32 1.442695, %v7702_v42  ;;  %14937 = vmatprep.mubr.msk.f32.mxu1 %vm2251_vm2, %v16303_v60 }
 0xc03   : > { %15681 = vmatprep.subr.bf16.mxu0 %v22271_v23  ;;  %v16307_v48 = vpop.eup %16306  ;;  %v7779_v19 = vmul.f32 1.442695, %v7750_v63  ;;  %v7701_v59 = vsub.f32 %v19656_v61, %v20086_v45  ;;  %v7749_v40 = vsub.f32 %v7655_v29, %v20086_v45  ;;  %v7704_v3 = vsub.f32 %v19659_v11, %v20089_v38  ;;  %14963 = vmatprep.mubr.msk.f32.mxu0 %vm2251_vm2, %v16305_v51 }
 0xc04   : > { %14938 = vmatmul.mubr.msk.f32.gmra.mrb[222].mxu1 %vm2251_vm2, %v16299_v53  ;;  %v16309_v2 = vpop.eup %16308  ;;  %v20104_v17 = vadd.f32 %v16305_v51, %v7791_v49  ;;  %v7794_v6 = vmul.f32 %v16307_v48, %v19680_v24  ;;  %16322 = vpow2.f32 %v7731_v37  ;;  %v7752_v50 = vsub.f32 %v7670_v28, %v20089_v38  ;;  %14964 = vmatmul.mubr.msk.f32.gmra.mrb[222].mxu0 %vm2251_vm2, %v16301_v52 }
 0xc05   : > { %v16311_v61 = vpop.eup %16310  ;;  %v7729_v29 = vmul.f32 1.442695, %v7701_v59  ;;  %v7777_v27 = vmul.f32 1.442695, %v7749_v40  ;;  %v7735_v42 = vmul.f32 1.442695, %v7704_v3  ;;  %16324 = vpow2.f32 %v7779_v19 }
 0xc06   : > { %15683 = vmatpush3.bf16.msra.mxu0 %v22271_v23  ;;  %v16313_v11 = vpop.eup %16312  ;;  %v20110_v60 = vadd.f32 %v16309_v2, %v7794_v6  ;;  %v7793_v53 = vmul.f32 %v16311_v61, %v19687_v21  ;;  %v7665_v63 = vadd.f32 %v7664_v35, %v7509_v55  ;;  %14940 = vmatprep.mubr.msk.f32.mxu1 %vm2251_vm2, %v16311_v61  ;;  %v7783_v24 = vmul.f32 1.442695, %v7752_v50 }
 0xc07   : > { %15685 = vmatprep.subr.bf16.mxu0 %v22272_v9  ;;  %16326 = vpow2.f32 %v7729_v29  ;;  %14966 = vmatprep.mubr.msk.f32.mxu0 %vm2251_vm2, %v16313_v11 }
 0xc08   : > { %14941 = vmatmul.mubr.msk.f32.gmra.mrb[224].mxu1 %vm2251_vm2, %v16307_v48  ;;  %v20117_v28 = vadd.f32 %v16313_v11, %v7793_v53  ;;  %16328 = vpow2.f32 %v7777_v27  ;;  %v20120_v52 = vmax.f32 %v19690_v36, %v7665_v63  ;;  %14967 = vmatmul.mubr.msk.f32.gmra.mrb[224].mxu0 %vm2251_vm2, %v16309_v2 }
 0xc09   : > { %v16315_v21 = vpop.eup %16314  ;;  %16330 = vpow2.f32 %v7735_v42 }
 0xc0a   : > { %15687 = vmatpush3.bf16.msra.mxu0 %v22272_v9  ;;  %v16317_v35 = vpop.eup %16316  ;;  %v7796_v51 = vmul.f32 %v16315_v21, %v19699_v33  ;;  %v7703_v49 = vsub.f32 %v19690_v36, %v20120_v52  ;;  %v7751_v37 = vsub.f32 %v7665_v63, %v20120_v52  ;;  %16332 = vpow2.f32 %v7783_v24 }
 0xc0b   : > { %15689 = vmatprep.subr.bf16.mxu0 %v22373_v10  ;;  %v16319_v48 = vpop.eup %16318 }
 0xc0c   : > { %v16321_v19 = vpop.eup %16320  ;;  %v20129_v59 = vadd.f32 %v16317_v35, %v7796_v51  ;;  %v7795_v40 = vmul.f32 %v16319_v48, %v19705_v26  ;;  %v7733_v3 = vmul.f32 1.442695, %v7703_v49  ;;  %v7781_v55 = vmul.f32 1.442695, %v7751_v37  ;;  %14943 = vmatprep.mubr.msk.f32.mxu1 %vm2251_vm2, %v16319_v48  ;;  %v15941_v51 = vld [vmem:[%s17055_s18 + $0x198] sm:$0xff]   ;;  %v15942_v49 = vld [vmem:[%s17055_s18 + $0x1a0] sm:$0xff]  }
 0xc0d   : > { %14969 = vmatprep.mubr.msk.f32.mxu0 %vm2251_vm2, %v16321_v19  ;;  %14944 = vmatmul.mubr.msk.f32.gmra.mrb[226].mxu1 %vm2251_vm2, %v16315_v21  ;;  %v15943_v37 = vld [vmem:[%s17055_s18 + $0x1a8] sm:$0xff]   ;;  %v15944_v48 = vld [vmem:[%s17055_s18 + $0x1b0] sm:$0xff]  }
 0xc0e   : > { %v16323_v36 = vpop.eup %16322  ;;  %v20135_v33 = vadd.f32 %v16321_v19, %v7795_v40  ;;  %16334 = vpow2.f32 %v7733_v3  ;;  %14970 = vmatmul.mubr.msk.f32.gmra.mrb[226].mxu0 %vm2251_vm2, %v16317_v35  ;;  %v20190_v19 = vld [vmem:[%s17707_s23] sm:$0xff]  ;;  %v20195_v40 = vld [vmem:[%s17707_s23 + $0x18] sm:$0xff]  ;;  %v20200_v3 = vld [vmem:[%s17707_s23 + $0x10] sm:$0xff] }
 0xc0f   : > { %v7798_v2 = vmul.f32 %v16323_v36, %v19711_v15  ;;  %16336 = vpow2.f32 %v7781_v55  ;;  %15691 = vmatpush3.bf16.msra.mxu0 %v22373_v10  ;;  %v16325_v26 = vpop.eup %16324  ;;  %22900 = vst [vmem:[#allocation104_spill] sm:$0xff] %v20190_v19  ;;  %8605 = vrot.lane.b32.xlu0 %v20190_v19, %s16754_s16  ;;  %22901 = vst [vmem:[#allocation122_spill] sm:$0xff] %v20195_v40  ;;  %v20205_v55 = vld [vmem:[%s17707_s23 + $0x28] sm:$0xff] }
 0xc10   : > { %15693 = vmatprep.subr.bf16.mxu0 %v22277_v34  ;;  %22902 = vst [vmem:[#allocation128_spill] sm:$0xff] %v20200_v3  ;;  %22903 = vst [vmem:[#allocation129_spill] sm:$0xff] %v20205_v55 }
 0xc11   : > { %v16327_v6 = vpop.eup %16326  ;;  %v20141_v50 = vadd.f32 %v16325_v26, %v7798_v2  ;;  %v20215_v2 = vld [vmem:[%s17707_s23 + $0x38] sm:$0xff] }
 0xc12   : > { %v16329_v61 = vpop.eup %16328  ;;  %v7797_v29 = vmul.f32 %v16327_v6, %v19717_v58  ;;  %14946 = vmatprep.mubr.msk.f32.mxu1 %vm2251_vm2, %v16327_v6  ;;  %v15938_v58 = vld [vmem:[%s17055_s18 + $0x180] sm:$0xff]   ;;  %22905 = vst [vmem:[#allocation124_spill] sm:$0xff] %v20215_v2  ;;  %v20225_v6 = vld [vmem:[%s17707_s23 + $0x48] sm:$0xff] }
 0xc13   : > { %v16331_v27 = vpop.eup %16330  ;;  %14972 = vmatprep.mubr.msk.f32.mxu0 %vm2251_vm2, %v16329_v61  ;;  %14947 = vmatmul.mubr.msk.f32.gmra.mrb[228].mxu1 %vm2251_vm2, %v16323_v36  ;;  %v20210_v36 = vld [vmem:[%s17707_s23 + $0x20] sm:$0xff]  ;;  %22907 = vst [vmem:[#allocation7_spill] sm:$0xff] %v20225_v6 }
 0xc14   : > { %v20147_v15 = vadd.f32 %v16329_v61, %v7797_v29  ;;  %v7800_v42 = vmul.f32 %v16331_v27, %v19722_v39  ;;  %14973 = vmatmul.mubr.msk.f32.gmra.mrb[228].mxu0 %vm2251_vm2, %v16325_v26  ;;  %v16333_v11 = vpop.eup %16332  ;;  %v15939_v39 = vld [vmem:[%s17055_s18 + $0x188] sm:$0xff]   ;;  %8609 = vrot.lane.b32.xlu0 %v20200_v3, %s16754_s16  ;;  %22904 = vst [vmem:[#allocation105_spill] sm:$0xff] %v20210_v36  ;;  %v20220_v26 = vld [vmem:[%s17707_s23 + $0x30] sm:$0xff]  ;;  %v20230_v61 = vld [vmem:[%s17707_s23 + $0x40] sm:$0xff] }
 0xc15   : > { %15695 = vmatpush3.bf16.msra.mxu0 %v22277_v34  ;;  %22906 = vst [vmem:[#allocation126_spill] sm:$0xff] %v20220_v26  ;;  %22908 = vst [vmem:[#allocation127_spill] sm:$0xff] %v20230_v61  ;;  %v20235_v29 = vld [vmem:[%s17707_s23 + $0x58] sm:$0xff] }
 0xc16   : > { %v20152_v53 = vadd.f32 %v16333_v11, %v7800_v42  ;;  %15697 = vmatprep.subr.bf16.mxu0 %v22278_v14  ;;  %22909 = vst [vmem:[#allocation132_spill] sm:$0xff] %v20235_v29  ;;  %v20245_v42 = vld [vmem:[%s17707_s23 + $0x68] sm:$0xff] }
 0xc17   : > { %22911 = vst [vmem:[#allocation116_spill] sm:$0xff] %v20245_v42 }
 0xc18   : > { %v16335_v63 = vpop.eup %16334  ;;  %8613 = vrot.lane.b32.xlu0 %v20210_v36, %s16754_s16 }
 0xc19   : > { %v16337_v24 = vpop.eup %16336  ;;  %v7799_v21 = vmul.f32 %v16335_v63, %v19732_v56  ;;  %14949 = vmatprep.mubr.msk.f32.mxu1 %vm2251_vm2, %v16335_v63  ;;  %15699 = vmatpush3.bf16.msra.mxu0 %v22278_v14  ;;  %v15940_v56 = vld [vmem:[%s17055_s18 + $0x190] sm:$0xff]  }
 0xc1a   : > { %14975 = vmatprep.mubr.msk.f32.mxu0 %vm2251_vm2, %v16337_v24  ;;  %14950 = vmatmul.mubr.msk.f32.gmra.mrb[230].mxu1 %vm2251_vm2, %v16331_v27  ;;  %v20240_v27 = vld [vmem:[%s17707_s23 + $0x50] sm:$0xff] }
 0xc1b   : > { %v20162_v35 = vadd.f32 %v16337_v24, %v7799_v21  ;;  %14976 = vmatmul.mubr.msk.f32.gmra.mrb[230].mxu0 %vm2251_vm2, %v16333_v11  ;;  %14982 = vmatprep.mubr.msk.bf16.mxu1 %vm1212_vm0, %v15938_v58  ;;  %22910 = vst [vmem:[#allocation125_spill] sm:$0xff] %v20240_v27  ;;  %v20250_v11 = vld [vmem:[%s17707_s23 + $0x60] sm:$0xff]  ;;  %v20255_v58 = vld [vmem:[%s17707_s23 + $0x78] sm:$0xff]  ;;  %v20260_v63 = vld [vmem:[%s17707_s23 + $0x70] sm:$0xff] }
 0xc1c   : > { %15080 = vmatprep.subr.msk.mxu0 %vm2300_vm1, %v19740_v16  ;;  %8617 = vrot.lane.b32.xlu0 %v20220_v26, %s16754_s16  ;;  %22912 = vst [vmem:[#allocation131_spill] sm:$0xff] %v20250_v11  ;;  %22913 = vst [vmem:[#allocation133_spill] sm:$0xff] %v20255_v58 }
 0xc1d   : > { %22914 = vst [vmem:[#allocation121_spill] sm:$0xff] %v20260_v63 }
 0xc1e   : > { %14983 = vmatmul.mubr.msk.bf16.vlgmr.msra.gmra.mrb[232].mxu1 %vm1212_vm0, %v15939_v39 }
 0xc1f   : > { %14986 = vmatprep.mubr.msk.bf16.mxu1 %vm1212_vm0, %v15940_v56  ;;  %15055 = vmatpush3.msk.msra.mxu1 %vm2300_vm1, %v19740_v16  ;;  %v15945_v16 = vld [vmem:[%s17055_s18 + $0x1b8] sm:$0xff]  }
 0xc20   : > { %15106 = vmatprep.subr.bf16.mxu1 %v19751_v62  ;;  %v20185_v62 = vld [vmem:[%s17707_s23 + $0x8] sm:$0xff]  ;;  %8621 = vrot.lane.b32.xlu0 %v20230_v61, %s16754_s16 }
 0xc21   : > { %22899 = vst [vmem:[#allocation111_spill] sm:$0xff] %v20185_v62  ;;  %8607 = vrot.lane.b32.xlu1 %v20185_v62, %s16754_s16 }
 0xc24   : > { %8625 = vrot.lane.b32.xlu0 %v20240_v27, %s16754_s16 }
 0xc25   : > { %8611 = vrot.lane.b32.xlu1 %v20195_v40, %s16754_s16 }
 0xc26   : > { %14987 = vmatmul.mubr.msk.bf16.gmra.mrb[236].mxu1 %vm1212_vm0, %v15941_v51  ;;  %v22915_v51 = vld [vmem:[#allocation109_spill] sm:$0xff] }
 0xc27   : > { %14990 = vmatprep.mubr.msk.bf16.mxu1 %vm1212_vm0, %v15942_v49 }
 0xc28   : > { %8629 = vrot.lane.b32.xlu0 %v20250_v11, %s16754_s16  ;;  %v22917_v11 = vld [vmem:[#allocation110_spill] sm:$0xff] }
 0xc29   : > { %8615 = vrot.lane.b32.xlu1 %v20205_v55, %s16754_s16 }
 0xc2c   : > { %8633 = vrot.lane.b32.xlu0 %v20260_v63, %s16754_s16 }
 0xc2d   : > { %8619 = vrot.lane.b32.xlu1 %v20215_v2, %s16754_s16  ;;  %v22921_v2 = vld [vmem:[#allocation98_spill] sm:$0xff] }
 0xc2e   : > { %14991 = vmatmul.mubr.msk.bf16.gmra.mrb[240].mxu1 %vm1212_vm0, %v15943_v37  ;;  %v22916_v37 = vld [vmem:[#allocation134_spill] sm:$0xff] }
 0xc2f   : > { %14994 = vmatprep.mubr.msk.bf16.mxu1 %vm1212_vm0, %v15944_v48 }
 0xc31   : > { %8623 = vrot.lane.b32.xlu1 %v20225_v6, %s16754_s16 }
 0xc35   : > { %8627 = vrot.lane.b32.xlu1 %v20235_v29, %s16754_s16 }
 0xc36   : > { %14995 = vmatmul.mubr.msk.bf16.gmra.mrb[244].mxu1 %vm1212_vm0, %v15945_v16 }
 0xc39   : > { %8631 = vrot.lane.b32.xlu1 %v20245_v42, %s16754_s16 }
 0xc3d   : > { %8635 = vrot.lane.b32.xlu1 %v20255_v58, %s16754_s16  ;;  %v22919_v58 = vld [vmem:[#allocation135_spill] sm:$0xff] }
 0xcca   : > { %v14930_v24 = vpop.f32.mrb[216].mxu1 }
 0xccb   : > { %v8284_v21 = vmul.f32 %v14930_v24, %v19784_v0  ;;  %v14956_v39 = vpop.f32.mrb[216].mxu0  ;;  %v8011_v56 = vpop.f32.mrb[217].mxu1  ;;  %v22922_v24 = vld [vmem:[#allocation136_spill] sm:$0xff] }
 0xccc   : > { %v8300_v49 = vmul.f32 %v14956_v39, %v22915_v51  ;;  %v8283_v48 = vmul.f32 %v8011_v56, %v22916_v37  ;;  %v8204_v16 = vpop.f32.mrb[217].mxu0  ;;  %v22923_v39 = vld [vmem:[#allocation96_spill] sm:$0xff] }
 0xccd   : > { %v8299_v42 = vmul.f32 %v8204_v16, %v22917_v11  ;;  %v22925_v11 = vld [vmem:[#allocation9_spill] sm:$0xff] }
 0xcce   : > { %v20268_v29 = vadd.f32 %v8300_v49, %v8284_v21 }
 0xccf   : > { %v14933_v27 = vpop.f32.mrb[218].mxu1  ;;  %v14959_v6 = vpop.f32.mrb[218].mxu0  ;;  %v20271_v63 = vadd.f32 %v8299_v42, %v8283_v48  ;;  %v22928_v42 = vld [vmem:[#allocation119_spill] sm:$0xff] }
 0xcd0   : > { %22918 = vst [vmem:[#allocation118_spill] sm:$0xff] %v20268_v29  ;;  %v8286_v61 = vmul.f32 %v14933_v27, %v22919_v58  ;;  %v8021_v26 = vpop.f32.mrb[219].mxu1  ;;  %v8302_v0 = vmul.f32 %v14959_v6, %v22921_v2  ;;  %v8214_v55 = vpop.f32.mrb[219].mxu0  ;;  %v22927_v27 = vld [vmem:[#allocation108_spill] sm:$0xff]  ;;  %v22929_v2 = vld [vmem:[#allocation117_spill] sm:$0xff] }
 0xcd1   : > { %22920 = vst [vmem:[#allocation137_spill] sm:$0xff] %v20271_v63  ;;  %v8285_v36 = vmul.f32 %v8021_v26, %v22922_v24  ;;  %v8301_v51 = vmul.f32 %v8214_v55, %v22923_v39  ;;  %v22931_v55 = vld [vmem:[#allocation120_spill] sm:$0xff] }
 0xcd2   : > { %v20276_v37 = vadd.f32 %v8302_v0, %v8286_v61 }
 0xcd3   : > { %v14936_v56 = vpop.f32.mrb[220].mxu1  ;;  %v14962_v21 = vpop.f32.mrb[220].mxu0  ;;  %v20279_v29 = vadd.f32 %v8301_v51, %v8285_v36  ;;  %v22934_v36 = vld [vmem:[#allocation10_spill] sm:$0xff] }
 0xcd4   : > { %22924 = vst [vmem:[#allocation109_spill] sm:$0xff] %v20276_v37  ;;  %v8288_v16 = vmul.f32 %v14936_v56, %v22925_v11  ;;  %v8031_v49 = vpop.f32.mrb[221].mxu1  ;;  %v8304_v58 = vmul.f32 %v14962_v21, %v22927_v27  ;;  %v8224_v63 = vpop.f32.mrb[221].mxu0  ;;  %v22933_v56 = vld [vmem:[#allocation100_spill] sm:$0xff]  ;;  %v22935_v21 = vld [vmem:[#allocation99_spill] sm:$0xff] }
 0xcd5   : > { %22926 = vst [vmem:[#allocation134_spill] sm:$0xff] %v20279_v29  ;;  %v8287_v48 = vmul.f32 %v8031_v49, %v22928_v42  ;;  %v8303_v6 = vmul.f32 %v8224_v63, %v22929_v2  ;;  %v22937_v63 = vld [vmem:[#allocation141_spill] sm:$0xff] }
 0xcd6   : > { %v20284_v24 = vadd.f32 %v8304_v58, %v8288_v16 }
 0xcd7   : > { %v14939_v26 = vpop.f32.mrb[222].mxu1  ;;  %v14965_v61 = vpop.f32.mrb[222].mxu0  ;;  %v20287_v37 = vadd.f32 %v8303_v6, %v8287_v48  ;;  %v22940_v48 = vld [vmem:[#allocation3_spill] sm:$0xff] }
 0xcd8   : > { %22930 = vst [vmem:[#allocation110_spill] sm:$0xff] %v20284_v24  ;;  %v8290_v39 = vmul.f32 %v14939_v26, %v22931_v55  ;;  %v8041_v0 = vpop.f32.mrb[223].mxu1  ;;  %v8306_v11 = vmul.f32 %v14965_v61, %v22933_v56  ;;  %v8234_v29 = vpop.f32.mrb[223].mxu0  ;;  %v22939_v26 = vld [vmem:[#allocation5_spill] sm:$0xff]  ;;  %v22941_v61 = vld [vmem:[#allocation112_spill] sm:$0xff] }
 0xcd9   : > { %22932 = vst [vmem:[#allocation135_spill] sm:$0xff] %v20287_v37  ;;  %v8289_v51 = vmul.f32 %v8041_v0, %v22934_v36  ;;  %v8305_v27 = vmul.f32 %v8234_v29, %v22935_v21 }
 0xcda   : > { %v20292_v42 = vadd.f32 %v8306_v11, %v8290_v39  ;;  %v22944_v39 = vld [vmem:[#allocation139_spill] sm:$0xff] }
 0xcdb   : > { %v14942_v49 = vpop.f32.mrb[224].mxu1  ;;  %v14968_v16 = vpop.f32.mrb[224].mxu0  ;;  %v20295_v24 = vadd.f32 %v8305_v27, %v8289_v51  ;;  %v22946_v51 = vld [vmem:[#allocation114_spill] sm:$0xff] }
 0xcdc   : > { %22936 = vst [vmem:[#allocation98_spill] sm:$0xff] %v20292_v42  ;;  %v8292_v2 = vmul.f32 %v14942_v49, %v22937_v63  ;;  %v8051_v58 = vpop.f32.mrb[225].mxu1  ;;  %v8308_v55 = vmul.f32 %v14968_v16, %v22939_v26  ;;  %v8244_v37 = vpop.f32.mrb[225].mxu0  ;;  %v22945_v63 = vld [vmem:[#allocation102_spill] sm:$0xff]  ;;  %v22947_v16 = vld [vmem:[#allocation101_spill] sm:$0xff] }
 0xcdd   : > { %22938 = vst [vmem:[#allocation136_spill] sm:$0xff] %v20295_v24  ;;  %v8291_v6 = vmul.f32 %v8051_v58, %v22940_v48  ;;  %v8307_v56 = vmul.f32 %v8244_v37, %v22941_v61 }
 0xcde   : > { %v20300_v0 = vadd.f32 %v8308_v55, %v8292_v2  ;;  %v22950_v2 = vld [vmem:[#allocation140_spill] sm:$0xff] }
 0xcdf   : > { %v20302_v36 = vadd.f32 %v8307_v56, %v8291_v6  ;;  %v22951_v56 = vld [vmem:[#allocation123_spill] sm:$0xff] }
 0xce0   : > { %22942 = vst [vmem:[#allocation96_spill] sm:$0xff] %v20300_v0  ;;  %v14945_v29 = vpop.f32.mrb[226].mxu1 }
 0xce1   : > { %22943 = vst [vmem:[#allocation9_spill] sm:$0xff] %v20302_v36  ;;  %v8294_v11 = vmul.f32 %v14945_v29, %v22944_v39  ;;  %v14971_v21 = vpop.f32.mrb[226].mxu0  ;;  %v8061_v49 = vpop.f32.mrb[227].mxu1  ;;  %v22952_v39 = vld [vmem:[#allocation115_spill] sm:$0xff] }
 0xce2   : > { %v8310_v42 = vmul.f32 %v14971_v21, %v22945_v63  ;;  %v8293_v27 = vmul.f32 %v8061_v49, %v22946_v51  ;;  %v8254_v24 = vpop.f32.mrb[227].mxu0  ;;  %v22953_v21 = vld [vmem:[#allocation130_spill] sm:$0xff] }
 0xce3   : > { %v8309_v26 = vmul.f32 %v8254_v24, %v22947_v16 }
 0xce4   : > { %v20308_v58 = vadd.f32 %v8310_v42, %v8294_v11  ;;  %v22956_v42 = vld [vmem:[#allocation95_spill] sm:$0xff] }
 0xce5   : > { %v20310_v48 = vadd.f32 %v8309_v26, %v8293_v27  ;;  %v22957_v26 = vld [vmem:[#allocation24_spill] sm:$0xff] }
 0xce6   : > { %22948 = vst [vmem:[#allocation108_spill] sm:$0xff] %v20308_v58  ;;  %v14948_v37 = vpop.f32.mrb[228].mxu1 }
 0xce7   : > { %22949 = vst [vmem:[#allocation119_spill] sm:$0xff] %v20310_v48  ;;  %v8296_v55 = vmul.f32 %v14948_v37, %v22950_v2  ;;  %v14974_v6 = vpop.f32.mrb[228].mxu0  ;;  %v8071_v61 = vpop.f32.mrb[229].mxu1  ;;  %v20322_v37 = vsub.s32 6, %v22957_v26  ;;  %v22959_v2 = vld [vmem:[#allocation4_spill] sm:$0xff] }
 0xce8   : > { %v8312_v29 = vmul.f32 %v14974_v6, %v22951_v56  ;;  %v8295_v36 = vmul.f32 %v8071_v61, %v22952_v39  ;;  %v8264_v0 = vpop.f32.mrb[229].mxu0  ;;  %v22960_v6 = vld [vmem:[#allocation97_spill] sm:$0xff]  ;;  %v22961_v39 = vld [vmem:[#allocation103_spill] sm:$0xff] }
 0xce9   : > { %v8311_v63 = vmul.f32 %v8264_v0, %v22953_v21  ;;  %22958 = vst [vmem:[#allocation100_spill] sm:$0xff] %v20322_v37  ;;  %v22962_v0 = vld [vmem:[#allocation33_spill] sm:$0xff] }
 0xcea   : > { %v20316_v49 = vadd.f32 %v8312_v29, %v8296_v55  ;;  %v8520_v55 = vrot.slane %v22962_v0, %v20322_v37  ;;  %v22969_v0 = vld [vmem:[#allocation39_spill] sm:$0xff] }
 0xceb   : > { %v20318_v51 = vadd.f32 %v8311_v63, %v8295_v36  ;;  %v22963_v36 = vld [vmem:[#allocation31_spill] sm:$0xff]  ;;  %v22964_v63 = vld [vmem:[#allocation32_spill] sm:$0xff] }
 0xcec   : > { %22954 = vst [vmem:[#allocation117_spill] sm:$0xff] %v20316_v49  ;;  %v8953_v29 = vrot.slane %v22963_v36, %v20322_v37 }
 0xced   : > { %22955 = vst [vmem:[#allocation120_spill] sm:$0xff] %v20318_v51  ;;  %v14951_v24 = vpop.f32.mrb[230].mxu1  ;;  %v8957_v51 = vrot.slane %v22969_v0, %v20322_v37 }
 0xcee   : > { %v8298_v11 = vmul.f32 %v14951_v24, %v22956_v42  ;;  %v14977_v27 = vpop.f32.mrb[230].mxu0  ;;  %v8081_v16 = vpop.f32.mrb[231].mxu1  ;;  %v8512_v24 = vrot.slane %v22964_v63, %v20322_v37  ;;  %v22965_v42 = vld [vmem:[#allocation35_spill] sm:$0xff] }
 0xcef   : > { %v8314_v48 = vmul.f32 %v14977_v27, %v22959_v2  ;;  %v8297_v56 = vmul.f32 %v8081_v16, %v22960_v6  ;;  %v8274_v61 = vpop.f32.mrb[231].mxu0  ;;  %v8945_v26 = vrot.slane %v22965_v42, %v20322_v37  ;;  %v22966_v27 = vld [vmem:[#allocation37_spill] sm:$0xff]  ;;  %v22972_v42 = vld [vmem:[#allocation36_spill] sm:$0xff] }
 0xcf0   : > { %v8313_v58 = vmul.f32 %v8274_v61, %v22961_v39  ;;  %v8524_v2 = vrot.slane %v22966_v27, %v20322_v37  ;;  %v8516_v40 = vrot.slane %v22972_v42, %v20322_v37  ;;  %v22973_v27 = vld [vmem:[#allocation38_spill] sm:$0xff] }
 0xcf1   : > { %v14984_v21 = vpop.f32.mrb[232].mxu1  ;;  %v20337_v16 = vadd.f32 %v8314_v48, %v8298_v11  ;;  %v8949_v48 = vrot.slane %v22973_v27, %v20322_v37 }
 0xcf2   : > { %v8575_v6 = vadd.f32 %v14984_v21, %v8520_v55  ;;  %v20339_v61 = vadd.f32 %v14984_v21, %v8953_v29  ;;  %v8446_v39 = vpop.f32.mrb[233].mxu1  ;;  %v20343_v36 = vadd.f32 %v8313_v58, %v8297_v56  ;;  %v22975_v21 = vld [vmem:[#allocation41_spill] sm:$0xff]  ;;  %v22977_v58 = vld [vmem:[#allocation42_spill] sm:$0xff] }
 0xcf3   : > { %22967 = vst [vmem:[#allocation10_spill] sm:$0xff] %v20337_v16  ;;  %v8573_v49 = vadd.f32 %v8512_v24, %v8446_v39  ;;  %v20345_v3 = vadd.f32 %v8945_v26, %v8446_v39  ;;  %v14985_v63 = vpop.f32.mrb[234].mxu1  ;;  %v22978_v26 = vld [vmem:[#allocation50_spill] sm:$0xff]  ;;  %v22979_v39 = vld [vmem:[#allocation45_spill] sm:$0xff] }
 0xcf4   : > { %22968 = vst [vmem:[#allocation99_spill] sm:$0xff] %v20339_v61  ;;  %22970 = vst [vmem:[#allocation141_spill] sm:$0xff] %v20343_v36  ;;  %v8576_v11 = vadd.f32 %v14985_v63, %v8524_v2  ;;  %v20351_v55 = vadd.f32 %v14985_v63, %v8957_v51  ;;  %v8449_v29 = vpop.f32.mrb[235].mxu1  ;;  %v8591_v24 = vmul.f32 %v8575_v6, %v22978_v26  ;;  %v22980_v36 = vld [vmem:[#allocation46_spill] sm:$0xff]  ;;  %v22981_v51 = vld [vmem:[#allocation43_spill] sm:$0xff] }
 0xcf5   : > { %22971 = vst [vmem:[#allocation5_spill] sm:$0xff] %v20345_v3  ;;  %v8589_v16 = vmul.f32 %v8573_v49, %v22975_v21  ;;  %v8574_v61 = vadd.f32 %v8516_v40, %v8449_v29  ;;  %v20354_v0 = vadd.f32 %v8949_v48, %v8449_v29  ;;  %v8536_v42 = vrot.slane %v22979_v39, %v20322_v37  ;;  %v22982_v40 = vld [vmem:[#allocation48_spill] sm:$0xff]  ;;  %v22983_v48 = vld [vmem:[#allocation47_spill] sm:$0xff] }
 0xcf6   : > { %22974 = vst [vmem:[#allocation3_spill] sm:$0xff] %v20351_v55  ;;  %v8969_v27 = vrot.slane %v22980_v36, %v20322_v37  ;;  %v8528_v63 = vrot.slane %v22981_v51, %v20322_v37  ;;  %v8961_v49 = vrot.slane %v22982_v40, %v20322_v37  ;;  %v22986_v36 = vld [vmem:[#allocation44_spill] sm:$0xff]  ;;  %v20377_v51 = vld [vmem:[%s21879_s7] sm:$0xf] }
 0xcf7   : > { %22976 = vst [vmem:[#allocation112_spill] sm:$0xff] %v20354_v0  ;;  %v8590_v56 = vmul.f32 %v8574_v61, %v22977_v58  ;;  %15030 = vmatprep.mubr.f32.mxu0 %v8589_v16  ;;  %v8540_v61 = vrot.slane %v22983_v48, %v20322_v37  ;;  %v22984_v16 = vld [vmem:[#allocation49_spill] sm:$0xff]  ;;  %v22987_v48 = vld [vmem:[#allocation51_spill] sm:$0xff] }
 0xcf8   : > { %v8973_v6 = vrot.slane %v22984_v16, %v20322_v37  ;;  %v8592_v40 = vmul.f32 %v8576_v11, %v22987_v48  ;;  %v22993_v11 = vld [vmem:[#allocation54_spill] sm:$0xff]  ;;  %v22995_v48 = vld [vmem:[#allocation56_spill] sm:$0xff] }
 0xcf9   : > { %v14988_v2 = vpop.f32.mrb[236].mxu1  ;;  %15031 = vmatmul.mubr.f32.vlgmr.msra.gmra.mrb[232].mxu0 %v8590_v56  ;;  %v8532_v56 = vrot.slane %v22986_v36, %v20322_v37 }
 0xcfa   : > { %v8579_v29 = vadd.f32 %v14988_v2, %v8536_v42  ;;  %v20370_v26 = vadd.f32 %v14988_v2, %v8969_v27  ;;  %v8462_v39 = vpop.f32.mrb[237].mxu1  ;;  %15033 = vmatprep.mubr.f32.mxu0 %v8591_v24  ;;  %15081 = vmatpush3.msk.msra.mxu0 %vm2300_vm1, %v20377_v51  ;;  %v22989_v27 = vld [vmem:[#allocation53_spill] sm:$0xff] }
 0xcfb   : > { %v8577_v58 = vadd.f32 %v8528_v63, %v8462_v39  ;;  %v20382_v16 = vadd.f32 %v8961_v49, %v8462_v39  ;;  %v14989_v42 = vpop.f32.mrb[238].mxu1  ;;  %v8965_v24 = vrot.slane %v22989_v27, %v20322_v37  ;;  %15701 = vmatprep.subr.bf16.mxu0 %v22300_v5  ;;  %v22994_v39 = vld [vmem:[#allocation61_spill] sm:$0xff]  ;;  %v8552_v27 = vrot.slane %v22995_v48, %v20322_v37  ;;  %v23001_v48 = vld [vmem:[#allocation60_spill] sm:$0xff] }
 0xcfc   : > { %22985 = vst [vmem:[#allocation139_spill] sm:$0xff] %v20370_v26  ;;  %v8580_v2 = vadd.f32 %v14989_v42, %v8540_v61  ;;  %v20387_v36 = vadd.f32 %v14989_v42, %v8973_v6  ;;  %v8465_v21 = vpop.f32.mrb[239].mxu1  ;;  %v22991_v26 = vld [vmem:[#allocation52_spill] sm:$0xff]  ;;  %v8595_v49 = vmul.f32 %v8579_v29, %v22994_v39  ;;  %v22997_v42 = vld [vmem:[#allocation55_spill] sm:$0xff]  ;;  %v8989_v39 = vrot.slane %v23001_v48, %v20322_v37 }
 0xcfd   : > { %22988 = vst [vmem:[#allocation102_spill] sm:$0xff] %v20382_v16  ;;  %v8593_v55 = vmul.f32 %v8577_v58, %v22991_v26  ;;  %v8578_v3 = vadd.f32 %v8532_v56, %v8465_v21  ;;  %v20390_v0 = vadd.f32 %v8965_v24, %v8465_v21  ;;  %15034 = vmatmul.mubr.f32.gmra.mrb[234].mxu0 %v8592_v40  ;;  %v22996_v16 = vld [vmem:[#allocation57_spill] sm:$0xff]  ;;  %v22998_v21 = vld [vmem:[#allocation59_spill] sm:$0xff]  ;;  %v22999_v40 = vld [vmem:[#allocation58_spill] sm:$0xff] }
 0xcfe   : > { %22990 = vst [vmem:[#allocation114_spill] sm:$0xff] %v20387_v36  ;;  %v8985_v61 = vrot.slane %v22996_v16, %v20322_v37  ;;  %v8544_v58 = vrot.slane %v22997_v42, %v20322_v37  ;;  %v8977_v56 = vrot.slane %v22998_v21, %v20322_v37  ;;  %v23002_v16 = vld [vmem:[#allocation62_spill] sm:$0xff] }
 0xcff   : > { %22992 = vst [vmem:[#allocation101_spill] sm:$0xff] %v20390_v0  ;;  %v8594_v63 = vmul.f32 %v8578_v3, %v22993_v11  ;;  %15036 = vmatprep.mubr.f32.mxu0 %v8593_v55  ;;  %v8556_v3 = vrot.slane %v22999_v40, %v20322_v37  ;;  %v23003_v11 = vld [vmem:[#allocation66_spill] sm:$0xff]  ;;  %v23005_v0 = vld [vmem:[#allocation65_spill] sm:$0xff] }
 0xd00   : > { %v8596_v26 = vmul.f32 %v8580_v2, %v23003_v11  ;;  %v8981_v40 = vrot.slane %v23005_v0, %v20322_v37  ;;  %v23010_v2 = vld [vmem:[#allocation70_spill] sm:$0xff]  ;;  %v23012_v0 = vld [vmem:[#allocation69_spill] sm:$0xff] }
 0xd01   : > { %v14992_v6 = vpop.f32.mrb[240].mxu1  ;;  %15037 = vmatmul.mubr.f32.gmra.mrb[236].mxu0 %v8594_v63  ;;  %v8548_v63 = vrot.slane %v23002_v16, %v20322_v37  ;;  %v23009_v16 = vld [vmem:[#allocation68_spill] sm:$0xff] }
 0xd02   : > { %v8583_v55 = vadd.f32 %v14992_v6, %v8552_v27  ;;  %v20404_v24 = vadd.f32 %v14992_v6, %v8985_v61  ;;  %v8478_v29 = vpop.f32.mrb[241].mxu1  ;;  %15039 = vmatprep.mubr.f32.mxu0 %v8595_v49  ;;  %v23007_v49 = vld [vmem:[#allocation67_spill] sm:$0xff] }
 0xd03   : > { %v8581_v42 = vadd.f32 %v8544_v58, %v8478_v29  ;;  %v20411_v36 = vadd.f32 %v8977_v56, %v8478_v29  ;;  %v14993_v21 = vpop.f32.mrb[242].mxu1  ;;  %v23011_v56 = vld [vmem:[#allocation64_spill] sm:$0xff] }
 0xd04   : > { %23000 = vst [vmem:[#allocation140_spill] sm:$0xff] %v20404_v24  ;;  %v8584_v27 = vadd.f32 %v14993_v21, %v8556_v3  ;;  %v20415_v61 = vadd.f32 %v14993_v21, %v8989_v39  ;;  %v8481_v6 = vpop.f32.mrb[243].mxu1  ;;  %v8599_v58 = vmul.f32 %v8583_v55, %v23010_v2  ;;  %v8568_v29 = vrot.slane %v23011_v56, %v20322_v37  ;;  %v23013_v21 = vld [vmem:[#allocation40_spill] sm:$0xff]  ;;  %v23017_v56 = vld [vmem:[#allocation73_spill] sm:$0xff] }
 0xd05   : > { %23004 = vst [vmem:[#allocation123_spill] sm:$0xff] %v20411_v36  ;;  %v8597_v24 = vmul.f32 %v8581_v42, %v23007_v49  ;;  %v8582_v19 = vadd.f32 %v8548_v63, %v8481_v6  ;;  %v20418_v48 = vadd.f32 %v8981_v40, %v8481_v6  ;;  %15040 = vmatmul.mubr.f32.gmra.mrb[238].mxu0 %v8596_v26  ;;  %v23014_v40 = vld [vmem:[#allocation71_spill] sm:$0xff]  ;;  %v23015_v26 = vld [vmem:[#allocation72_spill] sm:$0xff] }
 0xd06   : > { %23006 = vst [vmem:[#allocation115_spill] sm:$0xff] %v20415_v61  ;;  %v9001_v3 = vrot.slane %v23012_v0, %v20322_v37  ;;  %v8560_v42 = vrot.slane %v23013_v21, %v20322_v37  ;;  %v8993_v63 = vrot.slane %v23014_v40, %v20322_v37  ;;  %v9005_v2 = vrot.slane %v23017_v56, %v20322_v37  ;;  %v23018_v0 = vld [vmem:[#allocation63_spill] sm:$0xff]  ;;  %v23021_v61 = vld [vmem:[#allocation74_spill] sm:$0xff] }
 0xd07   : > { %23008 = vst [vmem:[#allocation130_spill] sm:$0xff] %v20418_v48  ;;  %v8598_v62 = vmul.f32 %v8582_v19, %v23009_v16  ;;  %15042 = vmatprep.mubr.f32.mxu0 %v8597_v24  ;;  %v8572_v19 = vrot.slane %v23015_v26, %v20322_v37  ;;  %v23019_v16 = vld [vmem:[#allocation76_spill] sm:$0xff]  ;;  %v8997_v26 = vrot.slane %v23021_v61, %v20322_v37 }
 0xd08   : > { %v8600_v49 = vmul.f32 %v8584_v27, %v23019_v16  ;;  %v23025_v27 = vld [vmem:[#allocation78_spill] sm:$0xff] }
 0xd09   : > { %v14996_v39 = vpop.f32.mrb[244].mxu1  ;;  %15043 = vmatmul.mubr.f32.gmra.mrb[240].mxu0 %v8598_v62  ;;  %v8564_v62 = vrot.slane %v23018_v0, %v20322_v37  ;;  %v23024_v0 = vld [vmem:[#allocation77_spill] sm:$0xff] }
 0xd0a   : > { %v8587_v24 = vadd.f32 %v14996_v39, %v8568_v29  ;;  %v20432_v6 = vadd.f32 %v14996_v39, %v9001_v3  ;;  %v8494_v55 = vpop.f32.mrb[245].mxu1  ;;  %15045 = vmatprep.mubr.f32.mxu0 %v8599_v58  ;;  %v23023_v58 = vld [vmem:[#allocation75_spill] sm:$0xff] }
 0xd0b   : > { %v8585_v21 = vadd.f32 %v8560_v42, %v8494_v55  ;;  %v20439_v11 = vadd.f32 %v8993_v63, %v8494_v55  ;;  %v14997_v40 = vpop.f32.mrb[246].mxu1  ;;  %v23026_v63 = vld [vmem:[#allocation11_spill] sm:$0xff] }
 0xd0c   : > { %23016 = vst [vmem:[#allocation95_spill] sm:$0xff] %v20432_v6  ;;  %v8588_v29 = vadd.f32 %v14997_v40, %v8572_v19  ;;  %v20443_v3 = vadd.f32 %v14997_v40, %v9005_v2  ;;  %v8497_v39 = vpop.f32.mrb[247].mxu1  ;;  %v8603_v42 = vmul.f32 %v8587_v24, %v23025_v27  ;;  %v8608_v19 = vpop.permute.xlu1 %8607 }
 0xd0d   : > { %23020 = vst [vmem:[#allocation4_spill] sm:$0xff] %v20439_v11  ;;  %v8601_v6 = vmul.f32 %v8585_v21, %v23023_v58  ;;  %v8586_v36 = vadd.f32 %v8564_v62, %v8497_v39  ;;  %v20446_v56 = vadd.f32 %v8997_v26, %v8497_v39  ;;  %15046 = vmatmul.mubr.f32.gmra.mrb[242].mxu0 %v8600_v49  ;;  %v8606_v2 = vpop.permute.xlu0 %8605 }
 0xd0e   : > { %23022 = vst [vmem:[#allocation97_spill] sm:$0xff] %v20443_v3  ;;  %v8604_v55 = vmul.f32 %v8588_v29, %v23026_v63  ;;  %v23027_v3 = vld [vmem:[#allocation106_spill] sm:$0xff] }
 0xd0f   : > { %v8602_v48 = vmul.f32 %v8586_v36, %v23024_v0  ;;  %15048 = vmatprep.mubr.f32.mxu0 %v8601_v6 }
 0xd10   : > { %v8612_v40 = vpop.permute.xlu1 %8611 }
 0xd11   : > { %15049 = vmatmul.mubr.f32.gmra.mrb[244].mxu0 %v8602_v48  ;;  %v8610_v37 = vpop.permute.xlu0 %8609 }
 0xd12   : > { %15051 = vmatprep.mubr.f32.mxu0 %v8603_v42 }
 0xd14   : > { %v8616_v61 = vpop.permute.xlu1 %8615 }
 0xd15   : > { %15052 = vmatmul.mubr.f32.gmra.mrb[246].mxu0 %v8604_v55  ;;  %v8614_v36 = vpop.permute.xlu0 %8613 }
 0xd18   : > { %v8620_v6 = vpop.permute.xlu1 %8619 }
 0xdcc   : > { %v15032_v21 = vpop.f32.mrb[232].mxu0 }
 0xdcd   : > { %v8725_v62 = vadd.f32 %v15032_v21, %v8608_v19  ;;  %v8719_v26 = vpop.f32.mrb[233].mxu0 }
 0xdce   : > { %v8720_v39 = vadd.f32 %v8719_v26, %v8606_v2 }
 0xdcf   : > { %v20452_v49 = vmax.f32 %v19963_v57, %v8725_v62 }
 0xdd0   : > { %v20455_v24 = vmax.f32 %v19966_v44, %v8720_v39  ;;  %v15035_v48 = vpop.f32.mrb[234].mxu0 }
 0xdd1   : > { %v8815_v29 = vsub.f32 %v19963_v57, %v20452_v49  ;;  %v8863_v42 = vsub.f32 %v8725_v62, %v20452_v49  ;;  %v8735_v55 = vadd.f32 %v15035_v48, %v8612_v40  ;;  %v8729_v63 = vpop.f32.mrb[235].mxu0 }
 0xdd2   : > { %v8814_v19 = vsub.f32 %v19966_v44, %v20455_v24  ;;  %v8862_v2 = vsub.f32 %v8720_v39, %v20455_v24  ;;  %v8730_v21 = vadd.f32 %v8729_v63, %v8610_v37  ;;  %v8618_v37 = vpop.permute.xlu0 %8617 }
 0xdd3   : > { %v8832_v26 = vmul.f32 1.442695, %v8815_v29  ;;  %v8880_v27 = vmul.f32 1.442695, %v8863_v42  ;;  %v20464_v0 = vmax.f32 %v19975_v22, %v8735_v55  ;;  %v8624_v42 = vpop.permute.xlu1 %8623 }
 0xdd4   : > { %v8830_v58 = vmul.f32 1.442695, %v8814_v19  ;;  %v8878_v16 = vmul.f32 1.442695, %v8862_v2  ;;  %v20467_v11 = vmax.f32 %v23027_v3, %v8730_v21  ;;  %v15038_v57 = vpop.f32.mrb[236].mxu0 }
 0xdd5   : > { %16338 = vpow2.f32 %v8832_v26  ;;  %v8817_v40 = vsub.f32 %v19975_v22, %v20464_v0  ;;  %v8865_v44 = vsub.f32 %v8735_v55, %v20464_v0  ;;  %v8745_v62 = vadd.f32 %v15038_v57, %v8616_v61  ;;  %v8739_v39 = vpop.f32.mrb[237].mxu0  ;;  %v23029_v61 = vld [vmem:[#allocation6_spill] sm:$0xff] }
 0xdd6   : > { %23028 = vst [vmem:[#allocation103_spill] sm:$0xff] %v20467_v11  ;;  %16340 = vpow2.f32 %v8880_v27  ;;  %v8816_v63 = vsub.f32 %v23027_v3, %v20467_v11  ;;  %v8864_v48 = vsub.f32 %v8730_v21, %v20467_v11  ;;  %v8740_v29 = vadd.f32 %v8739_v39, %v8614_v36 }
 0xdd7   : > { %16342 = vpow2.f32 %v8830_v58  ;;  %v8836_v19 = vmul.f32 1.442695, %v8817_v40  ;;  %v8884_v2 = vmul.f32 1.442695, %v8865_v44  ;;  %v20476_v26 = vmax.f32 %v19987_v1, %v8745_v62 }
 0xdd8   : > { %16344 = vpow2.f32 %v8878_v16  ;;  %v8834_v22 = vmul.f32 1.442695, %v8816_v63  ;;  %v8882_v55 = vmul.f32 1.442695, %v8864_v48  ;;  %v20479_v57 = vmax.f32 %v23029_v61, %v8740_v29  ;;  %v15041_v27 = vpop.f32.mrb[238].mxu0 }
 0xdd9   : > { %16346 = vpow2.f32 %v8836_v19  ;;  %v8819_v3 = vsub.f32 %v19987_v1, %v20476_v26  ;;  %v8867_v36 = vsub.f32 %v8745_v62, %v20476_v26  ;;  %v8755_v21 = vadd.f32 %v15041_v27, %v8620_v6  ;;  %v8749_v58 = vpop.f32.mrb[239].mxu0  ;;  %v8622_v19 = vpop.permute.xlu0 %8621 }
 0xdda   : > { %23030 = vst [vmem:[#allocation106_spill] sm:$0xff] %v20479_v57  ;;  %16348 = vpow2.f32 %v8884_v2  ;;  %v8818_v40 = vsub.f32 %v23029_v61, %v20479_v57  ;;  %v8866_v16 = vsub.f32 %v8740_v29, %v20479_v57  ;;  %v8750_v44 = vadd.f32 %v8749_v58, %v8618_v37  ;;  %v8628_v2 = vpop.permute.xlu1 %8627 }
 0xddb   : > { %16350 = vpow2.f32 %v8834_v22  ;;  %v8840_v39 = vmul.f32 1.442695, %v8819_v3  ;;  %v8888_v63 = vmul.f32 1.442695, %v8867_v36  ;;  %v20488_v48 = vmax.f32 %v19999_v41, %v8755_v21 }
 0xddc   : > { %16352 = vpow2.f32 %v8882_v55  ;;  %v8838_v1 = vmul.f32 1.442695, %v8818_v40  ;;  %v8886_v11 = vmul.f32 1.442695, %v8866_v16  ;;  %v20491_v6 = vmax.f32 %v20002_v4, %v8750_v44  ;;  %v15044_v62 = vpop.f32.mrb[240].mxu0 }
 0xddd   : > { %16354 = vpow2.f32 %v8840_v39  ;;  %v8821_v29 = vsub.f32 %v19999_v41, %v20488_v48  ;;  %v8869_v37 = vsub.f32 %v8755_v21, %v20488_v48  ;;  %v8765_v22 = vadd.f32 %v15044_v62, %v8624_v42  ;;  %v8759_v61 = vpop.f32.mrb[241].mxu0  ;;  %v23031_v41 = vld [vmem:[#allocation113_spill] sm:$0xff] }
 0xdde   : > { %16356 = vpow2.f32 %v8888_v63  ;;  %v8820_v27 = vsub.f32 %v20002_v4, %v20491_v6  ;;  %v8868_v55 = vsub.f32 %v8750_v44, %v20491_v6  ;;  %v8760_v3 = vadd.f32 %v8759_v61, %v8622_v19 }
 0xddf   : > { %v16339_v36 = vpop.eup %16338  ;;  %16358 = vpow2.f32 %v8838_v1  ;;  %v8844_v58 = vmul.f32 1.442695, %v8821_v29  ;;  %v8892_v40 = vmul.f32 1.442695, %v8869_v37  ;;  %v20500_v16 = vmax.f32 %v20011_v7, %v8765_v22  ;;  %v8626_v1 = vpop.permute.xlu0 %8625 }
 0xde0   : > { %v16341_v39 = vpop.eup %16340  ;;  %v8911_v57 = vmul.f32 %v16339_v36, %v23031_v41  ;;  %16360 = vpow2.f32 %v8886_v11  ;;  %v8842_v42 = vmul.f32 1.442695, %v8820_v27  ;;  %v8890_v21 = vmul.f32 1.442695, %v8868_v55  ;;  %v15047_v63 = vpop.f32.mrb[242].mxu0 }
 0xde1   : > { %v16343_v62 = vpop.eup %16342  ;;  %16362 = vpow2.f32 %v8844_v58  ;;  %v8823_v4 = vsub.f32 %v20011_v7, %v20500_v16  ;;  %v8871_v44 = vsub.f32 %v8765_v22, %v20500_v16  ;;  %v20507_v19 = vmax.f32 %v20018_v43, %v8760_v3  ;;  %v8769_v29 = vpop.f32.mrb[243].mxu0 }
 0xde2   : > { %v16345_v37 = vpop.eup %16344  ;;  %v20509_v61 = vadd.f32 %v16341_v39, %v8911_v57  ;;  %v8910_v11 = vmul.f32 %v16343_v62, %v20028_v30  ;;  %16364 = vpow2.f32 %v8892_v40  ;;  %v8775_v27 = vadd.f32 %v15047_v63, %v8628_v2  ;;  %15056 = vmatprep.mubr.msk.f32.mxu1 %vm2251_vm2, %v16343_v62  ;;  %v8632_v55 = vpop.permute.xlu1 %8631  ;;  %v16720_v40 = vld [vmem:[%s21877_s5] sm:$0xff]  }
 0xde3   : > { %v16347_v58 = vpop.eup %16346  ;;  %16366 = vpow2.f32 %v8842_v42  ;;  %v8848_v7 = vmul.f32 1.442695, %v8823_v4  ;;  %v8896_v41 = vmul.f32 1.442695, %v8871_v44  ;;  %v8822_v22 = vsub.f32 %v20018_v43, %v20507_v19  ;;  %15082 = vmatprep.mubr.msk.f32.mxu0 %vm2251_vm2, %v16345_v37  ;;  %15057 = vmatmul.mubr.msk.f32.vlgmr.msra.gmra.mrb[248].mxu1 %vm2251_vm2, %v16339_v36 }
 0xde4   : > { %23032 = vst [vmem:[#allocation6_spill] sm:$0xff] %v20509_v61  ;;  %v16349_v57 = vpop.eup %16348  ;;  %v20517_v61 = vadd.f32 %v16345_v37, %v8910_v11  ;;  %v8913_v30 = vmul.f32 %v16347_v58, %v20039_v8  ;;  %16368 = vpow2.f32 %v8890_v21  ;;  %v8870_v2 = vsub.f32 %v8760_v3, %v20507_v19  ;;  %15083 = vmatmul.mubr.msk.f32.vlgmr.msra.gmra.mrb[248].mxu0 %vm2251_vm2, %v16341_v39  ;;  %v15050_v43 = vpop.f32.mrb[244].mxu0 }
 0xde5   : > { %15107 = vmatpush3.bf16.msra.mxu1 %v16720_v40  ;;  %v16351_v42 = vpop.eup %16350  ;;  %16370 = vpow2.f32 %v8848_v7  ;;  %v8846_v63 = vmul.f32 1.442695, %v8822_v22  ;;  %v20526_v36 = vmax.f32 %v20035_v13, %v8775_v27  ;;  %v8770_v62 = vadd.f32 %v8769_v29, %v8626_v1  ;;  %v8779_v4 = vpop.f32.mrb[245].mxu0  ;;  %15703 = vmatpush3.bf16.msra.mxu0 %v22300_v5 }
 0xde6   : > { %15108 = vmatprep.subr.bf16.mxu1 %v20059_v12  ;;  %v16353_v8 = vpop.eup %16352  ;;  %v20530_v3 = vadd.f32 %v16349_v57, %v8913_v30  ;;  %v8912_v39 = vmul.f32 %v16351_v42, %v20052_v46  ;;  %16372 = vpow2.f32 %v8896_v41  ;;  %v8894_v21 = vmul.f32 1.442695, %v8870_v2  ;;  %15059 = vmatprep.mubr.msk.f32.mxu1 %vm2251_vm2, %v16351_v42  ;;  %v8630_v37 = vpop.permute.xlu0 %8629 }
 0xde7   : > { %15705 = vmatprep.subr.bf16.mxu0 %v22632_v32  ;;  %v16355_v44 = vpop.eup %16354  ;;  %16374 = vpow2.f32 %v8846_v63  ;;  %v8825_v1 = vsub.f32 %v20035_v13, %v20526_v36  ;;  %v8873_v29 = vsub.f32 %v8775_v27, %v20526_v36  ;;  %v20539_v5 = vmax.f32 %v20048_v20, %v8770_v62  ;;  %15085 = vmatprep.mubr.msk.f32.mxu0 %vm2251_vm2, %v16353_v8  ;;  %v8636_v13 = vpop.permute.xlu1 %8635 }
 0xde8   : > { %15060 = vmatmul.mubr.msk.f32.gmra.mrb[250].mxu1 %vm2251_vm2, %v16347_v58  ;;  %v16357_v46 = vpop.eup %16356  ;;  %v20543_v11 = vadd.f32 %v16353_v8, %v8912_v39  ;;  %v8915_v7 = vmul.f32 %v16355_v44, %v20068_v47  ;;  %16376 = vpow2.f32 %v8894_v21  ;;  %v8785_v41 = vadd.f32 %v15050_v43, %v8632_v55  ;;  %15086 = vmatmul.mubr.msk.f32.gmra.mrb[250].mxu0 %vm2251_vm2, %v16349_v57  ;;  %v15053_v22 = vpop.f32.mrb[246].mxu0 }
 0xde9   : > { %15109 = vmatpush3.bf16.msra.mxu1 %v20059_v12  ;;  %v16359_v27 = vpop.eup %16358  ;;  %v8852_v30 = vmul.f32 1.442695, %v8825_v1  ;;  %v8900_v2 = vmul.f32 1.442695, %v8873_v29  ;;  %v8824_v40 = vsub.f32 %v20048_v20, %v20539_v5  ;;  %v8872_v58 = vsub.f32 %v8770_v62, %v20539_v5  ;;  %v8789_v42 = vpop.f32.mrb[247].mxu0  ;;  %15707 = vmatpush3.bf16.msra.mxu0 %v22632_v32 }
 0xdea   : > { %15182 = vmatprep.subr.msk.mxu1 %vm2300_vm1, %v20377_v51  ;;  %v16361_v47 = vpop.eup %16360  ;;  %v20554_v55 = vadd.f32 %v16357_v46, %v8915_v7  ;;  %v8914_v57 = vmul.f32 %v16359_v27, %v20077_v18  ;;  %v20558_v12 = vmax.f32 %v20072_v31, %v8785_v41  ;;  %v8780_v43 = vadd.f32 %v8779_v4, %v8630_v37 }
 0xdeb   : > { %15062 = vmatprep.mubr.msk.f32.mxu1 %vm2251_vm2, %v16359_v27  ;;  %v16363_v20 = vpop.eup %16362  ;;  %16378 = vpow2.f32 %v8852_v30  ;;  %v8850_v63 = vmul.f32 1.442695, %v8824_v40  ;;  %v8898_v62 = vmul.f32 1.442695, %v8872_v58  ;;  %v8795_v8 = vadd.f32 %v15053_v22, %v8636_v13  ;;  %15088 = vmatprep.mubr.msk.f32.mxu0 %vm2251_vm2, %v16361_v47  ;;  %v8634_v27 = vpop.permute.xlu0 %8633 }
 0xdec   : > { %15063 = vmatmul.mubr.msk.f32.gmra.mrb[252].mxu1 %vm2251_vm2, %v16355_v44  ;;  %v16365_v32 = vpop.eup %16364  ;;  %v20563_v39 = vadd.f32 %v16361_v47, %v8914_v57  ;;  %v8917_v18 = vmul.f32 %v16363_v20, %v20092_v54  ;;  %16380 = vpow2.f32 %v8900_v2  ;;  %v8827_v4 = vsub.f32 %v20072_v31, %v20558_v12  ;;  %15089 = vmatmul.mubr.msk.f32.gmra.mrb[252].mxu0 %vm2251_vm2, %v16357_v46 }
 0xded   : > { %15709 = vmatprep.subr.bf16.mxu0 %v22267_v25  ;;  %v16367_v21 = vpop.eup %16366  ;;  %16382 = vpow2.f32 %v8850_v63  ;;  %v8875_v1 = vsub.f32 %v8785_v41, %v20558_v12  ;;  %v20572_v29 = vmax.f32 %v20086_v45, %v8780_v43  ;;  %v20575_v44 = vmax.f32 %v20089_v38, %v8795_v8 }
 0xdee   : > { %15711 = vmatpush3.bf16.msra.mxu0 %v22267_v25  ;;  %v16369_v54 = vpop.eup %16368  ;;  %v20578_v37 = vadd.f32 %v16365_v32, %v8917_v18  ;;  %v8916_v31 = vmul.f32 %v16367_v21, %v20104_v17  ;;  %16384 = vpow2.f32 %v8898_v62  ;;  %v8856_v46 = vmul.f32 1.442695, %v8827_v4  ;;  %15065 = vmatprep.mubr.msk.f32.mxu1 %vm2251_vm2, %v16367_v21 }
 0xdef   : > { %15713 = vmatprep.subr.bf16.mxu0 %v22271_v23  ;;  %v16371_v7 = vpop.eup %16370  ;;  %v8904_v41 = vmul.f32 1.442695, %v8875_v1  ;;  %v8826_v13 = vsub.f32 %v20086_v45, %v20572_v29  ;;  %v8874_v22 = vsub.f32 %v8780_v43, %v20572_v29  ;;  %v8829_v25 = vsub.f32 %v20089_v38, %v20575_v44  ;;  %15091 = vmatprep.mubr.msk.f32.mxu0 %vm2251_vm2, %v16369_v54 }
 0xdf0   : > { %15066 = vmatmul.mubr.msk.f32.gmra.mrb[254].mxu1 %vm2251_vm2, %v16363_v20  ;;  %v16373_v17 = vpop.eup %16372  ;;  %v20590_v30 = vadd.f32 %v16369_v54, %v8916_v31  ;;  %v8919_v2 = vmul.f32 %v16371_v7, %v20110_v60  ;;  %16386 = vpow2.f32 %v8856_v46  ;;  %v8877_v40 = vsub.f32 %v8795_v8, %v20575_v44  ;;  %15092 = vmatmul.mubr.msk.f32.gmra.mrb[254].mxu0 %vm2251_vm2, %v16365_v32 }
 0xdf1   : > { %v16375_v45 = vpop.eup %16374  ;;  %v8854_v58 = vmul.f32 1.442695, %v8826_v13  ;;  %v8902_v47 = vmul.f32 1.442695, %v8874_v22  ;;  %v8860_v57 = vmul.f32 1.442695, %v8829_v25  ;;  %16388 = vpow2.f32 %v8904_v41 }
 0xdf2   : > { %15715 = vmatpush3.bf16.msra.mxu0 %v22271_v23  ;;  %v16377_v38 = vpop.eup %16376  ;;  %v20596_v43 = vadd.f32 %v16373_v17, %v8919_v2  ;;  %v8918_v20 = vmul.f32 %v16375_v45, %v20117_v28  ;;  %v8790_v63 = vadd.f32 %v8789_v42, %v8634_v27  ;;  %15068 = vmatprep.mubr.msk.f32.mxu1 %vm2251_vm2, %v16375_v45  ;;  %v8908_v60 = vmul.f32 1.442695, %v8877_v40 }
 0xdf3   : > { %15717 = vmatprep.subr.bf16.mxu0 %v22272_v9  ;;  %16390 = vpow2.f32 %v8854_v58  ;;  %15094 = vmatprep.mubr.msk.f32.mxu0 %vm2251_vm2, %v16377_v38  ;;  %v15950_v58 = vld [vmem:[%s17055_s18 + $0x1e0] sm:$0xff]  }
 0xdf4   : > { %15069 = vmatmul.mubr.msk.f32.gmra.mrb[0].mxu1 %vm2251_vm2, %v16371_v7  ;;  %v20603_v62 = vadd.f32 %v16377_v38, %v8918_v20  ;;  %16392 = vpow2.f32 %v8902_v47  ;;  %v20606_v23 = vmax.f32 %v20120_v52, %v8790_v63  ;;  %15095 = vmatmul.mubr.msk.f32.gmra.mrb[0].mxu0 %vm2251_vm2, %v16373_v17  ;;  %v15951_v47 = vld [vmem:[%s17055_s18 + $0x1e8] sm:$0xff]   ;;  %v15953_v38 = vld [vmem:[%s17055_s18 + $0x1f8] sm:$0xff]   ;;  %v23033_v20 = vld [vmem:[#allocation111_spill] sm:$0xff] }
 0xdf5   : > { %v16379_v28 = vpop.eup %16378  ;;  %16394 = vpow2.f32 %v8860_v57  ;;  %v15952_v57 = vld [vmem:[%s17055_s18 + $0x1f0] sm:$0xff]   ;;  %9732 = vrot.lane.b32.xlu1 %v23033_v20, %s16755_s22 }
 0xdf6   : > { %15719 = vmatpush3.bf16.msra.mxu0 %v22272_v9  ;;  %v16381_v42 = vpop.eup %16380  ;;  %v8921_v8 = vmul.f32 %v16379_v28, %v20129_v59  ;;  %v8828_v32 = vsub.f32 %v20120_v52, %v20606_v23  ;;  %v8876_v18 = vsub.f32 %v8790_v63, %v20606_v23  ;;  %16396 = vpow2.f32 %v8908_v60  ;;  %v23034_v63 = vld [vmem:[#allocation104_spill] sm:$0xff]  ;;  %v23035_v60 = vld [vmem:[#allocation122_spill] sm:$0xff] }
 0xdf7   : > { %15721 = vmatprep.subr.bf16.mxu0 %v22373_v10  ;;  %v16383_v4 = vpop.eup %16382  ;;  %9730 = vrot.lane.b32.xlu0 %v23034_v63, %s16755_s22 }
 0xdf8   : > { %v16385_v21 = vpop.eup %16384  ;;  %v20615_v1 = vadd.f32 %v16381_v42, %v8921_v8  ;;  %v8920_v54 = vmul.f32 %v16383_v4, %v20135_v33  ;;  %v8858_v31 = vmul.f32 1.442695, %v8828_v32  ;;  %v8906_v46 = vmul.f32 1.442695, %v8876_v18  ;;  %15071 = vmatprep.mubr.msk.f32.mxu1 %vm2251_vm2, %v16383_v4  ;;  %v23038_v8 = vld [vmem:[#allocation105_spill] sm:$0xff]  ;;  %v23039_v32 = vld [vmem:[#allocation124_spill] sm:$0xff] }
 0xdf9   : > { %15097 = vmatprep.mubr.msk.f32.mxu0 %vm2251_vm2, %v16385_v21  ;;  %15072 = vmatmul.mubr.msk.f32.gmra.mrb[2].mxu1 %vm2251_vm2, %v16379_v28  ;;  %v23036_v28 = vld [vmem:[#allocation128_spill] sm:$0xff]  ;;  %v23040_v18 = vld [vmem:[#allocation126_spill] sm:$0xff]  ;;  %v23041_v4 = vld [vmem:[#allocation7_spill] sm:$0xff] }
 0xdfa   : > { %v16387_v9 = vpop.eup %16386  ;;  %v20621_v52 = vadd.f32 %v16385_v21, %v8920_v54  ;;  %16398 = vpow2.f32 %v8858_v31  ;;  %15098 = vmatmul.mubr.msk.f32.gmra.mrb[2].mxu0 %vm2251_vm2, %v16381_v42  ;;  %9736 = vrot.lane.b32.xlu1 %v23035_v60, %s16755_s22  ;;  %v23037_v42 = vld [vmem:[#allocation129_spill] sm:$0xff]  ;;  %v23042_v21 = vld [vmem:[#allocation127_spill] sm:$0xff]  ;;  %v23043_v54 = vld [vmem:[#allocation132_spill] sm:$0xff] }
 0xdfb   : > { %v8923_v59 = vmul.f32 %v16387_v9, %v20141_v50  ;;  %16400 = vpow2.f32 %v8906_v46  ;;  %15723 = vmatpush3.bf16.msra.mxu0 %v22373_v10  ;;  %v16389_v33 = vpop.eup %16388  ;;  %9734 = vrot.lane.b32.xlu0 %v23036_v28, %s16755_s22  ;;  %v23044_v31 = vld [vmem:[#allocation125_spill] sm:$0xff]  ;;  %v23045_v46 = vld [vmem:[#allocation116_spill] sm:$0xff]  ;;  %v23054_v60 = vld [vmem:[#allocation3_spill] sm:$0xff] }
 0xdfc   : > { %15725 = vmatprep.subr.bf16.mxu0 %v22277_v34 }
 0xdfd   : > { %v16391_v7 = vpop.eup %16390  ;;  %v20627_v41 = vadd.f32 %v16389_v33, %v8923_v59  ;;  %v23047_v59 = vld [vmem:[#allocation133_spill] sm:$0xff] }
 0xdfe   : > { %v16393_v13 = vpop.eup %16392  ;;  %v8922_v22 = vmul.f32 %v16391_v7, %v20147_v15  ;;  %15074 = vmatprep.mubr.msk.f32.mxu1 %vm2251_vm2, %v16391_v7  ;;  %v15946_v15 = vld [vmem:[%s17055_s18 + $0x1c0] sm:$0xff]   ;;  %9740 = vrot.lane.b32.xlu1 %v23037_v42, %s16755_s22  ;;  %v23055_v42 = vld [vmem:[#allocation134_spill] sm:$0xff] }
 0xdff   : > { %v16395_v25 = vpop.eup %16394  ;;  %15100 = vmatprep.mubr.msk.f32.mxu0 %vm2251_vm2, %v16393_v13  ;;  %15075 = vmatmul.mubr.msk.f32.gmra.mrb[4].mxu1 %vm2251_vm2, %v16387_v9  ;;  %v23046_v9 = vld [vmem:[#allocation131_spill] sm:$0xff] }
 0xe00   : > { %v20633_v50 = vadd.f32 %v16393_v13, %v8922_v22  ;;  %v8925_v10 = vmul.f32 %v16395_v25, %v20152_v53  ;;  %15101 = vmatmul.mubr.msk.f32.gmra.mrb[4].mxu0 %vm2251_vm2, %v16389_v33  ;;  %v16397_v27 = vpop.eup %16396  ;;  %9738 = vrot.lane.b32.xlu0 %v23038_v8, %s16755_s22  ;;  %v23048_v33 = vld [vmem:[#allocation121_spill] sm:$0xff]  ;;  %v23049_v13 = vld [vmem:[#allocation118_spill] sm:$0xff] }
 0xe01   : > { %15727 = vmatpush3.bf16.msra.mxu0 %v22277_v34  ;;  %v15947_v34 = vld [vmem:[%s17055_s18 + $0x1c8] sm:$0xff]  }
 0xe02   : > { %v20638_v17 = vadd.f32 %v16397_v27, %v8925_v10  ;;  %15729 = vmatprep.subr.bf16.mxu0 %v22278_v14  ;;  %9744 = vrot.lane.b32.xlu1 %v23039_v32, %s16755_s22 }
 0xe04   : > { %v16399_v2 = vpop.eup %16398  ;;  %9742 = vrot.lane.b32.xlu0 %v23040_v18, %s16755_s22  ;;  %v23056_v18 = vld [vmem:[#allocation99_spill] sm:$0xff] }
 0xe05   : > { %v16401_v40 = vpop.eup %16400  ;;  %v8924_v45 = vmul.f32 %v16399_v2, %v20162_v35  ;;  %15077 = vmatprep.mubr.msk.f32.mxu1 %vm2251_vm2, %v16399_v2  ;;  %15731 = vmatpush3.bf16.msra.mxu0 %v22278_v14  ;;  %v15948_v35 = vld [vmem:[%s17055_s18 + $0x1d0] sm:$0xff]   ;;  %v15949_v14 = vld [vmem:[%s17055_s18 + $0x1d8] sm:$0xff]  }
 0xe06   : > { %15103 = vmatprep.mubr.msk.f32.mxu0 %vm2251_vm2, %v16401_v40  ;;  %15078 = vmatmul.mubr.msk.f32.gmra.mrb[6].mxu1 %vm2251_vm2, %v16395_v25  ;;  %v23051_v2 = vld [vmem:[#allocation137_spill] sm:$0xff] }
 0xe07   : > { %v20648_v53 = vadd.f32 %v16401_v40, %v8924_v45  ;;  %15104 = vmatmul.mubr.msk.f32.gmra.mrb[6].mxu0 %vm2251_vm2, %v16397_v27  ;;  %15110 = vmatprep.mubr.msk.bf16.mxu1 %vm1212_vm0, %v15946_v15  ;;  %v23050_v27 = vld [vmem:[#allocation112_spill] sm:$0xff] }
 0xe08   : > { %15208 = vmatprep.subr.msk.mxu0 %vm2300_vm1, %v20377_v51  ;;  %9748 = vrot.lane.b32.xlu1 %v23041_v4, %s16755_s22 }
 0xe09   : > { %9746 = vrot.lane.b32.xlu0 %v23042_v21, %s16755_s22 }
 0xe0a   : > { %15111 = vmatmul.mubr.msk.bf16.vlgmr.msra.gmra.mrb[8].mxu1 %vm1212_vm0, %v15947_v34  ;;  %v23052_v34 = vld [vmem:[#allocation5_spill] sm:$0xff] }
 0xe0b   : > { %15114 = vmatprep.mubr.msk.bf16.mxu1 %vm1212_vm0, %v15948_v35  ;;  %15183 = vmatpush3.msk.msra.mxu1 %vm2300_vm1, %v20377_v51 }
 0xe0c   : > { %15234 = vmatprep.subr.msk.mxu1 %vm2300_vm1, %v20377_v51  ;;  %9752 = vrot.lane.b32.xlu1 %v23043_v54, %s16755_s22 }
 0xe0d   : > { %9750 = vrot.lane.b32.xlu0 %v23044_v31, %s16755_s22  ;;  %v23057_v31 = vld [vmem:[#allocation110_spill] sm:$0xff] }
 0xe10   : > { %9756 = vrot.lane.b32.xlu1 %v23045_v46, %s16755_s22 }
 0xe11   : > { %9754 = vrot.lane.b32.xlu0 %v23046_v9, %s16755_s22 }
 0xe12   : > { %15115 = vmatmul.mubr.msk.bf16.gmra.mrb[12].mxu1 %vm1212_vm0, %v15949_v14 }
 0xe13   : > { %15118 = vmatprep.mubr.msk.bf16.mxu1 %vm1212_vm0, %v15950_v58 }
 0xe14   : > { %9760 = vrot.lane.b32.xlu1 %v23047_v59, %s16755_s22 }
 0xe15   : > { %9758 = vrot.lane.b32.xlu0 %v23048_v33, %s16755_s22 }
 0xe1a   : > { %15119 = vmatmul.mubr.msk.bf16.gmra.mrb[16].mxu1 %vm1212_vm0, %v15951_v47  ;;  %v23053_v47 = vld [vmem:[#allocation109_spill] sm:$0xff] }
 0xe1b   : > { %15122 = vmatprep.mubr.msk.bf16.mxu1 %vm1212_vm0, %v15952_v57 }
 0xe22   : > { %15123 = vmatmul.mubr.msk.bf16.gmra.mrb[20].mxu1 %vm1212_vm0, %v15953_v38 }
 0xeb6   : > { %v15058_v7 = vpop.f32.mrb[248].mxu1 }
 0xeb7   : > { %v9409_v22 = vmul.f32 %v15058_v7, %v23049_v13  ;;  %v15084_v25 = vpop.f32.mrb[248].mxu0  ;;  %v9136_v10 = vpop.f32.mrb[249].mxu1  ;;  %v23058_v7 = vld [vmem:[#allocation101_spill] sm:$0xff] }
 0xeb8   : > { %v9425_v15 = vmul.f32 %v15084_v25, %v23050_v27  ;;  %v9408_v40 = vmul.f32 %v9136_v10, %v23051_v2  ;;  %v9329_v45 = vpop.f32.mrb[249].mxu0  ;;  %v23060_v27 = vld [vmem:[#allocation102_spill] sm:$0xff] }
 0xeb9   : > { %v9424_v35 = vmul.f32 %v9329_v45, %v23052_v34  ;;  %v23061_v45 = vld [vmem:[#allocation98_spill] sm:$0xff] }
 0xeba   : > { %v20691_v58 = vadd.f32 %v9425_v15, %v9409_v22  ;;  %v23059_v22 = vld [vmem:[#allocation135_spill] sm:$0xff] }
 0xebb   : > { %v15061_v14 = vpop.f32.mrb[250].mxu1  ;;  %v15087_v38 = vpop.f32.mrb[250].mxu0  ;;  %v20694_v63 = vadd.f32 %v9424_v35, %v9408_v40 }
 0xebc   : > { %v9411_v57 = vmul.f32 %v15061_v14, %v23053_v47  ;;  %v9146_v20 = vpop.f32.mrb[251].mxu1  ;;  %v9427_v28 = vmul.f32 %v15087_v38, %v23054_v60  ;;  %v9339_v32 = vpop.f32.mrb[251].mxu0 }
 0xebd   : > { %v9410_v8 = vmul.f32 %v9146_v20, %v23055_v42  ;;  %v9426_v4 = vmul.f32 %v9339_v32, %v23056_v18  ;;  %v23064_v20 = vld [vmem:[#allocation136_spill] sm:$0xff]  ;;  %v23065_v42 = vld [vmem:[#allocation139_spill] sm:$0xff] }
 0xebe   : > { %v20699_v54 = vadd.f32 %v9427_v28, %v9411_v57  ;;  %v23063_v57 = vld [vmem:[#allocation114_spill] sm:$0xff] }
 0xebf   : > { %v15064_v21 = vpop.f32.mrb[252].mxu1  ;;  %v15090_v9 = vpop.f32.mrb[252].mxu0  ;;  %v20702_v33 = vadd.f32 %v9426_v4, %v9410_v8  ;;  %v23067_v4 = vld [vmem:[#allocation96_spill] sm:$0xff] }
 0xec0   : > { %v9413_v46 = vmul.f32 %v15064_v21, %v23057_v31  ;;  %v9156_v59 = vpop.f32.mrb[253].mxu1  ;;  %v9429_v13 = vmul.f32 %v15090_v9, %v23058_v7  ;;  %v9349_v10 = vpop.f32.mrb[253].mxu0 }
 0xec1   : > { %v9412_v25 = vmul.f32 %v9156_v59, %v23059_v22  ;;  %v9428_v15 = vmul.f32 %v9349_v10, %v23060_v27  ;;  %v23069_v59 = vld [vmem:[#allocation130_spill] sm:$0xff]  ;;  %v23071_v10 = vld [vmem:[#allocation123_spill] sm:$0xff] }
 0xec2   : > { %v20707_v40 = vadd.f32 %v9429_v13, %v9413_v46  ;;  %v23070_v13 = vld [vmem:[#allocation9_spill] sm:$0xff] }
 0xec3   : > { %v15067_v2 = vpop.f32.mrb[254].mxu1  ;;  %v15093_v35 = vpop.f32.mrb[254].mxu0  ;;  %v20710_v47 = vadd.f32 %v9428_v15, %v9412_v25 }
 0xec4   : > { %v9415_v34 = vmul.f32 %v15067_v2, %v23061_v45  ;;  %v9166_v14 = vpop.f32.mrb[255].mxu1  ;;  %v9431_v38 = vmul.f32 %v15093_v35, %v23063_v57  ;;  %v9359_v28 = vpop.f32.mrb[255].mxu0 }
 0xec5   : > { %23062 = vst [vmem:[#allocation113_spill] sm:$0xff] %v20710_v47  ;;  %v9414_v60 = vmul.f32 %v9166_v14, %v23064_v20  ;;  %v9430_v8 = vmul.f32 %v9359_v28, %v23065_v42 }
 0xec6   : > { %v20715_v18 = vadd.f32 %v9431_v38, %v9415_v34  ;;  %v23074_v34 = vld [vmem:[#allocation108_spill] sm:$0xff]  ;;  %v23075_v38 = vld [vmem:[#allocation115_spill] sm:$0xff] }
 0xec7   : > { %v15070_v32 = vpop.f32.mrb[0].mxu1  ;;  %v15096_v31 = vpop.f32.mrb[0].mxu0  ;;  %v20718_v9 = vadd.f32 %v9430_v8, %v9414_v60  ;;  %v23076_v60 = vld [vmem:[#allocation119_spill] sm:$0xff]  ;;  %v23077_v8 = vld [vmem:[#allocation140_spill] sm:$0xff] }
 0xec8   : > { %23066 = vst [vmem:[#allocation111_spill] sm:$0xff] %v20715_v18  ;;  %v9417_v21 = vmul.f32 %v15070_v32, %v23067_v4  ;;  %v9176_v46 = vpop.f32.mrb[1].mxu1  ;;  %v9433_v7 = vmul.f32 %v15096_v31, %v23069_v59  ;;  %v9369_v25 = vpop.f32.mrb[1].mxu0 }
 0xec9   : > { %23068 = vst [vmem:[#allocation104_spill] sm:$0xff] %v20718_v9  ;;  %v9416_v22 = vmul.f32 %v9176_v46, %v23070_v13  ;;  %v9432_v27 = vmul.f32 %v9369_v25, %v23071_v10  ;;  %v23080_v46 = vld [vmem:[#allocation117_spill] sm:$0xff]  ;;  %v23081_v25 = vld [vmem:[#allocation120_spill] sm:$0xff] }
 0xeca   : > { %v20723_v15 = vadd.f32 %v9433_v7, %v9417_v21 }
 0xecb   : > { %v20725_v2 = vadd.f32 %v9432_v27, %v9416_v22 }
 0xecc   : > { %23072 = vst [vmem:[#allocation122_spill] sm:$0xff] %v20723_v15  ;;  %v15073_v45 = vpop.f32.mrb[2].mxu1  ;;  %v23114_v15 = vld [vmem:[#allocation53_spill] sm:$0xff] }
 0xecd   : > { %23073 = vst [vmem:[#allocation128_spill] sm:$0xff] %v20725_v2  ;;  %v9419_v35 = vmul.f32 %v15073_v45, %v23074_v34  ;;  %v15099_v14 = vpop.f32.mrb[2].mxu0  ;;  %v9186_v57 = vpop.f32.mrb[3].mxu1  ;;  %v23082_v45 = vld [vmem:[#allocation4_spill] sm:$0xff] }
 0xece   : > { %v9435_v20 = vmul.f32 %v15099_v14, %v23075_v38  ;;  %v9418_v28 = vmul.f32 %v9186_v57, %v23076_v60  ;;  %v9379_v42 = vpop.f32.mrb[3].mxu0  ;;  %v23085_v38 = vld [vmem:[#allocation10_spill] sm:$0xff] }
 0xecf   : > { %v9434_v32 = vmul.f32 %v9379_v42, %v23077_v8  ;;  %v23086_v42 = vld [vmem:[#allocation24_spill] sm:$0xff] }
 0xed0   : > { %v20731_v4 = vadd.f32 %v9435_v20, %v9419_v35  ;;  %v20745_v8 = vsub.s32 7, %v23086_v42 }
 0xed1   : > { %v20733_v31 = vadd.f32 %v9434_v32, %v9418_v28  ;;  %v23088_v32 = vld [vmem:[#allocation97_spill] sm:$0xff] }
 0xed2   : > { %23078 = vst [vmem:[#allocation129_spill] sm:$0xff] %v20731_v4  ;;  %v15076_v21 = vpop.f32.mrb[4].mxu1  ;;  %23087 = vst [vmem:[#allocation7_spill] sm:$0xff] %v20745_v8 }
 0xed3   : > { %23079 = vst [vmem:[#allocation105_spill] sm:$0xff] %v20733_v31  ;;  %v9421_v59 = vmul.f32 %v15076_v21, %v23080_v46  ;;  %v15102_v7 = vpop.f32.mrb[4].mxu0  ;;  %v9196_v13 = vpop.f32.mrb[5].mxu1 }
 0xed4   : > { %v9437_v22 = vmul.f32 %v15102_v7, %v20446_v56  ;;  %v9420_v10 = vmul.f32 %v9196_v13, %v23081_v25  ;;  %v9389_v27 = vpop.f32.mrb[5].mxu0  ;;  %v23089_v56 = vld [vmem:[#allocation141_spill] sm:$0xff]  ;;  %v23090_v13 = vld [vmem:[#allocation95_spill] sm:$0xff] }
 0xed5   : > { %v9436_v34 = vmul.f32 %v9389_v27, %v23082_v45 }
 0xed6   : > { %v20739_v14 = vadd.f32 %v9437_v22, %v9421_v59  ;;  %v23091_v59 = vld [vmem:[#allocation33_spill] sm:$0xff] }
 0xed7   : > { %v20741_v57 = vadd.f32 %v9436_v34, %v9420_v10  ;;  %v9645_v22 = vrot.slane %v23091_v59, %v20745_v8  ;;  %v23092_v10 = vld [vmem:[#allocation31_spill] sm:$0xff]  ;;  %v23093_v34 = vld [vmem:[#allocation32_spill] sm:$0xff] }
 0xed8   : > { %23083 = vst [vmem:[#allocation124_spill] sm:$0xff] %v20739_v14  ;;  %v10078_v27 = vrot.slane %v23092_v10, %v20745_v8  ;;  %v23097_v59 = vld [vmem:[#allocation39_spill] sm:$0xff] }
 0xed9   : > { %23084 = vst [vmem:[#allocation126_spill] sm:$0xff] %v20741_v57  ;;  %v15079_v35 = vpop.f32.mrb[6].mxu1  ;;  %v10082_v57 = vrot.slane %v23097_v59, %v20745_v8 }
 0xeda   : > { %v9423_v20 = vmul.f32 %v15079_v35, %v23085_v38  ;;  %v15105_v60 = vpop.f32.mrb[6].mxu0  ;;  %v9206_v28 = vpop.f32.mrb[7].mxu1  ;;  %v9637_v35 = vrot.slane %v23093_v34, %v20745_v8  ;;  %v23094_v38 = vld [vmem:[#allocation35_spill] sm:$0xff] }
 0xedb   : > { %v9439_v21 = vmul.f32 %v15105_v60, %v23088_v32  ;;  %v9422_v46 = vmul.f32 %v9206_v28, %v23089_v56  ;;  %v9399_v7 = vpop.f32.mrb[7].mxu0  ;;  %v10070_v42 = vrot.slane %v23094_v38, %v20745_v8  ;;  %v23095_v60 = vld [vmem:[#allocation37_spill] sm:$0xff]  ;;  %v23099_v38 = vld [vmem:[#allocation36_spill] sm:$0xff] }
 0xedc   : > { %v9438_v25 = vmul.f32 %v9399_v7, %v23090_v13  ;;  %v9649_v32 = vrot.slane %v23095_v60, %v20745_v8  ;;  %v9641_v4 = vrot.slane %v23099_v38, %v20745_v8  ;;  %v23100_v60 = vld [vmem:[#allocation38_spill] sm:$0xff] }
 0xedd   : > { %v15112_v45 = vpop.f32.mrb[8].mxu1  ;;  %v20760_v28 = vadd.f32 %v9439_v21, %v9423_v20  ;;  %v10074_v20 = vrot.slane %v23100_v60, %v20745_v8 }
 0xede   : > { %v9700_v56 = vadd.f32 %v15112_v45, %v9645_v22  ;;  %v20762_v7 = vadd.f32 %v15112_v45, %v10078_v27  ;;  %v9571_v13 = vpop.f32.mrb[9].mxu1  ;;  %v20766_v10 = vadd.f32 %v9438_v25, %v9422_v46  ;;  %v23101_v45 = vld [vmem:[#allocation41_spill] sm:$0xff]  ;;  %v23102_v46 = vld [vmem:[#allocation42_spill] sm:$0xff] }
 0xedf   : > { %23096 = vst [vmem:[#allocation127_spill] sm:$0xff] %v20760_v28  ;;  %v9698_v14 = vadd.f32 %v9637_v35, %v9571_v13  ;;  %v20768_v31 = vadd.f32 %v10070_v42, %v9571_v13  ;;  %v15113_v34 = vpop.f32.mrb[10].mxu1  ;;  %v23103_v35 = vld [vmem:[#allocation50_spill] sm:$0xff]  ;;  %v23104_v13 = vld [vmem:[#allocation45_spill] sm:$0xff] }
 0xee0   : > { %23098 = vst [vmem:[#allocation132_spill] sm:$0xff] %v20766_v10  ;;  %v9701_v21 = vadd.f32 %v15113_v34, %v9649_v32  ;;  %v20774_v22 = vadd.f32 %v15113_v34, %v10082_v57  ;;  %v9574_v27 = vpop.f32.mrb[11].mxu1  ;;  %v9716_v42 = vmul.f32 %v9700_v56, %v23103_v35  ;;  %v9661_v38 = vrot.slane %v23104_v13, %v20745_v8  ;;  %v23105_v10 = vld [vmem:[#allocation46_spill] sm:$0xff]  ;;  %v23106_v57 = vld [vmem:[#allocation43_spill] sm:$0xff] }
 0xee1   : > { %v9714_v28 = vmul.f32 %v9698_v14, %v23101_v45  ;;  %v9699_v2 = vadd.f32 %v9641_v4, %v9574_v27  ;;  %v20777_v59 = vadd.f32 %v10074_v20, %v9574_v27  ;;  %v10094_v60 = vrot.slane %v23105_v10, %v20745_v8  ;;  %v23107_v4 = vld [vmem:[#allocation48_spill] sm:$0xff]  ;;  %v23108_v20 = vld [vmem:[#allocation47_spill] sm:$0xff] }
 0xee2   : > { %v9653_v34 = vrot.slane %v23106_v57, %v20745_v8  ;;  %v10086_v14 = vrot.slane %v23107_v4, %v20745_v8  ;;  %v23111_v10 = vld [vmem:[#allocation44_spill] sm:$0xff]  ;;  %v23112_v35 = vld [vmem:[#allocation51_spill] sm:$0xff] }
 0xee3   : > { %v9715_v25 = vmul.f32 %v9699_v2, %v23102_v46  ;;  %15158 = vmatprep.mubr.f32.mxu0 %v9714_v28  ;;  %v9665_v2 = vrot.slane %v23108_v20, %v20745_v8  ;;  %v23109_v28 = vld [vmem:[#allocation49_spill] sm:$0xff]  ;;  %v9717_v13 = vmul.f32 %v9701_v21, %v23112_v35  ;;  %v23121_v35 = vld [vmem:[#allocation55_spill] sm:$0xff] }
 0xee4   : > { %v10098_v56 = vrot.slane %v23109_v28, %v20745_v8  ;;  %v10090_v28 = vrot.slane %v23114_v15, %v20745_v8  ;;  %v23118_v21 = vld [vmem:[#allocation61_spill] sm:$0xff] }
 0xee5   : > { %v15116_v32 = vpop.f32.mrb[12].mxu1  ;;  %15159 = vmatmul.mubr.f32.vlgmr.msra.gmra.mrb[8].mxu0 %v9715_v25  ;;  %v9657_v25 = vrot.slane %v23111_v10, %v20745_v8  ;;  %v23120_v15 = vld [vmem:[#allocation57_spill] sm:$0xff] }
 0xee6   : > { %v9704_v27 = vadd.f32 %v15116_v32, %v9661_v38  ;;  %v20793_v45 = vadd.f32 %v15116_v32, %v10094_v60  ;;  %v9587_v46 = vpop.f32.mrb[13].mxu1  ;;  %15161 = vmatprep.mubr.f32.mxu0 %v9716_v42  ;;  %15209 = vmatpush3.msk.msra.mxu0 %vm2300_vm1, %v20377_v51  ;;  %v23116_v42 = vld [vmem:[#allocation52_spill] sm:$0xff]  ;;  %v23117_v51 = vld [vmem:[#allocation54_spill] sm:$0xff] }
 0xee7   : > { %v9702_v57 = vadd.f32 %v9653_v34, %v9587_v46  ;;  %v20800_v4 = vadd.f32 %v10086_v14, %v9587_v46  ;;  %v15117_v20 = vpop.f32.mrb[14].mxu1  ;;  %v23119_v14 = vld [vmem:[#allocation56_spill] sm:$0xff] }
 0xee8   : > { %23110 = vst [vmem:[#allocation125_spill] sm:$0xff] %v20793_v45  ;;  %v9705_v38 = vadd.f32 %v15117_v20, %v9665_v2  ;;  %v20804_v60 = vadd.f32 %v15117_v20, %v10098_v56  ;;  %v9590_v32 = vpop.f32.mrb[15].mxu1  ;;  %v9720_v34 = vmul.f32 %v9704_v27, %v23118_v21  ;;  %v9677_v46 = vrot.slane %v23119_v14, %v20745_v8  ;;  %v23127_v21 = vld [vmem:[#allocation66_spill] sm:$0xff] }
 0xee9   : > { %23113 = vst [vmem:[#allocation116_spill] sm:$0xff] %v20800_v4  ;;  %v9718_v45 = vmul.f32 %v9702_v57, %v23116_v42  ;;  %v9703_v9 = vadd.f32 %v9657_v25, %v9590_v32  ;;  %v20807_v10 = vadd.f32 %v10090_v28, %v9590_v32  ;;  %15162 = vmatmul.mubr.f32.gmra.mrb[10].mxu0 %v9717_v13  ;;  %v23122_v25 = vld [vmem:[#allocation59_spill] sm:$0xff]  ;;  %v23123_v13 = vld [vmem:[#allocation58_spill] sm:$0xff]  ;;  %v23125_v32 = vld [vmem:[#allocation60_spill] sm:$0xff] }
 0xeea   : > { %23115 = vst [vmem:[#allocation131_spill] sm:$0xff] %v20804_v60  ;;  %v10110_v2 = vrot.slane %v23120_v15, %v20745_v8  ;;  %v9669_v57 = vrot.slane %v23121_v35, %v20745_v8  ;;  %v10102_v20 = vrot.slane %v23122_v25, %v20745_v8  ;;  %v10114_v42 = vrot.slane %v23125_v32, %v20745_v8  ;;  %v23129_v60 = vld [vmem:[#allocation65_spill] sm:$0xff] }
 0xeeb   : > { %v9719_v18 = vmul.f32 %v9703_v9, %v23117_v51  ;;  %15164 = vmatprep.mubr.f32.mxu0 %v9718_v45  ;;  %v9681_v9 = vrot.slane %v23123_v13, %v20745_v8  ;;  %v23126_v51 = vld [vmem:[#allocation62_spill] sm:$0xff]  ;;  %v9721_v14 = vmul.f32 %v9705_v38, %v23127_v21  ;;  %v10106_v13 = vrot.slane %v23129_v60, %v20745_v8  ;;  %v23136_v60 = vld [vmem:[#allocation69_spill] sm:$0xff]  ;;  %v23137_v21 = vld [vmem:[#allocation40_spill] sm:$0xff] }
 0xeec   : > { %v23134_v38 = vld [vmem:[#allocation70_spill] sm:$0xff] }
 0xeed   : > { %v15120_v56 = vpop.f32.mrb[16].mxu1  ;;  %15165 = vmatmul.mubr.f32.gmra.mrb[12].mxu0 %v9719_v18  ;;  %v9673_v18 = vrot.slane %v23126_v51, %v20745_v8  ;;  %v23133_v51 = vld [vmem:[#allocation68_spill] sm:$0xff] }
 0xeee   : > { %v9708_v45 = vadd.f32 %v15120_v56, %v9677_v46  ;;  %v20821_v28 = vadd.f32 %v15120_v56, %v10110_v2  ;;  %v9603_v27 = vpop.f32.mrb[17].mxu1  ;;  %15167 = vmatprep.mubr.f32.mxu0 %v9720_v34  ;;  %v23131_v34 = vld [vmem:[#allocation67_spill] sm:$0xff] }
 0xeef   : > { %v9706_v15 = vadd.f32 %v9669_v57, %v9603_v27  ;;  %v20828_v35 = vadd.f32 %v10102_v20, %v9603_v27  ;;  %v15121_v25 = vpop.f32.mrb[18].mxu1  ;;  %v23135_v20 = vld [vmem:[#allocation64_spill] sm:$0xff] }
 0xef0   : > { %23124 = vst [vmem:[#allocation133_spill] sm:$0xff] %v20821_v28  ;;  %v9709_v46 = vadd.f32 %v15121_v25, %v9681_v9  ;;  %v20832_v2 = vadd.f32 %v15121_v25, %v10114_v42  ;;  %v9606_v56 = vpop.f32.mrb[19].mxu1  ;;  %v9724_v57 = vmul.f32 %v9708_v45, %v23134_v38  ;;  %v9693_v27 = vrot.slane %v23135_v20, %v20745_v8  ;;  %v23143_v38 = vld [vmem:[#allocation76_spill] sm:$0xff] }
 0xef1   : > { %23128 = vst [vmem:[#allocation121_spill] sm:$0xff] %v20828_v35  ;;  %v9722_v28 = vmul.f32 %v9706_v15, %v23131_v34  ;;  %v9707_v4 = vadd.f32 %v9673_v18, %v9606_v56  ;;  %v20835_v32 = vadd.f32 %v10106_v13, %v9606_v56  ;;  %15168 = vmatmul.mubr.f32.gmra.mrb[14].mxu0 %v9721_v14  ;;  %v23138_v18 = vld [vmem:[#allocation71_spill] sm:$0xff]  ;;  %v23139_v14 = vld [vmem:[#allocation72_spill] sm:$0xff]  ;;  %v23141_v56 = vld [vmem:[#allocation73_spill] sm:$0xff] }
 0xef2   : > { %23130 = vst [vmem:[#allocation118_spill] sm:$0xff] %v20832_v2  ;;  %v10126_v9 = vrot.slane %v23136_v60, %v20745_v8  ;;  %v9685_v15 = vrot.slane %v23137_v21, %v20745_v8  ;;  %v10118_v25 = vrot.slane %v23138_v18, %v20745_v8  ;;  %v10130_v34 = vrot.slane %v23141_v56, %v20745_v8  ;;  %v23145_v2 = vld [vmem:[#allocation74_spill] sm:$0xff] }
 0xef3   : > { %23132 = vst [vmem:[#allocation112_spill] sm:$0xff] %v20835_v32  ;;  %v9723_v47 = vmul.f32 %v9707_v4, %v23133_v51  ;;  %15170 = vmatprep.mubr.f32.mxu0 %v9722_v28  ;;  %v9697_v4 = vrot.slane %v23139_v14, %v20745_v8  ;;  %v23142_v51 = vld [vmem:[#allocation63_spill] sm:$0xff]  ;;  %v9725_v20 = vmul.f32 %v9709_v46, %v23143_v38  ;;  %v23150_v46 = vld [vmem:[#allocation78_spill] sm:$0xff] }
 0xef4   : > { %v10122_v14 = vrot.slane %v23145_v2, %v20745_v8  ;;  %v9733_v2 = vpop.permute.xlu1 %9732 }
 0xef5   : > { %v15124_v42 = vpop.f32.mrb[20].mxu1  ;;  %15171 = vmatmul.mubr.f32.gmra.mrb[16].mxu0 %v9723_v47  ;;  %v9689_v47 = vrot.slane %v23142_v51, %v20745_v8  ;;  %v23149_v51 = vld [vmem:[#allocation77_spill] sm:$0xff] }
 0xef6   : > { %v9712_v28 = vadd.f32 %v15124_v42, %v9693_v27  ;;  %v20849_v13 = vadd.f32 %v15124_v42, %v10126_v9  ;;  %v9619_v45 = vpop.f32.mrb[21].mxu1  ;;  %15173 = vmatprep.mubr.f32.mxu0 %v9724_v57  ;;  %v23147_v57 = vld [vmem:[#allocation75_spill] sm:$0xff] }
 0xef7   : > { %v9710_v60 = vadd.f32 %v9685_v15, %v9619_v45  ;;  %v20856_v21 = vadd.f32 %v10118_v25, %v9619_v45  ;;  %v15125_v18 = vpop.f32.mrb[22].mxu1  ;;  %v23151_v25 = vld [vmem:[#allocation11_spill] sm:$0xff] }
 0xef8   : > { %23140 = vst [vmem:[#allocation137_spill] sm:$0xff] %v20849_v13  ;;  %v9713_v27 = vadd.f32 %v15125_v18, %v9697_v4  ;;  %v20860_v9 = vadd.f32 %v15125_v18, %v10130_v34  ;;  %v9622_v42 = vpop.f32.mrb[23].mxu1  ;;  %v9728_v15 = vmul.f32 %v9712_v28, %v23150_v46  ;;  %v9731_v4 = vpop.permute.xlu0 %9730 }
 0xef9   : > { %23144 = vst [vmem:[#allocation5_spill] sm:$0xff] %v20856_v21  ;;  %v9726_v13 = vmul.f32 %v9710_v60, %v23147_v57  ;;  %v9711_v35 = vadd.f32 %v9689_v47, %v9622_v42  ;;  %v20863_v56 = vadd.f32 %v10122_v14, %v9622_v42  ;;  %15174 = vmatmul.mubr.f32.gmra.mrb[18].mxu0 %v9725_v20  ;;  %v9737_v34 = vpop.permute.xlu1 %9736 }
 0xefa   : > { %23146 = vst [vmem:[#allocation109_spill] sm:$0xff] %v20860_v9  ;;  %v9729_v45 = vmul.f32 %v9713_v27, %v23151_v25  ;;  %v23152_v9 = vld [vmem:[#allocation103_spill] sm:$0xff] }
 0xefb   : > { %23148 = vst [vmem:[#allocation3_spill] sm:$0xff] %v20863_v56  ;;  %v9727_v32 = vmul.f32 %v9711_v35, %v23149_v51  ;;  %15176 = vmatprep.mubr.f32.mxu0 %v9726_v13 }
 0xefc   : > { %v9735_v38 = vpop.permute.xlu0 %9734 }
 0xefd   : > { %15177 = vmatmul.mubr.f32.gmra.mrb[20].mxu0 %v9727_v32  ;;  %v9741_v14 = vpop.permute.xlu1 %9740 }
 0xefe   : > { %15179 = vmatprep.mubr.f32.mxu0 %v9728_v15 }
 0xf00   : > { %v9739_v35 = vpop.permute.xlu0 %9738 }
 0xf01   : > { %15180 = vmatmul.mubr.f32.gmra.mrb[22].mxu0 %v9729_v45 }
 0xfb8   : > { %v15160_v18 = vpop.f32.mrb[8].mxu0 }
 0xfb9   : > { %v9850_v60 = vadd.f32 %v15160_v18, %v9733_v2  ;;  %v9844_v47 = vpop.f32.mrb[9].mxu0 }
 0xfba   : > { %v9845_v42 = vadd.f32 %v9844_v47, %v9731_v4  ;;  %v9745_v4 = vpop.permute.xlu1 %9744 }
 0xfbb   : > { %v9924_v20 = vmax.f32 %v20452_v49, %v9850_v60 }
 0xfbc   : > { %v9923_v13 = vmax.f32 %v20455_v24, %v9845_v42  ;;  %v15163_v28 = vpop.f32.mrb[10].mxu0 }
 0xfbd   : > { %v9940_v32 = vsub.f32 %v20452_v49, %v9924_v20  ;;  %v9988_v57 = vsub.f32 %v9850_v60, %v9924_v20  ;;  %v9860_v27 = vadd.f32 %v15163_v28, %v9737_v34  ;;  %v9854_v51 = vpop.f32.mrb[11].mxu0  ;;  %v9743_v28 = vpop.permute.xlu0 %9742 }
 0xfbe   : > { %v9939_v46 = vsub.f32 %v20455_v24, %v9923_v13  ;;  %v9987_v15 = vsub.f32 %v9845_v42, %v9923_v13  ;;  %v9855_v25 = vadd.f32 %v9854_v51, %v9735_v38 }
 0xfbf   : > { %v9957_v45 = vmul.f32 1.442695, %v9940_v32  ;;  %v10005_v2 = vmul.f32 1.442695, %v9988_v57  ;;  %v9926_v18 = vmax.f32 %v20464_v0, %v9860_v27 }
 0xfc0   : > { %v9955_v47 = vmul.f32 1.442695, %v9939_v46  ;;  %v10003_v8 = vmul.f32 1.442695, %v9987_v15  ;;  %v9925_v21 = vmax.f32 %v23152_v9, %v9855_v25  ;;  %v15166_v56 = vpop.f32.mrb[12].mxu0  ;;  %v23153_v15 = vld [vmem:[#allocation106_spill] sm:$0xff] }
 0xfc1   : > { %16402 = vpow2.f32 %v9957_v45  ;;  %v9942_v49 = vsub.f32 %v20464_v0, %v9926_v18  ;;  %v9990_v60 = vsub.f32 %v9860_v27, %v9926_v18  ;;  %v9870_v34 = vadd.f32 %v15166_v56, %v9741_v14  ;;  %v9864_v20 = vpop.f32.mrb[13].mxu0 }
 0xfc2   : > { %16404 = vpow2.f32 %v10005_v2  ;;  %v9941_v24 = vsub.f32 %v23152_v9, %v9925_v21  ;;  %v9989_v38 = vsub.f32 %v9855_v25, %v9925_v21  ;;  %v9865_v42 = vadd.f32 %v9864_v20, %v9739_v35  ;;  %v9749_v9 = vpop.permute.xlu1 %9748 }
 0xfc3   : > { %16406 = vpow2.f32 %v9955_v47  ;;  %v9961_v13 = vmul.f32 1.442695, %v9942_v49  ;;  %v10009_v32 = vmul.f32 1.442695, %v9990_v60  ;;  %v9928_v57 = vmax.f32 %v20476_v26, %v9870_v34  ;;  %v9747_v49 = vpop.permute.xlu0 %9746 }
 0xfc4   : > { %16408 = vpow2.f32 %v10003_v8  ;;  %v9959_v51 = vmul.f32 1.442695, %v9941_v24  ;;  %v10007_v46 = vmul.f32 1.442695, %v9989_v38  ;;  %v9927_v45 = vmax.f32 %v23153_v15, %v9865_v42  ;;  %v15169_v0 = vpop.f32.mrb[14].mxu0 }
 0xfc5   : > { %16410 = vpow2.f32 %v9961_v13  ;;  %v9944_v56 = vsub.f32 %v20476_v26, %v9928_v57  ;;  %v9992_v14 = vsub.f32 %v9870_v34, %v9928_v57  ;;  %v9880_v27 = vadd.f32 %v15169_v0, %v9745_v4  ;;  %v9874_v2 = vpop.f32.mrb[15].mxu0 }
 0xfc6   : > { %16412 = vpow2.f32 %v10009_v32  ;;  %v9943_v21 = vsub.f32 %v23153_v15, %v9927_v45  ;;  %v9991_v35 = vsub.f32 %v9865_v42, %v9927_v45  ;;  %v9875_v25 = vadd.f32 %v9874_v2, %v9743_v28  ;;  %v9753_v45 = vpop.permute.xlu1 %9752 }
 0xfc7   : > { %16414 = vpow2.f32 %v9959_v51  ;;  %v9965_v18 = vmul.f32 1.442695, %v9944_v56  ;;  %v10013_v8 = vmul.f32 1.442695, %v9992_v14  ;;  %v9930_v47 = vmax.f32 %v20488_v48, %v9880_v27  ;;  %v23154_v56 = vld [vmem:[#allocation6_spill] sm:$0xff] }
 0xfc8   : > { %16416 = vpow2.f32 %v10007_v46  ;;  %v9963_v60 = vmul.f32 1.442695, %v9943_v21  ;;  %v10011_v20 = vmul.f32 1.442695, %v9991_v35  ;;  %v9929_v26 = vmax.f32 %v20491_v6, %v9875_v25  ;;  %v15172_v34 = vpop.f32.mrb[16].mxu0 }
 0xfc9   : > { %16418 = vpow2.f32 %v9965_v18  ;;  %v9946_v4 = vsub.f32 %v20488_v48, %v9930_v47  ;;  %v9994_v24 = vsub.f32 %v9880_v27, %v9930_v47  ;;  %v9890_v38 = vadd.f32 %v15172_v34, %v9749_v9  ;;  %v9884_v13 = vpop.f32.mrb[17].mxu0 }
 0xfca   : > { %16420 = vpow2.f32 %v10013_v8  ;;  %v9945_v28 = vsub.f32 %v20491_v6, %v9929_v26  ;;  %v9993_v42 = vsub.f32 %v9875_v25, %v9929_v26  ;;  %v20884_v32 = vadd.f32 %v9884_v13, %v9747_v49 }
 0xfcb   : > { %v16403_v57 = vpop.eup %16402  ;;  %16422 = vpow2.f32 %v9963_v60  ;;  %v9969_v51 = vmul.f32 1.442695, %v9946_v4  ;;  %v10017_v46 = vmul.f32 1.442695, %v9994_v24  ;;  %v9932_v15 = vmax.f32 %v20500_v16, %v9890_v38  ;;  %v9751_v60 = vpop.permute.xlu0 %9750 }
 0xfcc   : > { %v16405_v0 = vpop.eup %16404  ;;  %v10036_v14 = vmul.f32 %v16403_v57, %v23154_v56  ;;  %16424 = vpow2.f32 %v10011_v20  ;;  %v9967_v48 = vmul.f32 1.442695, %v9945_v28  ;;  %v10015_v27 = vmul.f32 1.442695, %v9993_v42  ;;  %v15175_v2 = vpop.f32.mrb[18].mxu0 }
 0xfcd   : > { %v16407_v9 = vpop.eup %16406  ;;  %16426 = vpow2.f32 %v9969_v51  ;;  %v9948_v6 = vsub.f32 %v20500_v16, %v9932_v15  ;;  %v9996_v21 = vsub.f32 %v9890_v38, %v9932_v15  ;;  %v9931_v35 = vmax.f32 %v20507_v19, %v20884_v32  ;;  %v9894_v25 = vpop.f32.mrb[19].mxu0  ;;  %v16721_v38 = vld [vmem:[%s21879_s7] sm:$0xf] }
 0xfce   : > { %v16409_v18 = vpop.eup %16408  ;;  %v20891_v8 = vadd.f32 %v16405_v0, %v10036_v14  ;;  %v10035_v47 = vmul.f32 %v16407_v9, %v20517_v61  ;;  %16428 = vpow2.f32 %v10017_v46  ;;  %v20894_v49 = vadd.f32 %v15175_v2, %v9753_v45  ;;  %15184 = vmatprep.mubr.msk.f32.mxu1 %vm2251_vm2, %v16407_v9  ;;  %v9757_v51 = vpop.permute.xlu1 %9756 }
 0xfcf   : > { %v16411_v20 = vpop.eup %16410  ;;  %16430 = vpow2.f32 %v9967_v48  ;;  %v9973_v26 = vmul.f32 1.442695, %v9948_v6  ;;  %v9947_v16 = vsub.f32 %v20507_v19, %v9931_v35  ;;  %15210 = vmatprep.mubr.msk.f32.mxu0 %vm2251_vm2, %v16409_v18  ;;  %15185 = vmatmul.mubr.msk.f32.vlgmr.msra.gmra.mrb[24].mxu1 %vm2251_vm2, %v16403_v57  ;;  %v10021_v24 = vmul.f32 1.442695, %v9996_v21 }
 0xfd0   : > { %v16413_v34 = vpop.eup %16412  ;;  %v20900_v4 = vadd.f32 %v16409_v18, %v10035_v47  ;;  %v10038_v61 = vmul.f32 %v16411_v20, %v20530_v3  ;;  %15211 = vmatmul.mubr.msk.f32.vlgmr.msra.gmra.mrb[24].mxu0 %vm2251_vm2, %v16405_v0  ;;  %15235 = vmatpush3.msk.msra.mxu1 %vm2300_vm1, %v16721_v38  ;;  %v15178_v13 = vpop.f32.mrb[20].mxu0  ;;  %16432 = vpow2.f32 %v10015_v27  ;;  %v9995_v28 = vsub.f32 %v20884_v32, %v9931_v35 }
 0xfd1   : > { %v16415_v19 = vpop.eup %16414  ;;  %v9934_v42 = vmax.f32 %v20526_v36, %v20894_v49  ;;  %v9895_v57 = vadd.f32 %v9894_v25, %v9751_v60  ;;  %v9904_v3 = vpop.f32.mrb[21].mxu0  ;;  %16434 = vpow2.f32 %v9973_v26  ;;  %v9971_v56 = vmul.f32 1.442695, %v9947_v16 }
 0xfd2   : > { %v16417_v46 = vpop.eup %16416  ;;  %v20911_v15 = vadd.f32 %v16413_v34, %v10038_v61  ;;  %v10037_v45 = vmul.f32 %v16415_v19, %v20543_v11  ;;  %15187 = vmatprep.mubr.msk.f32.mxu1 %vm2251_vm2, %v16415_v19  ;;  %v9910_v9 = vadd.f32 %v15178_v13, %v9757_v51  ;;  %v9755_v11 = vpop.permute.xlu0 %9754  ;;  %16436 = vpow2.f32 %v10021_v24 }
 0xfd3   : > { %v16419_v0 = vpop.eup %16418  ;;  %v9950_v14 = vsub.f32 %v20526_v36, %v9934_v42  ;;  %v9933_v32 = vmax.f32 %v20539_v5, %v9895_v57  ;;  %15213 = vmatprep.mubr.msk.f32.mxu0 %vm2251_vm2, %v16417_v46  ;;  %15188 = vmatmul.mubr.msk.f32.gmra.mrb[26].mxu1 %vm2251_vm2, %v16411_v20  ;;  %v10019_v35 = vmul.f32 1.442695, %v9995_v28  ;;  %v9998_v36 = vsub.f32 %v20894_v49, %v9934_v42  ;;  %v9761_v61 = vpop.permute.xlu1 %9760 }
 0xfd4   : > { %v16421_v48 = vpop.eup %16420  ;;  %v20919_v27 = vadd.f32 %v16417_v46, %v10037_v45  ;;  %v10040_v2 = vmul.f32 %v16419_v0, %v20554_v55  ;;  %15214 = vmatmul.mubr.msk.f32.gmra.mrb[26].mxu0 %vm2251_vm2, %v16413_v34  ;;  %v15181_v6 = vpop.f32.mrb[22].mxu0  ;;  %16438 = vpow2.f32 %v9971_v56  ;;  %v9936_v16 = vmax.f32 %v20558_v12, %v9910_v9 }
 0xfd5   : > { %v16423_v21 = vpop.eup %16422  ;;  %v9914_v25 = vpop.f32.mrb[23].mxu0  ;;  %v9977_v20 = vmul.f32 1.442695, %v9950_v14  ;;  %v9949_v26 = vsub.f32 %v20539_v5, %v9933_v32  ;;  %v9905_v34 = vadd.f32 %v9904_v3, %v9755_v11  ;;  %v9997_v38 = vsub.f32 %v9895_v57, %v9933_v32 }
 0xfd6   : > { %v16425_v18 = vpop.eup %16424  ;;  %v20924_v47 = vadd.f32 %v16421_v48, %v10040_v2  ;;  %v10039_v60 = vmul.f32 %v16423_v21, %v20563_v39  ;;  %15190 = vmatprep.mubr.msk.f32.mxu1 %vm2251_vm2, %v16423_v21  ;;  %16440 = vpow2.f32 %v10019_v35  ;;  %v10025_v19 = vmul.f32 1.442695, %v9998_v36  ;;  %v9759_v46 = vpop.permute.xlu0 %9758 }
 0xfd7   : > { %v16427_v55 = vpop.eup %16426  ;;  %15216 = vmatprep.mubr.msk.f32.mxu0 %vm2251_vm2, %v16425_v18  ;;  %15191 = vmatmul.mubr.msk.f32.gmra.mrb[28].mxu1 %vm2251_vm2, %v16419_v0  ;;  %v9952_v5 = vsub.f32 %v20558_v12, %v9936_v16  ;;  %v9935_v28 = vmax.f32 %v20572_v29, %v9905_v34  ;;  %v9920_v3 = vadd.f32 %v15181_v6, %v9761_v61  ;;  %16442 = vpow2.f32 %v9977_v20 }
 0xfd8   : > { %v16429_v49 = vpop.eup %16428  ;;  %v20932_v24 = vadd.f32 %v16425_v18, %v10039_v60  ;;  %v10042_v39 = vmul.f32 %v16427_v55, %v20578_v37  ;;  %15217 = vmatmul.mubr.msk.f32.gmra.mrb[28].mxu0 %vm2251_vm2, %v16421_v48  ;;  %v9975_v37 = vmul.f32 1.442695, %v9949_v26  ;;  %v10000_v57 = vsub.f32 %v9910_v9, %v9936_v16 }
 0xfd9   : > { %v16431_v13 = vpop.eup %16430  ;;  %v10023_v56 = vmul.f32 1.442695, %v9997_v38  ;;  %v9951_v12 = vsub.f32 %v20572_v29, %v9935_v28  ;;  %v9938_v14 = vmax.f32 %v20575_v44, %v9920_v3  ;;  %16444 = vpow2.f32 %v10025_v19 }
 0xfda   : > { %v20938_v42 = vadd.f32 %v16429_v49, %v10042_v39  ;;  %v10041_v51 = vmul.f32 %v16431_v13, %v20590_v30  ;;  %15193 = vmatprep.mubr.msk.f32.mxu1 %vm2251_vm2, %v16431_v13  ;;  %v16433_v45 = vpop.eup %16432  ;;  %v9981_v32 = vmul.f32 1.442695, %v9952_v5  ;;  %v9999_v48 = vsub.f32 %v9905_v34, %v9935_v28 }
 0xfdb   : > { %15194 = vmatmul.mubr.msk.f32.gmra.mrb[30].mxu1 %vm2251_vm2, %v16427_v55  ;;  %15219 = vmatprep.mubr.msk.f32.mxu0 %vm2251_vm2, %v16433_v45  ;;  %v16435_v30 = vpop.eup %16434  ;;  %v9915_v2 = vadd.f32 %v9914_v25, %v9759_v46  ;;  %16446 = vpow2.f32 %v9975_v37  ;;  %v10029_v6 = vmul.f32 1.442695, %v10000_v57  ;;  %v9954_v21 = vsub.f32 %v20575_v44, %v9938_v14 }
 0xfdc   : > { %v20943_v0 = vadd.f32 %v16433_v45, %v10041_v51  ;;  %15220 = vmatmul.mubr.msk.f32.gmra.mrb[30].mxu0 %vm2251_vm2, %v16429_v49  ;;  %v10044_v9 = vmul.f32 %v16435_v30, %v20596_v43  ;;  %v16437_v11 = vpop.eup %16436  ;;  %16448 = vpow2.f32 %v10023_v56  ;;  %v9979_v36 = vmul.f32 1.442695, %v9951_v12 }
 0xfdd   : > { %v9937_v29 = vmax.f32 %v20606_v23, %v9915_v2  ;;  %v10002_v18 = vsub.f32 %v9920_v3, %v9938_v14  ;;  %16450 = vpow2.f32 %v9981_v32  ;;  %v10027_v20 = vmul.f32 1.442695, %v9999_v48 }
 0xfde   : > { %v20952_v35 = vadd.f32 %v16437_v11, %v10044_v9  ;;  %v16439_v60 = vpop.eup %16438  ;;  %16452 = vpow2.f32 %v10029_v6  ;;  %v9985_v26 = vmul.f32 1.442695, %v9954_v21 }
 0xfdf   : > { %v9953_v25 = vsub.f32 %v20606_v23, %v9937_v29  ;;  %v10043_v55 = vmul.f32 %v16439_v60, %v20603_v62  ;;  %15196 = vmatprep.mubr.msk.f32.mxu1 %vm2251_vm2, %v16439_v60  ;;  %v10001_v44 = vsub.f32 %v9915_v2, %v9937_v29  ;;  %16454 = vpow2.f32 %v9979_v36  ;;  %v10823_v36 = vld [vmem:[%s21880_s8 + $0x8] sm:$0xff]  ;;  %v10824_v60 = vld [vmem:[%s21880_s8 + $0x10] sm:$0xff] }
 0xfe0   : > { %v16441_v43 = vpop.eup %16440  ;;  %15197 = vmatmul.mubr.msk.f32.gmra.mrb[32].mxu1 %vm2251_vm2, %v16435_v30  ;;  %v10033_v34 = vmul.f32 1.442695, %v10002_v18  ;;  %16456 = vpow2.f32 %v10027_v20  ;;  %v10825_v20 = vld [vmem:[%s21880_s8 + $0x18] sm:$0xff] }
 0xfe1   : > { %v10059_v16 = vadd.f32 %v16441_v43, %v10043_v55  ;;  %15222 = vmatprep.mubr.msk.f32.mxu0 %vm2251_vm2, %v16441_v43  ;;  %v16443_v61 = vpop.eup %16442  ;;  %v9983_v49 = vmul.f32 1.442695, %v9953_v25  ;;  %16458 = vpow2.f32 %v9985_v26  ;;  %v10031_v39 = vmul.f32 1.442695, %v10001_v44  ;;  %v10826_v55 = vld [vmem:[%s21880_s8 + $0x20] sm:$0xff]  ;;  %v10827_v43 = vld [vmem:[%s21880_s8 + $0x28] sm:$0xff] }
 0xfe2   : > { %15223 = vmatmul.mubr.msk.f32.gmra.mrb[32].mxu0 %vm2251_vm2, %v16437_v11  ;;  %v10046_v62 = vmul.f32 %v16443_v61, %v20615_v1  ;;  %16460 = vpow2.f32 %v10033_v34  ;;  %v15736_v25 = vpack.c.bf16 %v10825_v20, %v10824_v60  ;;  %v15740_v26 = vpack.c.bf16 %v10827_v43, %v10826_v55  ;;  %v10828_v44 = vld [vmem:[%s21880_s8 + $0x30] sm:$0xff]  ;;  %v23161_v43 = vld [vmem:[#allocation122_spill] sm:$0xff] }
 0xfe3   : > { %v16445_v23 = vpop.eup %16444  ;;  %16462 = vpow2.f32 %v9983_v49  ;;  %v10831_v49 = vld [vmem:[%s21880_s8 + $0x48] sm:$0xff] }
 0xfe4   : > { %v10062_v38 = vadd.f32 %v16445_v23, %v10046_v62  ;;  %16464 = vrcp.f32 %v20900_v4 }
 0xfe5   : > { %v16447_v13 = vpop.eup %16446  ;;  %16466 = vpow2.f32 %v10031_v39  ;;  %v10833_v39 = vld [vmem:[%s21880_s8 + $0x58] sm:$0xff] }
 0xfe6   : > { %v16449_v19 = vpop.eup %16448  ;;  %v10045_v5 = vmul.f32 %v16447_v13, %v20621_v52  ;;  %15199 = vmatprep.mubr.msk.f32.mxu1 %vm2251_vm2, %v16447_v13  ;;  %16468 = vrcp.f32 %v20891_v8  ;;  %v10834_v13 = vld [vmem:[%s21880_s8 + $0x60] sm:$0xff] }
 0xfe7   : > { %v16451_v28 = vpop.eup %16450  ;;  %15225 = vmatprep.mubr.msk.f32.mxu0 %vm2251_vm2, %v16449_v19  ;;  %15200 = vmatmul.mubr.msk.f32.gmra.mrb[34].mxu1 %vm2251_vm2, %v16443_v61  ;;  %16470 = vrcp.f32 %v20919_v27  ;;  %v10830_v61 = vld [vmem:[%s21880_s8 + $0x40] sm:$0xff] }
 0xfe8   : > { %v10061_v1 = vadd.f32 %v16449_v19, %v10045_v5  ;;  %v10048_v51 = vmul.f32 %v16451_v28, %v20627_v41  ;;  %15226 = vmatmul.mubr.msk.f32.gmra.mrb[34].mxu0 %vm2251_vm2, %v16445_v23  ;;  %v16453_v3 = vpop.eup %16452  ;;  %16472 = vrcp.f32 %v20911_v15  ;;  %v15748_v62 = vpack.c.bf16 %v10831_v49, %v10830_v61  ;;  %v10832_v23 = vld [vmem:[%s21880_s8 + $0x50] sm:$0xff]  ;;  %v10835_v19 = vld [vmem:[%s21880_s8 + $0x68] sm:$0xff] }
 0xfe9   : > { %v16455_v46 = vpop.eup %16454  ;;  %16474 = vrcp.f32 %v20932_v24  ;;  %v15756_v5 = vpack.c.bf16 %v10835_v19, %v10834_v13  ;;  %v23163_v49 = vld [vmem:[#allocation112_spill] sm:$0xff] }
 0xfea   : > { %v10064_v4 = vadd.f32 %v16453_v3, %v10048_v51  ;;  %v16457_v45 = vpop.eup %16456  ;;  %v10047_v52 = vmul.f32 %v16455_v46, %v20633_v50  ;;  %15202 = vmatprep.mubr.msk.f32.mxu1 %vm2251_vm2, %v16455_v46  ;;  %16476 = vrcp.f32 %v20924_v47 }
 0xfeb   : > { %15228 = vmatprep.mubr.msk.f32.mxu0 %vm2251_vm2, %v16457_v45  ;;  %15203 = vmatmul.mubr.msk.f32.gmra.mrb[36].mxu1 %vm2251_vm2, %v16451_v28  ;;  %v16459_v37 = vpop.eup %16458  ;;  %16478 = vrcp.f32 %v20943_v0  ;;  %v10836_v28 = vld [vmem:[%s21880_s8 + $0x70] sm:$0xff] }
 0xfec   : > { %v10063_v41 = vadd.f32 %v16457_v45, %v10047_v52  ;;  %15229 = vmatmul.mubr.msk.f32.gmra.mrb[36].mxu0 %vm2251_vm2, %v16453_v3  ;;  %v16461_v57 = vpop.eup %16460  ;;  %v10050_v8 = vmul.f32 %v16459_v37, %v20638_v17  ;;  %16480 = vrcp.f32 %v20938_v42 }
 0xfed   : > { %v16463_v56 = vpop.eup %16462  ;;  %16482 = vrcp.f32 %v10059_v16  ;;  %v10829_v16 = vld [vmem:[%s21880_s8 + $0x38] sm:$0xff] }
 0xfee   : > { %v16465_v27 = vpop.eup %16464  ;;  %v10066_v50 = vadd.f32 %v16461_v57, %v10050_v8  ;;  %v10049_v12 = vmul.f32 %v16463_v56, %v20648_v53  ;;  %15205 = vmatprep.mubr.msk.f32.mxu1 %vm2251_vm2, %v16463_v56  ;;  %16484 = vrcp.f32 %v20952_v35  ;;  %v10822_v35 = vld [vmem:[%s21880_s8] sm:$0xff]  ;;  %v15744_v34 = vpack.c.bf16 %v10829_v16, %v10828_v44 }
 0xfef   : > { %v16467_v14 = vpop.eup %16466  ;;  %15206 = vmatmul.mubr.msk.f32.gmra.mrb[38].mxu1 %vm2251_vm2, %v16459_v37  ;;  %16486 = vrcp.f32 %v10061_v1  ;;  %v15732_v18 = vpack.c.bf16 %v10823_v36, %v10822_v35  ;;  %v10837_v1 = vld [vmem:[%s21880_s8 + $0x78] sm:$0xff]  ;;  %v23159_v35 = vld [vmem:[#allocation131_spill] sm:$0xff] }
 0xff0   : > { %v10065_v30 = vadd.f32 %v16467_v14, %v10049_v12  ;;  %15231 = vmatprep.mubr.msk.f32.mxu0 %vm2251_vm2, %v16467_v14  ;;  %15236 = vmatprep.mubr.msk.f32.mxu1 %vm2251_vm2, %v16465_v27  ;;  %v16469_v17 = vpop.eup %16468  ;;  %16488 = vrcp.f32 %v10062_v38  ;;  %v15752_v38 = vpack.c.bf16 %v10833_v39, %v10832_v23  ;;  %v15760_v51 = vpack.c.bf16 %v10837_v1, %v10836_v28  ;;  %v23164_v39 = vld [vmem:[#allocation121_spill] sm:$0xff] }
 0xff1   : > { %15232 = vmatmul.mubr.msk.f32.gmra.mrb[38].mxu0 %vm2251_vm2, %v16461_v57  ;;  %v16471_v15 = vpop.eup %16470  ;;  %16490 = vrcp.f32 %v10063_v41  ;;  %15733 = vmatprep.subr.bf16.mxu0 %v15732_v18  ;;  %v23165_v28 = vld [vmem:[#allocation129_spill] sm:$0xff] }
 0xff2   : > { %v16473_v53 = vpop.eup %16472  ;;  %16492 = vrcp.f32 %v10064_v4  ;;  %15735 = vmatpush3.bf16.msra.mxu0 %v15732_v18 }
 0xff3   : > { %15237 = vmatmul.mubr.msk.f32.vlgmr.msra.gmra.mrb[40].mxu1 %vm2251_vm2, %v16469_v17  ;;  %v16475_v47 = vpop.eup %16474  ;;  %16494 = vrcp.f32 %v10065_v30  ;;  %15737 = vmatprep.subr.bf16.mxu0 %v15736_v25 }
 0xff4   : > { %15239 = vmatprep.mubr.msk.f32.mxu1 %vm2251_vm2, %v16471_v15  ;;  %v16477_v24 = vpop.eup %16476  ;;  %16496 = vrcp.f32 %v10066_v50 }
 0xff5   : > { %v16479_v0 = vpop.eup %16478 }
 0xff6   : > { %v16481_v42 = vpop.eup %16480  ;;  %15739 = vmatpush3.bf16.msra.mxu0 %v15736_v25 }
 0xff7   : > { %15240 = vmatmul.mubr.msk.f32.gmra.mrb[42].mxu1 %vm2251_vm2, %v16473_v53  ;;  %v16483_v32 = vpop.eup %16482  ;;  %15741 = vmatprep.subr.bf16.mxu0 %v15740_v26 }
 0xff8   : > { %15242 = vmatprep.mubr.msk.f32.mxu1 %vm2251_vm2, %v16475_v47  ;;  %v16485_v48 = vpop.eup %16484 }
 0xff9   : > { %v16487_v2 = vpop.eup %16486 }
 0xffa   : > { %v16489_v9 = vpop.eup %16488  ;;  %15743 = vmatpush3.bf16.msra.mxu0 %v15740_v26 }
 0xffb   : > { %15243 = vmatmul.mubr.msk.f32.gmra.mrb[44].mxu1 %vm2251_vm2, %v16477_v24  ;;  %v16491_v11 = vpop.eup %16490  ;;  %15745 = vmatprep.subr.bf16.mxu0 %v15744_v34 }
 0xffc   : > { %15245 = vmatprep.mubr.msk.f32.mxu1 %vm2251_vm2, %v16479_v0  ;;  %v16493_v6 = vpop.eup %16492  ;;  %v23155_v0 = vld [vmem:[#allocation113_spill] sm:$0xff] }
 0xffd   : > { %v16495_v21 = vpop.eup %16494 }
 0xffe   : > { %v16497_v29 = vpop.eup %16496  ;;  %15747 = vmatpush3.bf16.msra.mxu0 %v15744_v34  ;;  %v23162_v34 = vld [vmem:[#allocation128_spill] sm:$0xff] }
 0xfff   : > { %15246 = vmatmul.mubr.msk.f32.gmra.mrb[46].mxu1 %vm2251_vm2, %v16481_v42  ;;  %15749 = vmatprep.subr.bf16.mxu0 %v15748_v62 }
0x1000   : > { %15248 = vmatprep.mubr.msk.f32.mxu1 %vm2251_vm2, %v16483_v32 }
0x1002   : > { %15751 = vmatpush3.bf16.msra.mxu0 %v15748_v62 }
0x1003   : > { %15249 = vmatmul.mubr.msk.f32.gmra.mrb[48].mxu1 %vm2251_vm2, %v16485_v48  ;;  %15753 = vmatprep.subr.bf16.mxu0 %v15752_v38 }
0x1004   : > { %15251 = vmatprep.mubr.msk.f32.mxu1 %vm2251_vm2, %v16487_v2 }
0x1006   : > { %15755 = vmatpush3.bf16.msra.mxu0 %v15752_v38 }
0x1007   : > { %15252 = vmatmul.mubr.msk.f32.gmra.mrb[50].mxu1 %vm2251_vm2, %v16489_v9  ;;  %15757 = vmatprep.subr.bf16.mxu0 %v15756_v5 }
0x1008   : > { %15254 = vmatprep.mubr.msk.f32.mxu1 %vm2251_vm2, %v16491_v11 }
0x100a   : > { %15759 = vmatpush3.bf16.msra.mxu0 %v15756_v5 }
0x100b   : > { %15255 = vmatmul.mubr.msk.f32.gmra.mrb[52].mxu1 %vm2251_vm2, %v16493_v6  ;;  %15761 = vmatprep.subr.bf16.mxu0 %v15760_v51 }
0x100c   : > { %15257 = vmatprep.mubr.msk.f32.mxu1 %vm2251_vm2, %v16495_v21  ;;  %v23158_v21 = vld [vmem:[#allocation104_spill] sm:$0xff] }
0x100e   : > { %15763 = vmatpush3.bf16.msra.mxu0 %v15760_v51 }
0x100f   : > { %15258 = vmatmul.mubr.msk.f32.gmra.mrb[54].mxu1 %vm2251_vm2, %v16497_v29 }
0x10a2   : > { %v15186_v3 = vpop.f32.mrb[24].mxu1 }
0x10a3   : > { %v10534_v46 = vmul.f32 %v15186_v3, %v20691_v58  ;;  %v15212_v4 = vpop.f32.mrb[24].mxu0  ;;  %v10261_v45 = vpop.f32.mrb[25].mxu1 }
0x10a4   : > { %v10550_v52 = vmul.f32 %v15212_v4, %v20777_v59  ;;  %v10533_v37 = vmul.f32 %v10261_v45, %v20694_v63  ;;  %v10454_v41 = vpop.f32.mrb[25].mxu0  ;;  %v23167_v45 = vld [vmem:[#allocation105_spill] sm:$0xff] }
0x10a5   : > { %v10549_v57 = vmul.f32 %v10454_v41, %v20768_v31  ;;  %v23168_v41 = vld [vmem:[#allocation133_spill] sm:$0xff] }
0x10a6   : > { %v15189_v8 = vpop.f32.mrb[26].mxu1  ;;  %v21055_v56 = vadd.f32 %v10550_v52, %v10534_v46  ;;  %v23166_v46 = vld [vmem:[#allocation118_spill] sm:$0xff] }
0x10a7   : > { %v10536_v27 = vmul.f32 %v15189_v8, %v20699_v54  ;;  %v15215_v50 = vpop.f32.mrb[26].mxu0  ;;  %v10271_v12 = vpop.f32.mrb[27].mxu1  ;;  %v21058_v14 = vadd.f32 %v10549_v57, %v10533_v37 }
0x10a8   : > { %v10552_v58 = vmul.f32 %v15215_v50, %v20774_v22  ;;  %v10535_v30 = vmul.f32 %v10271_v12, %v20702_v33  ;;  %v10464_v17 = vpop.f32.mrb[27].mxu0  ;;  %v23156_v22 = vld [vmem:[#allocation116_spill] sm:$0xff] }
0x10a9   : > { %v10551_v59 = vmul.f32 %v10464_v17, %v20762_v7  ;;  %v23157_v7 = vld [vmem:[#allocation111_spill] sm:$0xff]  ;;  %v23169_v12 = vld [vmem:[#allocation124_spill] sm:$0xff] }
0x10aa   : > { %v15192_v63 = vpop.f32.mrb[28].mxu1  ;;  %v21063_v15 = vadd.f32 %v10552_v58, %v10536_v27 }
0x10ab   : > { %v10538_v31 = vmul.f32 %v15192_v63, %v20707_v40  ;;  %v15218_v53 = vpop.f32.mrb[28].mxu0  ;;  %v10281_v47 = vpop.f32.mrb[29].mxu1  ;;  %v21066_v24 = vadd.f32 %v10551_v59, %v10535_v30  ;;  %v23170_v59 = vld [vmem:[#allocation3_spill] sm:$0xff] }
0x10ac   : > { %v10554_v54 = vmul.f32 %v15218_v53, %v20807_v10  ;;  %v10537_v42 = vmul.f32 %v10281_v47, %v23155_v0  ;;  %v10474_v32 = vpop.f32.mrb[29].mxu0  ;;  %v23160_v10 = vld [vmem:[#allocation125_spill] sm:$0xff] }
0x10ad   : > { %v10553_v48 = vmul.f32 %v10474_v32, %v23156_v22 }
0x10ae   : > { %v15195_v33 = vpop.f32.mrb[30].mxu1  ;;  %v21071_v2 = vadd.f32 %v10554_v54, %v10538_v31  ;;  %v23171_v31 = vld [vmem:[#allocation126_spill] sm:$0xff]  ;;  %v23172_v54 = vld [vmem:[#allocation5_spill] sm:$0xff] }
0x10af   : > { %v10540_v9 = vmul.f32 %v15195_v33, %v23157_v7  ;;  %v10291_v11 = vpop.f32.mrb[31].mxu1  ;;  %v21074_v6 = vadd.f32 %v10553_v48, %v10537_v42  ;;  %v15221_v40 = vpop.f32.mrb[30].mxu0  ;;  %v23173_v48 = vld [vmem:[#allocation127_spill] sm:$0xff] }
0x10b0   : > { %v10539_v29 = vmul.f32 %v10291_v11, %v23158_v21  ;;  %v10556_v36 = vmul.f32 %v15221_v40, %v23159_v35  ;;  %v10484_v18 = vpop.f32.mrb[31].mxu0  ;;  %v23174_v11 = vld [vmem:[#allocation132_spill] sm:$0xff]  ;;  %v23175_v21 = vld [vmem:[#allocation109_spill] sm:$0xff] }
0x10b1   : > { %v10555_v60 = vmul.f32 %v10484_v18, %v23160_v10 }
0x10b2   : > { %v10572_v20 = vadd.f32 %v10556_v36, %v10540_v9  ;;  %v23176_v36 = vld [vmem:[#allocation137_spill] sm:$0xff] }
0x10b3   : > { %v10571_v25 = vadd.f32 %v10555_v60, %v10539_v29  ;;  %v15198_v55 = vpop.f32.mrb[32].mxu1 }
0x10b4   : > { %v10542_v26 = vmul.f32 %v15198_v55, %v23161_v43  ;;  %v10301_v44 = vpop.f32.mrb[33].mxu1 }
0x10b5   : > { %v15224_v16 = vpop.f32.mrb[32].mxu0  ;;  %v10541_v61 = vmul.f32 %v10301_v44, %v23162_v34 }
0x10b6   : > { %v10558_v62 = vmul.f32 %v15224_v16, %v23163_v49  ;;  %v10494_v23 = vpop.f32.mrb[33].mxu0 }
0x10b7   : > { %v10557_v38 = vmul.f32 %v10494_v23, %v23164_v39 }
0x10b8   : > { %v10574_v13 = vadd.f32 %v10558_v62, %v10542_v26 }
0x10b9   : > { %v10573_v19 = vadd.f32 %v10557_v38, %v10541_v61 }
0x10ba   : > { %v15201_v5 = vpop.f32.mrb[34].mxu1 }
0x10bb   : > { %v10544_v1 = vmul.f32 %v15201_v5, %v23165_v28  ;;  %v15227_v51 = vpop.f32.mrb[34].mxu0  ;;  %v10311_v3 = vpop.f32.mrb[35].mxu1 }
0x10bc   : > { %v10560_v4 = vmul.f32 %v15227_v51, %v23166_v46  ;;  %v10543_v52 = vmul.f32 %v10311_v3, %v23167_v45  ;;  %v10504_v37 = vpop.f32.mrb[35].mxu0 }
0x10bd   : > { %v10559_v57 = vmul.f32 %v10504_v37, %v23168_v41  ;;  %v11304_v41 = vld [vmem:[%s21881_s9] sm:$0xff] }
0x10be   : > { %v10576_v8 = vadd.f32 %v10560_v4, %v10544_v1  ;;  %v15204_v27 = vpop.f32.mrb[36].mxu1 }
0x10bf   : > { %v10575_v50 = vadd.f32 %v10559_v57, %v10543_v52  ;;  %v10546_v58 = vmul.f32 %v15204_v27, %v23169_v12  ;;  %v15230_v30 = vpop.f32.mrb[36].mxu0  ;;  %v10321_v17 = vpop.f32.mrb[37].mxu1  ;;  %v11305_v57 = vld [vmem:[%s21881_s9 + $0x8] sm:$0xff] }
0x10c0   : > { %v10562_v63 = vmul.f32 %v15230_v30, %v23170_v59  ;;  %v10545_v53 = vmul.f32 %v10321_v17, %v23171_v31  ;;  %v10514_v47 = vpop.f32.mrb[37].mxu0  ;;  %v15764_v27 = vpack.c.bf16 %v11305_v57, %v11304_v41  ;;  %v11309_v30 = vld [vmem:[%s21881_s9 + $0x28] sm:$0xff]  ;;  %v11310_v59 = vld [vmem:[%s21881_s9 + $0x30] sm:$0xff] }
0x10c1   : > { %v10561_v0 = vmul.f32 %v10514_v47, %v23172_v54  ;;  %v11313_v47 = vld [vmem:[%s21881_s9 + $0x48] sm:$0xff] }
0x10c2   : > { %v10578_v42 = vadd.f32 %v10562_v63, %v10546_v58  ;;  %v15207_v32 = vpop.f32.mrb[38].mxu1  ;;  %v11308_v58 = vld [vmem:[%s21881_s9 + $0x20] sm:$0xff]  ;;  %15765 = vmatprep.subr.bf16.mxu1 %v15764_v27  ;;  %v11311_v63 = vld [vmem:[%s21881_s9 + $0x38] sm:$0xff] }
0x10c3   : > { %v10577_v22 = vadd.f32 %v10561_v0, %v10545_v53  ;;  %v10548_v33 = vmul.f32 %v15207_v32, %v23173_v48  ;;  %v10331_v7 = vpop.f32.mrb[39].mxu1  ;;  %15767 = vmatpush3.bf16.msra.mxu1 %v15764_v27  ;;  %v15772_v17 = vpack.c.bf16 %v11309_v30, %v11308_v58  ;;  %v15776_v31 = vpack.c.bf16 %v11311_v63, %v11310_v59  ;;  %v11312_v53 = vld [vmem:[%s21881_s9 + $0x40] sm:$0xff]  ;;  %v11314_v0 = vld [vmem:[%s21881_s9 + $0x50] sm:$0xff] }
0x10c4   : > { %v15233_v9 = vpop.f32.mrb[38].mxu0  ;;  %v10547_v40 = vmul.f32 %v10331_v7, %v23174_v11  ;;  %v15780_v54 = vpack.c.bf16 %v11313_v47, %v11312_v53  ;;  %v23177_v48 = vld [vmem:[#allocation107_spill] sm:$0xff]  ;;  %v23178_v7 = vld [vmem:[#allocation82_spill] sm:$0xff] }
0x10c5   : > { %v10564_v29 = vmul.f32 %v15233_v9, %v23175_v21  ;;  %v10524_v35 = vpop.f32.mrb[39].mxu0  ;;  %v23186_v53 = vld [vmem:[#allocation90_spill] sm:$0xff] }
0x10c6   : > { %v10563_v18 = vmul.f32 %v10524_v35, %v23176_v36  ;;  %v15238_v10 = vpop.f32.mrb[40].mxu1 }
0x10c7   : > { %v21096_v60 = vmul.f32 %v15238_v10, %v21055_v56  ;;  %v10727_v55 = vpop.f32.mrb[41].mxu1  ;;  %v10580_v43 = vadd.f32 %v10564_v29, %v10548_v33  ;;  %v23180_v10 = vld [vmem:[#allocation81_spill] sm:$0xff] }
0x10c8   : > { %v21099_v26 = vmul.f32 %v10727_v55, %v21058_v14  ;;  %v10579_v44 = vadd.f32 %v10563_v18, %v10547_v40  ;;  %v23179_v40 = vld [vmem:[#allocation80_spill] sm:$0xff] }
0x10ca   : > { %v15241_v16 = vpop.f32.mrb[42].mxu1  ;;  %15292 = vmatprep.mubr.f32.mxu0 %v21099_v26 }
0x10cb   : > { %v21103_v34 = vmul.f32 %v15241_v16, %v21063_v15  ;;  %v10737_v61 = vpop.f32.mrb[43].mxu1  ;;  %15293 = vmatmul.mubr.f32.vlgmr.msra.gmra.mrb[40].mxu0 %v21096_v60  ;;  %v23181_v16 = vld [vmem:[#allocation79_spill] sm:$0xff] }
0x10cc   : > { %v21107_v49 = vmul.f32 %v10737_v61, %v21066_v24 }
0x10ce   : > { %v15244_v56 = vpop.f32.mrb[44].mxu1  ;;  %15295 = vmatprep.mubr.f32.mxu0 %v21107_v49 }
0x10cf   : > { %v21111_v62 = vmul.f32 %v15244_v56, %v21071_v2  ;;  %v10747_v14 = vpop.f32.mrb[45].mxu1  ;;  %15296 = vmatmul.mubr.f32.gmra.mrb[42].mxu0 %v21103_v34 }
0x10d0   : > { %v21115_v23 = vmul.f32 %v10747_v14, %v21074_v6 }
0x10d2   : > { %v15247_v15 = vpop.f32.mrb[46].mxu1  ;;  %15298 = vmatprep.mubr.f32.mxu0 %v21115_v23 }
0x10d3   : > { %v21118_v39 = vmul.f32 %v15247_v15, %v10572_v20  ;;  %v10757_v38 = vpop.f32.mrb[47].mxu1  ;;  %15299 = vmatmul.mubr.f32.gmra.mrb[44].mxu0 %v21111_v62 }
0x10d4   : > { %v21121_v24 = vmul.f32 %v10757_v38, %v10571_v25 }
0x10d6   : > { %v15250_v5 = vpop.f32.mrb[48].mxu1  ;;  %15301 = vmatprep.mubr.f32.mxu0 %v21121_v24 }
0x10d7   : > { %v21124_v2 = vmul.f32 %v15250_v5, %v10574_v13  ;;  %v10767_v28 = vpop.f32.mrb[49].mxu1  ;;  %15302 = vmatmul.mubr.f32.gmra.mrb[46].mxu0 %v21118_v39  ;;  %v23182_v5 = vld [vmem:[#allocation86_spill] sm:$0xff] }
0x10d8   : > { %v21127_v6 = vmul.f32 %v10767_v28, %v10573_v19 }
0x10da   : > { %v15253_v1 = vpop.f32.mrb[50].mxu1  ;;  %15304 = vmatprep.mubr.f32.mxu0 %v21127_v6 }
0x10db   : > { %v21130_v20 = vmul.f32 %v15253_v1, %v10576_v8  ;;  %v10777_v51 = vpop.f32.mrb[51].mxu1  ;;  %15305 = vmatmul.mubr.f32.gmra.mrb[48].mxu0 %v21124_v2  ;;  %v11306_v8 = vld [vmem:[%s21881_s9 + $0x10] sm:$0xff] }
0x10dc   : > { %v21133_v25 = vmul.f32 %v10777_v51, %v10575_v50  ;;  %v11307_v50 = vld [vmem:[%s21881_s9 + $0x18] sm:$0xff] }
0x10dd   : > { %v15768_v12 = vpack.c.bf16 %v11307_v50, %v11306_v8  ;;  %v23184_v8 = vld [vmem:[#allocation85_spill] sm:$0xff] }
0x10de   : > { %v15256_v3 = vpop.f32.mrb[52].mxu1  ;;  %15307 = vmatprep.mubr.f32.mxu0 %v21133_v25 }
0x10df   : > { %v21136_v13 = vmul.f32 %v15256_v3, %v10578_v42  ;;  %v10787_v46 = vpop.f32.mrb[53].mxu1  ;;  %15308 = vmatmul.mubr.f32.gmra.mrb[50].mxu0 %v21130_v20  ;;  %15769 = vmatprep.subr.bf16.mxu1 %v15768_v12  ;;  %v11315_v42 = vld [vmem:[%s21881_s9 + $0x58] sm:$0xff]  ;;  %v23183_v3 = vld [vmem:[#allocation84_spill] sm:$0xff] }
0x10e0   : > { %v21139_v19 = vmul.f32 %v10787_v46, %v10577_v22  ;;  %15771 = vmatpush3.bf16.msra.mxu1 %v15768_v12  ;;  %v15784_v32 = vpack.c.bf16 %v11315_v42, %v11314_v0  ;;  %v21188_v22 = vld [vmem:[%s21876_s4] sm:$0x1f] }
0x10e1   : > { %15773 = vmatprep.subr.bf16.mxu1 %v15772_v17  ;;  %v21192_v33 = vrot.slane %v21188_v22, %v23177_v48  ;;  %v23185_v12 = vld [vmem:[#allocation83_spill] sm:$0xff] }
0x10e2   : > { %v15259_v4 = vpop.f32.mrb[54].mxu1  ;;  %15310 = vmatprep.mubr.f32.mxu0 %v21139_v19 }
0x10e3   : > { %v21142_v45 = vmul.f32 %v15259_v4, %v10580_v43  ;;  %v10797_v52 = vpop.f32.mrb[55].mxu1  ;;  %15311 = vmatmul.mubr.f32.gmra.mrb[52].mxu0 %v21136_v13  ;;  %v1501_v9 = vadd.f32 %v23178_v7, %v21192_v33  ;;  %v1498_v21 = vadd.f32 %v23179_v40, %v21192_v33  ;;  %v1509_v55 = vadd.f32 %v23180_v10, %v21192_v33 }
0x10e4   : > { %v21145_v37 = vmul.f32 %v10797_v52, %v10579_v44  ;;  %15775 = vmatpush3.bf16.msra.mxu1 %v15772_v17  ;;  %v1506_v61 = vadd.f32 %v23181_v16, %v21192_v33  ;;  %v1517_v28 = vadd.f32 %v23182_v5, %v21192_v33  ;;  %v1514_v46 = vadd.f32 %v23183_v3, %v21192_v33  ;;  %v23190_v5 = vld [vmem:[#allocation94_spill] sm:$0xff]  ;;  %v23191_v3 = vld [vmem:[#allocation92_spill] sm:$0xff] }
0x10e5   : > { %15777 = vmatprep.subr.bf16.mxu1 %v15776_v31  ;;  %v1525_v27 = vadd.f32 %v23184_v8, %v21192_v33  ;;  %v1522_v58 = vadd.f32 %v23185_v12, %v21192_v33  ;;  %v1533_v47 = vadd.f32 %v23186_v53, %v21192_v33 }
0x10e6   : > { %15313 = vmatprep.mubr.f32.mxu0 %v21145_v37 }
0x10e7   : > { %15314 = vmatmul.mubr.f32.gmra.mrb[54].mxu0 %v21142_v45 }
0x10e8   : > { %15779 = vmatpush3.bf16.msra.mxu1 %v15776_v31 }
0x10e9   : > { %15781 = vmatprep.subr.bf16.mxu1 %v15780_v54 }
0x10ec   : > { %15783 = vmatpush3.bf16.msra.mxu1 %v15780_v54 }
0x10ed   : > { %15785 = vmatprep.subr.bf16.mxu1 %v15784_v32 }
0x10f0   : > { %15787 = vmatpush3.bf16.msra.mxu1 %v15784_v32  ;;  %v23187_v32 = vld [vmem:[#allocation88_spill] sm:$0xff] }
0x10f1   : > { %v1530_v7 = vadd.f32 %v23187_v32, %v21192_v33  ;;  %v11317_v32 = vld [vmem:[%s21881_s9 + $0x68] sm:$0xff] }
0x119e   : > { %v15294_v11 = vpop.f32.mrb[40].mxu0 }
0x119f   : > { %v10910_v29 = vadd.f32 %v15294_v11, %v1501_v9  ;;  %v10904_v35 = vpop.f32.mrb[41].mxu0 }
0x11a0   : > { %v10905_v36 = vadd.f32 %v10904_v35, %v1498_v21 }
0x11a1   : > { %v13361_v18 = vmul.f32 -1.442695, %v10910_v29 }
0x11a2   : > { %v13360_v43 = vmul.f32 -1.442695, %v10905_v36  ;;  %v15297_v44 = vpop.f32.mrb[42].mxu0  ;;  %v23188_v36 = vld [vmem:[#allocation89_spill] sm:$0xff] }
0x11a3   : > { %16498 = vpow2.f32 %v13361_v18  ;;  %v10920_v56 = vadd.f32 %v15297_v44, %v1509_v55  ;;  %v10914_v14 = vpop.f32.mrb[43].mxu0  ;;  %v1541_v18 = vadd.f32 %v23188_v36, %v21192_v33  ;;  %v23189_v44 = vld [vmem:[#allocation87_spill] sm:$0xff]  ;;  %v11319_v36 = vld [vmem:[%s21881_s9 + $0x78] sm:$0xff] }
0x11a4   : > { %16500 = vpow2.f32 %v13360_v43  ;;  %v10915_v15 = vadd.f32 %v10914_v14, %v1506_v61  ;;  %v1538_v16 = vadd.f32 %v23189_v44, %v21192_v33 }
0x11a5   : > { %v13363_v38 = vmul.f32 -1.442695, %v10920_v56 }
0x11a6   : > { %v13362_v1 = vmul.f32 -1.442695, %v10915_v15  ;;  %v15300_v51 = vpop.f32.mrb[44].mxu0 }
0x11a7   : > { %16502 = vpow2.f32 %v13363_v38  ;;  %v10930_v4 = vadd.f32 %v15300_v51, %v1517_v28  ;;  %v10924_v52 = vpop.f32.mrb[45].mxu0  ;;  %v1549_v28 = vadd.f32 %v23190_v5, %v21192_v33 }
0x11a8   : > { %16504 = vpow2.f32 %v13362_v1  ;;  %v10925_v41 = vadd.f32 %v10924_v52, %v1514_v46  ;;  %v1546_v46 = vadd.f32 %v23191_v3, %v21192_v33 }
0x11a9   : > { %v13365_v57 = vmul.f32 -1.442695, %v10930_v4 }
0x11aa   : > { %v15303_v50 = vpop.f32.mrb[46].mxu0  ;;  %v13364_v30 = vmul.f32 -1.442695, %v10925_v41 }
0x11ab   : > { %v10940_v17 = vadd.f32 %v15303_v50, %v1525_v27  ;;  %v10934_v59 = vpop.f32.mrb[47].mxu0  ;;  %16506 = vpow2.f32 %v13365_v57  ;;  %v23192_v50 = vld [vmem:[#allocation93_spill] sm:$0xff] }
0x11ac   : > { %v10935_v63 = vadd.f32 %v10934_v59, %v1522_v58  ;;  %16508 = vpow2.f32 %v13364_v30  ;;  %v1557_v12 = vadd.f32 %v23192_v50, %v21192_v33 }
0x11ad   : > { %v16499_v31 = vpop.eup %16498  ;;  %v13367_v21 = vmul.f32 -1.442695, %v10940_v17  ;;  %v23193_v17 = vld [vmem:[#allocation91_spill] sm:$0xff] }
0x11ae   : > { %v16501_v54 = vpop.eup %16500  ;;  %v11032_v0 = vadd.f32 1.0, %v16499_v31  ;;  %v15306_v42 = vpop.f32.mrb[48].mxu0  ;;  %v13366_v14 = vmul.f32 -1.442695, %v10935_v63  ;;  %v1554_v59 = vadd.f32 %v23193_v17, %v21192_v33 }
0x11af   : > { %v11031_v9 = vadd.f32 1.0, %v16501_v54  ;;  %v10950_v11 = vadd.f32 %v15306_v42, %v1533_v47  ;;  %v10944_v40 = vpop.f32.mrb[49].mxu0  ;;  %v11316_v42 = vld [vmem:[%s21881_s9 + $0x60] sm:$0xff] }
0x11b0   : > { %16510 = vrcp.f32 %v11032_v0  ;;  %v10945_v29 = vadd.f32 %v10944_v40, %v1530_v7  ;;  %v15788_v7 = vpack.c.bf16 %v11317_v32, %v11316_v42 }
0x11b1   : > { %v16503_v35 = vpop.eup %16502  ;;  %16512 = vrcp.f32 %v11031_v9  ;;  %v13369_v41 = vmul.f32 -1.442695, %v10950_v11 }
0x11b2   : > { %v16505_v10 = vpop.eup %16504  ;;  %v11034_v55 = vadd.f32 1.0, %v16503_v35  ;;  %v15309_v43 = vpop.f32.mrb[50].mxu0  ;;  %16514 = vpow2.f32 %v13367_v21  ;;  %v13368_v47 = vmul.f32 -1.442695, %v10945_v29  ;;  %15789 = vmatprep.subr.bf16.mxu1 %v15788_v7  ;;  %v11318_v35 = vld [vmem:[%s21881_s9 + $0x70] sm:$0xff] }
0x11b3   : > { %v10960_v61 = vadd.f32 %v15309_v43, %v1541_v18  ;;  %v10954_v56 = vpop.f32.mrb[51].mxu0  ;;  %v11033_v38 = vadd.f32 1.0, %v16505_v10  ;;  %15791 = vmatpush3.bf16.msra.mxu1 %v15788_v7 }
0x11b4   : > { %v10955_v15 = vadd.f32 %v10954_v56, %v1538_v16  ;;  %16516 = vrcp.f32 %v11034_v55  ;;  %v15792_v55 = vpack.c.bf16 %v11319_v36, %v11318_v35 }
0x11b5   : > { %v16507_v1 = vpop.eup %16506  ;;  %16518 = vpow2.f32 %v13366_v14  ;;  %v13371_v21 = vmul.f32 -1.442695, %v10960_v61 }
0x11b6   : > { %v15312_v51 = vpop.f32.mrb[52].mxu0  ;;  %v16509_v8 = vpop.eup %16508  ;;  %16520 = vrcp.f32 %v11033_v38  ;;  %v11036_v27 = vadd.f32 1.0, %v16507_v1  ;;  %v13370_v44 = vmul.f32 -1.442695, %v10955_v15  ;;  %15793 = vmatprep.subr.bf16.mxu1 %v15792_v55 }
0x11b7   : > { %v10970_v4 = vadd.f32 %v15312_v51, %v1549_v28  ;;  %v10964_v52 = vpop.f32.mrb[53].mxu0  ;;  %16522 = vpow2.f32 %v13369_v41  ;;  %v11035_v33 = vadd.f32 1.0, %v16509_v8  ;;  %15795 = vmatpush3.bf16.msra.mxu1 %v15792_v55 }
0x11b8   : > { %v10965_v57 = vadd.f32 %v10964_v52, %v1546_v46  ;;  %16524 = vrcp.f32 %v11036_v27 }
0x11b9   : > { %16526 = vpow2.f32 %v13368_v47  ;;  %v13373_v38 = vmul.f32 -1.442695, %v10970_v4 }
0x11ba   : > { %v16511_v58 = vpop.eup %16510  ;;  %v15315_v30 = vpop.f32.mrb[54].mxu0  ;;  %16528 = vrcp.f32 %v11035_v33  ;;  %v13372_v15 = vmul.f32 -1.442695, %v10965_v57 }
0x11bb   : > { %v16513_v63 = vpop.eup %16512  ;;  %v21226_v31 = vadd.f32 %v15315_v30, %v1557_v12  ;;  %11086 = vperm.xlu1 %15864, %v16511_v58   ;;  %v10974_v53 = vpop.f32.mrb[55].mxu0  ;;  %v11176_v11 = vsub.f32 1.0, %v16511_v58  ;;  %16530 = vpow2.f32 %v13371_v21 }
0x11bc   : > { %v10975_v54 = vadd.f32 %v10974_v53, %v1554_v59  ;;  %11081 = vperm.xlu0 %15865, %v16513_v63   ;;  %v11175_v0 = vsub.f32 1.0, %v16513_v63  ;;  %v16515_v9 = vpop.eup %16514 }
0x11bd   : > { %v11038_v29 = vadd.f32 1.0, %v16515_v9  ;;  %v13375_v58 = vmul.f32 -1.442695, %v21226_v31 }
0x11be   : > { %v16517_v40 = vpop.eup %16516  ;;  %v13374_v8 = vmul.f32 -1.442695, %v10975_v54 }
0x11bf   : > { %11193 = vperm.xlu1 %15864, %v11175_v0   ;;  %v16519_v18 = vpop.eup %16518  ;;  %v11178_v10 = vsub.f32 1.0, %v16517_v40  ;;  %16532 = vrcp.f32 %v11038_v29 }
0x11c0   : > { %11198 = vperm.xlu0 %15865, %v11176_v11   ;;  %v16521_v43 = vpop.eup %16520  ;;  %v11037_v16 = vadd.f32 1.0, %v16519_v18  ;;  %16534 = vpow2.f32 %v13370_v44 }
0x11c1   : > { %v16523_v61 = vpop.eup %16522  ;;  %v11177_v56 = vsub.f32 1.0, %v16521_v43 }
0x11c2   : > { %v16525_v14 = vpop.eup %16524  ;;  %16536 = vrcp.f32 %v11037_v16  ;;  %v11040_v5 = vadd.f32 1.0, %v16523_v61  ;;  %v23194_v16 = vld [vmem:[#allocation8_spill] sm:$0xff] }
0x11c3   : > { %11096 = vperm.xlu1 %15864, %v16517_v40   ;;  %v16527_v28 = vpop.eup %16526  ;;  %v11180_v1 = vsub.f32 1.0, %v16525_v14  ;;  %16538 = vpow2.f32 %v13373_v38  ;;  %v21243_v61 = vrot.slane %v21188_v22, %v23194_v16  ;;  %v23195_v38 = vld [vmem:[#allocation12_spill] sm:$0xff] }
0x11c4   : > { %11208 = vperm.xlu0 %15865, %v11178_v10   ;;  %v16529_v51 = vpop.eup %16528  ;;  %16540 = vrcp.f32 %v11040_v5  ;;  %v11039_v3 = vadd.f32 1.0, %v16527_v28  ;;  %v23196_v28 = vld [vmem:[#allocation13_spill] sm:$0xff] }
0x11c5   : > { %v16531_v46 = vpop.eup %16530  ;;  %v11179_v52 = vsub.f32 1.0, %v16529_v51  ;;  %16542 = vpow2.f32 %v13372_v15  ;;  %v1387_v5 = vadd.f32 %v23195_v38, %v21243_v61 }
0x11c6   : > { %16544 = vrcp.f32 %v11039_v3  ;;  %v11042_v4 = vadd.f32 1.0, %v16531_v46 }
0x11c7   : > { %11091 = vperm.xlu1 %15864, %v16521_v43   ;;  %16546 = vpow2.f32 %v13374_v8 }
0x11c8   : > { %11203 = vperm.xlu0 %15865, %v11177_v56   ;;  %16548 = vrcp.f32 %v11042_v4 }
0x11c9   : > { %v16533_v41 = vpop.eup %16532  ;;  %16550 = vpow2.f32 %v13375_v58  ;;  %v23198_v58 = vld [vmem:[#allocation14_spill] sm:$0xff] }
0x11ca   : > { %v16535_v27 = vpop.eup %16534  ;;  %v11182_v50 = vsub.f32 1.0, %v16533_v41 }
0x11cb   : > { %11106 = vperm.xlu1 %15864, %v16525_v14   ;;  %v11041_v57 = vadd.f32 1.0, %v16535_v27 }
0x11cc   : > { %11218 = vperm.xlu0 %15865, %v11180_v1   ;;  %v16537_v12 = vpop.eup %16536  ;;  %v1391_v1 = vadd.f32 %v23196_v28, %v21243_v61 }
0x11cd   : > { %v16539_v30 = vpop.eup %16538  ;;  %v11181_v17 = vsub.f32 1.0, %v16537_v12  ;;  %16552 = vrcp.f32 %v11041_v57  ;;  %v1397_v57 = vadd.f32 %v23198_v58, %v21243_v61 }
0x11ce   : > { %v16541_v59 = vpop.eup %16540  ;;  %v11044_v63 = vadd.f32 1.0, %v16539_v30 }
0x11cf   : > { %11101 = vperm.xlu1 %15864, %v16529_v51   ;;  %v16543_v53 = vpop.eup %16542  ;;  %v11184_v47 = vsub.f32 1.0, %v16541_v59 }
0x11d0   : > { %11213 = vperm.xlu0 %15865, %v11179_v52   ;;  %v16545_v54 = vpop.eup %16544  ;;  %16554 = vrcp.f32 %v11044_v63  ;;  %v11043_v0 = vadd.f32 1.0, %v16543_v53 }
0x11d1   : > { %v16547_v31 = vpop.eup %16546  ;;  %v11183_v42 = vsub.f32 1.0, %v16545_v54 }
0x11d2   : > { %v16549_v32 = vpop.eup %16548  ;;  %16556 = vrcp.f32 %v11043_v0  ;;  %v11045_v33 = vadd.f32 1.0, %v16547_v31  ;;  %v23199_v31 = vld [vmem:[#allocation17_spill] sm:$0xff] }
0x11d3   : > { %11116 = vperm.xlu1 %15864, %v16533_v41   ;;  %v16551_v7 = vpop.eup %16550  ;;  %v11186_v9 = vsub.f32 1.0, %v16549_v32 }
0x11d4   : > { %11228 = vperm.xlu0 %15865, %v11182_v50   ;;  %v11046_v40 = vadd.f32 1.0, %v16551_v7  ;;  %16558 = vrcp.f32 %v11045_v33  ;;  %v23197_v50 = vld [vmem:[#allocation15_spill] sm:$0xff] }
0x11d6   : > { %16560 = vrcp.f32 %v11046_v40 }
0x11d7   : > { %11111 = vperm.xlu1 %15864, %v16537_v12   ;;  %v16553_v11 = vpop.eup %16552  ;;  %v1401_v12 = vadd.f32 %v23197_v50, %v21243_v61 }
0x11d8   : > { %11223 = vperm.xlu0 %15865, %v11181_v17   ;;  %v11185_v21 = vsub.f32 1.0, %v16553_v11 }
0x11da   : > { %v16555_v29 = vpop.eup %16554 }
0x11db   : > { %11126 = vperm.xlu1 %15864, %v16541_v59   ;;  %v11188_v35 = vsub.f32 1.0, %v16555_v29 }
0x11dc   : > { %11238 = vperm.xlu0 %15865, %v11184_v47   ;;  %v16557_v36 = vpop.eup %16556 }
0x11dd   : > { %v11187_v18 = vsub.f32 1.0, %v16557_v36 }
0x11de   : > { %v16559_v10 = vpop.eup %16558 }
0x11df   : > { %11121 = vperm.xlu1 %15864, %v16545_v54   ;;  %v11189_v55 = vsub.f32 1.0, %v16559_v10 }
0x11e0   : > { %11233 = vperm.xlu0 %15865, %v11183_v42   ;;  %v16561_v43 = vpop.eup %16560  ;;  %v1411_v42 = vadd.f32 %v23199_v31, %v21243_v61 }
0x11e1   : > { %v11190_v44 = vsub.f32 1.0, %v16561_v43 }
0x11e3   : > { %11136 = vperm.xlu1 %15864, %v16549_v32   ;;  %v23200_v32 = vld [vmem:[#allocation16_spill] sm:$0xff] }
0x11e4   : > { %11248 = vperm.xlu0 %15865, %v11186_v9   ;;  %v1407_v33 = vadd.f32 %v23200_v32, %v21243_v61 }
0x11e7   : > { %11131 = vperm.xlu1 %15864, %v16553_v11  }
0x11e8   : > { %11243 = vperm.xlu0 %15865, %v11185_v21  }
0x11eb   : > { %11146 = vperm.xlu1 %15864, %v16555_v29  }
0x11ec   : > { %11258 = vperm.xlu0 %15865, %v11188_v35  }
0x11ef   : > { %11141 = vperm.xlu1 %15864, %v16557_v36  }
0x11f0   : > { %11253 = vperm.xlu0 %15865, %v11187_v18   ;;  %v23201_v18 = vld [vmem:[#allocation19_spill] sm:$0xff] }
0x11f3   : > { %11151 = vperm.xlu1 %15864, %v16559_v10   ;;  %v1421_v10 = vadd.f32 %v23201_v18, %v21243_v61 }
0x11f4   : > { %11263 = vperm.xlu0 %15865, %v11189_v55   ;;  %v23202_v55 = vld [vmem:[#allocation18_spill] sm:$0xff] }
0x11f7   : > { %11156 = vperm.xlu1 %15864, %v16561_v43   ;;  %v1417_v43 = vadd.f32 %v23202_v55, %v21243_v61 }
0x11f8   : > { %11268 = vperm.xlu0 %15865, %v11190_v44  }
0x123a   : > { %v11087_v56 = vpop.permute.xlu1 %11086 }
0x123b   : > { %v11082_v14 = vpop.permute.xlu0 %11081  ;;  %v11160_v52 = vmul.f32 %v11087_v56, %v1391_v1 }
0x123c   : > { %v11159_v15 = vmul.f32 %v11082_v14, %v1387_v5 }
0x123e   : > { %v11194_v51 = vpop.permute.xlu1 %11193 }
0x123f   : > { %v11271_v3 = vmul.f32 %v11194_v51, %v21099_v26  ;;  %v11199_v46 = vpop.permute.xlu0 %11198 }
0x1240   : > { %v11272_v41 = vmul.f32 %v11199_v46, %v21096_v60  ;;  %v23204_v46 = vld [vmem:[#allocation20_spill] sm:$0xff] }
0x1241   : > { %v11287_v8 = vadd.f32 %v11271_v3, %v11159_v15  ;;  %v23203_v15 = vld [vmem:[#allocation21_spill] sm:$0xff] }
0x1242   : > { %v11288_v4 = vadd.f32 %v11272_v41, %v11160_v52  ;;  %v11097_v22 = vpop.permute.xlu1 %11096  ;;  %v1431_v3 = vadd.f32 %v23203_v15, %v21243_v61  ;;  %v1427_v52 = vadd.f32 %v23204_v46, %v21243_v61 }
0x1243   : > { %v11209_v27 = vpop.permute.xlu0 %11208  ;;  %15348 = vmatprep.mubr.f32.mxu1 %v11287_v8  ;;  %v11162_v17 = vmul.f32 %v11097_v22, %v1401_v12 }
0x1244   : > { %15349 = vmatmul.mubr.f32.vlgmr.msra.gmra.mrb[56].mxu1 %v11288_v4  ;;  %v11274_v26 = vmul.f32 %v11209_v27, %v21103_v34 }
0x1246   : > { %v11092_v30 = vpop.permute.xlu1 %11091  ;;  %v11290_v54 = vadd.f32 %v11274_v26, %v11162_v17  ;;  %v23206_v17 = vld [vmem:[#allocation22_spill] sm:$0xff] }
0x1247   : > { %v11161_v59 = vmul.f32 %v11092_v30, %v1397_v57  ;;  %v11204_v63 = vpop.permute.xlu0 %11203  ;;  %v23205_v57 = vld [vmem:[#allocation23_spill] sm:$0xff]  ;;  %v1437_v26 = vadd.f32 %v23206_v17, %v21243_v61 }
0x1248   : > { %v11273_v60 = vmul.f32 %v11204_v63, %v21107_v49  ;;  %v1441_v30 = vadd.f32 %v23205_v57, %v21243_v61 }
0x124a   : > { %v11289_v53 = vadd.f32 %v11273_v60, %v11161_v59  ;;  %v11107_v47 = vpop.permute.xlu1 %11106 }
0x124b   : > { %v11219_v0 = vpop.permute.xlu0 %11218  ;;  %v11164_v9 = vmul.f32 %v11107_v47, %v1411_v42  ;;  %v23207_v42 = vld [vmem:[#allocation26_spill] sm:$0xff] }
0x124c   : > { %15351 = vmatprep.mubr.f32.mxu1 %v11289_v53  ;;  %v11276_v34 = vmul.f32 %v11219_v0, %v21111_v62  ;;  %v1451_v32 = vadd.f32 %v23207_v42, %v21243_v61 }
0x124d   : > { %15352 = vmatmul.mubr.f32.gmra.mrb[58].mxu1 %v11290_v54 }
0x124e   : > { %v11102_v7 = vpop.permute.xlu1 %11101  ;;  %v11292_v35 = vadd.f32 %v11276_v34, %v11164_v9 }
0x124f   : > { %v11163_v11 = vmul.f32 %v11102_v7, %v1407_v33  ;;  %v11214_v40 = vpop.permute.xlu0 %11213  ;;  %v23208_v33 = vld [vmem:[#allocation25_spill] sm:$0xff] }
0x1250   : > { %v11275_v49 = vmul.f32 %v11214_v40, %v21115_v23  ;;  %v1447_v7 = vadd.f32 %v23208_v33, %v21243_v61 }
0x1252   : > { %v11291_v21 = vadd.f32 %v11275_v49, %v11163_v11  ;;  %v11117_v29 = vpop.permute.xlu1 %11116  ;;  %v23209_v49 = vld [vmem:[#allocation30_spill] sm:$0xff] }
0x1253   : > { %v11229_v36 = vpop.permute.xlu0 %11228  ;;  %v11166_v56 = vmul.f32 %v11117_v29, %v1421_v10 }
0x1254   : > { %15354 = vmatprep.mubr.f32.mxu1 %v11291_v21  ;;  %v11278_v62 = vmul.f32 %v11229_v36, %v21118_v39  ;;  %v1457_v21 = vadd.f32 %v23209_v49, %v21243_v61 }
0x1255   : > { %15355 = vmatmul.mubr.f32.gmra.mrb[60].mxu1 %v11292_v35 }
0x1256   : > { %v11112_v44 = vpop.permute.xlu1 %11111  ;;  %v11294_v1 = vadd.f32 %v11278_v62, %v11166_v56 }
0x1257   : > { %v11165_v14 = vmul.f32 %v11112_v44, %v1417_v43  ;;  %v11224_v38 = vpop.permute.xlu0 %11223  ;;  %v23210_v43 = vld [vmem:[#allocation34_spill] sm:$0xff] }
0x1258   : > { %v11277_v23 = vmul.f32 %v11224_v38, %v21121_v24  ;;  %v1461_v44 = vadd.f32 %v23210_v43, %v21243_v61 }
0x125a   : > { %v11293_v5 = vadd.f32 %v11277_v23, %v11165_v14  ;;  %v11127_v28 = vpop.permute.xlu1 %11126  ;;  %v21296_v23 = vld [vmem:[%s21885_s13] sm:$0xff] }
0x125b   : > { %v11239_v51 = vpop.permute.xlu0 %11238  ;;  %v11168_v8 = vmul.f32 %v11127_v28, %v1431_v3 }
0x125c   : > { %15357 = vmatprep.mubr.f32.mxu1 %v11293_v5  ;;  %v11280_v39 = vmul.f32 %v11239_v51, %v21124_v2 }
0x125d   : > { %15358 = vmatmul.mubr.f32.gmra.mrb[62].mxu1 %v11294_v1 }
0x125e   : > { %v11122_v41 = vpop.permute.xlu1 %11121  ;;  %v11296_v12 = vadd.f32 %v11280_v39, %v11168_v8 }
0x125f   : > { %v11167_v4 = vmul.f32 %v11122_v41, %v1427_v52  ;;  %v11234_v22 = vpop.permute.xlu0 %11233 }
0x1260   : > { %v11279_v24 = vmul.f32 %v11234_v22, %v21127_v6 }
0x1262   : > { %v11295_v27 = vadd.f32 %v11279_v24, %v11167_v4  ;;  %v11137_v50 = vpop.permute.xlu1 %11136 }
0x1263   : > { %v11249_v58 = vpop.permute.xlu0 %11248  ;;  %v11170_v63 = vmul.f32 %v11137_v50, %v1441_v30 }
0x1264   : > { %15360 = vmatprep.mubr.f32.mxu1 %v11295_v27  ;;  %v11282_v2 = vmul.f32 %v11249_v58, %v21130_v20 }
0x1265   : > { %15361 = vmatmul.mubr.f32.gmra.mrb[64].mxu1 %v11296_v12 }
0x1266   : > { %v11132_v59 = vpop.permute.xlu1 %11131  ;;  %v11298_v0 = vadd.f32 %v11282_v2, %v11170_v63 }
0x1267   : > { %v11169_v60 = vmul.f32 %v11132_v59, %v1437_v26  ;;  %v11244_v53 = vpop.permute.xlu0 %11243 }
0x1268   : > { %v11281_v6 = vmul.f32 %v11244_v53, %v21133_v25 }
0x126a   : > { %v11297_v47 = vadd.f32 %v11281_v6, %v11169_v60  ;;  %v11147_v54 = vpop.permute.xlu1 %11146 }
0x126b   : > { %v11259_v31 = vpop.permute.xlu0 %11258  ;;  %v11172_v34 = vmul.f32 %v11147_v54, %v1451_v32 }
0x126c   : > { %15363 = vmatprep.mubr.f32.mxu1 %v11297_v47  ;;  %v11284_v20 = vmul.f32 %v11259_v31, %v21136_v13 }
0x126d   : > { %15364 = vmatmul.mubr.f32.gmra.mrb[66].mxu1 %v11298_v0 }
0x126e   : > { %v11142_v9 = vpop.permute.xlu1 %11141  ;;  %v11300_v36 = vadd.f32 %v11284_v20, %v11172_v34 }
0x126f   : > { %v11171_v11 = vmul.f32 %v11142_v9, %v1447_v7  ;;  %v11254_v40 = vpop.permute.xlu0 %11253 }
0x1270   : > { %v11283_v25 = vmul.f32 %v11254_v40, %v21139_v19 }
0x1272   : > { %v11299_v29 = vadd.f32 %v11283_v25, %v11171_v11  ;;  %v11152_v35 = vpop.permute.xlu1 %11151 }
0x1273   : > { %v11173_v18 = vmul.f32 %v11152_v35, %v1457_v21  ;;  %v11264_v10 = vpop.permute.xlu0 %11263 }
0x1274   : > { %v11285_v55 = vmul.f32 %v11264_v10, %v21145_v37  ;;  %15366 = vmatprep.mubr.f32.mxu1 %v11299_v29  ;;  %v23211_v37 = vld [vmem:[#allocation29_spill] sm:$0xff] }
0x1275   : > { %15367 = vmatmul.mubr.f32.gmra.mrb[68].mxu1 %v11300_v36  ;;  %v11323_v5 = vrot.slane %v21296_v23, %v23211_v37 }
0x1276   : > { %v11301_v13 = vadd.f32 %v11285_v55, %v11173_v18  ;;  %v11157_v56 = vpop.permute.xlu1 %11156 }
0x1277   : > { %v11174_v62 = vmul.f32 %v11157_v56, %v1461_v44  ;;  %v11269_v14 = vpop.permute.xlu0 %11268 }
0x1278   : > { %v11286_v19 = vmul.f32 %v11269_v14, %v21142_v45  ;;  %15369 = vmatprep.mubr.f32.mxu1 %v11301_v13 }
0x127a   : > { %v11302_v38 = vadd.f32 %v11286_v19, %v11174_v62 }
0x127c   : > { %15370 = vmatmul.mubr.f32.gmra.mrb[70].mxu1 %v11302_v38 }
0x1317   : > { %v15350_v28 = vpop.f32.mrb[56].mxu1 }
0x1318   : > { %v21300_v1 = vadd.f32 %v15350_v28, %v11323_v5  ;;  %v11390_v61 = vpop.f32.mrb[57].mxu1 }
0x1319   : > { %v21302_v51 = vadd.f32 %v11390_v61, %v11323_v5 }
0x131a   : > { %v11472_v45 = vsel %vm1212_vm0, %v21300_v1, 0.0 }
0x131b   : > { %11473 = vadd.xlane.f32.xlu0 %v11472_v45  ;;  %v11469_v15 = vsel %vm1212_vm0, %v21302_v51, 0.0 }
0x131c   : > { %11470 = vadd.xlane.f32.xlu1 %v11469_v15 }
0x1320   : > { %v15353_v3 = vpop.f32.mrb[58].mxu1 }
0x1321   : > { %v21308_v46 = vadd.f32 %v15353_v3, %v11323_v5  ;;  %v11400_v52 = vpop.f32.mrb[59].mxu1 }
0x1322   : > { %v21310_v41 = vadd.f32 %v11400_v52, %v11323_v5 }
0x1323   : > { %v11478_v8 = vsel %vm1212_vm0, %v21308_v46, 0.0 }
0x1324   : > { %11479 = vadd.xlane.f32.xlu1 %v11478_v8  ;;  %v11475_v39 = vsel %vm1212_vm0, %v21310_v41, 0.0 }
0x1325   : > { %11476 = vadd.xlane.f32.xlu0 %v11475_v39 }
0x1328   : > { %v15356_v4 = vpop.f32.mrb[60].mxu1 }
0x1329   : > { %v21316_v22 = vadd.f32 %v15356_v4, %v11323_v5  ;;  %v11410_v24 = vpop.f32.mrb[61].mxu1 }
0x132a   : > { %v21318_v27 = vadd.f32 %v11410_v24, %v11323_v5 }
0x132b   : > { %v11484_v50 = vsel %vm1212_vm0, %v21316_v22, 0.0 }
0x132c   : > { %11485 = vadd.xlane.f32.xlu1 %v11484_v50  ;;  %v11481_v12 = vsel %vm1212_vm0, %v21318_v27, 0.0 }
0x132d   : > { %11482 = vadd.xlane.f32.xlu0 %v11481_v12 }
0x1330   : > { %v15359_v58 = vpop.f32.mrb[62].mxu1 }
0x1331   : > { %v21324_v57 = vadd.f32 %v15359_v58, %v11323_v5  ;;  %v11420_v30 = vpop.f32.mrb[63].mxu1 }
0x1332   : > { %v21326_v17 = vadd.f32 %v11420_v30, %v11323_v5 }
0x1333   : > { %v11490_v26 = vsel %vm1212_vm0, %v21324_v57, 0.0 }
0x1334   : > { %11491 = vadd.xlane.f32.xlu1 %v11490_v26  ;;  %v11487_v59 = vsel %vm1212_vm0, %v21326_v17, 0.0 }
0x1335   : > { %11488 = vadd.xlane.f32.xlu0 %v11487_v59 }
0x1338   : > { %v15362_v63 = vpop.f32.mrb[64].mxu1 }
0x1339   : > { %v21332_v2 = vadd.f32 %v15362_v63, %v11323_v5  ;;  %v11430_v60 = vpop.f32.mrb[65].mxu1 }
0x133a   : > { %v21334_v53 = vadd.f32 %v11430_v60, %v11323_v5 }
0x133b   : > { %v11496_v6 = vsel %vm1212_vm0, %v21332_v2, 0.0 }
0x133c   : > { %11497 = vadd.xlane.f32.xlu1 %v11496_v6  ;;  %v11493_v47 = vsel %vm1212_vm0, %v21334_v53, 0.0 }
0x133d   : > { %11494 = vadd.xlane.f32.xlu0 %v11493_v47 }
0x1340   : > { %v15365_v54 = vpop.f32.mrb[66].mxu1 }
0x1341   : > { %v21340_v0 = vadd.f32 %v15365_v54, %v11323_v5  ;;  %v11440_v31 = vpop.f32.mrb[67].mxu1 }
0x1342   : > { %v21342_v42 = vadd.f32 %v11440_v31, %v11323_v5 }
0x1343   : > { %v11502_v32 = vsel %vm1212_vm0, %v21340_v0, 0.0 }
0x1344   : > { %11503 = vadd.xlane.f32.xlu1 %v11502_v32  ;;  %v11499_v33 = vsel %vm1212_vm0, %v21342_v42, 0.0 }
0x1345   : > { %11500 = vadd.xlane.f32.xlu0 %v11499_v33 }
0x1348   : > { %v15368_v7 = vpop.f32.mrb[68].mxu1 }
0x1349   : > { %v21348_v9 = vadd.f32 %v15368_v7, %v11323_v5  ;;  %v11450_v34 = vpop.f32.mrb[69].mxu1 }
0x134a   : > { %v21350_v20 = vadd.f32 %v11450_v34, %v11323_v5 }
0x134b   : > { %v11508_v11 = vsel %vm1212_vm0, %v21348_v9, 0.0 }
0x134c   : > { %11509 = vadd.xlane.f32.xlu1 %v11508_v11  ;;  %v11505_v40 = vsel %vm1212_vm0, %v21350_v20, 0.0 }
0x134d   : > { %11506 = vadd.xlane.f32.xlu0 %v11505_v40 }
0x134f   : > { %v15371_v25 = vpop.f32.mrb[70].mxu1 }
0x1350   : > { %v21356_v49 = vadd.f32 %v15371_v25, %v11323_v5  ;;  %v11460_v21 = vpop.f32.mrb[71].mxu1 }
0x1351   : > { %v21358_v29 = vadd.f32 %v11460_v21, %v11323_v5 }
0x1352   : > { %v11514_v35 = vsel %vm1212_vm0, %v21356_v49, 0.0 }
0x1353   : > { %11515 = vadd.xlane.f32.xlu1 %v11514_v35  ;;  %v11511_v36 = vsel %vm1212_vm0, %v21358_v29, 0.0 }
0x1354   : > { %11512 = vadd.xlane.f32.xlu0 %v11511_v36 }
0x13a8   : > { %v11474_v18 = vpop.xlane.xlu0 %11473 }
0x13a9   : > { %v11519_v10 = vmul.f32 0.03125, %v11474_v18  ;;  %v11471_v55 = vpop.xlane.xlu1 %11470 }
0x13aa   : > { %v11518_v43 = vmul.f32 0.03125, %v11471_v55 }
0x13ab   : > { %v21365_v44 = vsub.f32 %v21300_v1, %v11519_v10 }
0x13ac   : > { %v21368_v13 = vsub.f32 %v21302_v51, %v11518_v43 }
0x13ad   : > { %v11551_v56 = vmul.f32 %v21365_v44, %v21365_v44 }
0x13ae   : > { %v11550_v62 = vmul.f32 %v21368_v13, %v21368_v13 }
0x13af   : > { %v11569_v14 = vsel %vm1212_vm0, %v11551_v56, 0.0 }
0x13b0   : > { %11570 = vadd.xlane.f32.xlu1 %v11569_v14  ;;  %v11566_v19 = vsel %vm1212_vm0, %v11550_v62, 0.0 }
0x13b1   : > { %v11480_v38 = vpop.xlane.xlu1 %11479  ;;  %11567 = vadd.xlane.f32.xlu0 %v11566_v19 }
0x13b2   : > { %v11521_v37 = vmul.f32 0.03125, %v11480_v38  ;;  %v11477_v5 = vpop.xlane.xlu0 %11476 }
0x13b3   : > { %v11520_v28 = vmul.f32 0.03125, %v11477_v5 }
0x13b4   : > { %v21377_v1 = vsub.f32 %v21308_v46, %v11521_v37 }
0x13b5   : > { %v21380_v61 = vsub.f32 %v21310_v41, %v11520_v28 }
0x13b6   : > { %v11553_v51 = vmul.f32 %v21377_v1, %v21377_v1 }
0x13b7   : > { %v11552_v45 = vmul.f32 %v21380_v61, %v21380_v61 }
0x13b8   : > { %v11575_v15 = vsel %vm1212_vm0, %v11553_v51, 0.0 }
0x13b9   : > { %v11486_v3 = vpop.xlane.xlu1 %11485  ;;  %11576 = vadd.xlane.f32.xlu1 %v11575_v15  ;;  %v11572_v52 = vsel %vm1212_vm0, %v11552_v45, 0.0 }
0x13ba   : > { %v11523_v8 = vmul.f32 0.03125, %v11486_v3  ;;  %11573 = vadd.xlane.f32.xlu0 %v11572_v52  ;;  %v11483_v39 = vpop.xlane.xlu0 %11482 }
0x13bb   : > { %v11522_v46 = vmul.f32 0.03125, %v11483_v39 }
0x13bc   : > { %v21389_v4 = vsub.f32 %v21316_v22, %v11523_v8 }
0x13bd   : > { %v21392_v41 = vsub.f32 %v21318_v27, %v11522_v46 }
0x13be   : > { %v11555_v24 = vmul.f32 %v21389_v4, %v21389_v4 }
0x13bf   : > { %v11554_v50 = vmul.f32 %v21392_v41, %v21392_v41 }
0x13c0   : > { %v11581_v12 = vsel %vm1212_vm0, %v11555_v24, 0.0 }
0x13c1   : > { %v11492_v58 = vpop.xlane.xlu1 %11491  ;;  %11582 = vadd.xlane.f32.xlu1 %v11581_v12  ;;  %v11578_v30 = vsel %vm1212_vm0, %v11554_v50, 0.0 }
0x13c2   : > { %v11525_v26 = vmul.f32 0.03125, %v11492_v58  ;;  %11579 = vadd.xlane.f32.xlu0 %v11578_v30  ;;  %v11489_v59 = vpop.xlane.xlu0 %11488 }
0x13c3   : > { %v11524_v22 = vmul.f32 0.03125, %v11489_v59 }
0x13c4   : > { %v21401_v63 = vsub.f32 %v21324_v57, %v11525_v26 }
0x13c5   : > { %v21404_v27 = vsub.f32 %v21326_v17, %v11524_v22 }
0x13c6   : > { %v11557_v60 = vmul.f32 %v21401_v63, %v21401_v63 }
0x13c7   : > { %v11556_v6 = vmul.f32 %v21404_v27, %v21404_v27 }
0x13c8   : > { %v11587_v47 = vsel %vm1212_vm0, %v11557_v60, 0.0 }
0x13c9   : > { %v11498_v54 = vpop.xlane.xlu1 %11497  ;;  %11588 = vadd.xlane.f32.xlu1 %v11587_v47  ;;  %v11584_v31 = vsel %vm1212_vm0, %v11556_v6, 0.0 }
0x13ca   : > { %v11527_v32 = vmul.f32 0.03125, %v11498_v54  ;;  %11585 = vadd.xlane.f32.xlu0 %v11584_v31  ;;  %v11495_v33 = vpop.xlane.xlu0 %11494  ;;  %v23212_v54 = vld [vmem:[#allocation27_spill] sm:$0xff] }
0x13cb   : > { %v11526_v57 = vmul.f32 0.03125, %v11495_v33  ;;  %v21462_v31 = vrot.slane %v21296_v23, %v23212_v54 }
0x13cc   : > { %v21413_v7 = vsub.f32 %v21332_v2, %v11527_v32 }
0x13cd   : > { %v21416_v17 = vsub.f32 %v21334_v53, %v11526_v57 }
0x13ce   : > { %v11559_v34 = vmul.f32 %v21413_v7, %v21413_v7 }
0x13cf   : > { %v11558_v11 = vmul.f32 %v21416_v17, %v21416_v17 }
0x13d0   : > { %v11593_v40 = vsel %vm1212_vm0, %v11559_v34, 0.0  ;;  %v23213_v34 = vld [vmem:[#allocation28_spill] sm:$0xff] }
0x13d1   : > { %v11504_v25 = vpop.xlane.xlu1 %11503  ;;  %11594 = vadd.xlane.f32.xlu1 %v11593_v40  ;;  %v11590_v21 = vsel %vm1212_vm0, %v11558_v11, 0.0  ;;  %v21467_v11 = vrot.slane %v21296_v23, %v23213_v34 }
0x13d2   : > { %v11529_v35 = vmul.f32 0.03125, %v11504_v25  ;;  %11591 = vadd.xlane.f32.xlu0 %v11590_v21  ;;  %v11501_v36 = vpop.xlane.xlu0 %11500 }
0x13d3   : > { %v11528_v2 = vmul.f32 0.03125, %v11501_v36 }
0x13d4   : > { %v21425_v18 = vsub.f32 %v21340_v0, %v11529_v35 }
0x13d5   : > { %v21428_v53 = vsub.f32 %v21342_v42, %v11528_v2 }
0x13d6   : > { %v11561_v10 = vmul.f32 %v21425_v18, %v21425_v18 }
0x13d7   : > { %v11560_v55 = vmul.f32 %v21428_v53, %v21428_v53 }
0x13d8   : > { %v11599_v43 = vsel %vm1212_vm0, %v11561_v10, 0.0 }
0x13d9   : > { %v11510_v56 = vpop.xlane.xlu1 %11509  ;;  %11600 = vadd.xlane.f32.xlu1 %v11599_v43  ;;  %v11596_v62 = vsel %vm1212_vm0, %v11560_v55, 0.0 }
0x13da   : > { %v11531_v14 = vmul.f32 0.03125, %v11510_v56  ;;  %11597 = vadd.xlane.f32.xlu0 %v11596_v62  ;;  %v11507_v19 = vpop.xlane.xlu0 %11506 }
0x13db   : > { %v11530_v0 = vmul.f32 0.03125, %v11507_v19 }
0x13dc   : > { %v21437_v38 = vsub.f32 %v21348_v9, %v11531_v14 }
0x13dd   : > { %v21440_v42 = vsub.f32 %v21350_v20, %v11530_v0 }
0x13de   : > { %v11563_v37 = vmul.f32 %v21437_v38, %v21437_v38 }
0x13df   : > { %v11562_v5 = vmul.f32 %v21440_v42, %v21440_v42 }
0x13e0   : > { %v11516_v28 = vpop.xlane.xlu1 %11515  ;;  %v11605_v51 = vsel %vm1212_vm0, %v11563_v37, 0.0 }
0x13e1   : > { %v11533_v45 = vmul.f32 0.03125, %v11516_v28  ;;  %11606 = vadd.xlane.f32.xlu1 %v11605_v51  ;;  %v11513_v15 = vpop.xlane.xlu0 %11512  ;;  %v11602_v3 = vsel %vm1212_vm0, %v11562_v5, 0.0 }
0x13e2   : > { %v11532_v52 = vmul.f32 0.03125, %v11513_v15  ;;  %11603 = vadd.xlane.f32.xlu0 %v11602_v3 }
0x13e3   : > { %v21449_v9 = vsub.f32 %v21356_v49, %v11533_v45 }
0x13e4   : > { %v21452_v20 = vsub.f32 %v21358_v29, %v11532_v52 }
0x13e5   : > { %v11565_v8 = vmul.f32 %v21449_v9, %v21449_v9 }
0x13e6   : > { %v11564_v39 = vmul.f32 %v21452_v20, %v21452_v20 }
0x13e7   : > { %v11611_v46 = vsel %vm1212_vm0, %v11565_v8, 0.0 }
0x13e8   : > { %11612 = vadd.xlane.f32.xlu1 %v11611_v46  ;;  %v11608_v24 = vsel %vm1212_vm0, %v11564_v39, 0.0 }
0x13e9   : > { %11609 = vadd.xlane.f32.xlu0 %v11608_v24 }
0x143d   : > { %v11571_v50 = vpop.xlane.xlu1 %11570 }
0x143e   : > { %v11615_v12 = vmul.f32 0.03125, %v11571_v50  ;;  %v11568_v58 = vpop.xlane.xlu0 %11567 }
0x143f   : > { %v11614_v49 = vmul.f32 0.03125, %v11568_v58 }
0x1440   : > { %v11631_v30 = vadd.f32 1e-05, %v11615_v12 }
0x1441   : > { %v11630_v26 = vadd.f32 1e-05, %v11614_v49 }
0x1442   : > { %16562 = vrsqrt.f32 %v11631_v30 }
0x1443   : > { %16564 = vrsqrt.f32 %v11630_v26 }
0x1446   : > { %v11577_v29 = vpop.xlane.xlu1 %11576 }
0x1447   : > { %v11617_v59 = vmul.f32 0.03125, %v11577_v29  ;;  %v11574_v22 = vpop.xlane.xlu0 %11573 }
0x1448   : > { %v11616_v60 = vmul.f32 0.03125, %v11574_v22 }
0x1449   : > { %v11633_v6 = vadd.f32 1e-05, %v11617_v59 }
0x144a   : > { %v11632_v47 = vadd.f32 1e-05, %v11616_v60 }
0x144b   : > { %16566 = vrsqrt.f32 %v11633_v6 }
0x144c   : > { %v16563_v32 = vpop.eup %16562  ;;  %16568 = vrsqrt.f32 %v11632_v47 }
0x144d   : > { %v16565_v33 = vpop.eup %16564  ;;  %v11663_v57 = vmul.f32 %v16563_v32, %v21365_v44 }
0x144e   : > { %v11583_v40 = vpop.xlane.xlu1 %11582  ;;  %v11662_v25 = vmul.f32 %v16565_v33, %v21368_v13 }
0x144f   : > { %v11619_v21 = vmul.f32 0.03125, %v11583_v40  ;;  %v11580_v35 = vpop.xlane.xlu0 %11579  ;;  %v11683_v36 = vmul.f32 %v21462_v31, %v11663_v57 }
0x1450   : > { %v11618_v2 = vmul.f32 0.03125, %v11580_v35  ;;  %v11682_v10 = vmul.f32 %v21462_v31, %v11662_v25 }
0x1451   : > { %v11635_v55 = vadd.f32 1e-05, %v11619_v21  ;;  %v11703_v43 = vadd.f32 %v21467_v11, %v11683_v36 }
0x1452   : > { %v11634_v56 = vadd.f32 1e-05, %v11618_v2  ;;  %v11702_v44 = vadd.f32 %v21467_v11, %v11682_v10 }
0x1453   : > { %16570 = vrsqrt.f32 %v11635_v55  ;;  %v11735_v62 = vmul.f32 0.70710677, %v11703_v43  ;;  %v11719_v22 = vmul.f32 0.5, %v11703_v43 }
0x1454   : > { %16572 = vrsqrt.f32 %v11634_v56  ;;  %v11734_v23 = vmul.f32 0.70710677, %v11702_v44  ;;  %v11718_v54 = vmul.f32 0.5, %v11702_v44 }
0x1455   : > { %v16567_v14 = vpop.eup %16566  ;;  %16574 = verf.f32 %v11735_v62 }
0x1456   : > { %v16569_v13 = vpop.eup %16568  ;;  %v11589_v19 = vpop.xlane.xlu1 %11588  ;;  %16576 = verf.f32 %v11734_v23  ;;  %v11665_v0 = vmul.f32 %v16567_v14, %v21377_v1 }
0x1457   : > { %v11621_v37 = vmul.f32 0.03125, %v11589_v19  ;;  %v11586_v5 = vpop.xlane.xlu0 %11585  ;;  %v11664_v28 = vmul.f32 %v16569_v13, %v21380_v61 }
0x1458   : > { %v11620_v51 = vmul.f32 0.03125, %v11586_v5  ;;  %v11685_v45 = vmul.f32 %v21462_v31, %v11665_v0 }
0x1459   : > { %v11637_v15 = vadd.f32 1e-05, %v11621_v37  ;;  %v11684_v3 = vmul.f32 %v21462_v31, %v11664_v28 }
0x145a   : > { %v11636_v52 = vadd.f32 1e-05, %v11620_v51  ;;  %v11705_v8 = vadd.f32 %v21467_v11, %v11685_v45 }
0x145b   : > { %16578 = vrsqrt.f32 %v11637_v15  ;;  %v11704_v39 = vadd.f32 %v21467_v11, %v11684_v3 }
0x145c   : > { %16580 = vrsqrt.f32 %v11636_v52  ;;  %v11737_v46 = vmul.f32 0.70710677, %v11705_v8  ;;  %v11721_v37 = vmul.f32 0.5, %v11705_v8 }
0x145d   : > { %v16571_v24 = vpop.eup %16570  ;;  %v11736_v1 = vmul.f32 0.70710677, %v11704_v39  ;;  %v11720_v45 = vmul.f32 0.5, %v11704_v39 }
0x145e   : > { %v16573_v50 = vpop.eup %16572  ;;  %v11595_v12 = vpop.xlane.xlu1 %11594  ;;  %16582 = verf.f32 %v11737_v46  ;;  %v11667_v61 = vmul.f32 %v16571_v24, %v21389_v4 }
0x145f   : > { %v16575_v58 = vpop.eup %16574  ;;  %v11623_v49 = vmul.f32 0.03125, %v11595_v12  ;;  %v11592_v30 = vpop.xlane.xlu0 %11591  ;;  %16584 = verf.f32 %v11736_v1  ;;  %v11666_v26 = vmul.f32 %v16573_v50, %v21392_v41 }
0x1460   : > { %v16577_v29 = vpop.eup %16576  ;;  %v11622_v59 = vmul.f32 0.03125, %v11592_v30  ;;  %v11767_v60 = vadd.f32 1.0, %v16575_v58  ;;  %v11687_v6 = vmul.f32 %v21462_v31, %v11667_v61 }
0x1461   : > { %v11639_v47 = vadd.f32 1e-05, %v11623_v49  ;;  %v11766_v32 = vadd.f32 1.0, %v16577_v29  ;;  %v11686_v33 = vmul.f32 %v21462_v31, %v11666_v26 }
0x1462   : > { %v11638_v57 = vadd.f32 1e-05, %v11622_v59  ;;  %v21484_v34 = vmul.f32 %v11767_v60, %v11719_v22  ;;  %v11707_v4 = vadd.f32 %v21467_v11, %v11687_v6 }
0x1463   : > { %16586 = vrsqrt.f32 %v11639_v47  ;;  %v21487_v40 = vmul.f32 %v11766_v32, %v11718_v54  ;;  %v11706_v41 = vadd.f32 %v21467_v11, %v11686_v33 }
0x1464   : > { %16588 = vrsqrt.f32 %v11638_v57  ;;  %v11801_v25 = vsel %vm1212_vm0, %v21484_v34, 0.0  ;;  %v11739_v21 = vmul.f32 0.70710677, %v11707_v4  ;;  %v11723_v6 = vmul.f32 0.5, %v11707_v4 }
0x1465   : > { %v16579_v35 = vpop.eup %16578  ;;  %11802 = vadd.xlane.f32.xlu1 %v11801_v25  ;;  %v11798_v36 = vsel %vm1212_vm0, %v21487_v40, 0.0  ;;  %v11738_v2 = vmul.f32 0.70710677, %v11706_v41  ;;  %v11722_v33 = vmul.f32 0.5, %v11706_v41 }
0x1466   : > { %v16581_v10 = vpop.eup %16580  ;;  %v11601_v55 = vpop.xlane.xlu1 %11600  ;;  %11799 = vadd.xlane.f32.xlu0 %v11798_v36  ;;  %16590 = verf.f32 %v11739_v21  ;;  %v11669_v43 = vmul.f32 %v16579_v35, %v21401_v63 }
0x1467   : > { %v11625_v56 = vmul.f32 0.03125, %v11601_v55  ;;  %v11598_v44 = vpop.xlane.xlu0 %11597  ;;  %16592 = verf.f32 %v11738_v2  ;;  %v11668_v62 = vmul.f32 %v16581_v10, %v21404_v27 }
0x1468   : > { %v16583_v23 = vpop.eup %16582  ;;  %v11624_v14 = vmul.f32 0.03125, %v11598_v44  ;;  %v11689_v13 = vmul.f32 %v21462_v31, %v11669_v43 }
0x1469   : > { %v16585_v19 = vpop.eup %16584  ;;  %v11641_v0 = vadd.f32 1e-05, %v11625_v56  ;;  %v11769_v5 = vadd.f32 1.0, %v16583_v23  ;;  %v11688_v28 = vmul.f32 %v21462_v31, %v11668_v62 }
0x146a   : > { %v11640_v51 = vadd.f32 1e-05, %v11624_v14  ;;  %v11768_v15 = vadd.f32 1.0, %v16585_v19  ;;  %v11709_v63 = vadd.f32 %v21467_v11, %v11689_v13 }
0x146b   : > { %16594 = vrsqrt.f32 %v11641_v0  ;;  %v21499_v3 = vmul.f32 %v11769_v5, %v11721_v37  ;;  %v11708_v27 = vadd.f32 %v21467_v11, %v11688_v28 }
0x146c   : > { %16596 = vrsqrt.f32 %v11640_v51  ;;  %v21502_v52 = vmul.f32 %v11768_v15, %v11720_v45  ;;  %v11741_v46 = vmul.f32 0.70710677, %v11709_v63  ;;  %v11725_v5 = vmul.f32 0.5, %v11709_v63 }
0x146d   : > { %v16587_v24 = vpop.eup %16586  ;;  %v11807_v8 = vsel %vm1212_vm0, %v21499_v3, 0.0  ;;  %v11740_v1 = vmul.f32 0.70710677, %v11708_v27  ;;  %v11724_v45 = vmul.f32 0.5, %v11708_v27 }
0x146e   : > { %v16589_v50 = vpop.eup %16588  ;;  %11808 = vadd.xlane.f32.xlu1 %v11807_v8  ;;  %v11607_v39 = vpop.xlane.xlu1 %11606  ;;  %v11804_v12 = vsel %vm1212_vm0, %v21502_v52, 0.0  ;;  %16598 = verf.f32 %v11741_v46  ;;  %v11671_v61 = vmul.f32 %v16587_v24, %v21413_v7 }
0x146f   : > { %v11627_v58 = vmul.f32 0.03125, %v11607_v39  ;;  %11805 = vadd.xlane.f32.xlu0 %v11804_v12  ;;  %v11604_v49 = vpop.xlane.xlu0 %11603  ;;  %16600 = verf.f32 %v11740_v1  ;;  %v11670_v30 = vmul.f32 %v16589_v50, %v21416_v17 }
0x1470   : > { %v16591_v26 = vpop.eup %16590  ;;  %v11626_v29 = vmul.f32 0.03125, %v11604_v49  ;;  %v11691_v59 = vmul.f32 %v21462_v31, %v11671_v61 }
0x1471   : > { %v16593_v22 = vpop.eup %16592  ;;  %v11643_v60 = vadd.f32 1e-05, %v11627_v58  ;;  %v11771_v47 = vadd.f32 1.0, %v16591_v26  ;;  %v11690_v54 = vmul.f32 %v21462_v31, %v11670_v30 }
0x1472   : > { %v11642_v32 = vadd.f32 1e-05, %v11626_v29  ;;  %v11770_v57 = vadd.f32 1.0, %v16593_v22  ;;  %v11711_v7 = vadd.f32 %v21467_v11, %v11691_v59 }
0x1473   : > { %16602 = vrsqrt.f32 %v11643_v60  ;;  %v21513_v25 = vmul.f32 %v11771_v47, %v11723_v6  ;;  %v11710_v17 = vadd.f32 %v21467_v11, %v11690_v54 }
0x1474   : > { %16604 = vrsqrt.f32 %v11642_v32  ;;  %v21516_v21 = vmul.f32 %v11770_v57, %v11722_v33  ;;  %v11743_v35 = vmul.f32 0.70710677, %v11711_v7  ;;  %v11727_v26 = vmul.f32 0.5, %v11711_v7 }
0x1475   : > { %v16595_v36 = vpop.eup %16594  ;;  %v11613_v2 = vpop.xlane.xlu1 %11612  ;;  %v11813_v4 = vsel %vm1212_vm0, %v21513_v25, 0.0  ;;  %v11742_v10 = vmul.f32 0.70710677, %v11710_v17  ;;  %v11726_v22 = vmul.f32 0.5, %v11710_v17 }
0x1476   : > { %v16597_v55 = vpop.eup %16596  ;;  %v11629_v41 = vmul.f32 0.03125, %v11613_v2  ;;  %11814 = vadd.xlane.f32.xlu1 %v11813_v4  ;;  %v11610_v43 = vpop.xlane.xlu0 %11609  ;;  %v11810_v56 = vsel %vm1212_vm0, %v21516_v21, 0.0  ;;  %16606 = verf.f32 %v11743_v35  ;;  %v11673_v44 = vmul.f32 %v16595_v36, %v21425_v18 }
0x1477   : > { %v11628_v62 = vmul.f32 0.03125, %v11610_v43  ;;  %11811 = vadd.xlane.f32.xlu0 %v11810_v56  ;;  %16608 = verf.f32 %v11742_v10  ;;  %v11672_v23 = vmul.f32 %v16597_v55, %v21428_v53 }
0x1478   : > { %v16599_v14 = vpop.eup %16598  ;;  %v11645_v13 = vadd.f32 1e-05, %v11629_v41  ;;  %v11693_v19 = vmul.f32 %v21462_v31, %v11673_v44 }
0x1479   : > { %v16601_v0 = vpop.eup %16600  ;;  %v11644_v37 = vadd.f32 1e-05, %v11628_v62  ;;  %v11773_v28 = vadd.f32 1.0, %v16599_v14  ;;  %v11692_v51 = vmul.f32 %v21462_v31, %v11672_v23 }
0x147a   : > { %16610 = vrsqrt.f32 %v11645_v13  ;;  %v11772_v15 = vadd.f32 1.0, %v16601_v0  ;;  %v11713_v18 = vadd.f32 %v21467_v11, %v11693_v19 }
0x147b   : > { %16612 = vrsqrt.f32 %v11644_v37  ;;  %v21527_v46 = vmul.f32 %v11773_v28, %v11725_v5  ;;  %v11712_v53 = vadd.f32 %v21467_v11, %v11692_v51 }
0x147c   : > { %v21530_v24 = vmul.f32 %v11772_v15, %v11724_v45  ;;  %v11745_v8 = vmul.f32 0.70710677, %v11713_v18  ;;  %v11729_v41 = vmul.f32 0.5, %v11713_v18 }
0x147d   : > { %v16603_v1 = vpop.eup %16602  ;;  %v11819_v63 = vsel %vm1212_vm0, %v21527_v46, 0.0  ;;  %v11744_v50 = vmul.f32 0.70710677, %v11712_v53 }
0x147e   : > { %v16605_v39 = vpop.eup %16604  ;;  %11820 = vadd.xlane.f32.xlu1 %v11819_v63  ;;  %v11816_v27 = vsel %vm1212_vm0, %v21530_v24, 0.0  ;;  %16614 = verf.f32 %v11745_v8  ;;  %v11675_v12 = vmul.f32 %v16603_v1, %v21437_v38 }
0x147f   : > { %11817 = vadd.xlane.f32.xlu0 %v11816_v27  ;;  %16616 = verf.f32 %v11744_v50  ;;  %v11674_v61 = vmul.f32 %v16605_v39, %v21440_v42 }
0x1480   : > { %v16607_v58 = vpop.eup %16606  ;;  %v11695_v49 = vmul.f32 %v21462_v31, %v11675_v12 }
0x1481   : > { %v16609_v30 = vpop.eup %16608  ;;  %v11775_v29 = vadd.f32 1.0, %v16607_v58  ;;  %v11694_v59 = vmul.f32 %v21462_v31, %v11674_v61 }
0x1482   : > { %v11774_v60 = vadd.f32 1.0, %v16609_v30  ;;  %v11715_v6 = vadd.f32 %v21467_v11, %v11695_v49 }
0x1483   : > { %v21541_v47 = vmul.f32 %v11775_v29, %v11727_v26  ;;  %v11714_v38 = vadd.f32 %v21467_v11, %v11694_v59 }
0x1484   : > { %v16611_v54 = vpop.eup %16610  ;;  %v21544_v32 = vmul.f32 %v11774_v60, %v11726_v22  ;;  %v11747_v42 = vmul.f32 0.70710677, %v11715_v6  ;;  %v11731_v5 = vmul.f32 0.5, %v11715_v6 }
0x1485   : > { %v16613_v33 = vpop.eup %16612  ;;  %v11825_v57 = vsel %vm1212_vm0, %v21541_v47, 0.0  ;;  %v11746_v7 = vmul.f32 0.70710677, %v11714_v38  ;;  %v11677_v35 = vmul.f32 %v16611_v54, %v21449_v9  ;;  %v11728_v9 = vmul.f32 0.5, %v11712_v53 }
0x1486   : > { %11826 = vadd.xlane.f32.xlu1 %v11825_v57  ;;  %v11822_v17 = vsel %vm1212_vm0, %v21544_v32, 0.0  ;;  %16618 = verf.f32 %v11747_v42  ;;  %v11676_v36 = vmul.f32 %v16613_v33, %v21452_v20  ;;  %v11730_v28 = vmul.f32 0.5, %v11714_v38 }
0x1487   : > { %11823 = vadd.xlane.f32.xlu0 %v11822_v17  ;;  %16620 = verf.f32 %v11746_v7  ;;  %v11697_v2 = vmul.f32 %v21462_v31, %v11677_v35 }
0x1488   : > { %v16615_v4 = vpop.eup %16614  ;;  %v11696_v10 = vmul.f32 %v21462_v31, %v11676_v36 }
0x1489   : > { %v16617_v55 = vpop.eup %16616  ;;  %v11777_v43 = vadd.f32 1.0, %v16615_v4  ;;  %v11717_v56 = vadd.f32 %v21467_v11, %v11697_v2 }
0x148a   : > { %v11776_v44 = vadd.f32 1.0, %v16617_v55  ;;  %v11716_v62 = vadd.f32 %v21467_v11, %v11696_v10 }
0x148b   : > { %v21556_v23 = vmul.f32 %v11777_v43, %v11729_v41  ;;  %v11749_v14 = vmul.f32 0.70710677, %v11717_v56  ;;  %v11733_v63 = vmul.f32 0.5, %v11717_v56 }
0x148c   : > { %v21558_v20 = vmul.f32 %v11776_v44, %v11728_v9  ;;  %v11748_v13 = vmul.f32 0.70710677, %v11716_v62  ;;  %v11732_v39 = vmul.f32 0.5, %v11716_v62 }
0x148d   : > { %v11831_v19 = vsel %vm1212_vm0, %v21556_v23, 0.0  ;;  %16622 = verf.f32 %v11749_v14 }
0x148e   : > { %11832 = vadd.xlane.f32.xlu1 %v11831_v19  ;;  %v11828_v31 = vsel %vm1212_vm0, %v21558_v20, 0.0  ;;  %16624 = verf.f32 %v11748_v13 }
0x148f   : > { %11829 = vadd.xlane.f32.xlu0 %v11828_v31 }
0x1490   : > { %v16619_v0 = vpop.eup %16618 }
0x1491   : > { %v16621_v37 = vpop.eup %16620  ;;  %v11779_v11 = vadd.f32 1.0, %v16619_v0 }
0x1492   : > { %v11778_v51 = vadd.f32 1.0, %v16621_v37 }
0x1493   : > { %v21564_v45 = vmul.f32 %v11779_v11, %v11731_v5 }
0x1494   : > { %v21566_v15 = vmul.f32 %v11778_v51, %v11730_v28 }
0x1495   : > { %v11837_v18 = vsel %vm1212_vm0, %v21564_v45, 0.0 }
0x1496   : > { %11838 = vadd.xlane.f32.xlu1 %v11837_v18  ;;  %v11834_v53 = vsel %vm1212_vm0, %v21566_v15, 0.0 }
0x1497   : > { %v16623_v8 = vpop.eup %16622  ;;  %11835 = vadd.xlane.f32.xlu0 %v11834_v53 }
0x1498   : > { %v16625_v1 = vpop.eup %16624  ;;  %v11781_v50 = vadd.f32 1.0, %v16623_v8 }
0x1499   : > { %v11780_v27 = vadd.f32 1.0, %v16625_v1  ;;  %v12046_v1 = vld [vmem:[%s21882_s10] sm:$0xff] }
0x149a   : > { %v21572_v12 = vmul.f32 %v11781_v50, %v11733_v63  ;;  %v12047_v63 = vld [vmem:[%s21882_s10 + $0x8] sm:$0xff] }
0x149b   : > { %v21574_v61 = vmul.f32 %v11780_v27, %v11732_v39  ;;  %v15796_v39 = vpack.c.bf16 %v12047_v63, %v12046_v1 }
0x149c   : > { %v11843_v58 = vsel %vm1212_vm0, %v21572_v12, 0.0 }
0x149d   : > { %11844 = vadd.xlane.f32.xlu1 %v11843_v58  ;;  %v11840_v49 = vsel %vm1212_vm0, %v21574_v61, 0.0  ;;  %15797 = vmatprep.subr.bf16.mxu0 %v15796_v39 }
0x149e   : > { %11841 = vadd.xlane.f32.xlu0 %v11840_v49  ;;  %15799 = vmatpush3.bf16.msra.mxu0 %v15796_v39 }
0x14f2   : > { %v11803_v30 = vpop.xlane.xlu1 %11802 }
0x14f3   : > { %v11847_v26 = vmul.f32 0.03125, %v11803_v30  ;;  %v11800_v29 = vpop.xlane.xlu0 %11799  ;;  %v12048_v30 = vld [vmem:[%s21882_s10 + $0x10] sm:$0xff] }
0x14f4   : > { %v11846_v59 = vmul.f32 0.03125, %v11800_v29 }
0x14f5   : > { %v21581_v22 = vsub.f32 %v21484_v34, %v11847_v26  ;;  %v12049_v26 = vld [vmem:[%s21882_s10 + $0x18] sm:$0xff] }
0x14f6   : > { %v21584_v60 = vsub.f32 %v21487_v40, %v11846_v59  ;;  %v15800_v59 = vpack.c.bf16 %v12049_v26, %v12048_v30 }
0x14f7   : > { %v11879_v6 = vmul.f32 %v21581_v22, %v21581_v22 }
0x14f8   : > { %v11878_v38 = vmul.f32 %v21584_v60, %v21584_v60  ;;  %15801 = vmatprep.subr.bf16.mxu0 %v15800_v59 }
0x14f9   : > { %v11897_v54 = vsel %vm1212_vm0, %v11879_v6, 0.0  ;;  %15803 = vmatpush3.bf16.msra.mxu0 %v15800_v59 }
0x14fa   : > { %11898 = vadd.xlane.f32.xlu1 %v11897_v54  ;;  %v11894_v42 = vsel %vm1212_vm0, %v11878_v38, 0.0 }
0x14fb   : > { %v11809_v33 = vpop.xlane.xlu1 %11808  ;;  %11895 = vadd.xlane.f32.xlu0 %v11894_v42 }
0x14fc   : > { %v11849_v57 = vmul.f32 0.03125, %v11809_v33  ;;  %v11806_v7 = vpop.xlane.xlu0 %11805 }
0x14fd   : > { %v11848_v34 = vmul.f32 0.03125, %v11806_v7 }
0x14fe   : > { %v21593_v35 = vsub.f32 %v21499_v3, %v11849_v57 }
0x14ff   : > { %v21596_v40 = vsub.f32 %v21502_v52, %v11848_v34 }
0x1500   : > { %v11881_v17 = vmul.f32 %v21593_v35, %v21593_v35 }
0x1501   : > { %v11880_v36 = vmul.f32 %v21596_v40, %v21596_v40 }
0x1502   : > { %v11903_v2 = vsel %vm1212_vm0, %v11881_v17, 0.0 }
0x1503   : > { %11904 = vadd.xlane.f32.xlu1 %v11903_v2  ;;  %v11815_v4 = vpop.xlane.xlu1 %11814  ;;  %v11900_v10 = vsel %vm1212_vm0, %v11880_v36, 0.0 }
0x1504   : > { %v11851_v55 = vmul.f32 0.03125, %v11815_v4  ;;  %11901 = vadd.xlane.f32.xlu0 %v11900_v10  ;;  %v11812_v41 = vpop.xlane.xlu0 %11811 }
0x1505   : > { %v11850_v3 = vmul.f32 0.03125, %v11812_v41 }
0x1506   : > { %v21605_v43 = vsub.f32 %v21513_v25, %v11851_v55 }
0x1507   : > { %v21608_v52 = vsub.f32 %v21516_v21, %v11850_v3 }
0x1508   : > { %v11883_v56 = vmul.f32 %v21605_v43, %v21605_v43 }
0x1509   : > { %v11882_v9 = vmul.f32 %v21608_v52, %v21608_v52 }
0x150a   : > { %v11909_v44 = vsel %vm1212_vm0, %v11883_v56, 0.0 }
0x150b   : > { %11910 = vadd.xlane.f32.xlu1 %v11909_v44  ;;  %v11821_v62 = vpop.xlane.xlu1 %11820  ;;  %v11906_v14 = vsel %vm1212_vm0, %v11882_v9, 0.0 }
0x150c   : > { %v11853_v13 = vmul.f32 0.03125, %v11821_v62  ;;  %11907 = vadd.xlane.f32.xlu0 %v11906_v14  ;;  %v11818_v19 = vpop.xlane.xlu0 %11817 }
0x150d   : > { %v11852_v25 = vmul.f32 0.03125, %v11818_v19 }
0x150e   : > { %v21617_v31 = vsub.f32 %v21527_v46, %v11853_v13 }
0x150f   : > { %v21620_v21 = vsub.f32 %v21530_v24, %v11852_v25 }
0x1510   : > { %v11885_v0 = vmul.f32 %v21617_v31, %v21617_v31 }
0x1511   : > { %v11884_v37 = vmul.f32 %v21620_v21, %v21620_v21 }
0x1512   : > { %v11915_v5 = vsel %vm1212_vm0, %v11885_v0, 0.0 }
0x1513   : > { %11916 = vadd.xlane.f32.xlu1 %v11915_v5  ;;  %v11827_v11 = vpop.xlane.xlu1 %11826  ;;  %v11912_v28 = vsel %vm1212_vm0, %v11884_v37, 0.0 }
0x1514   : > { %v11855_v51 = vmul.f32 0.03125, %v11827_v11  ;;  %11913 = vadd.xlane.f32.xlu0 %v11912_v28  ;;  %v11824_v18 = vpop.xlane.xlu0 %11823 }
0x1515   : > { %v11854_v46 = vmul.f32 0.03125, %v11824_v18 }
0x1516   : > { %v21629_v53 = vsub.f32 %v21541_v47, %v11855_v51 }
0x1517   : > { %v21632_v24 = vsub.f32 %v21544_v32, %v11854_v46 }
0x1518   : > { %v11887_v8 = vmul.f32 %v21629_v53, %v21629_v53 }
0x1519   : > { %v11886_v50 = vmul.f32 %v21632_v24, %v21632_v24 }
0x151a   : > { %v11921_v47 = vsel %vm1212_vm0, %v11887_v8, 0.0 }
0x151b   : > { %11922 = vadd.xlane.f32.xlu1 %v11921_v47  ;;  %v11833_v32 = vpop.xlane.xlu1 %11832  ;;  %v11918_v27 = vsel %vm1212_vm0, %v11886_v50, 0.0  ;;  %v21697_v50 = vld [vmem:[%s21885_s13] sm:$0xff] }
0x151c   : > { %v11857_v58 = vmul.f32 0.03125, %v11833_v32  ;;  %11919 = vadd.xlane.f32.xlu0 %v11918_v27  ;;  %v11830_v49 = vpop.xlane.xlu0 %11829  ;;  %v21701_v39 = vrot.slane %v21697_v50, %v23194_v16 }
0x151d   : > { %v11856_v29 = vmul.f32 0.03125, %v11830_v49 }
0x151e   : > { %v21653_v6 = vsub.f32 %v21556_v23, %v11857_v58  ;;  %v21706_v58 = vrot.slane %v21697_v50, %v23177_v48 }
0x151f   : > { %v21656_v38 = vsub.f32 %v21558_v20, %v11856_v29 }
0x1520   : > { %v11889_v54 = vmul.f32 %v21653_v6, %v21653_v6 }
0x1521   : > { %v11888_v42 = vmul.f32 %v21656_v38, %v21656_v38 }
0x1522   : > { %v11927_v33 = vsel %vm1212_vm0, %v11889_v54, 0.0 }
0x1523   : > { %11928 = vadd.xlane.f32.xlu1 %v11927_v33  ;;  %v11839_v57 = vpop.xlane.xlu1 %11838  ;;  %v11924_v7 = vsel %vm1212_vm0, %v11888_v42, 0.0 }
0x1524   : > { %v11859_v34 = vmul.f32 0.03125, %v11839_v57  ;;  %11925 = vadd.xlane.f32.xlu0 %v11924_v7  ;;  %v11836_v23 = vpop.xlane.xlu0 %11835 }
0x1525   : > { %v11858_v17 = vmul.f32 0.03125, %v11836_v23 }
0x1526   : > { %v21665_v20 = vsub.f32 %v21564_v45, %v11859_v34 }
0x1527   : > { %v21668_v36 = vsub.f32 %v21566_v15, %v11858_v17 }
0x1528   : > { %v11891_v2 = vmul.f32 %v21665_v20, %v21665_v20 }
0x1529   : > { %v11890_v4 = vmul.f32 %v21668_v36, %v21668_v36 }
0x152a   : > { %v11845_v10 = vpop.xlane.xlu1 %11844  ;;  %v11933_v55 = vsel %vm1212_vm0, %v11891_v2, 0.0 }
0x152b   : > { %v11861_v41 = vmul.f32 0.03125, %v11845_v10  ;;  %11934 = vadd.xlane.f32.xlu1 %v11933_v55  ;;  %v11842_v3 = vpop.xlane.xlu0 %11841  ;;  %v11930_v56 = vsel %vm1212_vm0, %v11890_v4, 0.0 }
0x152c   : > { %v11860_v9 = vmul.f32 0.03125, %v11842_v3  ;;  %11931 = vadd.xlane.f32.xlu0 %v11930_v56 }
0x152d   : > { %v21677_v45 = vsub.f32 %v21572_v12, %v11861_v41  ;;  %v12247_v12 = vld [vmem:[%s21883_s11] sm:$0xff] }
0x152e   : > { %v21680_v15 = vsub.f32 %v21574_v61, %v11860_v9  ;;  %v12248_v61 = vld [vmem:[%s21883_s11 + $0x8] sm:$0xff] }
0x152f   : > { %v11893_v44 = vmul.f32 %v21677_v45, %v21677_v45  ;;  %v15804_v19 = vpack.c.bf16 %v12248_v61, %v12247_v12 }
0x1530   : > { %v11892_v62 = vmul.f32 %v21680_v15, %v21680_v15 }
0x1531   : > { %v11939_v14 = vsel %vm1212_vm0, %v11893_v44, 0.0  ;;  %15805 = vmatprep.subr.bf16.mxu1 %v15804_v19 }
0x1532   : > { %11940 = vadd.xlane.f32.xlu1 %v11939_v14  ;;  %v11936_v13 = vsel %vm1212_vm0, %v11892_v62, 0.0  ;;  %15807 = vmatpush3.bf16.msra.mxu1 %v15804_v19 }
0x1533   : > { %11937 = vadd.xlane.f32.xlu0 %v11936_v13 }
0x1587   : > { %v11899_v25 = vpop.xlane.xlu1 %11898 }
0x1588   : > { %v11943_v0 = vmul.f32 0.03125, %v11899_v25  ;;  %v11896_v37 = vpop.xlane.xlu0 %11895 }
0x1589   : > { %v11942_v5 = vmul.f32 0.03125, %v11896_v37 }
0x158a   : > { %v11959_v11 = vadd.f32 1e-05, %v11943_v0 }
0x158b   : > { %v11958_v28 = vadd.f32 1e-05, %v11942_v5 }
0x158c   : > { %16626 = vrsqrt.f32 %v11959_v11 }
0x158d   : > { %16628 = vrsqrt.f32 %v11958_v28 }
0x1590   : > { %v11905_v51 = vpop.xlane.xlu1 %11904 }
0x1591   : > { %v11945_v18 = vmul.f32 0.03125, %v11905_v51  ;;  %v11902_v46 = vpop.xlane.xlu0 %11901 }
0x1592   : > { %v11944_v8 = vmul.f32 0.03125, %v11902_v46 }
0x1593   : > { %v11961_v1 = vadd.f32 1e-05, %v11945_v18 }
0x1594   : > { %v11960_v63 = vadd.f32 1e-05, %v11944_v8 }
0x1595   : > { %16630 = vrsqrt.f32 %v11961_v1 }
0x1596   : > { %v16627_v47 = vpop.eup %16626  ;;  %16632 = vrsqrt.f32 %v11960_v63 }
0x1597   : > { %v16629_v32 = vpop.eup %16628  ;;  %v11991_v27 = vmul.f32 %v16627_v47, %v21581_v22 }
0x1598   : > { %v11911_v49 = vpop.xlane.xlu1 %11910  ;;  %v11990_v30 = vmul.f32 %v16629_v32, %v21584_v60 }
0x1599   : > { %v12011_v26 = vmul.f32 %v21701_v39, %v11991_v27  ;;  %v11947_v29 = vmul.f32 0.03125, %v11911_v49  ;;  %v11908_v59 = vpop.xlane.xlu0 %11907 }
0x159a   : > { %v11946_v54 = vmul.f32 0.03125, %v11908_v59  ;;  %v12010_v16 = vmul.f32 %v21701_v39, %v11990_v30 }
0x159b   : > { %v11963_v42 = vadd.f32 1e-05, %v11947_v29  ;;  %v12031_v22 = vadd.f32 %v21706_v58, %v12011_v26 }
0x159c   : > { %v11962_v33 = vadd.f32 1e-05, %v11946_v54  ;;  %v12030_v57 = vadd.f32 %v21706_v58, %v12010_v16 }
0x159d   : > { %16634 = vrsqrt.f32 %v11963_v42 }
0x159e   : > { %16636 = vrsqrt.f32 %v11962_v33  ;;  %15380 = vmatprep.mubr.msk.f32.mxu0 %vm1212_vm0, %v12030_v57 }
0x159f   : > { %v16631_v48 = vpop.eup %16630  ;;  %15381 = vmatmul.mubr.msk.f32.vlgmr.msra.gmra.mrb[56].mxu0 %vm1212_vm0, %v12031_v22 }
0x15a0   : > { %v16633_v60 = vpop.eup %16632  ;;  %v11993_v7 = vmul.f32 %v16631_v48, %v21593_v35  ;;  %v11917_v34 = vpop.xlane.xlu1 %11916 }
0x15a1   : > { %v11949_v23 = vmul.f32 0.03125, %v11917_v34  ;;  %v11914_v17 = vpop.xlane.xlu0 %11913  ;;  %v11992_v2 = vmul.f32 %v16633_v60, %v21596_v40 }
0x15a2   : > { %v12013_v4 = vmul.f32 %v21701_v39, %v11993_v7  ;;  %v11948_v10 = vmul.f32 0.03125, %v11914_v17 }
0x15a3   : > { %v11965_v55 = vadd.f32 1e-05, %v11949_v23  ;;  %v12012_v41 = vmul.f32 %v21701_v39, %v11992_v2 }
0x15a4   : > { %v11964_v3 = vadd.f32 1e-05, %v11948_v10  ;;  %v12033_v9 = vadd.f32 %v21706_v58, %v12013_v4 }
0x15a5   : > { %16638 = vrsqrt.f32 %v11965_v55  ;;  %v12032_v56 = vadd.f32 %v21706_v58, %v12012_v41 }
0x15a6   : > { %16640 = vrsqrt.f32 %v11964_v3 }
0x15a7   : > { %v16635_v44 = vpop.eup %16634  ;;  %15383 = vmatprep.mubr.msk.f32.mxu0 %vm1212_vm0, %v12032_v56 }
0x15a8   : > { %v16637_v35 = vpop.eup %16636  ;;  %v11995_v62 = vmul.f32 %v16635_v44, %v21605_v43  ;;  %v11923_v40 = vpop.xlane.xlu1 %11922  ;;  %15384 = vmatmul.mubr.msk.f32.gmra.mrb[58].mxu0 %vm1212_vm0, %v12033_v9 }
0x15a9   : > { %v11951_v14 = vmul.f32 0.03125, %v11923_v40  ;;  %v11920_v13 = vpop.xlane.xlu0 %11919  ;;  %v11994_v12 = vmul.f32 %v16637_v35, %v21608_v52 }
0x15aa   : > { %v12015_v61 = vmul.f32 %v21701_v39, %v11995_v62  ;;  %v11950_v19 = vmul.f32 0.03125, %v11920_v13 }
0x15ab   : > { %v11967_v25 = vadd.f32 1e-05, %v11951_v14  ;;  %v12014_v0 = vmul.f32 %v21701_v39, %v11994_v12 }
0x15ac   : > { %v11966_v37 = vadd.f32 1e-05, %v11950_v19  ;;  %v12035_v11 = vadd.f32 %v21706_v58, %v12015_v61 }
0x15ad   : > { %16642 = vrsqrt.f32 %v11967_v25  ;;  %v12034_v5 = vadd.f32 %v21706_v58, %v12014_v0 }
0x15ae   : > { %16644 = vrsqrt.f32 %v11966_v37 }
0x15af   : > { %v16639_v43 = vpop.eup %16638  ;;  %15386 = vmatprep.mubr.msk.f32.mxu0 %vm1212_vm0, %v12034_v5 }
0x15b0   : > { %v16641_v28 = vpop.eup %16640  ;;  %v11997_v51 = vmul.f32 %v16639_v43, %v21617_v31  ;;  %v11929_v52 = vpop.xlane.xlu1 %11928  ;;  %15387 = vmatmul.mubr.msk.f32.gmra.mrb[60].mxu0 %vm1212_vm0, %v12035_v11  ;;  %v12466_v43 = vld [vmem:[%s21884_s12 + $0x10] sm:$0xff] }
0x15b1   : > { %v11953_v18 = vmul.f32 0.03125, %v11929_v52  ;;  %v11926_v46 = vpop.xlane.xlu0 %11925  ;;  %v11996_v8 = vmul.f32 %v16641_v28, %v21620_v21 }
0x15b2   : > { %v12017_v1 = vmul.f32 %v21701_v39, %v11997_v51  ;;  %v11952_v63 = vmul.f32 0.03125, %v11926_v46  ;;  %v12467_v51 = vld [vmem:[%s21884_s12 + $0x18] sm:$0xff]  ;;  %v12469_v46 = vld [vmem:[%s21884_s12 + $0x28] sm:$0xff] }
0x15b3   : > { %v11969_v47 = vadd.f32 1e-05, %v11953_v18  ;;  %v12016_v32 = vmul.f32 %v21701_v39, %v11996_v8  ;;  %v15816_v52 = vpack.c.bf16 %v12467_v51, %v12466_v43  ;;  %v12468_v18 = vld [vmem:[%s21884_s12 + $0x20] sm:$0xff] }
0x15b4   : > { %v11968_v27 = vadd.f32 1e-05, %v11952_v63  ;;  %v12037_v30 = vadd.f32 %v21706_v58, %v12017_v1  ;;  %v15820_v8 = vpack.c.bf16 %v12469_v46, %v12468_v18  ;;  %v23214_v1 = vld [vmem:[#allocation138_spill] sm:$0xff] }
0x15b5   : > { %16646 = vrsqrt.f32 %v11969_v47  ;;  %v12036_v49 = vadd.f32 %v21706_v58, %v12016_v32  ;;  %v12053_v63 = vrot.slane %v21697_v50, %v23214_v1 }
0x15b6   : > { %16648 = vrsqrt.f32 %v11968_v27 }
0x15b7   : > { %v16643_v31 = vpop.eup %16642  ;;  %15389 = vmatprep.mubr.msk.f32.mxu0 %vm1212_vm0, %v12036_v49 }
0x15b8   : > { %v16645_v26 = vpop.eup %16644  ;;  %v11999_v29 = vmul.f32 %v16643_v31, %v21629_v53  ;;  %v11935_v21 = vpop.xlane.xlu1 %11934  ;;  %15390 = vmatmul.mubr.msk.f32.gmra.mrb[62].mxu0 %vm1212_vm0, %v12037_v30 }
0x15b9   : > { %v11955_v59 = vmul.f32 0.03125, %v11935_v21  ;;  %v11932_v54 = vpop.xlane.xlu0 %11931  ;;  %v11998_v16 = vmul.f32 %v16645_v26, %v21632_v24 }
0x15ba   : > { %v12019_v42 = vmul.f32 %v21701_v39, %v11999_v29  ;;  %v11954_v33 = vmul.f32 0.03125, %v11932_v54 }
0x15bb   : > { %v11971_v57 = vadd.f32 1e-05, %v11955_v59  ;;  %v12018_v22 = vmul.f32 %v21701_v39, %v11998_v16 }
0x15bc   : > { %v11970_v48 = vadd.f32 1e-05, %v11954_v33  ;;  %v12039_v7 = vadd.f32 %v21706_v58, %v12019_v42 }
0x15bd   : > { %16650 = vrsqrt.f32 %v11971_v57  ;;  %v12038_v60 = vadd.f32 %v21706_v58, %v12018_v22 }
0x15be   : > { %16652 = vrsqrt.f32 %v11970_v48 }
0x15bf   : > { %v16647_v53 = vpop.eup %16646  ;;  %v11941_v34 = vpop.xlane.xlu1 %11940  ;;  %15392 = vmatprep.mubr.msk.f32.mxu0 %vm1212_vm0, %v12038_v60 }
0x15c0   : > { %v16649_v23 = vpop.eup %16648  ;;  %v12001_v24 = vmul.f32 %v16647_v53, %v21653_v6  ;;  %v11957_v17 = vmul.f32 0.03125, %v11941_v34  ;;  %15393 = vmatmul.mubr.msk.f32.gmra.mrb[64].mxu0 %vm1212_vm0, %v12039_v7  ;;  %v11938_v2 = vpop.xlane.xlu0 %11937 }
0x15c1   : > { %v11956_v4 = vmul.f32 0.03125, %v11938_v2  ;;  %v12000_v10 = vmul.f32 %v16649_v23, %v21656_v38 }
0x15c2   : > { %v12021_v55 = vmul.f32 %v21701_v39, %v12001_v24  ;;  %v11973_v41 = vadd.f32 1e-05, %v11957_v17 }
0x15c3   : > { %v11972_v3 = vadd.f32 1e-05, %v11956_v4  ;;  %v12020_v56 = vmul.f32 %v21701_v39, %v12000_v10 }
0x15c4   : > { %16654 = vrsqrt.f32 %v11973_v41  ;;  %v12041_v44 = vadd.f32 %v21706_v58, %v12021_v55 }
0x15c5   : > { %16656 = vrsqrt.f32 %v11972_v3  ;;  %v12040_v9 = vadd.f32 %v21706_v58, %v12020_v56 }
0x15c7   : > { %v16651_v6 = vpop.eup %16650  ;;  %15395 = vmatprep.mubr.msk.f32.mxu0 %vm1212_vm0, %v12040_v9 }
0x15c8   : > { %v16653_v35 = vpop.eup %16652  ;;  %v12003_v62 = vmul.f32 %v16651_v6, %v21665_v20  ;;  %15396 = vmatmul.mubr.msk.f32.gmra.mrb[66].mxu0 %vm1212_vm0, %v12041_v44  ;;  %v12470_v44 = vld [vmem:[%s21884_s12 + $0x30] sm:$0xff]  ;;  %v12471_v6 = vld [vmem:[%s21884_s12 + $0x38] sm:$0xff] }
0x15c9   : > { %v12002_v38 = vmul.f32 %v16653_v35, %v21668_v36  ;;  %v15824_v35 = vpack.c.bf16 %v12471_v6, %v12470_v44 }
0x15ca   : > { %v12023_v40 = vmul.f32 %v21701_v39, %v12003_v62  ;;  %v23215_v62 = vld [vmem:[#allocation100_spill] sm:$0xff] }
0x15cb   : > { %v12022_v14 = vmul.f32 %v21701_v39, %v12002_v38  ;;  %v12254_v38 = vrot.slane %v21697_v50, %v23215_v62 }
0x15cc   : > { %v12043_v61 = vadd.f32 %v21706_v58, %v12023_v40 }
0x15cd   : > { %v12042_v13 = vadd.f32 %v21706_v58, %v12022_v14 }
0x15ce   : > { %v16655_v12 = vpop.eup %16654 }
0x15cf   : > { %v16657_v19 = vpop.eup %16656  ;;  %v12005_v25 = vmul.f32 %v16655_v12, %v21677_v45  ;;  %15398 = vmatprep.mubr.msk.f32.mxu0 %vm1212_vm0, %v12042_v13  ;;  %v12249_v45 = vld [vmem:[%s21883_s11 + $0x10] sm:$0xff] }
0x15d0   : > { %15399 = vmatmul.mubr.msk.f32.gmra.mrb[68].mxu0 %vm1212_vm0, %v12043_v61  ;;  %v12004_v20 = vmul.f32 %v16657_v19, %v21680_v15  ;;  %v12250_v15 = vld [vmem:[%s21883_s11 + $0x18] sm:$0xff] }
0x15d1   : > { %v12025_v36 = vmul.f32 %v21701_v39, %v12005_v25  ;;  %v15808_v11 = vpack.c.bf16 %v12250_v15, %v12249_v45 }
0x15d2   : > { %v12024_v0 = vmul.f32 %v21701_v39, %v12004_v20  ;;  %v12464_v39 = vld [vmem:[%s21884_s12] sm:$0xff] }
0x15d3   : > { %v12045_v5 = vadd.f32 %v21706_v58, %v12025_v36  ;;  %15809 = vmatprep.subr.bf16.mxu1 %v15808_v11 }
0x15d4   : > { %v12044_v37 = vadd.f32 %v21706_v58, %v12024_v0  ;;  %15811 = vmatpush3.bf16.msra.mxu1 %v15808_v11  ;;  %v12465_v58 = vld [vmem:[%s21884_s12 + $0x8] sm:$0xff] }
0x15d5   : > { %v15812_v28 = vpack.c.bf16 %v12465_v58, %v12464_v39 }
0x15d6   : > { %15401 = vmatprep.mubr.msk.f32.mxu0 %vm1212_vm0, %v12044_v37 }
0x15d7   : > { %15402 = vmatmul.mubr.msk.f32.gmra.mrb[70].mxu0 %vm1212_vm0, %v12045_v5  ;;  %15813 = vmatprep.subr.bf16.mxu0 %v15812_v28 }
0x15d8   : > { %15815 = vmatpush3.bf16.msra.mxu0 %v15812_v28 }
0x15d9   : > { %15817 = vmatprep.subr.bf16.mxu0 %v15816_v52 }
0x15dc   : > { %15819 = vmatpush3.bf16.msra.mxu0 %v15816_v52 }
0x15dd   : > { %15821 = vmatprep.subr.bf16.mxu0 %v15820_v8 }
0x15e0   : > { %15823 = vmatpush3.bf16.msra.mxu0 %v15820_v8 }
0x15e1   : > { %15825 = vmatprep.subr.bf16.mxu0 %v15824_v35 }
0x15e4   : > { %15827 = vmatpush3.bf16.msra.mxu0 %v15824_v35 }
0x1672   : > { %v15382_v47 = vpop.f32.mrb[56].mxu0 }
0x1673   : > { %v12168_v32 = vpop.f32.mrb[57].mxu0  ;;  %v12174_v49 = vadd.f32 %v15382_v47, %v12053_v63 }
0x1674   : > { %v12169_v27 = vadd.f32 %v12168_v32, %v12053_v63 }
0x1676   : > { %15412 = vmatprep.mubr.msk.f32.mxu1 %vm1212_vm0, %v12169_v27 }
0x1677   : > { %15413 = vmatmul.mubr.msk.f32.vlgmr.msra.gmra.mrb[72].mxu1 %vm1212_vm0, %v12174_v49 }
0x167b   : > { %v15385_v30 = vpop.f32.mrb[58].mxu0 }
0x167c   : > { %v12178_v31 = vpop.f32.mrb[59].mxu0  ;;  %v12184_v29 = vadd.f32 %v15385_v30, %v12053_v63 }
0x167d   : > { %v12179_v26 = vadd.f32 %v12178_v31, %v12053_v63 }
0x167f   : > { %15415 = vmatprep.mubr.msk.f32.mxu1 %vm1212_vm0, %v12179_v26 }
0x1680   : > { %15416 = vmatmul.mubr.msk.f32.gmra.mrb[74].mxu1 %vm1212_vm0, %v12184_v29 }
0x1683   : > { %v15388_v21 = vpop.f32.mrb[60].mxu0 }
0x1684   : > { %v12188_v59 = vpop.f32.mrb[61].mxu0  ;;  %v12194_v16 = vadd.f32 %v15388_v21, %v12053_v63 }
0x1685   : > { %v12189_v54 = vadd.f32 %v12188_v59, %v12053_v63 }
0x1687   : > { %15418 = vmatprep.mubr.msk.f32.mxu1 %vm1212_vm0, %v12189_v54 }
0x1688   : > { %15419 = vmatmul.mubr.msk.f32.gmra.mrb[76].mxu1 %vm1212_vm0, %v12194_v16 }
0x168b   : > { %v15391_v42 = vpop.f32.mrb[62].mxu0 }
0x168c   : > { %v12198_v33 = vpop.f32.mrb[63].mxu0  ;;  %v12204_v22 = vadd.f32 %v15391_v42, %v12053_v63 }
0x168d   : > { %v12199_v57 = vadd.f32 %v12198_v33, %v12053_v63 }
0x168f   : > { %15421 = vmatprep.mubr.msk.f32.mxu1 %vm1212_vm0, %v12199_v57 }
0x1690   : > { %15422 = vmatmul.mubr.msk.f32.gmra.mrb[78].mxu1 %vm1212_vm0, %v12204_v22 }
0x1693   : > { %v15394_v48 = vpop.f32.mrb[64].mxu0 }
0x1694   : > { %v12208_v60 = vpop.f32.mrb[65].mxu0  ;;  %v12214_v53 = vadd.f32 %v15394_v48, %v12053_v63 }
0x1695   : > { %v12209_v7 = vadd.f32 %v12208_v60, %v12053_v63 }
0x1697   : > { %15424 = vmatprep.mubr.msk.f32.mxu1 %vm1212_vm0, %v12209_v7 }
0x1698   : > { %15425 = vmatmul.mubr.msk.f32.gmra.mrb[80].mxu1 %vm1212_vm0, %v12214_v53 }
0x169b   : > { %v15397_v34 = vpop.f32.mrb[66].mxu0 }
0x169c   : > { %v12218_v23 = vpop.f32.mrb[67].mxu0  ;;  %v12224_v17 = vadd.f32 %v15397_v34, %v12053_v63 }
0x169d   : > { %v12219_v24 = vadd.f32 %v12218_v23, %v12053_v63 }
0x169f   : > { %15427 = vmatprep.mubr.msk.f32.mxu1 %vm1212_vm0, %v12219_v24  ;;  %v23216_v24 = vld [vmem:[#allocation7_spill] sm:$0xff] }
0x16a0   : > { %15428 = vmatmul.mubr.msk.f32.gmra.mrb[82].mxu1 %vm1212_vm0, %v12224_v17  ;;  %v12475_v17 = vrot.slane %v21697_v50, %v23216_v24 }
0x16a3   : > { %v15400_v2 = vpop.f32.mrb[68].mxu0 }
0x16a4   : > { %v12228_v4 = vpop.f32.mrb[69].mxu0  ;;  %v12234_v55 = vadd.f32 %v15400_v2, %v12053_v63 }
0x16a5   : > { %v12229_v10 = vadd.f32 %v12228_v4, %v12053_v63 }
0x16a7   : > { %15430 = vmatprep.mubr.msk.f32.mxu1 %vm1212_vm0, %v12229_v10 }
0x16a8   : > { %15431 = vmatmul.mubr.msk.f32.gmra.mrb[84].mxu1 %vm1212_vm0, %v12234_v55 }
0x16aa   : > { %v15403_v41 = vpop.f32.mrb[70].mxu0 }
0x16ab   : > { %v12238_v3 = vpop.f32.mrb[71].mxu0  ;;  %v12244_v9 = vadd.f32 %v15403_v41, %v12053_v63 }
0x16ac   : > { %v12239_v56 = vadd.f32 %v12238_v3, %v12053_v63 }
0x16ae   : > { %15433 = vmatprep.mubr.msk.f32.mxu1 %vm1212_vm0, %v12239_v56 }
0x16af   : > { %15434 = vmatmul.mubr.msk.f32.gmra.mrb[86].mxu1 %vm1212_vm0, %v12244_v9 }
0x174a   : > { %v15414_v40 = vpop.f32.mrb[72].mxu1 }
0x174b   : > { %v12375_v14 = vadd.f32 %v15414_v40, %v12254_v38  ;;  %v12369_v13 = vpop.f32.mrb[73].mxu1 }
0x174c   : > { %v12370_v12 = vadd.f32 %v12369_v13, %v12254_v38 }
0x174d   : > { %v12449_v19 = vmax.f32 %v12375_v14, 0.0 }
0x174e   : > { %v12448_v61 = vmax.f32 %v12370_v12, 0.0 }
0x1750   : > { %15452 = vmatprep.mubr.msk.f32.mxu0 %vm12476_vm3, %v12448_v61 }
0x1751   : > { %15453 = vmatmul.mubr.msk.f32.vlgmr.msra.gmra.mrb[72].mxu0 %vm12476_vm3, %v12449_v19 }
0x1753   : > { %v15417_v25 = vpop.f32.mrb[74].mxu1 }
0x1754   : > { %v12385_v20 = vadd.f32 %v15417_v25, %v12254_v38  ;;  %v12379_v36 = vpop.f32.mrb[75].mxu1 }
0x1755   : > { %v12380_v0 = vadd.f32 %v12379_v36, %v12254_v38 }
0x1756   : > { %v12451_v5 = vmax.f32 %v12385_v20, 0.0 }
0x1757   : > { %v12450_v37 = vmax.f32 %v12380_v0, 0.0 }
0x1759   : > { %15455 = vmatprep.mubr.msk.f32.mxu0 %vm12476_vm3, %v12450_v37 }
0x175a   : > { %15456 = vmatmul.mubr.msk.f32.gmra.mrb[74].mxu0 %vm12476_vm3, %v12451_v5 }
0x175b   : > { %v15420_v45 = vpop.f32.mrb[76].mxu1 }
0x175c   : > { %v12395_v15 = vadd.f32 %v15420_v45, %v12254_v38  ;;  %v12389_v11 = vpop.f32.mrb[77].mxu1 }
0x175d   : > { %v12390_v39 = vadd.f32 %v12389_v11, %v12254_v38 }
0x175e   : > { %v12453_v43 = vmax.f32 %v12395_v15, 0.0 }
0x175f   : > { %v12452_v58 = vmax.f32 %v12390_v39, 0.0 }
0x1761   : > { %15458 = vmatprep.mubr.msk.f32.mxu0 %vm12476_vm3, %v12452_v58 }
0x1762   : > { %15459 = vmatmul.mubr.msk.f32.gmra.mrb[76].mxu0 %vm12476_vm3, %v12453_v43 }
0x1763   : > { %v15423_v28 = vpop.f32.mrb[78].mxu1 }
0x1764   : > { %v12405_v51 = vadd.f32 %v15423_v28, %v12254_v38  ;;  %v12399_v52 = vpop.f32.mrb[79].mxu1 }
0x1765   : > { %v12400_v18 = vadd.f32 %v12399_v52, %v12254_v38 }
0x1766   : > { %v12455_v8 = vmax.f32 %v12405_v51, 0.0 }
0x1767   : > { %v12454_v46 = vmax.f32 %v12400_v18, 0.0 }
0x1769   : > { %15461 = vmatprep.mubr.msk.f32.mxu0 %vm12476_vm3, %v12454_v46 }
0x176a   : > { %15462 = vmatmul.mubr.msk.f32.gmra.mrb[78].mxu0 %vm12476_vm3, %v12455_v8 }
0x176b   : > { %v15426_v1 = vpop.f32.mrb[80].mxu1 }
0x176c   : > { %v12415_v63 = vadd.f32 %v15426_v1, %v12254_v38  ;;  %v12409_v47 = vpop.f32.mrb[81].mxu1 }
0x176d   : > { %v12410_v32 = vadd.f32 %v12409_v47, %v12254_v38 }
0x176e   : > { %v12457_v49 = vmax.f32 %v12415_v63, 0.0 }
0x176f   : > { %v12456_v27 = vmax.f32 %v12410_v32, 0.0 }
0x1771   : > { %15464 = vmatprep.mubr.msk.f32.mxu0 %vm12476_vm3, %v12456_v27 }
0x1772   : > { %15465 = vmatmul.mubr.msk.f32.gmra.mrb[80].mxu0 %vm12476_vm3, %v12457_v49 }
0x1773   : > { %v15429_v30 = vpop.f32.mrb[82].mxu1 }
0x1774   : > { %v12425_v31 = vadd.f32 %v15429_v30, %v12254_v38  ;;  %v12419_v26 = vpop.f32.mrb[83].mxu1 }
0x1775   : > { %v12420_v29 = vadd.f32 %v12419_v26, %v12254_v38 }
0x1776   : > { %v12459_v59 = vmax.f32 %v12425_v31, 0.0 }
0x1777   : > { %v12458_v21 = vmax.f32 %v12420_v29, 0.0 }
0x1779   : > { %15467 = vmatprep.mubr.msk.f32.mxu0 %vm12476_vm3, %v12458_v21 }
0x177a   : > { %15468 = vmatmul.mubr.msk.f32.gmra.mrb[82].mxu0 %vm12476_vm3, %v12459_v59 }
0x177b   : > { %v15432_v54 = vpop.f32.mrb[84].mxu1 }
0x177c   : > { %v12435_v16 = vadd.f32 %v15432_v54, %v12254_v38  ;;  %v12429_v42 = vpop.f32.mrb[85].mxu1 }
0x177d   : > { %v12430_v33 = vadd.f32 %v12429_v42, %v12254_v38 }
0x177e   : > { %v12461_v22 = vmax.f32 %v12435_v16, 0.0 }
0x177f   : > { %v12460_v57 = vmax.f32 %v12430_v33, 0.0 }
0x1781   : > { %15470 = vmatprep.mubr.msk.f32.mxu0 %vm12476_vm3, %v12460_v57 }
0x1782   : > { %v15435_v48 = vpop.f32.mrb[86].mxu1  ;;  %15471 = vmatmul.mubr.msk.f32.gmra.mrb[84].mxu0 %vm12476_vm3, %v12461_v22 }
0x1783   : > { %v12445_v60 = vadd.f32 %v15435_v48, %v12254_v38  ;;  %v12439_v7 = vpop.f32.mrb[87].mxu1 }
0x1784   : > { %v12440_v53 = vadd.f32 %v12439_v7, %v12254_v38 }
0x1785   : > { %v12463_v23 = vmax.f32 %v12445_v60, 0.0 }
0x1786   : > { %v12462_v34 = vmax.f32 %v12440_v53, 0.0 }
0x1788   : > { %15473 = vmatprep.mubr.msk.f32.mxu0 %vm12476_vm3, %v12462_v34 }
0x1789   : > { %15474 = vmatmul.mubr.msk.f32.gmra.mrb[86].mxu0 %vm12476_vm3, %v12463_v23 }
0x1824   : > { %v15454_v2 = vpop.f32.mrb[72].mxu0 }
0x1825   : > { %v12597_v4 = vadd.f32 %v15454_v2, %v12475_v17  ;;  %v12591_v10 = vpop.f32.mrb[73].mxu0 }
0x1826   : > { %v12592_v55 = vadd.f32 %v12591_v10, %v12475_v17 }
0x1827   : > { %12671 = vst [vmem:[%s21844_s26 + $0x8] sm:$0xff] %v12597_v4 }
0x1828   : > { %12670 = vst [vmem:[%s21844_s26] sm:$0xff] %v12592_v55 }
0x182d   : > { %v15457_v41 = vpop.f32.mrb[74].mxu0 }
0x182e   : > { %v12607_v50 = vadd.f32 %v15457_v41, %v12475_v17  ;;  %v12601_v3 = vpop.f32.mrb[75].mxu0 }
0x182f   : > { %v12602_v56 = vadd.f32 %v12601_v3, %v12475_v17 }
0x1830   : > { %12673 = vst [vmem:[%s21844_s26 + $0x18] sm:$0xff] %v12607_v50 }
0x1831   : > { %12672 = vst [vmem:[%s21844_s26 + $0x10] sm:$0xff] %v12602_v56 }
0x1835   : > { %v15460_v9 = vpop.f32.mrb[76].mxu0 }
0x1836   : > { %v12617_v44 = vadd.f32 %v15460_v9, %v12475_v17  ;;  %v12611_v6 = vpop.f32.mrb[77].mxu0 }
0x1837   : > { %v12612_v35 = vadd.f32 %v12611_v6, %v12475_v17 }
0x1838   : > { %12675 = vst [vmem:[%s21844_s26 + $0x28] sm:$0xff] %v12617_v44 }
0x1839   : > { %12674 = vst [vmem:[%s21844_s26 + $0x20] sm:$0xff] %v12612_v35 }
0x183d   : > { %v15463_v62 = vpop.f32.mrb[78].mxu0 }
0x183e   : > { %v12627_v38 = vadd.f32 %v15463_v62, %v12475_v17  ;;  %v12621_v40 = vpop.f32.mrb[79].mxu0 }
0x183f   : > { %v12622_v14 = vadd.f32 %v12621_v40, %v12475_v17 }
0x1840   : > { %12677 = vst [vmem:[%s21844_s26 + $0x38] sm:$0xff] %v12627_v38 }
0x1841   : > { %12676 = vst [vmem:[%s21844_s26 + $0x30] sm:$0xff] %v12622_v14 }
0x1845   : > { %v15466_v13 = vpop.f32.mrb[80].mxu0 }
0x1846   : > { %v12637_v12 = vadd.f32 %v15466_v13, %v12475_v17  ;;  %v12631_v61 = vpop.f32.mrb[81].mxu0 }
0x1847   : > { %v12632_v19 = vadd.f32 %v12631_v61, %v12475_v17 }
0x1848   : > { %12679 = vst [vmem:[%s21844_s26 + $0x48] sm:$0xff] %v12637_v12 }
0x1849   : > { %12678 = vst [vmem:[%s21844_s26 + $0x40] sm:$0xff] %v12632_v19 }
0x184d   : > { %v15469_v25 = vpop.f32.mrb[82].mxu0 }
0x184e   : > { %v12647_v20 = vadd.f32 %v15469_v25, %v12475_v17  ;;  %v12641_v36 = vpop.f32.mrb[83].mxu0 }
0x184f   : > { %v12642_v0 = vadd.f32 %v12641_v36, %v12475_v17 }
0x1850   : > { %12681 = vst [vmem:[%s21844_s26 + $0x58] sm:$0xff] %v12647_v20 }
0x1851   : > { %12680 = vst [vmem:[%s21844_s26 + $0x50] sm:$0xff] %v12642_v0 }
0x1855   : > { %v15472_v37 = vpop.f32.mrb[84].mxu0 }
0x1856   : > { %v12657_v5 = vadd.f32 %v15472_v37, %v12475_v17  ;;  %v12651_v45 = vpop.f32.mrb[85].mxu0 }
0x1857   : > { %v12652_v15 = vadd.f32 %v12651_v45, %v12475_v17 }
0x1858   : > { %12683 = vst [vmem:[%s21844_s26 + $0x68] sm:$0xff] %v12657_v5 }
0x1859   : > { %12682 = vst [vmem:[%s21844_s26 + $0x60] sm:$0xff] %v12652_v15 }
0x185c   : > { %v15475_v11 = vpop.f32.mrb[86].mxu0 }
0x185d   : > { %v12667_v39 = vadd.f32 %v15475_v11, %v12475_v17  ;;  %v12661_v58 = vpop.f32.mrb[87].mxu0 }
0x185e   : > { %v12662_v43 = vadd.f32 %v12661_v58, %v12475_v17 }
0x185f   : > { %12685 = vst [vmem:[%s21844_s26 + $0x78] sm:$0xff] %v12667_v39 }
0x1860   : > { %12684 = vst [vmem:[%s21844_s26 + $0x70] sm:$0xff] %v12662_v43 }
0x1861 PF: > { %p21_p9 = scmp.ge.s32.totalorder %s16848_s17, 6   ;;  %s23217_s29 = smov %s16742_s30 }
0x1862   : > { %s23218_s30 = smov %s16857_s20  ;;  %s23219_s15 = smov %s16848_s17 }
0x1863   :  { %23 = sbr.rel (!%p21_p9) target bundleno = 2 (0x2), region = 165 }

</bundles_post_ra>
